<compile_context>
chip_gen: v5e
topology: v5e:2x2
jax: 0.10.0
libtpu: 0.0.40
codegen_flags: <defaults>
</compile_context>

<pallas_src>
import jax
import jax.numpy as jnp
from jax import lax
from jax.experimental import pallas as pl
from jax.experimental.pallas import tpu as pltpu


def gelu_kernel(x_ref, o_ref):
    x = x_ref[...]
    if x.dtype != jnp.float32:
        # Compute erf in f32 for accuracy (and v5e has no bf16 VPU/EUP).
        x = x.astype(jnp.float32)
    inv_sqrt2 = jnp.float32(0.7071067811865476)
    # Exact GELU: x * (0.5 + 0.5 * erf(x / sqrt(2)))
    y = x * (0.5 * lax.erf(x * inv_sqrt2) + 0.5)
    o_ref[...] = y.astype(o_ref.dtype)


def _lane_split(c):
    """Pick an even lane-axis split (prefer 2 -> one grid step per v7x TC)."""
    for g in (2, 4):
        if c % g == 0 and (c // g) % 128 == 0:
            return g
    return 1  # fallback: single full-array block


def gelu_pallas(x):
    orig_shape = x.shape
    c = orig_shape[-1]
    r = x.size // c
    g = _lane_split(c)
    block_c = c // g

    # Collapse leading dims only (free bitcast for default row-major layout).
    x2d = x.reshape(r, c)

    out2d = pl.pallas_call(
        gelu_kernel,
        out_shape=jax.ShapeDtypeStruct((r, c), x.dtype),
        grid=(g,),
        # Sublane block dim == full array dim (196): legal even though it is
        # not a multiple of 8; lane block dim (768) is a multiple of 128.
        in_specs=[pl.BlockSpec((r, block_c), lambda i: (0, i))],
        out_specs=pl.BlockSpec((r, block_c), lambda i: (0, i)),
        compiler_params=pltpu.CompilerParams(
            dimension_semantics=("parallel",)
        ),
    )(x2d)
    return out2d.reshape(orig_shape)


if __name__ == "__main__":
    key = jax.random.PRNGKey(0)
    # Shape implied by the module's forward: [1, 14, 14, 1536]
    x = jax.random.normal(key, (1, 14, 14, 1536), dtype=jnp.float32)

    out = gelu_pallas(x)
    out = jax.block_until_ready(out)

    # Reference check against plain-JAX exact GELU.
    ref = jax.nn.gelu(x, approximate=False)
    assert out.shape == x.shape and out.dtype == x.dtype
    assert jnp.max(jnp.abs(out - ref)) < 1e-5

    print("KERNEL_OK")
</pallas_src>

<mosaic_0001>
module attributes {stable_mosaic.version = 11 : i64} {
  func.func @gelu_kernel(%arg0: i32, %arg1: memref<196x768xf32, #tpu.memory_space<vmem>>, %arg2: memref<196x768xf32, #tpu.memory_space<vmem>>) attributes {dimension_semantics = [#tpu.dimension_semantics<parallel>], iteration_bounds = array<i64: 2>, scalar_prefetch = 0 : i64, scratch_operands = 0 : i64, tpu.core_type = #tpu.core_type<tc>, window_params = [{transform_indices = @transform_0, window_bounds = array<i64: 196, 768>}, {transform_indices = @transform_1, window_bounds = array<i64: 196, 768>}]} {
    %c0 = arith.constant 0 : index
    %c0_0 = arith.constant 0 : index
    %0 = vector.load %arg1[%c0, %c0_0] : memref<196x768xf32, #tpu.memory_space<vmem>>, vector<196x768xf32>
    %cst = arith.constant 0.707106769 : f32
    %1 = vector.broadcast %cst : f32 to vector<196x768xf32>
    %2 = arith.mulf %0, %1 : vector<196x768xf32>
    %3 = math.erf %2 : vector<196x768xf32>
    %cst_1 = arith.constant 5.000000e-01 : f32
    %4 = vector.broadcast %cst_1 : f32 to vector<196x768xf32>
    %5 = arith.mulf %4, %3 : vector<196x768xf32>
    %cst_2 = arith.constant 5.000000e-01 : f32
    %6 = vector.broadcast %cst_2 : f32 to vector<196x768xf32>
    %7 = arith.addf %5, %6 : vector<196x768xf32>
    %8 = arith.mulf %0, %7 : vector<196x768xf32>
    %c0_3 = arith.constant 0 : index
    %c0_4 = arith.constant 0 : index
    %9 = vector.load %arg2[%c0_3, %c0_4] : memref<196x768xf32, #tpu.memory_space<vmem>>, vector<196x768xf32>
    tpu.vector_store %arg2[%c0_3, %c0_4], %8 {strides = array<i32>} : memref<196x768xf32, #tpu.memory_space<vmem>>, vector<196x768xf32>,
    return
  }
  func.func @transform_0(%arg0: i32) -> (i32, i32) {
    %c0_i32 = arith.constant 0 : i32
    %c0_i32_0 = arith.constant 0 : i32
    return %c0_i32, %arg0 : i32, i32
  }
  func.func @transform_1(%arg0: i32) -> (i32, i32) {
    %c0_i32 = arith.constant 0 : i32
    %c0_i32_0 = arith.constant 0 : i32
    return %c0_i32, %arg0 : i32, i32
  }
}

</mosaic_0001>

<bundles_post_ra>
// kernel: tpu_custom_call.1
= control target key start
LH: loop header
LB: loop body
LE: loop exit
PB: predicated region body
PF: predicated region fallthrough
CT: control target
= control target key end

     0   :  { %6 = vsyncpa [#allocation3], 0  ;;  %s13475_s0 = inlined_call_operand.hbm [shape: f32[196,1536], index: 0, kind: input, shape index: {}]   ;;  %s13476_s1 = inlined_call_operand.hbm [shape: f32[196,1536], index: 1, kind: output, shape index: {}]  }
   0x1   :  { %8 = vsyncpa [#allocation3 + $0x1], 0 }
   0x2   :  { %9 = vsyncpa [#allocation4], 0 }
   0x3   :  { %11 = vsyncpa [#allocation4 + $0x1], 0  ;;  %s7756_s6 = smov 0   ;;  %s7758_s7 = smov 0  }
   0x4   :  { %s7760_s8 = smov 0   ;;  %s7762_s9 = smov 0  }
   0x5 LB: > { %s7777_s10 = sadd.s32 4294967295, %s7738_s9   ;;  %s7128_s11 = sadd.s32 4294967294, %s7738_s9   ;;  %s7738_s9 = sphi %s7762_s9, %s13964_s9   ;;  %s7734_s8 = sphi %s7760_s8, %s13963_s8   ;;  %s7730_s7 = sphi %s7758_s7, %s13962_s7   ;;  %s7726_s6 = sphi %s7756_s6, %s13961_s6  }
   0x6   : > { %s7781_s12 = sadd.s32 1, %s7738_s9   ;;  %s24_s13 = sadd.s32 1, %s7734_s8 }
   0x7   : > { %s21_s14 = ssub.s32 %s7738_s9, %s7781_s12  ;;  %p31_p0 = scmp.ne.s32.totalorder %s7734_s8, %s7730_s7 }
   0x8   : > { %p22_p1 = scmp.eq.s32.totalorder %s21_s14, 0  ;;  %p32_p2 = scmp.eq.s32.totalorder %s7738_s9, 0 }
   0x9   : > { %p37_p3 = scmp.ne.s32.totalorder %s7730_s7, %s7726_s6  ;;  %p38_p4 = scmp.eq.s32.totalorder %s7777_s10, 0 }
   0xa   : > { %s7793_s15 = scalar_select %p22_p1, %s7734_s8, %s24_s13  }
   0xb   : > { %p33_p5 = por %p32_p2, %p31_p0  ;;  %p7795_p6 = por %p38_p4, %p37_p3 }
   0xc   : > { %p61_p7 = scmp.eq.s32.totalorder %s7777_s10, 1  ;;  %p67_p8 = scmp.eq.s32.totalorder %s7128_s11, 1 }
   0xd   : > { %p7130_p9 = scmp.ge.s32.totalorder %s7738_s9, 2  ;;  %p7302_p10 = scmp.lt.s32.totalorder %s7738_s9, 2 }
   0xe   : > { %p7802_p11 = por %p61_p7, %p31_p0  ;;  %p7806_p12 = por %p67_p8, %p37_p3 }
   0xf   : > { %s87_s19 = sand.u32 1, %s7734_s8   ;;  %s7286_s20 = smul.u32 48, %s7738_s9 }
  0x10   : > { %s7288_s21 = smul.u32 1200, %s87_s19  ;;  %p7815_p13 = pnand %p7302_p10, %p33_p5 }
  0x11   : > { %s96_s24 = scalar_lea.hbm %s13475_s0, %s7286_s20  ;;  %p7132_p0 = scmp.ge.s32.totalorder %s7738_s9, 1 }
  0x12   : > { %s97_s26 = sshll.u32 %s96_s24, 4  ;;  %s91_s27 = scalar_lea.vmem [#allocation2], %s7288_s21  ;;  %s98_s26 = int_to_ptr.hbm [resolvable:$true] %s97_s26 }
  0x13   : > { %s99_s28 = sshll.u32 %s91_s27, 4  ;;  %s88_s29 = scalar_lea.sflag [#allocation3], %s87_s19  ;;  %s100_s28 = int_to_ptr.vmem [resolvable:$true] %s99_s28 }
  0x14   : > { %s7642_s30 = sshra.s32 %s98_s26, 4  ;;  %p7646_p2 = pneg %p7815_p13  ;;  %s7643_s30 = int_to_ptr.hbm [resolvable:$true] %s7642_s30 }
  0x15   : > { %s7644_s2 = scalar_lea.hbm %s7643_s30, 1200  ;;  %s7649_s5 = scalar_lea.hbm %s13475_s0, 2400 }
  0x16   : > { %p7645_p1 = scmp.ne.s32.totalorder %s7643_s30, %s7644_s2  ;;  %p7650_p5 = scmp.lt.s32.totalorder %s7643_s30, %s13475_s0 }
  0x17   : > { %p7651_p7 = scmp.lt.s32.totalorder %s7649_s5, %s7644_s2 }
  0x18   : > { %p7647_p3 = pnand %p7646_p2, %p7645_p1 }
  0x19   : > { %p7652_p8 = por %p7651_p7, %p7650_p5 }
  0x1a   : > { %p7648_p4 = pneg %p7647_p3 }
  0x1c   : > { %p7653_p10 = pnand %p7652_p8, %p7648_p4 }
  0x1e   : > { %7656 = shalt.err (!%p7653_p10)
}
  0x1f   : > { %s7740_s14 = smov 1536   ;;  %s7741_s19 = smov 768  }
  0x20   : > { %s7742_s20 = smov 48   ;;  %p107_p1 = scmp.lt.s32.totalorder %s7738_s9, 3 }
  0x21   : > { %7297 = dma.hbm_to_vmem [thread:$0]  (!%p7815_p13), %s98_s26, 19200, %s100_s28, %s88_s29, %s7740_s14, %s7741_s19, %s7742_s20  }
  0x22   : > { %p108_p2 = pnand %p7132_p0, %p107_p1 }
  0x23   : > { %s7834_s21 = sand.u32 (!%p108_p2), 1, %s7730_s7  }
  0x24   : > { %111 = sbr.rel (%p108_p2) target bundleno = 1648 (0x670), region = 24  ;;  %s114_s23 = scalar_lea.sflag (!%p108_p2), [#allocation3], %s7834_s21 }
  0x25   : > { %s7289_s22 = smul.u32 (!%p108_p2), 1200, %s7834_s21 }
  0x27   : > { %s7840_s24 = scalar_lea.vmem (!%p108_p2), [#allocation2], %s7289_s22 }
  0x29   : > { %7717 = dma.done.wait (%p7795_p6), %s114_s23, 19200  }
  0x2a   : > { %7719 = vsyncadd (%p7795_p6), %s114_s23, 4294948096  ;;  %v7847_v0 = vld [vmem:[%s7840_s24] sm:$0xff]  ;;  %v7850_v1 = vld [vmem:[%s7840_s24 + $0x8] sm:$0xff]  ;;  %s8053_s16 = scalar_lea.vmem [#allocation5], %s7289_s22  ;;  %s7287_s25 = smul.u32 48, %s7777_s10 }
  0x2b   : > { %v7853_v2 = vld [vmem:[%s7840_s24 + $0x10] sm:$0xff]  ;;  %v7856_v3 = vmul.f32 0.70710677, %v7847_v0  ;;  %v7859_v4 = vmul.f32 0.70710677, %v7850_v1  ;;  %v7865_v6 = vld [vmem:[%s7840_s24 + $0x18] sm:$0xff] }
  0x2c   : > { %v7862_v5 = vmul.f32 0.70710677, %v7853_v2  ;;  %v7874_v10 = vld [vmem:[%s7840_s24 + $0x20] sm:$0xff]  ;;  %v7877_v11 = vmul.f32 0.70710677, %v7865_v6  ;;  %v7889_v16 = vld [vmem:[%s7840_s24 + $0x28] sm:$0xff]  ;;  %s7051_s28 = scalar_lea.hbm %s13476_s1, %s7287_s25 }
  0x2d   : > { %v439_v7 = vmul.f32 %v7856_v3, %v7856_v3  ;;  %v479_v8 = vmul.f32 %v7859_v4, %v7859_v4  ;;  %v7886_v15 = vmul.f32 0.70710677, %v7874_v10  ;;  %v7903_v33 = vmul.f32 0.70710677, %v7889_v16  ;;  %s7052_s29 = sshll.u32 %s8053_s16, 4  ;;  %s7054_s30 = sshll.u32 %s7051_s28, 4  ;;  %s7053_s29 = int_to_ptr.vmem [resolvable:$true] %s7052_s29  ;;  %s7055_s30 = int_to_ptr.hbm [resolvable:$true] %s7054_s30 }
  0x2e   : > { %v519_v9 = vmul.f32 %v7862_v5, %v7862_v5  ;;  %v559_v23 = vmul.f32 %v7877_v11, %v7877_v11  ;;  %s7040_s2 = scalar_lea.sflag [#allocation4], %s7834_s21  ;;  %s7686_s10 = sshra.s32 %s7055_s30, 4  ;;  %s7687_s10 = int_to_ptr.hbm [resolvable:$true] %s7686_s10 }
  0x2f   : > { %v7879_v12 = vmin.f32 %v439_v7, 16.0  ;;  %v7881_v13 = vmin.f32 %v479_v8, 16.0  ;;  %s7688_s3 = scalar_lea.hbm %s7687_s10, 1200  ;;  %s7692_s11 = scalar_lea.hbm %s13476_s1, 2400 }
  0x30   : > { %v7883_v14 = vmin.f32 %v519_v9, 16.0  ;;  %v7908_v37 = vmin.f32 %v559_v23, 16.0  ;;  %p7689_p6 = scmp.ne.s32.totalorder %s7687_s10, %s7688_s3  ;;  %p7693_p3 = scmp.lt.s32.totalorder %s7687_s10, %s13476_s1 }
  0x31   : > { %v441_v17 = vmul.f32 2.1237322e-06, %v7879_v12  ;;  %v452_v18 = vmul.f32 3.8918573e-05, %v7879_v12  ;;  %v481_v19 = vmul.f32 2.1237322e-06, %v7881_v13  ;;  %p7694_p4 = scmp.lt.s32.totalorder %s7692_s11, %s7688_s3 }
  0x32   : > { %v492_v20 = vmul.f32 3.8918573e-05, %v7881_v13  ;;  %v521_v21 = vmul.f32 2.1237322e-06, %v7883_v14  ;;  %v532_v22 = vmul.f32 3.8918573e-05, %v7883_v14  ;;  %p7690_p13 = pnand %p7689_p6, %p7802_p11 }
  0x33   : > { %v442_v24 = vadd.f32 0.00028619796, %v441_v17  ;;  %v453_v25 = vadd.f32 0.001143296, %v452_v18  ;;  %v482_v26 = vadd.f32 0.00028619796, %v481_v19  ;;  %p7695_p5 = por %p7694_p4, %p7693_p3 }
  0x34   : > { %v493_v27 = vadd.f32 0.001143296, %v492_v20  ;;  %v522_v28 = vadd.f32 0.00028619796, %v521_v21  ;;  %v533_v29 = vadd.f32 0.001143296, %v532_v22  ;;  %p7691_p0 = pneg %p7690_p13 }
  0x35   : > { %v443_v30 = vmul.f32 %v442_v24, %v7879_v12  ;;  %v454_v31 = vmul.f32 %v453_v25, %v7879_v12  ;;  %v483_v32 = vmul.f32 %v482_v26, %v7881_v13  ;;  %v561_v47 = vmul.f32 2.1237322e-06, %v7908_v37 }
  0x36   : > { %v494_v34 = vmul.f32 %v493_v27, %v7881_v13  ;;  %v523_v35 = vmul.f32 %v522_v28, %v7883_v14  ;;  %v534_v36 = vmul.f32 %v533_v29, %v7883_v14  ;;  %v572_v51 = vmul.f32 3.8918573e-05, %v7908_v37  ;;  %p7696_p7 = pnand %p7695_p5, %p7691_p0 }
  0x37   : > { %v444_v38 = vadd.f32 0.0036580483, %v443_v30  ;;  %v455_v39 = vadd.f32 0.014752088, %v454_v31  ;;  %v484_v40 = vadd.f32 0.0036580483, %v483_v32 }
  0x38   : > { %v495_v41 = vadd.f32 0.014752088, %v494_v34  ;;  %v524_v42 = vadd.f32 0.0036580483, %v523_v35  ;;  %v535_v43 = vadd.f32 0.014752088, %v534_v36  ;;  %v599_v35 = vmul.f32 %v7886_v15, %v7886_v15 }
  0x39   : > { %v445_v44 = vmul.f32 %v444_v38, %v7879_v12  ;;  %v456_v45 = vmul.f32 %v455_v39, %v7879_v12  ;;  %v485_v46 = vmul.f32 %v484_v40, %v7881_v13  ;;  %v562_v61 = vadd.f32 0.00028619796, %v561_v47 }
  0x3a   : > { %v496_v48 = vmul.f32 %v495_v41, %v7881_v13  ;;  %v525_v49 = vmul.f32 %v524_v42, %v7883_v14  ;;  %v536_v50 = vmul.f32 %v535_v43, %v7883_v14  ;;  %v573_v8 = vadd.f32 0.001143296, %v572_v51 }
  0x3b   : > { %v446_v52 = vadd.f32 0.05243302, %v445_v44  ;;  %v457_v53 = vadd.f32 0.112945676, %v456_v45  ;;  %v486_v54 = vadd.f32 0.05243302, %v485_v46  ;;  %v563_v19 = vmul.f32 %v562_v61, %v7908_v37 }
  0x3c   : > { %v497_v55 = vadd.f32 0.112945676, %v496_v48  ;;  %v526_v56 = vadd.f32 0.05243302, %v525_v49  ;;  %v537_v57 = vadd.f32 0.112945676, %v536_v50  ;;  %v574_v23 = vmul.f32 %v573_v8, %v7908_v37 }
  0x3d   : > { %v447_v58 = vmul.f32 %v446_v52, %v7879_v12  ;;  %v458_v59 = vmul.f32 %v457_v53, %v7879_v12  ;;  %v487_v60 = vmul.f32 %v486_v54, %v7881_v13  ;;  %v564_v27 = vadd.f32 0.0036580483, %v563_v19 }
  0x3e   : > { %v498_v62 = vmul.f32 %v497_v55, %v7881_v13  ;;  %v527_v63 = vmul.f32 %v526_v56, %v7883_v14  ;;  %v538_v7 = vmul.f32 %v537_v57, %v7883_v14  ;;  %v575_v31 = vadd.f32 0.014752088, %v574_v23 }
  0x3f   : > { %v448_v9 = vadd.f32 0.18741608, %v447_v58  ;;  %v459_v17 = vadd.f32 0.4994258, %v458_v59  ;;  %v488_v18 = vadd.f32 0.18741608, %v487_v60  ;;  %v565_v40 = vmul.f32 %v564_v27, %v7908_v37 }
  0x40   : > { %v499_v20 = vadd.f32 0.4994258, %v498_v62  ;;  %v528_v21 = vadd.f32 0.18741608, %v527_v63  ;;  %v539_v22 = vadd.f32 0.4994258, %v538_v7  ;;  %v576_v42 = vmul.f32 %v575_v31, %v7908_v37 }
  0x41   : > { %v449_v24 = vmul.f32 %v448_v9, %v7879_v12  ;;  %v460_v25 = vmul.f32 %v459_v17, %v7879_v12  ;;  %v489_v26 = vmul.f32 %v488_v18, %v7881_v13  ;;  %v7948_v46 = vmin.f32 %v599_v35, 16.0 }
  0x42   : > { %v500_v28 = vmul.f32 %v499_v20, %v7881_v13  ;;  %v529_v29 = vmul.f32 %v528_v21, %v7883_v14  ;;  %v540_v30 = vmul.f32 %v539_v22, %v7883_v14  ;;  %v639_v13 = vmul.f32 %v7903_v33, %v7903_v33 }
  0x43   : > { %v450_v32 = vadd.f32 1.1283791, %v449_v24  ;;  %v461_v34 = vadd.f32 1.0, %v460_v25  ;;  %v490_v36 = vadd.f32 1.1283791, %v489_v26 }
  0x44   : > { %v7934_v38 = vadd.f32 1.0, %v500_v28  ;;  %v7936_v39 = vadd.f32 1.0, %v540_v30  ;;  %v530_v12 = vadd.f32 1.1283791, %v529_v29  ;;  %v566_v50 = vadd.f32 0.05243302, %v565_v40 }
  0x45   : > { %7342 = vrcp.f32 %v461_v34  ;;  %v471_v41 = vand.u32 2147483647, %v461_v34  ;;  %v473_v14 = vand.u32 2147483648, %v461_v34  ;;  %v7944_v43 = vmul.f32 %v450_v32, %v7856_v3  ;;  %v7987_v29 = vld [vmem:[%s7840_s24 + $0x30] sm:$0xff] }
  0x46   : > { %7344 = vrcp.f32 %v7934_v38  ;;  %v511_v44 = vand.u32 2147483647, %v7934_v38  ;;  %v513_v45 = vand.u32 2147483648, %v7934_v38  ;;  %vm467_vm0 = vweird.f32 %v461_v34 }
  0x47   : > { %v7951_v47 = vmul.f32 %v490_v36, %v7859_v4  ;;  %vm507_vm1 = vweird.f32 %v7934_v38  ;;  %7346 = vrcp.f32 %v7936_v39  ;;  %v474_v48 = vor.u32 1.1754944e-38, %v473_v14 }
  0x48   : > { %v7956_v49 = vmul.f32 %v530_v12, %v7862_v5  ;;  %v551_v3 = vand.u32 2147483647, %v7936_v39  ;;  %vm7959_vm2 = vcmp.eq.f32.partialorder %v471_v41, 8.507059e+37  ;;  %v514_v52 = vor.u32 1.1754944e-38, %v513_v45 }
  0x49   : > { %vm547_vm3 = vweird.f32 %v7936_v39  ;;  %v577_v4 = vadd.f32 0.112945676, %v576_v42  ;;  %v601_v53 = vmul.f32 2.1237322e-06, %v7948_v46  ;;  %vm7965_vm4 = vcmp.eq.f32.partialorder %v511_v44, 8.507059e+37 }
  0x4a   : > { %v553_v5 = vand.u32 2147483648, %v7936_v39  ;;  %v567_v56 = vmul.f32 %v566_v50, %v7908_v37  ;;  %v612_v57 = vmul.f32 3.8918573e-05, %v7948_v46  ;;  %v7972_v58 = vmin.f32 %v639_v13, 16.0 }
  0x4b   : > { %v7343_v54 = vpop.eup %7342  ;;  %v578_v61 = vmul.f32 %v577_v4, %v7908_v37  ;;  %v602_v62 = vadd.f32 0.00028619796, %v601_v53  ;;  %vm7976_vm7 = vcmp.eq.f32.partialorder %v551_v3, 8.507059e+37  ;;  %v8004_v44 = vmul.f32 0.70710677, %v7987_v29 }
  0x4c   : > { %v7345_v59 = vpop.eup %7344  ;;  %v463_v60 = vmul.f32 %v7343_v54, %v461_v34  ;;  %vm468_vm5 = vweird.f32 %v7343_v54  ;;  %v568_v8 = vadd.f32 0.18741608, %v567_v56  ;;  %v613_v9 = vadd.f32 0.001143296, %v612_v57 }
  0x4d   : > { %v503_v63 = vmul.f32 %v7345_v59, %v7934_v38  ;;  %vm508_vm6 = vweird.f32 %v7345_v59  ;;  %v7347_v17 = vpop.eup %7346  ;;  %v579_v19 = vadd.f32 0.4994258, %v578_v61  ;;  %v603_v20 = vmul.f32 %v602_v62, %v7948_v46  ;;  %vm7991_vm9 = vmor %vm467_vm0, %vm468_vm5 }
  0x4e   : > { %v464_v18 = vsub.f32 1.0, %v463_v60  ;;  %v641_v21 = vmul.f32 2.1237322e-06, %v7972_v58  ;;  %v543_v23 = vmul.f32 %v7347_v17, %v7936_v39  ;;  %vm548_vm8 = vweird.f32 %v7347_v17  ;;  %vm7998_vm10 = vmor %vm507_vm1, %vm508_vm6 }
  0x4f   : > { %v504_v22 = vsub.f32 1.0, %v503_v63  ;;  %v569_v24 = vmul.f32 %v568_v8, %v7908_v37  ;;  %v580_v26 = vmul.f32 %v579_v19, %v7908_v37  ;;  %v604_v27 = vadd.f32 0.0036580483, %v603_v20  ;;  %vm8011_vm11 = vmor %vm547_vm3, %vm548_vm8 }
  0x50   : > { %v465_v25 = vmul.f32 %v7343_v54, %v464_v18  ;;  %v614_v28 = vmul.f32 %v613_v9, %v7948_v46  ;;  %v544_v32 = vsub.f32 1.0, %v543_v23  ;;  %v642_v36 = vadd.f32 0.00028619796, %v641_v21 }
  0x51   : > { %v505_v31 = vmul.f32 %v7345_v59, %v504_v22  ;;  %v570_v35 = vadd.f32 1.1283791, %v569_v24  ;;  %v554_v40 = vor.u32 1.1754944e-38, %v553_v5  ;;  %v581_v13 = vadd.f32 1.0, %v580_v26 }
  0x52   : > { %v466_v12 = vadd.f32 %v7343_v54, %v465_v25  ;;  %v605_v34 = vmul.f32 %v604_v27, %v7948_v46  ;;  %v545_v14 = vmul.f32 %v7347_v17, %v544_v32  ;;  %v615_v42 = vadd.f32 0.014752088, %v614_v28 }
  0x53   : > { %v506_v41 = vadd.f32 %v7345_v59, %v505_v31  ;;  %v8016_v3 = vmul.f32 %v570_v35, %v7877_v11  ;;  %7348 = vrcp.f32 %v581_v13  ;;  %v643_v50 = vmul.f32 %v642_v36, %v7972_v58 }
  0x54   : > { %v470_v45 = vsel %vm7991_vm9, %v7343_v54, %v466_v12  ;;  %v546_v54 = vadd.f32 %v7347_v17, %v545_v14  ;;  %v591_v5 = vand.u32 2147483647, %v581_v13  ;;  %vm587_vm12 = vweird.f32 %v581_v13  ;;  %v8047_v12 = vld [vmem:[%s7840_s24 + $0x38] sm:$0xff] }
  0x55   : > { %v475_v4 = vsel %vm7959_vm2, %v474_v48, %v470_v45  ;;  %v510_v53 = vsel %vm7998_vm10, %v7345_v59, %v506_v41  ;;  %v606_v57 = vadd.f32 0.05243302, %v605_v34  ;;  %v593_v61 = vand.u32 2147483648, %v581_v13 }
  0x56   : > { %v476_v39 = vmul.f32 %v475_v4, %v7944_v43  ;;  %v515_v56 = vsel %vm7965_vm4, %v514_v52, %v510_v53  ;;  %v550_v60 = vsel %vm8011_vm11, %v7347_v17, %v546_v54  ;;  %v616_v48 = vmul.f32 %v615_v42, %v7948_v46 }
  0x57   : > { %v516_v11 = vmul.f32 %v515_v56, %v7951_v47  ;;  %v555_v59 = vsel %vm7976_vm7, %v554_v40, %v550_v60  ;;  %v607_v62 = vmul.f32 %v606_v57, %v7948_v46  ;;  %v644_v43 = vadd.f32 0.0036580483, %v643_v50  ;;  %v8081_v57 = vld [vmem:[%s7840_s24 + $0x40] sm:$0xff] }
  0x58   : > { %v7133_v51 = vclamps-f32 %v476_v39, 1.0  ;;  %v556_v52 = vmul.f32 %v555_v59, %v7956_v49  ;;  %vm8034_vm13 = vcmp.eq.f32.partialorder %v591_v5, 8.507059e+37  ;;  %v617_v47 = vadd.f32 0.112945676, %v616_v48 }
  0x59   : > { %v7134_v63 = vclamps-f32 %v516_v11, 1.0  ;;  %v652_v8 = vmul.f32 3.8918573e-05, %v7972_v58  ;;  %v7349_v9 = vpop.eup %7348  ;;  %v608_v18 = vadd.f32 0.18741608, %v607_v62  ;;  %v645_v19 = vmul.f32 %v644_v43, %v7972_v58 }
  0x5a   : > { %v6439_v17 = vmul.f32 0.5, %v7133_v51  ;;  %v679_v7 = vmul.f32 %v8004_v44, %v8004_v44  ;;  %v7135_v21 = vclamps-f32 %v556_v52, 1.0  ;;  %v583_v22 = vmul.f32 %v7349_v9, %v581_v13 }
  0x5b   : > { %v6440_v20 = vmul.f32 0.5, %v7134_v63  ;;  %vm588_vm14 = vweird.f32 %v7349_v9  ;;  %v609_v23 = vmul.f32 %v608_v18, %v7948_v46  ;;  %v618_v24 = vmul.f32 %v617_v47, %v7948_v46 }
  0x5c   : > { %v6589_v49 = vadd.f32 0.5, %v6439_v17  ;;  %v646_v25 = vadd.f32 0.05243302, %v645_v19  ;;  %v6441_v27 = vmul.f32 0.5, %v7135_v21  ;;  %v584_v28 = vsub.f32 1.0, %v583_v22  ;;  %vm8058_vm15 = vmor %vm587_vm12, %vm588_vm14 }
  0x5d   : > { %v6590_v26 = vadd.f32 0.5, %v6440_v20  ;;  %v653_v30 = vadd.f32 0.001143296, %v652_v8  ;;  %v594_v32 = vor.u32 1.1754944e-38, %v593_v61  ;;  %v619_v35 = vadd.f32 0.4994258, %v618_v24 }
  0x5e   : > { %v6739_v31 = vmul.f32 %v6589_v49, %v7847_v0  ;;  %v647_v36 = vmul.f32 %v646_v25, %v7972_v58  ;;  %v6591_v40 = vadd.f32 0.5, %v6441_v27  ;;  %v585_v34 = vmul.f32 %v7349_v9, %v584_v28 }
  0x5f   : > { %v6740_v37 = vmul.f32 %v6590_v26, %v7850_v1  ;;  %v654_v41 = vmul.f32 %v653_v30, %v7972_v58  ;;  %v610_v14 = vadd.f32 1.1283791, %v609_v23  ;;  %v620_v1 = vmul.f32 %v619_v35, %v7948_v46 }
  0x60   : > { %6889 = vst [vmem:[%s8053_s16] sm:$0xff] %v6739_v31  ;;  %v648_v42 = vadd.f32 0.18741608, %v647_v36  ;;  %v8063_v45 = vmin.f32 %v679_v7, 16.0  ;;  %v6741_v38 = vmul.f32 %v6591_v40, %v7853_v2  ;;  %v586_v50 = vadd.f32 %v7349_v9, %v585_v34 }
  0x61   : > { %6890 = vst [vmem:[%s8053_s16 + $0x8] sm:$0xff] %v6740_v37  ;;  %v655_v4 = vadd.f32 0.014752088, %v654_v41  ;;  %v8068_v53 = vmul.f32 0.70710677, %v8047_v12  ;;  %v621_v13 = vadd.f32 1.0, %v620_v1  ;;  %v8086_v51 = vmul.f32 %v610_v14, %v7886_v15 }
  0x62   : > { %v681_v54 = vmul.f32 2.1237322e-06, %v8063_v45  ;;  %v692_v5 = vmul.f32 3.8918573e-05, %v8063_v45  ;;  %6891 = vst [vmem:[%s8053_s16 + $0x10] sm:$0xff] %v6741_v38  ;;  %v590_v46 = vsel %vm8058_vm15, %v7349_v9, %v586_v50  ;;  %v649_v61 = vmul.f32 %v648_v42, %v7972_v58  ;;  %v8110_v37 = vld [vmem:[%s7840_s24 + $0x48] sm:$0xff] }
  0x63   : > { %v656_v39 = vmul.f32 %v655_v4, %v7972_v58  ;;  %v719_v56 = vmul.f32 %v8068_v53, %v8068_v53  ;;  %v595_v2 = vsel %vm8034_vm13, %v594_v32, %v590_v46  ;;  %7350 = vrcp.f32 %v621_v13 }
  0x64   : > { %v596_v11 = vmul.f32 %v595_v2, %v8016_v3  ;;  %v631_v60 = vand.u32 2147483647, %v621_v13  ;;  %v682_v59 = vadd.f32 0.00028619796, %v681_v54  ;;  %v693_v62 = vadd.f32 0.001143296, %v692_v5 }
  0x65   : > { %v657_v48 = vadd.f32 0.112945676, %v656_v39  ;;  %v8088_v43 = vmin.f32 %v719_v56, 16.0  ;;  %v633_v52 = vand.u32 2147483648, %v621_v13  ;;  %v8092_v47 = vmul.f32 0.70710677, %v8081_v57 }
  0x66   : > { %v7136_v63 = vclamps-f32 %v596_v11, 1.0  ;;  %v683_v3 = vmul.f32 %v682_v59, %v8063_v45  ;;  %v694_v8 = vmul.f32 %v693_v62, %v8063_v45  ;;  %vm8098_vm0 = vcmp.eq.f32.partialorder %v631_v60, 8.507059e+37 }
  0x67   : > { %v658_v55 = vmul.f32 %v657_v48, %v7972_v58  ;;  %v721_v9 = vmul.f32 2.1237322e-06, %v8088_v43  ;;  %v732_v15 = vmul.f32 3.8918573e-05, %v8088_v43  ;;  %v650_v19 = vadd.f32 1.1283791, %v649_v61 }
  0x68   : > { %v6442_v17 = vmul.f32 0.5, %v7136_v63  ;;  %vm627_vm1 = vweird.f32 %v621_v13  ;;  %v684_v21 = vadd.f32 0.0036580483, %v683_v3  ;;  %v695_v22 = vadd.f32 0.014752088, %v694_v8 }
  0x69   : > { %v659_v7 = vadd.f32 0.4994258, %v658_v55  ;;  %v7351_v20 = vpop.eup %7350  ;;  %v722_v49 = vadd.f32 0.00028619796, %v721_v9  ;;  %v759_v26 = vmul.f32 %v8092_v47, %v8092_v47  ;;  %v733_v31 = vadd.f32 0.001143296, %v732_v15 }
  0x6a   : > { %v6592_v23 = vadd.f32 0.5, %v6442_v17  ;;  %v623_v24 = vmul.f32 %v7351_v20, %v621_v13  ;;  %v685_v27 = vmul.f32 %v684_v21, %v8063_v45  ;;  %v696_v28 = vmul.f32 %v695_v22, %v8063_v45 }
  0x6b   : > { %v660_v25 = vmul.f32 %v659_v7, %v7972_v58  ;;  %v723_v30 = vmul.f32 %v722_v49, %v8088_v43  ;;  %vm628_vm2 = vweird.f32 %v7351_v20  ;;  %v734_v41 = vmul.f32 %v733_v31, %v8088_v43 }
  0x6c   : > { %v6742_v32 = vmul.f32 %v6592_v23, %v7865_v6  ;;  %v624_v35 = vsub.f32 1.0, %v623_v24  ;;  %v686_v40 = vadd.f32 0.05243302, %v685_v27  ;;  %v697_v34 = vadd.f32 0.112945676, %v696_v28  ;;  %vm8117_vm3 = vmor %vm627_vm1, %vm628_vm2 }
  0x6d   : > { %v661_v36 = vadd.f32 1.0, %v660_v25  ;;  %v724_v58 = vadd.f32 0.0036580483, %v723_v30  ;;  %v634_v14 = vor.u32 1.1754944e-38, %v633_v52  ;;  %v8114_v1 = vmin.f32 %v759_v26, 16.0 }
  0x6e   : > { %6892 = vst [vmem:[%s8053_s16 + $0x18] sm:$0xff] %v6742_v32  ;;  %v625_v0 = vmul.f32 %v7351_v20, %v624_v35  ;;  %v8122_v6 = vmul.f32 %v650_v19, %v7903_v33  ;;  %v687_v38 = vmul.f32 %v686_v40, %v8063_v45  ;;  %v698_v50 = vmul.f32 %v697_v34, %v8063_v45 }
  0x6f   : > { %7352 = vrcp.f32 %v661_v36  ;;  %v725_v4 = vmul.f32 %v724_v58, %v8088_v43  ;;  %v735_v5 = vadd.f32 0.014752088, %v734_v41  ;;  %v761_v46 = vmul.f32 2.1237322e-06, %v8114_v1 }
  0x70   : > { %v626_v54 = vadd.f32 %v7351_v20, %v625_v0  ;;  %v8129_v39 = vmul.f32 0.70710677, %v8110_v37  ;;  %vm667_vm4 = vweird.f32 %v661_v36  ;;  %v671_v13 = vand.u32 2147483647, %v661_v36 }
  0x71   : > { %v688_v56 = vadd.f32 0.18741608, %v687_v38  ;;  %v699_v2 = vadd.f32 0.4994258, %v698_v50  ;;  %v726_v11 = vadd.f32 0.05243302, %v725_v4  ;;  %v736_v60 = vmul.f32 %v735_v5, %v8088_v43 }
  0x72   : > { %v630_v33 = vsel %vm8117_vm3, %v7351_v20, %v626_v54  ;;  %v762_v61 = vadd.f32 0.00028619796, %v761_v46  ;;  %v673_v59 = vand.u32 2147483648, %v661_v36  ;;  %v772_v7 = vmul.f32 3.8918573e-05, %v8114_v1  ;;  %v8163_v50 = vld [vmem:[%s7840_s24 + $0x50] sm:$0xff] }
  0x73   : > { %v635_v48 = vsel %vm8098_vm0, %v634_v14, %v630_v33  ;;  %v689_v62 = vmul.f32 %v688_v56, %v8063_v45  ;;  %v700_v63 = vmul.f32 %v699_v2, %v8063_v45  ;;  %v727_v3 = vmul.f32 %v726_v11, %v8088_v43 }
  0x74   : > { %v636_v55 = vmul.f32 %v635_v48, %v8086_v51  ;;  %v737_v8 = vadd.f32 0.112945676, %v736_v60  ;;  %v763_v9 = vmul.f32 %v762_v61, %v8114_v1  ;;  %vm8143_vm6 = vcmp.eq.f32.partialorder %v671_v13, 8.507059e+37 }
  0x75   : > { %v7353_v52 = vpop.eup %7352  ;;  %v690_v17 = vadd.f32 1.1283791, %v689_v62  ;;  %v701_v19 = vadd.f32 1.0, %v700_v63  ;;  %v728_v20 = vadd.f32 0.18741608, %v727_v3  ;;  %v799_v25 = vmul.f32 %v8129_v39, %v8129_v39 }
  0x76   : > { %v663_v15 = vmul.f32 %v7353_v52, %v661_v36  ;;  %v7137_v18 = vclamps-f32 %v636_v55, 1.0  ;;  %v738_v21 = vmul.f32 %v737_v8, %v8088_v43  ;;  %v764_v22 = vadd.f32 0.0036580483, %v763_v9 }
  0x77   : > { %vm668_vm5 = vweird.f32 %v7353_v52  ;;  %7354 = vrcp.f32 %v701_v19  ;;  %v711_v23 = vand.u32 2147483647, %v701_v19  ;;  %v729_v24 = vmul.f32 %v728_v20, %v8088_v43 }
  0x78   : > { %v664_v49 = vsub.f32 1.0, %v663_v15  ;;  %v6443_v51 = vmul.f32 0.5, %v7137_v18  ;;  %v739_v27 = vadd.f32 0.4994258, %v738_v21  ;;  %v765_v28 = vmul.f32 %v764_v22, %v8114_v1  ;;  %vm8152_vm7 = vmor %vm667_vm4, %vm668_vm5 }
  0x79   : > { %v773_v30 = vadd.f32 0.001143296, %v772_v7  ;;  %v674_v35 = vor.u32 1.1754944e-38, %v673_v59  ;;  %v691_v40 = vmul.f32 %v690_v17, %v8004_v44  ;;  %v713_v34 = vand.u32 2147483648, %v701_v19 }
  0x7a   : > { %v665_v26 = vmul.f32 %v7353_v52, %v664_v49  ;;  %v6593_v31 = vadd.f32 0.5, %v6443_v51  ;;  %v730_v41 = vadd.f32 1.1283791, %v729_v24  ;;  %v740_v0 = vmul.f32 %v739_v27, %v8088_v43 }
  0x7b   : > { %v774_v14 = vmul.f32 %v773_v30, %v8114_v1  ;;  %vm707_vm8 = vweird.f32 %v701_v19  ;;  %v766_v38 = vadd.f32 0.05243302, %v765_v28  ;;  %v8160_v36 = vmin.f32 %v799_v25, 16.0 }
  0x7c   : > { %v666_v58 = vadd.f32 %v7353_v52, %v665_v26  ;;  %v6743_v42 = vmul.f32 %v6593_v31, %v7874_v10  ;;  %vm8167_vm9 = vcmp.eq.f32.partialorder %v711_v23, 8.507059e+37  ;;  %v741_v5 = vadd.f32 1.0, %v740_v0 }
  0x7d   : > { %v7355_v4 = vpop.eup %7354  ;;  %v775_v43 = vadd.f32 0.014752088, %v774_v14  ;;  %v714_v13 = vor.u32 1.1754944e-38, %v713_v34  ;;  %v801_v56 = vmul.f32 2.1237322e-06, %v8160_v36  ;;  %v8177_v33 = vmul.f32 %v730_v41, %v8068_v53 }
  0x7e   : > { %v670_v44 = vsel %vm8152_vm7, %v7353_v52, %v666_v58  ;;  %6893 = vst [vmem:[%s8053_s16 + $0x20] sm:$0xff] %v6743_v42  ;;  %v703_v46 = vmul.f32 %v7355_v4, %v701_v19  ;;  %7356 = vrcp.f32 %v741_v5  ;;  %v8180_v11 = vmul.f32 0.70710677, %v8163_v50  ;;  %v8186_v52 = vld [vmem:[%s7840_s24 + $0x58] sm:$0xff] }
  0x7f   : > { %v675_v10 = vsel %vm8143_vm6, %v674_v35, %v670_v44  ;;  %vm708_vm10 = vweird.f32 %v7355_v4  ;;  %v767_v61 = vmul.f32 %v766_v38, %v8114_v1  ;;  %v776_v48 = vmul.f32 %v775_v43, %v8114_v1 }
  0x80   : > { %v676_v2 = vmul.f32 %v675_v10, %v8122_v6  ;;  %v704_v60 = vsub.f32 1.0, %v703_v46  ;;  %vm747_vm11 = vweird.f32 %v741_v5  ;;  %v802_v62 = vadd.f32 0.00028619796, %v801_v56  ;;  %vm8189_vm12 = vmor %vm707_vm8, %vm708_vm10 }
  0x81   : > { %v812_v63 = vmul.f32 3.8918573e-05, %v8160_v36  ;;  %v751_v53 = vand.u32 2147483647, %v741_v5  ;;  %v753_v55 = vand.u32 2147483648, %v741_v5  ;;  %v839_v7 = vmul.f32 %v8180_v11, %v8180_v11 }
  0x82   : > { %v7138_v59 = vclamps-f32 %v676_v2, 1.0  ;;  %v705_v6 = vmul.f32 %v7355_v4, %v704_v60  ;;  %v777_v3 = vadd.f32 0.112945676, %v776_v48  ;;  %v803_v15 = vmul.f32 %v802_v62, %v8160_v36 }
  0x83   : > { %v813_v17 = vadd.f32 0.001143296, %v812_v63  ;;  %v768_v20 = vadd.f32 0.18741608, %v767_v61  ;;  %v8198_v22 = vmul.f32 0.70710677, %v8186_v52 }
  0x84   : > { %v6444_v8 = vmul.f32 0.5, %v7138_v59  ;;  %v706_v18 = vadd.f32 %v7355_v4, %v705_v6  ;;  %v778_v21 = vmul.f32 %v777_v3, %v8114_v1  ;;  %v7357_v49 = vpop.eup %7356  ;;  %v804_v19 = vadd.f32 0.0036580483, %v803_v15  ;;  %v8235_v63 = vld [vmem:[%s7840_s24 + $0x60] sm:$0xff] }
  0x85   : > { %v814_v51 = vmul.f32 %v813_v17, %v8160_v36  ;;  %v8201_v23 = vmin.f32 %v839_v7, 16.0  ;;  %v743_v25 = vmul.f32 %v7357_v49, %v741_v5  ;;  %vm748_vm13 = vweird.f32 %v7357_v49 }
  0x86   : > { %v6594_v45 = vadd.f32 0.5, %v6444_v8  ;;  %v710_v24 = vsel %vm8189_vm12, %v7355_v4, %v706_v18  ;;  %vm8205_vm14 = vcmp.eq.f32.partialorder %v751_v53, 8.507059e+37  ;;  %v779_v30 = vadd.f32 0.4994258, %v778_v21  ;;  %vm8222_vm15 = vmor %vm747_vm11, %vm748_vm13 }
  0x87   : > { %v715_v28 = vsel %vm8167_vm9, %v714_v13, %v710_v24  ;;  %v805_v31 = vmul.f32 %v804_v19, %v8160_v36  ;;  %v744_v35 = vsub.f32 1.0, %v743_v25  ;;  %v815_v34 = vadd.f32 0.014752088, %v814_v51 }
  0x88   : > { %v6744_v27 = vmul.f32 %v6594_v45, %v7889_v16  ;;  %v716_v32 = vmul.f32 %v715_v28, %v691_v40  ;;  %v841_v58 = vmul.f32 2.1237322e-06, %v8201_v23  ;;  %v780_v41 = vmul.f32 %v779_v30, %v8114_v1 }
  0x89   : > { %v806_v0 = vadd.f32 0.05243302, %v805_v31  ;;  %v852_v14 = vmul.f32 3.8918573e-05, %v8201_v23  ;;  %v879_v16 = vmul.f32 %v8198_v22, %v8198_v22  ;;  %v745_v38 = vmul.f32 %v7357_v49, %v744_v35 }
  0x8a   : > { %6894 = vst [vmem:[%s8053_s16 + $0x28] sm:$0xff] %v6744_v27  ;;  %v7139_v42 = vclamps-f32 %v716_v32, 1.0  ;;  %v816_v4 = vmul.f32 %v815_v34, %v8160_v36  ;;  %v842_v44 = vadd.f32 0.00028619796, %v841_v58  ;;  %v754_v54 = vor.u32 1.1754944e-38, %v753_v55 }
  0x8b   : > { %v769_v43 = vmul.f32 %v768_v20, %v8114_v1  ;;  %v781_v10 = vadd.f32 1.0, %v780_v41  ;;  %v807_v46 = vmul.f32 %v806_v0, %v8160_v36  ;;  %v746_v56 = vadd.f32 %v7357_v49, %v745_v38 }
  0x8c   : > { %v6445_v13 = vmul.f32 0.5, %v7139_v42  ;;  %v817_v2 = vadd.f32 0.112945676, %v816_v4  ;;  %v843_v60 = vmul.f32 %v842_v44, %v8201_v23  ;;  %v853_v61 = vadd.f32 0.001143296, %v852_v14 }
  0x8d   : > { %7358 = vrcp.f32 %v781_v10  ;;  %v8229_v48 = vmin.f32 %v879_v16, 16.0  ;;  %v750_v59 = vsel %vm8222_vm15, %v7357_v49, %v746_v56  ;;  %v808_v62 = vadd.f32 0.18741608, %v807_v46  ;;  %v8273_v46 = vld [vmem:[%s7840_s24 + $0x68] sm:$0xff] }
  0x8e   : > { %v6595_v5 = vadd.f32 0.5, %v6445_v13  ;;  %v818_v1 = vmul.f32 %v817_v2, %v8160_v36  ;;  %v755_v6 = vsel %vm8205_vm14, %v754_v54, %v750_v59  ;;  %v770_v53 = vadd.f32 1.1283791, %v769_v43 }
  0x8f   : > { %v791_v55 = vand.u32 2147483647, %v781_v10  ;;  %v844_v3 = vadd.f32 0.0036580483, %v843_v60  ;;  %v756_v9 = vmul.f32 %v755_v6, %v8177_v33  ;;  %v809_v15 = vmul.f32 %v808_v62, %v8160_v36 }
  0x90   : > { %v6745_v8 = vmul.f32 %v6595_v5, %v7987_v29  ;;  %v819_v17 = vadd.f32 0.4994258, %v818_v1  ;;  %v793_v7 = vand.u32 2147483648, %v781_v10  ;;  %v854_v20 = vmul.f32 %v853_v61, %v8201_v23 }
  0x91   : > { %v845_v18 = vmul.f32 %v844_v3, %v8201_v23  ;;  %v881_v21 = vmul.f32 2.1237322e-06, %v8229_v48  ;;  %v7140_v49 = vclamps-f32 %v756_v9, 1.0  ;;  %v892_v19 = vmul.f32 3.8918573e-05, %v8229_v48 }
  0x92   : > { %6895 = vst [vmem:[%s8053_s16 + $0x30] sm:$0xff] %v6745_v8  ;;  %v820_v45 = vmul.f32 %v819_v17, %v8160_v36  ;;  %v8249_v29 = vmul.f32 0.70710677, %v8235_v63  ;;  %vm787_vm0 = vweird.f32 %v781_v10  ;;  %v855_v24 = vadd.f32 0.014752088, %v854_v20 }
  0x93   : > { %v7359_v33 = vpop.eup %7358  ;;  %v846_v51 = vadd.f32 0.05243302, %v845_v18  ;;  %v882_v25 = vadd.f32 0.00028619796, %v881_v21  ;;  %v6446_v26 = vmul.f32 0.5, %v7140_v49  ;;  %v771_v0 = vmul.f32 %v770_v53, %v8092_v47 }
  0x94   : > { %v783_v27 = vmul.f32 %v7359_v33, %v781_v10  ;;  %vm788_vm1 = vweird.f32 %v7359_v33  ;;  %v810_v28 = vadd.f32 1.1283791, %v809_v15  ;;  %v821_v30 = vadd.f32 1.0, %v820_v45 }
  0x95   : > { %v847_v31 = vmul.f32 %v846_v51, %v8201_v23  ;;  %v856_v32 = vmul.f32 %v855_v24, %v8201_v23  ;;  %v883_v36 = vmul.f32 %v882_v25, %v8229_v48  ;;  %v6596_v35 = vadd.f32 0.5, %v6446_v26  ;;  %vm8264_vm3 = vmor %vm787_vm0, %vm788_vm1  ;;  %v8296_v51 = vld [vmem:[%s7840_s24 + $0x70] sm:$0xff] }
  0x96   : > { %v784_v34 = vsub.f32 1.0, %v783_v27  ;;  %v893_v58 = vadd.f32 0.001143296, %v892_v19  ;;  %v919_v41 = vmul.f32 %v8249_v29, %v8249_v29  ;;  %vm8257_vm2 = vcmp.eq.f32.partialorder %v791_v55, 8.507059e+37 }
  0x97   : > { %v794_v16 = vor.u32 1.1754944e-38, %v793_v7  ;;  %7360 = vrcp.f32 %v821_v30  ;;  %v6746_v42 = vmul.f32 %v6596_v35, %v8047_v12  ;;  %v848_v4 = vadd.f32 0.18741608, %v847_v31 }
  0x98   : > { %v785_v38 = vmul.f32 %v7359_v33, %v784_v34  ;;  %v857_v44 = vadd.f32 0.112945676, %v856_v32  ;;  %v8269_v54 = vmul.f32 %v810_v28, %v8129_v39  ;;  %vm827_vm4 = vweird.f32 %v821_v30 }
  0x99   : > { %v884_v47 = vadd.f32 0.0036580483, %v883_v36  ;;  %v894_v43 = vmul.f32 %v893_v58, %v8229_v48  ;;  %6896 = vst [vmem:[%s8053_s16 + $0x38] sm:$0xff] %v6746_v42  ;;  %v849_v13 = vmul.f32 %v848_v4, %v8201_v23  ;;  %v8278_v10 = vmin.f32 %v919_v41, 16.0 }
  0x9a   : > { %v786_v12 = vadd.f32 %v7359_v33, %v785_v38  ;;  %v858_v56 = vmul.f32 %v857_v44, %v8201_v23  ;;  %v831_v2 = vand.u32 2147483647, %v821_v30  ;;  %v833_v60 = vand.u32 2147483648, %v821_v30 }
  0x9b   : > { %v885_v61 = vmul.f32 %v884_v47, %v8229_v48  ;;  %v895_v39 = vadd.f32 0.014752088, %v894_v43  ;;  %v921_v62 = vmul.f32 2.1237322e-06, %v8278_v10  ;;  %v8285_v1 = vmul.f32 0.70710677, %v8273_v46 }
  0x9c   : > { %v790_v5 = vsel %vm8264_vm3, %v7359_v33, %v786_v12  ;;  %v859_v59 = vadd.f32 0.4994258, %v858_v56  ;;  %v932_v8 = vmul.f32 3.8918573e-05, %v8278_v10  ;;  %v850_v17 = vadd.f32 1.1283791, %v849_v13 }
  0x9d   : > { %v7361_v6 = vpop.eup %7360  ;;  %v795_v53 = vsel %vm8257_vm2, %v794_v16, %v790_v5  ;;  %v886_v55 = vadd.f32 0.05243302, %v885_v61  ;;  %v896_v3 = vmul.f32 %v895_v39, %v8229_v48  ;;  %v922_v21 = vadd.f32 0.00028619796, %v921_v62 }
  0x9e   : > { %v796_v9 = vmul.f32 %v795_v53, %v771_v0  ;;  %v823_v15 = vmul.f32 %v7361_v6, %v821_v30  ;;  %vm828_vm5 = vweird.f32 %v7361_v6  ;;  %v860_v7 = vmul.f32 %v859_v59, %v8201_v23 }
  0x9f   : > { %v887_v18 = vmul.f32 %v886_v55, %v8229_v48  ;;  %v897_v20 = vadd.f32 0.112945676, %v896_v3  ;;  %v933_v19 = vadd.f32 0.001143296, %v932_v8  ;;  %v959_v33 = vmul.f32 %v8285_v1, %v8285_v1  ;;  %vm8307_vm7 = vmor %vm827_vm4, %vm828_vm5 }
  0xa0   : > { %v7141_v49 = vclamps-f32 %v796_v9, 1.0  ;;  %v824_v45 = vsub.f32 1.0, %v823_v15  ;;  %v861_v24 = vadd.f32 1.0, %v860_v7  ;;  %v923_v27 = vmul.f32 %v922_v21, %v8278_v10 }
  0xa1   : > { %v888_v25 = vadd.f32 0.18741608, %v887_v18  ;;  %v898_v26 = vmul.f32 %v897_v20, %v8229_v48  ;;  %vm8300_vm6 = vcmp.eq.f32.partialorder %v831_v2, 8.507059e+37  ;;  %v934_v32 = vmul.f32 %v933_v19, %v8278_v10 }
  0xa2   : > { %v6447_v28 = vmul.f32 0.5, %v7141_v49  ;;  %v825_v23 = vmul.f32 %v7361_v6, %v824_v45  ;;  %v834_v35 = vor.u32 1.1754944e-38, %v833_v60  ;;  %7362 = vrcp.f32 %v861_v24 }
  0xa3   : > { %v8311_v34 = vmin.f32 %v959_v33, 16.0  ;;  %v8314_v58 = vmul.f32 0.70710677, %v8296_v51  ;;  %v889_v14 = vmul.f32 %v888_v25, %v8229_v48  ;;  %v899_v16 = vadd.f32 0.4994258, %v898_v26 }
  0xa4   : > { %v6597_v41 = vadd.f32 0.5, %v6447_v28  ;;  %v826_v0 = vadd.f32 %v7361_v6, %v825_v23  ;;  %v8318_v42 = vmul.f32 %v850_v17, %v8180_v11  ;;  %v871_v30 = vand.u32 2147483647, %v861_v24 }
  0xa5   : > { %v924_v38 = vadd.f32 0.0036580483, %v923_v27  ;;  %v935_v4 = vadd.f32 0.014752088, %v934_v32  ;;  %v873_v47 = vand.u32 2147483648, %v861_v24  ;;  %v900_v43 = vmul.f32 %v899_v16, %v8229_v48 }
  0xa6   : > { %v6747_v44 = vmul.f32 %v6597_v41, %v8081_v57  ;;  %v830_v40 = vsel %vm8307_vm7, %v7361_v6, %v826_v0  ;;  %v961_v11 = vmul.f32 2.1237322e-06, %v8311_v34  ;;  %v890_v60 = vadd.f32 1.1283791, %v889_v14  ;;  %v8358_v14 = vld [vmem:[%s7840_s24 + $0x78] sm:$0xff] }
  0xa7   : > { %v835_v12 = vsel %vm8300_vm6, %v834_v35, %v830_v40  ;;  %v925_v13 = vmul.f32 %v924_v38, %v8278_v10  ;;  %v936_v56 = vmul.f32 %v935_v4, %v8278_v10  ;;  %v901_v57 = vadd.f32 1.0, %v900_v43 }
  0xa8   : > { %6897 = vst [vmem:[%s8053_s16 + $0x40] sm:$0xff] %v6747_v44  ;;  %v836_v2 = vmul.f32 %v835_v12, %v8269_v54  ;;  %v972_v61 = vmul.f32 3.8918573e-05, %v8311_v34  ;;  %v7363_v39 = vpop.eup %7362  ;;  %vm867_vm8 = vweird.f32 %v861_v24  ;;  %v962_v59 = vadd.f32 0.00028619796, %v961_v11 }
  0xa9   : > { %v926_v5 = vadd.f32 0.05243302, %v925_v13  ;;  %v937_v48 = vadd.f32 0.112945676, %v936_v56  ;;  %v863_v6 = vmul.f32 %v7363_v39, %v861_v24  ;;  %vm8332_vm9 = vcmp.eq.f32.partialorder %v871_v30, 8.507059e+37 }
  0xaa   : > { %v7142_v62 = vclamps-f32 %v836_v2, 1.0  ;;  %7364 = vrcp.f32 %v901_v57  ;;  %vm868_vm10 = vweird.f32 %v7363_v39  ;;  %v874_v55 = vor.u32 1.1754944e-38, %v873_v47 }
  0xab   : > { %v927_v54 = vmul.f32 %v926_v5, %v8278_v10  ;;  %v999_v3 = vmul.f32 %v8314_v58, %v8314_v58  ;;  %v864_v9 = vsub.f32 1.0, %v863_v6  ;;  %v938_v15 = vmul.f32 %v937_v48, %v8278_v10  ;;  %vm8346_vm11 = vmor %vm867_vm8, %vm868_vm10 }
  0xac   : > { %v6448_v8 = vmul.f32 0.5, %v7142_v62  ;;  %v963_v17 = vmul.f32 %v962_v59, %v8311_v34  ;;  %v8342_v7 = vmul.f32 %v890_v60, %v8198_v22  ;;  %v911_v18 = vand.u32 2147483647, %v901_v57 }
  0xad   : > { %v928_v20 = vadd.f32 0.18741608, %v927_v54  ;;  %v973_v21 = vadd.f32 0.001143296, %v972_v61  ;;  %v865_v45 = vmul.f32 %v7363_v39, %v864_v9  ;;  %v939_v19 = vadd.f32 0.4994258, %v938_v15 }
  0xae   : > { %v6598_v49 = vadd.f32 0.5, %v6448_v8  ;;  %v964_v33 = vadd.f32 0.0036580483, %v963_v17  ;;  %v913_v26 = vand.u32 2147483648, %v901_v57  ;;  %v8352_v28 = vmin.f32 %v999_v3, 16.0 }
  0xaf   : > { %v929_v27 = vmul.f32 %v928_v20, %v8278_v10  ;;  %v974_v22 = vmul.f32 %v973_v21, %v8311_v34  ;;  %v866_v32 = vadd.f32 %v7363_v39, %v865_v45  ;;  %v940_v36 = vmul.f32 %v939_v19, %v8278_v10 }
  0xb0   : > { %v7365_v23 = vpop.eup %7364  ;;  %v6748_v31 = vmul.f32 %v6598_v49, %v8110_v37  ;;  %v965_v24 = vmul.f32 %v964_v33, %v8311_v34  ;;  %vm907_vm12 = vweird.f32 %v901_v57  ;;  %v1001_v4 = vmul.f32 2.1237322e-06, %v8352_v28 }
  0xb1   : > { %v903_v35 = vmul.f32 %v7365_v23, %v901_v57  ;;  %v930_v41 = vadd.f32 1.1283791, %v929_v27  ;;  %v975_v0 = vadd.f32 0.014752088, %v974_v22  ;;  %v870_v16 = vsel %vm8346_vm11, %v7363_v39, %v866_v32 }
  0xb2   : > { %6898 = vst [vmem:[%s8053_s16 + $0x48] sm:$0xff] %v6748_v31  ;;  %v941_v30 = vadd.f32 1.0, %v940_v36  ;;  %v966_v38 = vadd.f32 0.05243302, %v965_v24  ;;  %v875_v37 = vsel %vm8332_vm9, %v874_v55, %v870_v16  ;;  %vm908_vm13 = vweird.f32 %v7365_v23  ;;  %v8388_v55 = vld [vmem:[%s7840_s24 + $0x80] sm:$0xff] }
  0xb3   : > { %v904_v10 = vsub.f32 1.0, %v903_v35  ;;  %v976_v44 = vmul.f32 %v975_v0, %v8311_v34  ;;  %v876_v40 = vmul.f32 %v875_v37, %v8318_v42  ;;  %vm8368_vm14 = vcmp.eq.f32.partialorder %v911_v18, 8.507059e+37  ;;  %vm8377_vm15 = vmor %vm907_vm12, %vm908_vm13 }
  0xb4   : > { %v914_v43 = vor.u32 1.1754944e-38, %v913_v26  ;;  %7366 = vrcp.f32 %v941_v30  ;;  %v967_v13 = vmul.f32 %v966_v38, %v8311_v34  ;;  %v8374_v11 = vmul.f32 0.70710677, %v8358_v14 }
  0xb5   : > { %v905_v12 = vmul.f32 %v7365_v23, %v904_v10  ;;  %v977_v56 = vadd.f32 0.112945676, %v976_v44  ;;  %v7143_v2 = vclamps-f32 %v876_v40, 1.0  ;;  %v8382_v42 = vmul.f32 %v930_v41, %v8249_v29 }
  0xb6   : > { %v1002_v61 = vadd.f32 0.00028619796, %v1001_v4  ;;  %v1012_v39 = vmul.f32 3.8918573e-05, %v8352_v28  ;;  %vm947_vm0 = vweird.f32 %v941_v30  ;;  %v968_v48 = vadd.f32 0.18741608, %v967_v13 }
  0xb7   : > { %v906_v5 = vadd.f32 %v7365_v23, %v905_v12  ;;  %v978_v59 = vmul.f32 %v977_v56, %v8311_v34  ;;  %v6449_v62 = vmul.f32 0.5, %v7143_v2  ;;  %v951_v6 = vand.u32 2147483647, %v941_v30 }
  0xb8   : > { %v1003_v53 = vmul.f32 %v1002_v61, %v8352_v28  ;;  %v1013_v57 = vadd.f32 0.001143296, %v1012_v39  ;;  %v953_v29 = vand.u32 2147483648, %v941_v30  ;;  %v1039_v8 = vmul.f32 %v8374_v11, %v8374_v11 }
  0xb9   : > { %v910_v54 = vsel %vm8377_vm15, %v7365_v23, %v906_v5  ;;  %v979_v3 = vadd.f32 0.4994258, %v978_v59  ;;  %v6599_v15 = vadd.f32 0.5, %v6449_v62  ;;  %v969_v45 = vmul.f32 %v968_v48, %v8311_v34  ;;  %v8434_v48 = vld [vmem:[%s7840_s24 + $0x88] sm:$0xff] }
  0xba   : > { %v7367_v9 = vpop.eup %7366  ;;  %v915_v17 = vsel %vm8368_vm14, %v914_v43, %v910_v54  ;;  %v1004_v18 = vadd.f32 0.0036580483, %v1003_v53  ;;  %v1014_v20 = vmul.f32 %v1013_v57, %v8352_v28  ;;  %v8400_v19 = vmul.f32 0.70710677, %v8388_v55 }
  0xbb   : > { %v916_v21 = vmul.f32 %v915_v17, %v8342_v7  ;;  %v943_v49 = vmul.f32 %v7367_v9, %v941_v30  ;;  %v6749_v33 = vmul.f32 %v6599_v15, %v8163_v50  ;;  %v980_v25 = vmul.f32 %v979_v3, %v8311_v34 }
  0xbc   : > { %v1005_v26 = vmul.f32 %v1004_v18, %v8352_v28  ;;  %v1015_v27 = vadd.f32 0.014752088, %v1014_v20  ;;  %vm948_vm1 = vweird.f32 %v7367_v9  ;;  %v8405_v31 = vmin.f32 %v1039_v8, 16.0 }
  0xbd   : > { %v7144_v22 = vclamps-f32 %v916_v21, 1.0  ;;  %v944_v23 = vsub.f32 1.0, %v943_v49  ;;  %6899 = vst [vmem:[%s8053_s16 + $0x50] sm:$0xff] %v6749_v33  ;;  %vm8408_vm2 = vcmp.eq.f32.partialorder %v951_v6, 8.507059e+37  ;;  %v981_v32 = vadd.f32 1.0, %v980_v25  ;;  %vm8416_vm3 = vmor %vm947_vm0, %vm948_vm1 }
  0xbe   : > { %v1006_v36 = vadd.f32 0.05243302, %v1005_v26  ;;  %v1016_v24 = vmul.f32 %v1015_v27, %v8352_v28  ;;  %v1041_v34 = vmul.f32 2.1237322e-06, %v8405_v31  ;;  %v1052_v41 = vmul.f32 3.8918573e-05, %v8405_v31 }
  0xbf   : > { %v6450_v50 = vmul.f32 0.5, %v7144_v22  ;;  %v945_v35 = vmul.f32 %v7367_v9, %v944_v23  ;;  %v954_v16 = vor.u32 1.1754944e-38, %v953_v29  ;;  %v970_v38 = vadd.f32 1.1283791, %v969_v45 }
  0xc0   : > { %7368 = vrcp.f32 %v981_v32  ;;  %v1079_v4 = vmul.f32 %v8400_v19, %v8400_v19  ;;  %v1007_v44 = vmul.f32 %v1006_v36, %v8352_v28  ;;  %v1017_v40 = vadd.f32 0.112945676, %v1016_v24 }
  0xc1   : > { %v6600_v37 = vadd.f32 0.5, %v6450_v50  ;;  %v946_v10 = vadd.f32 %v7367_v9, %v945_v35  ;;  %v991_v47 = vand.u32 2147483647, %v981_v32  ;;  %v1042_v43 = vadd.f32 0.00028619796, %v1041_v34 }
  0xc2   : > { %v1053_v30 = vadd.f32 0.001143296, %v1052_v41  ;;  %v1008_v56 = vadd.f32 0.18741608, %v1007_v44  ;;  %v1018_v2 = vmul.f32 %v1017_v40, %v8352_v28  ;;  %v8431_v5 = vmin.f32 %v1079_v4, 16.0  ;;  %v8469_v4 = vld [vmem:[%s7840_s24 + $0x90] sm:$0xff] }
  0xc3   : > { %v6750_v12 = vmul.f32 %v6600_v37, %v8186_v52  ;;  %v950_v13 = vsel %vm8416_vm3, %v7367_v9, %v946_v10  ;;  %v1043_v61 = vmul.f32 %v1042_v43, %v8405_v31  ;;  %v993_v59 = vand.u32 2147483648, %v981_v32 }
  0xc4   : > { %v955_v60 = vsel %vm8408_vm2, %v954_v16, %v950_v13  ;;  %v1054_v39 = vmul.f32 %v1053_v30, %v8405_v31  ;;  %v1009_v62 = vmul.f32 %v1008_v56, %v8352_v28  ;;  %v1019_v6 = vadd.f32 0.4994258, %v1018_v2 }
  0xc5   : > { %6900 = vst [vmem:[%s8053_s16 + $0x58] sm:$0xff] %v6750_v12  ;;  %v956_v52 = vmul.f32 %v955_v60, %v8382_v42  ;;  %vm987_vm4 = vweird.f32 %v981_v32  ;;  %v1044_v57 = vadd.f32 0.0036580483, %v1043_v61  ;;  %v1081_v29 = vmul.f32 2.1237322e-06, %v8431_v5 }
  0xc6   : > { %v7369_v53 = vpop.eup %7368  ;;  %v1055_v54 = vadd.f32 0.014752088, %v1054_v39  ;;  %v8441_v9 = vmul.f32 0.70710677, %v8434_v48  ;;  %v1020_v15 = vmul.f32 %v1019_v6, %v8352_v28  ;;  %v1010_v49 = vadd.f32 1.1283791, %v1009_v62 }
  0xc7   : > { %v7145_v3 = vclamps-f32 %v956_v52, 1.0  ;;  %v983_v8 = vmul.f32 %v7369_v53, %v981_v32  ;;  %vm988_vm5 = vweird.f32 %v7369_v53  ;;  %v1045_v42 = vmul.f32 %v1044_v57, %v8405_v31 }
  0xc8   : > { %v1056_v17 = vmul.f32 %v1055_v54, %v8405_v31  ;;  %v1082_v18 = vadd.f32 0.00028619796, %v1081_v29  ;;  %v1092_v45 = vmul.f32 3.8918573e-05, %v8431_v5  ;;  %v1021_v33 = vadd.f32 1.0, %v1020_v15  ;;  %vm8453_vm6 = vmor %vm987_vm4, %vm988_vm5 }
  0xc9   : > { %v6451_v20 = vmul.f32 0.5, %v7145_v3  ;;  %v984_v21 = vsub.f32 1.0, %v983_v8  ;;  %v1046_v25 = vadd.f32 0.05243302, %v1045_v42  ;;  %v1119_v7 = vmul.f32 %v8441_v9, %v8441_v9 }
  0xca   : > { %v1057_v26 = vadd.f32 0.112945676, %v1056_v17  ;;  %v1083_v27 = vmul.f32 %v1082_v18, %v8431_v5  ;;  %v1093_v28 = vadd.f32 0.001143296, %v1092_v45  ;;  %v971_v36 = vmul.f32 %v970_v38, %v8285_v1 }
  0xcb   : > { %v6601_v22 = vadd.f32 0.5, %v6451_v20  ;;  %v985_v23 = vmul.f32 %v7369_v53, %v984_v21  ;;  %vm8457_vm7 = vcmp.eq.f32.partialorder %v991_v47, 8.507059e+37  ;;  %v994_v35 = vor.u32 1.1754944e-38, %v993_v59 }
  0xcc   : > { %7370 = vrcp.f32 %v1021_v33  ;;  %v1047_v0 = vmul.f32 %v1046_v25, %v8405_v31  ;;  %v1058_v16 = vmul.f32 %v1057_v26, %v8405_v31  ;;  %v8465_v1 = vmul.f32 %v1010_v49, %v8314_v58 }
  0xcd   : > { %v6751_v34 = vmul.f32 %v6601_v22, %v8235_v63  ;;  %v986_v41 = vadd.f32 %v7369_v53, %v985_v23  ;;  %v1084_v32 = vadd.f32 0.0036580483, %v1083_v27  ;;  %v1094_v38 = vmul.f32 %v1093_v28, %v8431_v5  ;;  %v8503_v23 = vld [vmem:[%s7840_s24 + $0x98] sm:$0xff] }
  0xce   : > { %v1048_v10 = vadd.f32 0.18741608, %v1047_v0  ;;  %v1059_v44 = vadd.f32 0.4994258, %v1058_v16  ;;  %v8474_v63 = vmin.f32 %v1119_v7, 16.0  ;;  %vm1027_vm8 = vweird.f32 %v1021_v33 }
  0xcf   : > { %6901 = vst [vmem:[%s8053_s16 + $0x60] sm:$0xff] %v6751_v34  ;;  %v990_v37 = vsel %vm8453_vm6, %v7369_v53, %v986_v41  ;;  %v1031_v47 = vand.u32 2147483647, %v1021_v33  ;;  %v1085_v58 = vmul.f32 %v1084_v32, %v8431_v5  ;;  %v1095_v43 = vadd.f32 0.014752088, %v1094_v38 }
  0xd0   : > { %v995_v40 = vsel %vm8457_vm7, %v994_v35, %v990_v37  ;;  %v1060_v12 = vmul.f32 %v1059_v44, %v8405_v31  ;;  %v1121_v13 = vmul.f32 2.1237322e-06, %v8474_v63  ;;  %v8482_v56 = vmul.f32 0.70710677, %v8469_v4 }
  0xd1   : > { %v996_v30 = vmul.f32 %v995_v40, %v971_v36  ;;  %v1049_v60 = vmul.f32 %v1048_v10, %v8405_v31  ;;  %v1086_v61 = vadd.f32 0.05243302, %v1085_v58  ;;  %v1096_v39 = vmul.f32 %v1095_v43, %v8431_v5 }
  0xd2   : > { %v7371_v2 = vpop.eup %7370  ;;  %v1132_v52 = vmul.f32 3.8918573e-05, %v8474_v63  ;;  %v1033_v6 = vand.u32 2147483648, %v1021_v33  ;;  %v1061_v53 = vadd.f32 1.0, %v1060_v12  ;;  %v1122_v29 = vadd.f32 0.00028619796, %v1121_v13 }
  0xd3   : > { %v7146_v59 = vclamps-f32 %v996_v30, 1.0  ;;  %v1023_v62 = vmul.f32 %v7371_v2, %v1021_v33  ;;  %v1087_v57 = vmul.f32 %v1086_v61, %v8431_v5  ;;  %v1097_v54 = vadd.f32 0.112945676, %v1096_v39 }
  0xd4   : > { %vm1028_vm9 = vweird.f32 %v7371_v2  ;;  %v1133_v15 = vadd.f32 0.001143296, %v1132_v52  ;;  %vm8488_vm10 = vcmp.eq.f32.partialorder %v1031_v47, 8.507059e+37  ;;  %v1050_v42 = vadd.f32 1.1283791, %v1049_v60 }
  0xd5   : > { %v6452_v3 = vmul.f32 0.5, %v7146_v59  ;;  %v1024_v8 = vsub.f32 1.0, %v1023_v62  ;;  %7372 = vrcp.f32 %v1061_v53  ;;  %v1159_v17 = vmul.f32 %v8482_v56, %v8482_v56  ;;  %vm8496_vm11 = vmor %vm1027_vm8, %vm1028_vm9 }
  0xd6   : > { %v1088_v21 = vadd.f32 0.18741608, %v1087_v57  ;;  %v1098_v49 = vmul.f32 %v1097_v54, %v8431_v5  ;;  %v1034_v25 = vor.u32 1.1754944e-38, %v1033_v6  ;;  %v1071_v26 = vand.u32 2147483647, %v1061_v53 }
  0xd7   : > { %v6602_v18 = vadd.f32 0.5, %v6452_v3  ;;  %v1025_v20 = vmul.f32 %v7371_v2, %v1024_v8  ;;  %v1123_v27 = vmul.f32 %v1122_v29, %v8474_v63  ;;  %v1134_v22 = vmul.f32 %v1133_v15, %v8474_v63 }
  0xd8   : > { %v1089_v36 = vmul.f32 %v1088_v21, %v8431_v5  ;;  %v1099_v24 = vadd.f32 0.4994258, %v1098_v49  ;;  %v1051_v33 = vmul.f32 %v1050_v42, %v8374_v11  ;;  %v8508_v34 = vmin.f32 %v1159_v17, 16.0 }
  0xd9   : > { %v6752_v28 = vmul.f32 %v6602_v18, %v8273_v46  ;;  %v1026_v7 = vadd.f32 %v7371_v2, %v1025_v20  ;;  %v1124_v50 = vadd.f32 0.0036580483, %v1123_v27  ;;  %v1135_v35 = vadd.f32 0.014752088, %v1134_v22 }
  0xda   : > { %v1073_v0 = vand.u32 2147483648, %v1061_v53  ;;  %v1100_v16 = vmul.f32 %v1099_v24, %v8431_v5  ;;  %v8515_v32 = vmul.f32 0.70710677, %v8503_v23  ;;  %v1161_v10 = vmul.f32 2.1237322e-06, %v8508_v34  ;;  %v8560_v24 = vld [vmem:[%s7840_s24 + $0xa0] sm:$0xff] }
  0xdb   : > { %6902 = vst [vmem:[%s8053_s16 + $0x68] sm:$0xff] %v6752_v28  ;;  %v1030_v41 = vsel %vm8496_vm11, %v7371_v2, %v1026_v7  ;;  %v7373_v46 = vpop.eup %7372  ;;  %v1125_v11 = vmul.f32 %v1124_v50, %v8474_v63  ;;  %v1136_v37 = vmul.f32 %v1135_v35, %v8474_v63  ;;  %vm1067_vm12 = vweird.f32 %v1061_v53 }
  0xdc   : > { %v1035_v38 = vsel %vm8488_vm10, %v1034_v25, %v1030_v41  ;;  %v1063_v40 = vmul.f32 %v7373_v46, %v1061_v53  ;;  %v1090_v47 = vadd.f32 1.1283791, %v1089_v36  ;;  %vm1068_vm13 = vweird.f32 %v7373_v46 }
  0xdd   : > { %v1036_v44 = vmul.f32 %v1035_v38, %v8465_v1  ;;  %v1101_v5 = vadd.f32 1.0, %v1100_v16  ;;  %v1126_v58 = vadd.f32 0.05243302, %v1125_v11  ;;  %v1137_v43 = vadd.f32 0.112945676, %v1136_v37  ;;  %vm8534_vm15 = vmor %vm1067_vm12, %vm1068_vm13 }
  0xde   : > { %v1064_v12 = vsub.f32 1.0, %v1063_v40  ;;  %v1162_v13 = vadd.f32 0.00028619796, %v1161_v10  ;;  %v1172_v2 = vmul.f32 3.8918573e-05, %v8508_v34  ;;  %vm8524_vm14 = vcmp.eq.f32.partialorder %v1071_v26, 8.507059e+37 }
  0xdf   : > { %v7147_v30 = vclamps-f32 %v1036_v44, 1.0  ;;  %v1074_v61 = vor.u32 1.1754944e-38, %v1073_v0  ;;  %7374 = vrcp.f32 %v1101_v5  ;;  %v1199_v1 = vmul.f32 %v8515_v32, %v8515_v32 }
  0xe0   : > { %v1065_v52 = vmul.f32 %v7373_v46, %v1064_v12  ;;  %v1127_v59 = vmul.f32 %v1126_v58, %v8474_v63  ;;  %v1138_v62 = vmul.f32 %v1137_v43, %v8474_v63  ;;  %v8539_v57 = vmul.f32 %v1090_v47, %v8400_v19 }
  0xe1   : > { %v6453_v39 = vmul.f32 0.5, %v7147_v30  ;;  %v1111_v54 = vand.u32 2147483647, %v1101_v5  ;;  %v1163_v29 = vmul.f32 %v1162_v13, %v8508_v34  ;;  %v1173_v3 = vadd.f32 0.001143296, %v1172_v2 }
  0xe2   : > { %v1066_v15 = vadd.f32 %v7373_v46, %v1065_v52  ;;  %v1128_v31 = vadd.f32 0.18741608, %v1127_v59  ;;  %v1139_v42 = vadd.f32 0.4994258, %v1138_v62  ;;  %v1113_v17 = vand.u32 2147483648, %v1101_v5  ;;  %v8585_v52 = vld [vmem:[%s7840_s24 + $0xa8] sm:$0xff] }
  0xe3   : > { %v6603_v8 = vadd.f32 0.5, %v6453_v39  ;;  %v1164_v18 = vadd.f32 0.0036580483, %v1163_v29  ;;  %v1174_v53 = vmul.f32 %v1173_v3, %v8508_v34  ;;  %v8543_v20 = vmin.f32 %v1199_v1, 16.0 }
  0xe4   : > { %v1070_v19 = vsel %vm8534_vm15, %v7373_v46, %v1066_v15  ;;  %v1129_v49 = vmul.f32 %v1128_v31, %v8474_v63  ;;  %v1140_v45 = vmul.f32 %v1139_v42, %v8474_v63  ;;  %vm1107_vm0 = vweird.f32 %v1101_v5 }
  0xe5   : > { %v6753_v21 = vmul.f32 %v6603_v8, %v8296_v51  ;;  %v7375_v25 = vpop.eup %7374  ;;  %v1075_v26 = vsel %vm8524_vm14, %v1074_v61, %v1070_v19  ;;  %v1165_v27 = vmul.f32 %v1164_v18, %v8508_v34  ;;  %v1175_v22 = vadd.f32 0.014752088, %v1174_v53 }
  0xe6   : > { %v1201_v28 = vmul.f32 2.1237322e-06, %v8543_v20  ;;  %v1076_v7 = vmul.f32 %v1075_v26, %v1051_v33  ;;  %v1103_v36 = vmul.f32 %v7375_v25, %v1101_v5  ;;  %vm8555_vm1 = vcmp.eq.f32.partialorder %v1111_v54, 8.507059e+37 }
  0xe7   : > { %6903 = vst [vmem:[%s8053_s16 + $0x70] sm:$0xff] %v6753_v21  ;;  %v8562_v63 = vadd.f32 1.0, %v1140_v45  ;;  %v1166_v50 = vadd.f32 0.05243302, %v1165_v27  ;;  %v1176_v35 = vmul.f32 %v1175_v22, %v8508_v34  ;;  %vm1108_vm2 = vweird.f32 %v7375_v25 }
  0xe8   : > { %v1202_v41 = vadd.f32 0.00028619796, %v1201_v28  ;;  %v7148_v0 = vclamps-f32 %v1076_v7, 1.0  ;;  %v1104_v16 = vsub.f32 1.0, %v1103_v36  ;;  %v1212_v46 = vmul.f32 3.8918573e-05, %v8543_v20  ;;  %vm8572_vm3 = vmor %vm1107_vm0, %vm1108_vm2 }
  0xe9   : > { %v1114_v33 = vor.u32 1.1754944e-38, %v1113_v17  ;;  %v1130_v38 = vadd.f32 1.1283791, %v1129_v49  ;;  %7376 = vrcp.f32 %v8562_v63  ;;  %v8568_v11 = vmul.f32 0.70710677, %v8560_v24 }
  0xea   : > { %v6454_v37 = vmul.f32 0.5, %v7148_v0  ;;  %v1105_v10 = vmul.f32 %v7375_v25, %v1104_v16  ;;  %v1167_v44 = vmul.f32 %v1166_v50, %v8508_v34  ;;  %v1177_v40 = vadd.f32 0.112945676, %v1176_v35 }
  0xeb   : > { %vm1147_vm4 = vweird.f32 %v8562_v63  ;;  %v1151_v58 = vand.u32 2147483647, %v8562_v63  ;;  %v1203_v43 = vmul.f32 %v1202_v41, %v8543_v20  ;;  %v1213_v30 = vadd.f32 0.001143296, %v1212_v46 }
  0xec   : > { %v6604_v12 = vadd.f32 0.5, %v6454_v37  ;;  %v1106_v13 = vadd.f32 %v7375_v25, %v1105_v10  ;;  %v1168_v2 = vadd.f32 0.18741608, %v1167_v44  ;;  %v1178_v60 = vmul.f32 %v1177_v40, %v8508_v34  ;;  %v8624_v37 = vld [vmem:[%s7840_s24 + $0xb0] sm:$0xff] }
  0xed   : > { %v1153_v61 = vand.u32 2147483648, %v8562_v63  ;;  %v1204_v5 = vadd.f32 0.0036580483, %v1203_v43  ;;  %v1214_v1 = vmul.f32 %v1213_v30, %v8543_v20  ;;  %v1239_v39 = vmul.f32 %v8568_v11, %v8568_v11 }
  0xee   : > { %v6754_v59 = vmul.f32 %v6604_v12, %v8358_v14  ;;  %v1110_v62 = vsel %vm8572_vm3, %v7375_v25, %v1106_v13  ;;  %v1169_v6 = vmul.f32 %v1168_v2, %v8508_v34  ;;  %v1179_v54 = vadd.f32 0.4994258, %v1178_v60 }
  0xef   : > { %v7377_v29 = vpop.eup %7376  ;;  %v1115_v3 = vsel %vm8555_vm1, %v1114_v33, %v1110_v62  ;;  %v1205_v8 = vmul.f32 %v1204_v5, %v8543_v20  ;;  %v1215_v15 = vadd.f32 0.014752088, %v1214_v1  ;;  %v8594_v31 = vmin.f32 %v1239_v39, 16.0 }
  0xf0   : > { %6904 = vst [vmem:[%s8053_s16 + $0x78] sm:$0xff] %v6754_v59  ;;  %v1116_v42 = vmul.f32 %v1115_v3, %v8539_v57  ;;  %v1143_v14 = vmul.f32 %v7377_v29, %v8562_v63  ;;  %vm1148_vm5 = vweird.f32 %v7377_v29  ;;  %v8600_v17 = vmul.f32 0.70710677, %v8585_v52 }
  0xf1   : > { %v1180_v18 = vmul.f32 %v1179_v54, %v8508_v34  ;;  %v1206_v53 = vadd.f32 0.05243302, %v1205_v8  ;;  %v1216_v21 = vmul.f32 %v1215_v15, %v8543_v20  ;;  %v1241_v19 = vmul.f32 2.1237322e-06, %v8594_v31  ;;  %vm8611_vm6 = vmor %vm1147_vm4, %vm1148_vm5 }
  0xf2   : > { %v7149_v49 = vclamps-f32 %v1116_v42, 1.0  ;;  %v1144_v45 = vsub.f32 1.0, %v1143_v14  ;;  %v1170_v25 = vadd.f32 1.1283791, %v1169_v6  ;;  %v1252_v26 = vmul.f32 3.8918573e-05, %v8594_v31 }
  0xf3   : > { %v1181_v27 = vadd.f32 1.0, %v1180_v18  ;;  %v1217_v57 = vadd.f32 0.112945676, %v1216_v21  ;;  %v1242_v22 = vadd.f32 0.00028619796, %v1241_v19  ;;  %v1207_v36 = vmul.f32 %v1206_v53, %v8543_v20 }
  0xf4   : > { %v6455_v28 = vmul.f32 0.5, %v7149_v49  ;;  %v1145_v7 = vmul.f32 %v7377_v29, %v1144_v45  ;;  %v1253_v51 = vadd.f32 0.001143296, %v1252_v26  ;;  %v1131_v34 = vmul.f32 %v1130_v38, %v8441_v9 }
  0xf5   : > { %v1154_v35 = vor.u32 1.1754944e-38, %v1153_v61  ;;  %7378 = vrcp.f32 %v1181_v27  ;;  %v1279_v41 = vmul.f32 %v8600_v17, %v8600_v17  ;;  %vm1152_vm7 = vcmp.eq.f32.partialorder %v1151_v58, 8.507059e+37 }
  0xf6   : > { %v6605_v0 = vadd.f32 0.5, %v6455_v28  ;;  %v1146_v16 = vadd.f32 %v7377_v29, %v1145_v7  ;;  %v1218_v46 = vmul.f32 %v1217_v57, %v8543_v20  ;;  %v8619_v9 = vmul.f32 %v1170_v25, %v8482_v56  ;;  %v8658_v7 = vld [vmem:[%s7840_s24 + $0xb8] sm:$0xff] }
  0xf7   : > { %v1191_v33 = vand.u32 2147483647, %v1181_v27  ;;  %v1243_v63 = vmul.f32 %v1242_v22, %v8594_v31  ;;  %v1254_v38 = vmul.f32 %v1253_v51, %v8594_v31  ;;  %v1208_v40 = vadd.f32 0.18741608, %v1207_v36 }
  0xf8   : > { %v6755_v10 = vmul.f32 %v6605_v0, %v8388_v55  ;;  %v1150_v44 = vsel %vm8611_vm6, %v7377_v29, %v1146_v16  ;;  %v1219_v47 = vadd.f32 0.4994258, %v1218_v46  ;;  %v8629_v12 = vmin.f32 %v1279_v41, 16.0 }
  0xf9   : > { %v1155_v58 = vsel %vm1152_vm7, %v1154_v35, %v1150_v44  ;;  %v1244_v43 = vadd.f32 0.0036580483, %v1243_v63  ;;  %v1255_v30 = vadd.f32 0.014752088, %v1254_v38  ;;  %v1193_v13 = vand.u32 2147483648, %v1181_v27 }
  0xfa   : > { %6905 = vst [vmem:[%s8053_s16 + $0x80] sm:$0xff] %v6755_v10  ;;  %v1156_v56 = vmul.f32 %v1155_v58, %v1131_v34  ;;  %v1220_v2 = vmul.f32 %v1219_v47, %v8543_v20  ;;  %v8634_v60 = vmul.f32 0.70710677, %v8624_v37  ;;  %v1281_v1 = vmul.f32 2.1237322e-06, %v8629_v12 }
  0xfb   : > { %v7379_v61 = vpop.eup %7378  ;;  %v1245_v55 = vmul.f32 %v1244_v43, %v8594_v31  ;;  %v1256_v5 = vmul.f32 %v1255_v30, %v8594_v31  ;;  %v1292_v39 = vmul.f32 3.8918573e-05, %v8629_v12  ;;  %vm1187_vm8 = vweird.f32 %v1181_v27 }
  0xfc   : > { %v7150_v59 = vclamps-f32 %v1156_v56, 1.0  ;;  %v1183_v62 = vmul.f32 %v7379_v61, %v1181_v27  ;;  %v1209_v6 = vmul.f32 %v1208_v40, %v8543_v20  ;;  %vm1188_vm9 = vweird.f32 %v7379_v61 }
  0xfd   : > { %v1221_v54 = vadd.f32 1.0, %v1220_v2  ;;  %v1246_v29 = vadd.f32 0.05243302, %v1245_v55  ;;  %v1257_v3 = vadd.f32 0.112945676, %v1256_v5  ;;  %vm8641_vm10 = vcmp.eq.f32.partialorder %v1191_v33, 8.507059e+37  ;;  %vm8651_vm11 = vmor %vm1187_vm8, %vm1188_vm9 }
  0xfe   : > { %v6456_v8 = vmul.f32 0.5, %v7150_v59  ;;  %v1184_v15 = vsub.f32 1.0, %v1183_v62  ;;  %v1282_v42 = vadd.f32 0.00028619796, %v1281_v1  ;;  %v1293_v14 = vadd.f32 0.001143296, %v1292_v39 }
  0xff   : > { %v1194_v53 = vor.u32 1.1754944e-38, %v1193_v13  ;;  %7380 = vrcp.f32 %v1221_v54  ;;  %v1319_v21 = vmul.f32 %v8634_v60, %v8634_v60  ;;  %v1247_v49 = vmul.f32 %v1246_v29, %v8594_v31 }
 0x100   : > { %v6606_v19 = vadd.f32 0.5, %v6456_v8  ;;  %v1185_v20 = vmul.f32 %v7379_v61, %v1184_v15  ;;  %v1258_v45 = vmul.f32 %v1257_v3, %v8594_v31  ;;  %v1210_v26 = vadd.f32 1.1283791, %v1209_v6 }
 0x101   : > { %v1231_v57 = vand.u32 2147483647, %v1221_v54  ;;  %v1283_v22 = vmul.f32 %v1282_v42, %v8629_v12  ;;  %v1294_v28 = vmul.f32 %v1293_v14, %v8629_v12  ;;  %v1248_v34 = vadd.f32 0.18741608, %v1247_v49 }
 0x102   : > { %v6756_v36 = vmul.f32 %v6606_v19, %v8434_v48  ;;  %v1186_v51 = vadd.f32 %v7379_v61, %v1185_v20  ;;  %v1259_v50 = vadd.f32 0.4994258, %v1258_v45  ;;  %v8661_v27 = vmin.f32 %v1319_v21, 16.0 }
 0x103   : > { %v1284_v35 = vadd.f32 0.0036580483, %v1283_v22  ;;  %v1295_v41 = vadd.f32 0.014752088, %v1294_v28  ;;  %v1233_v16 = vand.u32 2147483648, %v1221_v54  ;;  %v1211_v47 = vmul.f32 %v1210_v26, %v8515_v32 }
 0x104   : > { %6906 = vst [vmem:[%s8053_s16 + $0x88] sm:$0xff] %v6756_v36  ;;  %v1190_v0 = vsel %vm8651_vm11, %v7379_v61, %v1186_v51  ;;  %v1260_v46 = vmul.f32 %v1259_v50, %v8594_v31  ;;  %v8668_v33 = vmul.f32 0.70710677, %v8658_v7  ;;  %v1321_v44 = vmul.f32 2.1237322e-06, %v8661_v27 }
 0x105   : > { %v7381_v63 = vpop.eup %7380  ;;  %v1195_v48 = vsel %vm8641_vm10, %v1194_v53, %v1190_v0  ;;  %v1285_v38 = vmul.f32 %v1284_v35, %v8629_v12  ;;  %v1296_v10 = vmul.f32 %v1295_v41, %v8629_v12  ;;  %vm1227_vm12 = vweird.f32 %v1221_v54 }
 0x106   : > { %v1196_v40 = vmul.f32 %v1195_v48, %v8619_v9  ;;  %v1223_v58 = vmul.f32 %v7381_v63, %v1221_v54  ;;  %v1249_v43 = vmul.f32 %v1248_v34, %v8594_v31  ;;  %v1261_v30 = vadd.f32 1.0, %v1260_v46 }
 0x107   : > { %v1286_v56 = vadd.f32 0.05243302, %v1285_v38  ;;  %v1297_v13 = vadd.f32 0.112945676, %v1296_v10  ;;  %vm1228_vm13 = vweird.f32 %v7381_v63  ;;  %v1322_v55 = vadd.f32 0.00028619796, %v1321_v44 }
 0x108   : > { %v7151_v2 = vclamps-f32 %v1196_v40, 1.0  ;;  %v1224_v61 = vsub.f32 1.0, %v1223_v58  ;;  %vm8678_vm14 = vcmp.eq.f32.partialorder %v1231_v57, 8.507059e+37  ;;  %v1234_v1 = vor.u32 1.1754944e-38, %v1233_v16  ;;  %vm8687_vm15 = vmor %vm1227_vm12, %vm1228_vm13 }
 0x109   : > { %7382 = vrcp.f32 %v1261_v30  ;;  %v1359_v32 = vmul.f32 %v8668_v33, %v8668_v33  ;;  %v1287_v31 = vmul.f32 %v1286_v56, %v8629_v12  ;;  %v1298_v59 = vmul.f32 %v1297_v13, %v8629_v12 }
 0x10a   : > { %v6457_v9 = vmul.f32 0.5, %v7151_v2  ;;  %v1225_v39 = vmul.f32 %v7381_v63, %v1224_v61  ;;  %v1250_v6 = vadd.f32 1.1283791, %v1249_v43  ;;  %v1271_v29 = vand.u32 2147483647, %v1261_v30 }
 0x10b   : > { %v1323_v3 = vmul.f32 %v1322_v55, %v8661_v27  ;;  %v1332_v8 = vmul.f32 3.8918573e-05, %v8661_v27  ;;  %v1288_v14 = vadd.f32 0.18741608, %v1287_v31  ;;  %v1299_v18 = vadd.f32 0.4994258, %v1298_v59 }
 0x10c   : > { %v6607_v15 = vadd.f32 0.5, %v6457_v9  ;;  %v1226_v42 = vadd.f32 %v7381_v63, %v1225_v39  ;;  %v1273_v53 = vand.u32 2147483648, %v1261_v30  ;;  %v8693_v20 = vmin.f32 %v1359_v32, 16.0 }
 0x10d   : > { %v1324_v21 = vadd.f32 0.0036580483, %v1323_v3  ;;  %v1333_v19 = vadd.f32 0.001143296, %v1332_v8  ;;  %v1289_v45 = vmul.f32 %v1288_v14, %v8629_v12  ;;  %v1300_v25 = vmul.f32 %v1299_v18, %v8629_v12  ;;  %v8746_v14 = vld [vmem:[%s7840_s24 + $0xc8] sm:$0xff] }
 0x10e   : > { %v6757_v54 = vmul.f32 %v6607_v15, %v8469_v4  ;;  %v1230_v49 = vsel %vm8687_vm15, %v7381_v63, %v1226_v42  ;;  %v1361_v36 = vmul.f32 2.1237322e-06, %v8693_v20  ;;  %vm1267_vm0 = vweird.f32 %v1261_v30 }
 0x10f   : > { %v7383_v26 = vpop.eup %7382  ;;  %v1235_v57 = vsel %vm8678_vm14, %v1234_v1, %v1230_v49  ;;  %v1325_v22 = vmul.f32 %v1324_v21, %v8661_v27  ;;  %v1334_v28 = vmul.f32 %v1333_v19, %v8661_v27  ;;  %v1290_v34 = vadd.f32 1.1283791, %v1289_v45 }
 0x110   : > { %6907 = vst [vmem:[%s8053_s16 + $0x90] sm:$0xff] %v6757_v54  ;;  %v1236_v51 = vmul.f32 %v1235_v57, %v1211_v47  ;;  %v1263_v4 = vmul.f32 %v7383_v26, %v1261_v30  ;;  %v1301_v50 = vadd.f32 1.0, %v1300_v25  ;;  %vm1268_vm1 = vweird.f32 %v7383_v26  ;;  %v8714_v47 = vld [vmem:[%s7840_s24 + $0xc0] sm:$0xff] }
 0x111   : > { %v1326_v35 = vadd.f32 0.05243302, %v1325_v22  ;;  %v1335_v41 = vadd.f32 0.014752088, %v1334_v28  ;;  %v1362_v16 = vadd.f32 0.00028619796, %v1361_v36  ;;  %v1251_v46 = vmul.f32 %v1250_v6, %v8568_v11  ;;  %vm8717_vm3 = vmor %vm1267_vm0, %vm1268_vm1 }
 0x112   : > { %v7152_v12 = vclamps-f32 %v1236_v51, 1.0  ;;  %v1264_v0 = vsub.f32 1.0, %v1263_v4  ;;  %vm8707_vm2 = vcmp.eq.f32.partialorder %v1271_v29, 8.507059e+37  ;;  %v1274_v48 = vor.u32 1.1754944e-38, %v1273_v53 }
 0x113   : > { %7384 = vrcp.f32 %v1301_v50  ;;  %v1327_v44 = vmul.f32 %v1326_v35, %v8661_v27  ;;  %v1336_v40 = vmul.f32 %v1335_v41, %v8661_v27  ;;  %v8722_v11 = vmul.f32 %v1290_v34, %v8600_v17 }
 0x114   : > { %v6458_v38 = vmul.f32 0.5, %v7152_v12  ;;  %v1265_v10 = vmul.f32 %v7383_v26, %v1264_v0  ;;  %v1311_v43 = vand.u32 2147483647, %v1301_v50  ;;  %v1363_v56 = vmul.f32 %v1362_v16, %v8693_v20 }
 0x115   : > { %v1372_v13 = vmul.f32 3.8918573e-05, %v8693_v20  ;;  %v1328_v55 = vadd.f32 0.18741608, %v1327_v44  ;;  %v1337_v5 = vadd.f32 0.112945676, %v1336_v40  ;;  %vm1307_vm4 = vweird.f32 %v1301_v50 }
 0x116   : > { %v6608_v2 = vadd.f32 0.5, %v6458_v38  ;;  %v1266_v61 = vadd.f32 %v7383_v26, %v1265_v10  ;;  %v1364_v1 = vadd.f32 0.0036580483, %v1363_v56  ;;  %v8727_v32 = vmul.f32 0.70710677, %v8714_v47  ;;  %v8771_v44 = vld [vmem:[%s7840_s24 + $0xd0] sm:$0xff] }
 0x117   : > { %v1373_v30 = vadd.f32 0.001143296, %v1372_v13  ;;  %v1329_v39 = vmul.f32 %v1328_v55, %v8661_v27  ;;  %v1338_v31 = vmul.f32 %v1337_v5, %v8661_v27  ;;  %vm8741_vm5 = vcmp.eq.f32.partialorder %v1311_v43, 8.507059e+37 }
 0x118   : > { %v6758_v17 = vmul.f32 %v6608_v2, %v8503_v23  ;;  %v1270_v9 = vsel %vm8717_vm3, %v7383_v26, %v1266_v61  ;;  %v1365_v6 = vmul.f32 %v1364_v1, %v8693_v20  ;;  %v1399_v3 = vmul.f32 %v8727_v32, %v8727_v32 }
 0x119   : > { %v7385_v59 = vpop.eup %7384  ;;  %v1275_v62 = vsel %vm8707_vm2, %v1274_v48, %v1270_v9  ;;  %v1374_v29 = vmul.f32 %v1373_v30, %v8693_v20  ;;  %v1313_v42 = vand.u32 2147483648, %v1301_v50  ;;  %v1339_v18 = vadd.f32 0.4994258, %v1338_v31 }
 0x11a   : > { %6908 = vst [vmem:[%s8053_s16 + $0x98] sm:$0xff] %v6758_v17  ;;  %v1276_v23 = vmul.f32 %v1275_v62, %v1251_v46  ;;  %v1303_v8 = vmul.f32 %v7385_v59, %v1301_v50  ;;  %vm1308_vm6 = vweird.f32 %v7385_v59  ;;  %v1366_v53 = vadd.f32 0.05243302, %v1365_v6 }
 0x11b   : > { %v1375_v21 = vadd.f32 0.014752088, %v1374_v29  ;;  %v1330_v49 = vadd.f32 1.1283791, %v1329_v39  ;;  %v8748_v45 = vmin.f32 %v1399_v3, 16.0  ;;  %v1340_v25 = vmul.f32 %v1339_v18, %v8661_v27  ;;  %vm8760_vm7 = vmor %vm1307_vm4, %vm1308_vm6 }
 0x11c   : > { %v7153_v19 = vclamps-f32 %v1276_v23, 1.0  ;;  %v1304_v54 = vsub.f32 1.0, %v1303_v8  ;;  %v1367_v26 = vmul.f32 %v1366_v53, %v8693_v20  ;;  %v8754_v22 = vmul.f32 0.70710677, %v8746_v14 }
 0x11d   : > { %v1376_v57 = vmul.f32 %v1375_v21, %v8693_v20  ;;  %v1401_v51 = vmul.f32 2.1237322e-06, %v8748_v45  ;;  %v1412_v4 = vmul.f32 3.8918573e-05, %v8748_v45  ;;  %v1314_v27 = vor.u32 1.1754944e-38, %v1313_v42 }
 0x11e   : > { %v6459_v28 = vmul.f32 0.5, %v7153_v19  ;;  %v1305_v36 = vmul.f32 %v7385_v59, %v1304_v54  ;;  %v1341_v35 = vadd.f32 1.0, %v1340_v25  ;;  %v1368_v41 = vadd.f32 0.18741608, %v1367_v26 }
 0x11f   : > { %v1377_v12 = vadd.f32 0.112945676, %v1376_v57  ;;  %v1402_v46 = vadd.f32 0.00028619796, %v1401_v51  ;;  %v1413_v63 = vadd.f32 0.001143296, %v1412_v4  ;;  %v1439_v48 = vmul.f32 %v8754_v22, %v8754_v22 }
 0x120   : > { %v6609_v0 = vadd.f32 0.5, %v6459_v28  ;;  %v1306_v16 = vadd.f32 %v7385_v59, %v1305_v36  ;;  %7386 = vrcp.f32 %v1341_v35  ;;  %v8776_v58 = vmul.f32 %v1330_v49, %v8634_v60 }
 0x121   : > { %v1378_v10 = vmul.f32 %v1377_v12, %v8693_v20  ;;  %v1369_v43 = vmul.f32 %v1368_v41, %v8693_v20  ;;  %v1403_v56 = vmul.f32 %v1402_v46, %v8748_v45  ;;  %v1351_v13 = vand.u32 2147483647, %v1341_v35  ;;  %v8811_v41 = vld [vmem:[%s7840_s24 + $0xd8] sm:$0xff] }
 0x122   : > { %v6759_v38 = vmul.f32 %v6609_v0, %v8560_v24  ;;  %v1310_v50 = vsel %vm8760_vm7, %v7385_v59, %v1306_v16  ;;  %v1414_v61 = vmul.f32 %v1413_v63, %v8748_v45  ;;  %vm1347_vm8 = vweird.f32 %v1341_v35 }
 0x123   : > { %v1315_v40 = vsel %vm8741_vm5, %v1314_v27, %v1310_v50  ;;  %v1379_v2 = vadd.f32 0.4994258, %v1378_v10  ;;  %v1404_v55 = vadd.f32 0.0036580483, %v1403_v56  ;;  %v8783_v5 = vmin.f32 %v1439_v48, 16.0 }
 0x124   : > { %6909 = vst [vmem:[%s8053_s16 + $0xa0] sm:$0xff] %v6759_v38  ;;  %v1316_v24 = vmul.f32 %v1315_v40, %v8722_v11  ;;  %v8786_v1 = vmul.f32 0.70710677, %v8771_v44  ;;  %v1353_v30 = vand.u32 2147483648, %v1341_v35  ;;  %v1415_v9 = vadd.f32 0.014752088, %v1414_v61 }
 0x125   : > { %v1380_v17 = vmul.f32 %v1379_v2, %v8693_v20  ;;  %v1370_v31 = vadd.f32 1.1283791, %v1369_v43  ;;  %v1405_v11 = vmul.f32 %v1404_v55, %v8748_v45  ;;  %v1441_v59 = vmul.f32 2.1237322e-06, %v8783_v5 }
 0x126   : > { %v7154_v60 = vclamps-f32 %v1316_v24, 1.0  ;;  %v7387_v39 = vpop.eup %7386  ;;  %v1452_v62 = vmul.f32 3.8918573e-05, %v8783_v5  ;;  %v1479_v23 = vmul.f32 %v8786_v1, %v8786_v1  ;;  %v1416_v15 = vmul.f32 %v1415_v9, %v8748_v45  ;;  %v8835_v9 = vld [vmem:[%s7840_s24 + $0xe0] sm:$0xff] }
 0x127   : > { %v1343_v29 = vmul.f32 %v7387_v39, %v1341_v35  ;;  %v1381_v3 = vadd.f32 1.0, %v1380_v17  ;;  %v1406_v8 = vadd.f32 0.05243302, %v1405_v11  ;;  %v1442_v42 = vadd.f32 0.00028619796, %v1441_v59 }
 0x128   : > { %v6460_v6 = vmul.f32 0.5, %v7154_v60  ;;  %v1453_v20 = vadd.f32 0.001143296, %v1452_v62  ;;  %vm1348_vm9 = vweird.f32 %v7387_v39  ;;  %vm8795_vm10 = vcmp.eq.f32.partialorder %v1351_v13, 8.507059e+37 }
 0x129   : > { %v1344_v53 = vsub.f32 1.0, %v1343_v29  ;;  %7388 = vrcp.f32 %v1381_v3  ;;  %v1391_v19 = vand.u32 2147483647, %v1381_v3  ;;  %v1407_v54 = vmul.f32 %v1406_v8, %v8748_v45  ;;  %vm8804_vm11 = vmor %vm1347_vm8, %vm1348_vm9 }
 0x12a   : > { %v6610_v18 = vadd.f32 0.5, %v6460_v6  ;;  %v1417_v49 = vadd.f32 0.112945676, %v1416_v15  ;;  %v1443_v57 = vmul.f32 %v1442_v42, %v8783_v5  ;;  %v1454_v28 = vmul.f32 %v1453_v20, %v8783_v5 }
 0x12b   : > { %v1345_v26 = vmul.f32 %v7387_v39, %v1344_v53  ;;  %v1354_v51 = vor.u32 1.1754944e-38, %v1353_v30  ;;  %v1371_v4 = vmul.f32 %v1370_v31, %v8668_v33  ;;  %v1408_v34 = vadd.f32 0.18741608, %v1407_v54 }
 0x12c   : > { %v6760_v25 = vmul.f32 %v6610_v18, %v8585_v52  ;;  %v1418_v27 = vmul.f32 %v1417_v49, %v8748_v45  ;;  %v1444_v12 = vadd.f32 0.0036580483, %v1443_v57  ;;  %v1455_v0 = vadd.f32 0.014752088, %v1454_v28 }
 0x12d   : > { %v1346_v52 = vadd.f32 %v7387_v39, %v1345_v26  ;;  %v8814_v16 = vmin.f32 %v1479_v23, 16.0  ;;  %vm1387_vm12 = vweird.f32 %v1381_v3  ;;  %vm8816_vm13 = vcmp.eq.f32.partialorder %v1391_v19, 8.507059e+37 }
 0x12e   : > { %6910 = vst [vmem:[%s8053_s16 + $0xa8] sm:$0xff] %v6760_v25  ;;  %v1393_v46 = vand.u32 2147483648, %v1381_v3  ;;  %v1419_v63 = vadd.f32 0.4994258, %v1418_v27  ;;  %v1445_v38 = vmul.f32 %v1444_v12, %v8783_v5  ;;  %v1456_v50 = vmul.f32 %v1455_v0, %v8783_v5  ;;  %v8863_v0 = vld [vmem:[%s7840_s24 + $0xe8] sm:$0xff] }
 0x12f   : > { %v7389_v48 = vpop.eup %7388  ;;  %v1350_v33 = vsel %vm8804_vm11, %v7387_v39, %v1346_v52  ;;  %v1481_v10 = vmul.f32 2.1237322e-06, %v8814_v16  ;;  %v1409_v56 = vmul.f32 %v1408_v34, %v8748_v45  ;;  %v8829_v24 = vmul.f32 0.70710677, %v8811_v41 }
 0x130   : > { %v1355_v40 = vsel %vm8795_vm10, %v1354_v51, %v1350_v33  ;;  %v1383_v43 = vmul.f32 %v7389_v48, %v1381_v3  ;;  %v1420_v2 = vmul.f32 %v1419_v63, %v8748_v45  ;;  %v1446_v61 = vadd.f32 0.05243302, %v1445_v38 }
 0x131   : > { %v1356_v13 = vmul.f32 %v1355_v40, %v8776_v58  ;;  %v1457_v55 = vadd.f32 0.112945676, %v1456_v50  ;;  %vm1388_vm14 = vweird.f32 %v7389_v48  ;;  %v1482_v30 = vadd.f32 0.00028619796, %v1481_v10 }
 0x132   : > { %v1384_v60 = vsub.f32 1.0, %v1383_v43  ;;  %v1492_v17 = vmul.f32 3.8918573e-05, %v8814_v16  ;;  %v1421_v31 = vadd.f32 1.0, %v1420_v2  ;;  %v1447_v11 = vmul.f32 %v1446_v61, %v8783_v5  ;;  %vm8841_vm15 = vmor %vm1387_vm12, %vm1388_vm14 }
 0x133   : > { %v7155_v39 = vclamps-f32 %v1356_v13, 1.0  ;;  %v1458_v59 = vmul.f32 %v1457_v55, %v8783_v5  ;;  %v1394_v6 = vor.u32 1.1754944e-38, %v1393_v46  ;;  %v1483_v58 = vmul.f32 %v1482_v30, %v8814_v16 }
 0x134   : > { %v1385_v62 = vmul.f32 %v7389_v48, %v1384_v60  ;;  %v1493_v45 = vadd.f32 0.001143296, %v1492_v17  ;;  %v1410_v8 = vadd.f32 1.1283791, %v1409_v56  ;;  %7390 = vrcp.f32 %v1421_v31 }
 0x135   : > { %v6461_v29 = vmul.f32 0.5, %v7155_v39  ;;  %v8846_v15 = vmul.f32 0.70710677, %v8835_v9  ;;  %v1448_v20 = vadd.f32 0.18741608, %v1447_v11  ;;  %v1519_v53 = vmul.f32 %v8829_v24, %v8829_v24 }
 0x136   : > { %v1386_v42 = vadd.f32 %v7389_v48, %v1385_v62  ;;  %v1459_v18 = vadd.f32 0.4994258, %v1458_v59  ;;  %v1431_v19 = vand.u32 2147483647, %v1421_v31  ;;  %v1484_v54 = vadd.f32 0.0036580483, %v1483_v58 }
 0x137   : > { %v6611_v21 = vadd.f32 0.5, %v6461_v29  ;;  %v1494_v3 = vmul.f32 %v1493_v45, %v8814_v16  ;;  %v1433_v25 = vand.u32 2147483648, %v1421_v31  ;;  %v1449_v26 = vmul.f32 %v1448_v20, %v8783_v5 }
 0x138   : > { %v1390_v49 = vsel %vm8841_vm15, %v7389_v48, %v1386_v42  ;;  %v1460_v57 = vmul.f32 %v1459_v18, %v8783_v5  ;;  %v1485_v51 = vmul.f32 %v1484_v54, %v8814_v16  ;;  %v1411_v52 = vmul.f32 %v1410_v8, %v8727_v32 }
 0x139   : > { %v6761_v28 = vmul.f32 %v6611_v21, %v8624_v37  ;;  %v1395_v36 = vsel %vm8816_vm13, %v1394_v6, %v1390_v49  ;;  %v1495_v34 = vadd.f32 0.014752088, %v1494_v3  ;;  %vm1427_vm0 = vweird.f32 %v1421_v31 }
 0x13a   : > { %v1396_v27 = vmul.f32 %v1395_v36, %v1371_v4  ;;  %v8860_v12 = vadd.f32 1.0, %v1460_v57  ;;  %v7391_v46 = vpop.eup %7390  ;;  %v1450_v63 = vadd.f32 1.1283791, %v1449_v26  ;;  %v1486_v5 = vadd.f32 0.05243302, %v1485_v51 }
 0x13b   : > { %6911 = vst [vmem:[%s8053_s16 + $0xb0] sm:$0xff] %v6761_v28  ;;  %v1496_v37 = vmul.f32 %v1495_v34, %v8814_v16  ;;  %v8867_v48 = vmin.f32 %v1519_v53, 16.0  ;;  %v1423_v33 = vmul.f32 %v7391_v46, %v1421_v31  ;;  %vm8869_vm1 = vcmp.eq.f32.partialorder %v1431_v19, 8.507059e+37 }
 0x13c   : > { %v7156_v35 = vclamps-f32 %v1396_v27, 1.0  ;;  %v1434_v32 = vor.u32 1.1754944e-38, %v1433_v25  ;;  %vm1428_vm2 = vweird.f32 %v7391_v46  ;;  %7392 = vrcp.f32 %v8860_v12 }
 0x13d   : > { %v1559_v4 = vmul.f32 %v8846_v15, %v8846_v15  ;;  %v8877_v50 = vmul.f32 0.70710677, %v8863_v0  ;;  %v1424_v40 = vsub.f32 1.0, %v1423_v33  ;;  %v1487_v43 = vmul.f32 %v1486_v5, %v8814_v16  ;;  %vm8889_vm3 = vmor %vm1427_vm0, %vm1428_vm2 }
 0x13e   : > { %v6462_v10 = vmul.f32 0.5, %v7156_v35  ;;  %v1497_v56 = vadd.f32 0.112945676, %v1496_v37  ;;  %v8881_v13 = vmul.f32 %v1450_v63, %v8754_v22  ;;  %v1471_v2 = vand.u32 2147483647, %v8860_v12 }
 0x13f   : > { %v1521_v61 = vmul.f32 2.1237322e-06, %v8867_v48  ;;  %v1532_v55 = vmul.f32 3.8918573e-05, %v8867_v48  ;;  %v1425_v30 = vmul.f32 %v7391_v46, %v1424_v40  ;;  %v1488_v17 = vadd.f32 0.18741608, %v1487_v43 }
 0x140   : > { %v6612_v60 = vadd.f32 0.5, %v6462_v10  ;;  %v1498_v39 = vmul.f32 %v1497_v56, %v8814_v16  ;;  %vm1467_vm4 = vweird.f32 %v8860_v12  ;;  %v8894_v62 = vmin.f32 %v1559_v4, 16.0 }
 0x141   : > { %v1522_v22 = vadd.f32 0.00028619796, %v1521_v61  ;;  %v1533_v59 = vadd.f32 0.001143296, %v1532_v55  ;;  %v1426_v58 = vadd.f32 %v7391_v46, %v1425_v30  ;;  %v1473_v45 = vand.u32 2147483648, %v8860_v12 }
 0x142   : > { %v6762_v6 = vmul.f32 %v6612_v60, %v8658_v7  ;;  %v1499_v29 = vadd.f32 0.4994258, %v1498_v39  ;;  %v7393_v23 = vpop.eup %7392  ;;  %v1561_v42 = vmul.f32 2.1237322e-06, %v8894_v62  ;;  %v1572_v20 = vmul.f32 3.8918573e-05, %v8894_v62 }
 0x143   : > { %v1523_v8 = vmul.f32 %v1522_v22, %v8867_v48  ;;  %v1534_v31 = vmul.f32 %v1533_v59, %v8867_v48  ;;  %v1430_v18 = vsel %vm8889_vm3, %v7391_v46, %v1426_v58  ;;  %v1463_v53 = vmul.f32 %v7393_v23, %v8860_v12 }
 0x144   : > { %6912 = vst [vmem:[%s8053_s16 + $0xb8] sm:$0xff] %v6762_v6  ;;  %v1489_v7 = vmul.f32 %v1488_v17, %v8814_v16  ;;  %v1599_v21 = vmul.f32 %v8877_v50, %v8877_v50  ;;  %v1435_v19 = vsel %vm8869_vm1, %v1434_v32, %v1430_v18  ;;  %v1500_v54 = vmul.f32 %v1499_v29, %v8814_v16 }
 0x145   : > { %v1524_v3 = vadd.f32 0.0036580483, %v1523_v8  ;;  %v1535_v49 = vadd.f32 0.014752088, %v1534_v31  ;;  %v1436_v25 = vmul.f32 %v1435_v19, %v1411_v52  ;;  %v1464_v26 = vsub.f32 1.0, %v1463_v53 }
 0x146   : > { %vm1468_vm5 = vweird.f32 %v7393_v23  ;;  %v1562_v57 = vadd.f32 0.00028619796, %v1561_v42  ;;  %v1501_v28 = vadd.f32 1.0, %v1500_v54  ;;  %v1573_v34 = vadd.f32 0.001143296, %v1572_v20 }
 0x147   : > { %v1525_v36 = vmul.f32 %v1524_v3, %v8867_v48  ;;  %v1536_v51 = vmul.f32 %v1535_v49, %v8867_v48  ;;  %v7157_v27 = vclamps-f32 %v1436_v25, 1.0  ;;  %v1465_v46 = vmul.f32 %v7393_v23, %v1464_v26  ;;  %vm8921_vm7 = vmor %vm1467_vm4, %vm1468_vm5 }
 0x148   : > { %vm8914_vm6 = vcmp.eq.f32.partialorder %v1471_v2, 8.507059e+37  ;;  %v1563_v16 = vmul.f32 %v1562_v57, %v8894_v62  ;;  %v1474_v5 = vor.u32 1.1754944e-38, %v1473_v45  ;;  %v1490_v37 = vadd.f32 1.1283791, %v1489_v7 }
 0x149   : > { %7394 = vrcp.f32 %v1501_v28  ;;  %v8925_v35 = vmin.f32 %v1599_v21, 16.0  ;;  %v6463_v33 = vmul.f32 0.5, %v7157_v27  ;;  %v1466_v38 = vadd.f32 %v7393_v23, %v1465_v46 }
 0x14a   : > { %vm1507_vm8 = vweird.f32 %v1501_v28  ;;  %v1526_v32 = vadd.f32 0.05243302, %v1525_v36  ;;  %v1537_v4 = vadd.f32 0.112945676, %v1536_v51  ;;  %v1511_v10 = vand.u32 2147483647, %v1501_v28 }
 0x14b   : > { %v1513_v40 = vand.u32 2147483648, %v1501_v28  ;;  %v1564_v43 = vadd.f32 0.0036580483, %v1563_v16  ;;  %v1574_v56 = vmul.f32 %v1573_v34, %v8894_v62  ;;  %v6613_v12 = vadd.f32 0.5, %v6463_v33 }
 0x14c   : > { %v1470_v2 = vsel %vm8921_vm7, %v7393_v23, %v1466_v38  ;;  %v1527_v61 = vmul.f32 %v1526_v32, %v8867_v48  ;;  %v1538_v55 = vmul.f32 %v1537_v4, %v8867_v48  ;;  %v1601_v39 = vmul.f32 2.1237322e-06, %v8925_v35 }
 0x14d   : > { %v1475_v60 = vsel %vm8914_vm6, %v1474_v5, %v1470_v2  ;;  %v1565_v30 = vmul.f32 %v1564_v43, %v8894_v62  ;;  %v1575_v17 = vadd.f32 0.014752088, %v1574_v56  ;;  %v6763_v11 = vmul.f32 %v6613_v12, %v8714_v47 }
 0x14e   : > { %v1476_v22 = vmul.f32 %v1475_v60, %v8881_v13  ;;  %v1528_v59 = vadd.f32 0.18741608, %v1527_v61  ;;  %v1539_v6 = vadd.f32 0.4994258, %v1538_v55  ;;  %v1602_v23 = vadd.f32 0.00028619796, %v1601_v39 }
 0x14f   : > { %v7395_v58 = vpop.eup %7394  ;;  %v1566_v45 = vadd.f32 0.05243302, %v1565_v30  ;;  %v1576_v29 = vmul.f32 %v1575_v17, %v8894_v62  ;;  %v1612_v8 = vmul.f32 3.8918573e-05, %v8925_v35  ;;  %6913 = vst [vmem:[%s8053_s16 + $0xc0] sm:$0xff] %v6763_v11  ;;  %v1491_v36 = vmul.f32 %v1490_v37, %v8786_v1  ;;  %v8962_v1 = vld [vmem:[%s7840_s24 + $0xf0] sm:$0xff] }
 0x150   : > { %v7158_v31 = vclamps-f32 %v1476_v22, 1.0  ;;  %v1503_v42 = vmul.f32 %v7395_v58, %v1501_v28  ;;  %vm1508_vm9 = vweird.f32 %v7395_v58  ;;  %v1529_v20 = vmul.f32 %v1528_v59, %v8867_v48  ;;  %v8967_v37 = vld [vmem:[%s7840_s24 + $0xf8] sm:$0xff] }
 0x151   : > { %v1540_v18 = vmul.f32 %v1539_v6, %v8867_v48  ;;  %v1567_v47 = vmul.f32 %v1566_v45, %v8894_v62  ;;  %v1577_v13 = vadd.f32 0.112945676, %v1576_v29  ;;  %v1603_v53 = vmul.f32 %v1602_v23, %v8925_v35  ;;  %vm8950_vm10 = vmor %vm1507_vm8, %vm1508_vm9 }
 0x152   : > { %v6464_v7 = vmul.f32 0.5, %v7158_v31  ;;  %v1504_v21 = vsub.f32 1.0, %v1503_v42  ;;  %v1530_v19 = vadd.f32 1.1283791, %v1529_v20  ;;  %v1613_v54 = vadd.f32 0.001143296, %v1612_v8 }
 0x153   : > { %v1541_v3 = vadd.f32 1.0, %v1540_v18  ;;  %v1568_v49 = vadd.f32 0.18741608, %v1567_v47  ;;  %v1578_v25 = vmul.f32 %v1577_v13, %v8894_v62  ;;  %v1604_v26 = vadd.f32 0.0036580483, %v1603_v53 }
 0x154   : > { %v6614_v57 = vadd.f32 0.5, %v6464_v7  ;;  %v1505_v48 = vmul.f32 %v7395_v58, %v1504_v21  ;;  %v1614_v51 = vmul.f32 %v1613_v54, %v8925_v35  ;;  %vm8954_vm11 = vcmp.eq.f32.partialorder %v1511_v10, 8.507059e+37 }
 0x155   : > { %v1514_v46 = vor.u32 1.1754944e-38, %v1513_v40  ;;  %v8959_v63 = vmul.f32 %v1530_v19, %v8829_v24  ;;  %7396 = vrcp.f32 %v1541_v3  ;;  %v1569_v28 = vmul.f32 %v1568_v49, %v8894_v62 }
 0x156   : > { %v6764_v16 = vmul.f32 %v6614_v57, %v8746_v14  ;;  %v1506_v52 = vadd.f32 %v7395_v58, %v1505_v48  ;;  %v1579_v5 = vadd.f32 0.4994258, %v1578_v25  ;;  %v1551_v33 = vand.u32 2147483647, %v1541_v3 }
 0x157   : > { %v1553_v38 = vand.u32 2147483648, %v1541_v3  ;;  %v1605_v32 = vmul.f32 %v1604_v26, %v8925_v35  ;;  %v1615_v4 = vadd.f32 0.014752088, %v1614_v51  ;;  %v1570_v10 = vadd.f32 1.1283791, %v1569_v28 }
 0x158   : > { %6914 = vst [vmem:[%s8053_s16 + $0xc8] sm:$0xff] %v6764_v16  ;;  %v1510_v24 = vsel %vm8950_vm10, %v7395_v58, %v1506_v52  ;;  %v1580_v40 = vmul.f32 %v1579_v5, %v8894_v62  ;;  %v8975_v14 = vmul.f32 0.70710677, %v8962_v1  ;;  %v8981_v2 = vmul.f32 0.70710677, %v8967_v37  ;;  %v8993_v58 = vld [vmem:[%s7840_s24 + $0x100] sm:$0xff] }
 0x159   : > { %v1515_v43 = vsel %vm8954_vm11, %v1514_v46, %v1510_v24  ;;  %v1606_v56 = vadd.f32 0.05243302, %v1605_v32  ;;  %v1616_v12 = vmul.f32 %v1615_v4, %v8925_v35  ;;  %vm1547_vm12 = vweird.f32 %v1541_v3 }
 0x15a   : > { %v1516_v61 = vmul.f32 %v1515_v43, %v1491_v36  ;;  %v1581_v55 = vadd.f32 1.0, %v1580_v40  ;;  %v1639_v60 = vmul.f32 %v8975_v14, %v8975_v14  ;;  %vm8985_vm13 = vcmp.eq.f32.partialorder %v1551_v33, 8.507059e+37 }
 0x15b   : > { %v7397_v62 = vpop.eup %7396  ;;  %v1607_v17 = vmul.f32 %v1606_v56, %v8925_v35  ;;  %v1617_v39 = vadd.f32 0.112945676, %v1616_v12  ;;  %v1679_v11 = vmul.f32 %v8981_v2, %v8981_v2  ;;  %v1554_v6 = vor.u32 1.1754944e-38, %v1553_v38 }
 0x15c   : > { %v7159_v22 = vclamps-f32 %v1516_v61, 1.0  ;;  %v1543_v59 = vmul.f32 %v7397_v62, %v1541_v3  ;;  %7398 = vrcp.f32 %v1581_v55  ;;  %vm1548_vm14 = vweird.f32 %v7397_v62 }
 0x15d   : > { %v8996_v45 = vmul.f32 %v1570_v10, %v8846_v15  ;;  %v1591_v29 = vand.u32 2147483647, %v1581_v55  ;;  %v1608_v23 = vadd.f32 0.18741608, %v1607_v17  ;;  %v1618_v42 = vmul.f32 %v1617_v39, %v8925_v35  ;;  %vm9009_vm0 = vmor %vm1547_vm12, %vm1548_vm14 }
 0x15e   : > { %v6465_v8 = vmul.f32 0.5, %v7159_v22  ;;  %v1544_v31 = vsub.f32 1.0, %v1543_v59  ;;  %v8999_v20 = vmin.f32 %v1639_v60, 16.0  ;;  %vm1587_vm15 = vweird.f32 %v1581_v55 }
 0x15f   : > { %v1593_v18 = vand.u32 2147483648, %v1581_v55  ;;  %v9001_v47 = vmin.f32 %v1679_v11, 16.0  ;;  %v9004_v13 = vmul.f32 0.70710677, %v8993_v58  ;;  %v1619_v21 = vadd.f32 0.4994258, %v1618_v42 }
 0x160   : > { %v6615_v53 = vadd.f32 0.5, %v6465_v8  ;;  %v1545_v7 = vmul.f32 %v7397_v62, %v1544_v31  ;;  %v1641_v15 = vmul.f32 2.1237322e-06, %v8999_v20  ;;  %vm9013_vm1 = vcmp.eq.f32.partialorder %v1591_v29, 8.507059e+37 }
 0x161   : > { %v1609_v49 = vmul.f32 %v1608_v23, %v8925_v35  ;;  %v1652_v25 = vmul.f32 3.8918573e-05, %v8999_v20  ;;  %v1681_v26 = vmul.f32 2.1237322e-06, %v9001_v47  ;;  %v1620_v3 = vmul.f32 %v1619_v21, %v8925_v35 }
 0x162   : > { %v7399_v57 = vpop.eup %7398  ;;  %v6765_v36 = vmul.f32 %v6615_v53, %v8771_v44  ;;  %v1546_v48 = vadd.f32 %v7397_v62, %v1545_v7  ;;  %v1642_v51 = vadd.f32 0.00028619796, %v1641_v15  ;;  %v1594_v27 = vor.u32 1.1754944e-38, %v1593_v18 }
 0x163   : > { %v1583_v34 = vmul.f32 %v7399_v57, %v1581_v55  ;;  %vm1588_vm2 = vweird.f32 %v7399_v57  ;;  %v1653_v46 = vadd.f32 0.001143296, %v1652_v25  ;;  %v1621_v52 = vadd.f32 1.0, %v1620_v3 }
 0x164   : > { %6915 = vst [vmem:[%s8053_s16 + $0xd0] sm:$0xff] %v6765_v36  ;;  %v1550_v16 = vsel %vm9009_vm0, %v7397_v62, %v1546_v48  ;;  %v1643_v28 = vmul.f32 %v1642_v51, %v8999_v20  ;;  %v1682_v5 = vadd.f32 0.00028619796, %v1681_v26  ;;  %v1692_v38 = vmul.f32 3.8918573e-05, %v9001_v47  ;;  %vm9035_vm4 = vmor %vm1587_vm15, %vm1588_vm2  ;;  %v9041_v62 = vld [vmem:[%s7840_s24 + $0x108] sm:$0xff] }
 0x165   : > { %v1555_v33 = vsel %vm8985_vm13, %v1554_v6, %v1550_v16  ;;  %v1584_v44 = vsub.f32 1.0, %v1583_v34  ;;  %v1654_v35 = vmul.f32 %v1653_v46, %v8999_v20  ;;  %v1610_v4 = vadd.f32 1.1283791, %v1609_v49 }
 0x166   : > { %v1556_v32 = vmul.f32 %v1555_v33, %v8959_v63  ;;  %7400 = vrcp.f32 %v1621_v52  ;;  %v1719_v24 = vmul.f32 %v9004_v13, %v9004_v13  ;;  %vm1627_vm3 = vweird.f32 %v1621_v52 }
 0x167   : > { %v1585_v10 = vmul.f32 %v7399_v57, %v1584_v44  ;;  %v1644_v40 = vadd.f32 0.0036580483, %v1643_v28  ;;  %v1655_v43 = vadd.f32 0.014752088, %v1654_v35  ;;  %v1631_v61 = vand.u32 2147483647, %v1621_v52 }
 0x168   : > { %v7160_v56 = vclamps-f32 %v1556_v32, 1.0  ;;  %v1683_v60 = vmul.f32 %v1682_v5, %v9001_v47  ;;  %v1693_v63 = vadd.f32 0.001143296, %v1692_v38  ;;  %v1633_v17 = vand.u32 2147483648, %v1621_v52 }
 0x169   : > { %v1586_v30 = vadd.f32 %v7399_v57, %v1585_v10  ;;  %v1645_v39 = vmul.f32 %v1644_v40, %v8999_v20  ;;  %v1656_v11 = vmul.f32 %v1655_v43, %v8999_v20  ;;  %v9046_v6 = vmin.f32 %v1719_v24, 16.0 }
 0x16a   : > { %v6466_v22 = vmul.f32 0.5, %v7160_v56  ;;  %v1684_v59 = vadd.f32 0.0036580483, %v1683_v60  ;;  %v1694_v55 = vmul.f32 %v1693_v63, %v9001_v47  ;;  %v9051_v31 = vmul.f32 0.70710677, %v9041_v62 }
 0x16b   : > { %v1590_v29 = vsel %vm9035_vm4, %v7399_v57, %v1586_v30  ;;  %v1646_v23 = vadd.f32 0.05243302, %v1645_v39  ;;  %v1657_v8 = vadd.f32 0.112945676, %v1656_v11  ;;  %v1721_v51 = vmul.f32 2.1237322e-06, %v9046_v6 }
 0x16c   : > { %v7401_v42 = vpop.eup %7400  ;;  %v6616_v18 = vadd.f32 0.5, %v6466_v22  ;;  %v1595_v53 = vsel %vm9013_vm1, %v1594_v27, %v1590_v29  ;;  %v1685_v7 = vmul.f32 %v1684_v59, %v9001_v47  ;;  %v1695_v21 = vadd.f32 0.014752088, %v1694_v55 }
 0x16d   : > { %v1596_v15 = vmul.f32 %v1595_v53, %v8996_v45  ;;  %v1623_v19 = vmul.f32 %v7401_v42, %v1621_v52  ;;  %vm1628_vm5 = vweird.f32 %v7401_v42  ;;  %v1647_v49 = vmul.f32 %v1646_v23, %v8999_v20 }
 0x16e   : > { %v6766_v25 = vmul.f32 %v6616_v18, %v8811_v41  ;;  %v1658_v26 = vmul.f32 %v1657_v8, %v8999_v20  ;;  %v1686_v57 = vadd.f32 0.05243302, %v1685_v7  ;;  %v1696_v36 = vmul.f32 %v1695_v21, %v9001_v47  ;;  %vm9071_vm7 = vmor %vm1627_vm3, %vm1628_vm5 }
 0x16f   : > { %v7161_v48 = vclamps-f32 %v1596_v15, 1.0  ;;  %v1624_v54 = vsub.f32 1.0, %v1623_v19  ;;  %v1648_v3 = vadd.f32 0.18741608, %v1647_v49  ;;  %v1611_v34 = vmul.f32 %v1610_v4, %v8877_v50 }
 0x170   : > { %6916 = vst [vmem:[%s8053_s16 + $0xd8] sm:$0xff] %v6766_v25  ;;  %vm9064_vm6 = vcmp.eq.f32.partialorder %v1631_v61, 8.507059e+37  ;;  %v1659_v27 = vadd.f32 0.4994258, %v1658_v26  ;;  %v1697_v46 = vadd.f32 0.112945676, %v1696_v36  ;;  %v1687_v28 = vmul.f32 %v1686_v57, %v9001_v47 }
 0x171   : > { %v6467_v41 = vmul.f32 0.5, %v7161_v48  ;;  %v1625_v16 = vmul.f32 %v7401_v42, %v1624_v54  ;;  %v1722_v5 = vadd.f32 0.00028619796, %v1721_v51  ;;  %v1634_v44 = vor.u32 1.1754944e-38, %v1633_v17 }
 0x172   : > { %v1660_v50 = vmul.f32 %v1659_v27, %v8999_v20  ;;  %v1698_v35 = vmul.f32 %v1697_v46, %v9001_v47  ;;  %v1732_v38 = vmul.f32 3.8918573e-05, %v9046_v6  ;;  %v1649_v24 = vmul.f32 %v1648_v3, %v8999_v20 }
 0x173   : > { %v6617_v32 = vadd.f32 0.5, %v6467_v41  ;;  %v1626_v4 = vadd.f32 %v7401_v42, %v1625_v16  ;;  %v1723_v10 = vmul.f32 %v1722_v5, %v9046_v6  ;;  %v1759_v56 = vmul.f32 %v9051_v31, %v9051_v31 }
 0x174   : > { %v1661_v40 = vadd.f32 1.0, %v1660_v50  ;;  %v1699_v52 = vadd.f32 0.4994258, %v1698_v35  ;;  %v1733_v43 = vadd.f32 0.001143296, %v1732_v38 }
 0x175   : > { %v6767_v12 = vmul.f32 %v6617_v32, %v8835_v9  ;;  %v1630_v61 = vsel %vm9071_vm7, %v7401_v42, %v1626_v4  ;;  %v1688_v60 = vadd.f32 0.18741608, %v1687_v28  ;;  %v1724_v63 = vadd.f32 0.0036580483, %v1723_v10 }
 0x176   : > { %v1635_v30 = vsel %vm9064_vm6, %v1634_v44, %v1630_v61  ;;  %7402 = vrcp.f32 %v1661_v40  ;;  %v1650_v17 = vadd.f32 1.1283791, %v1649_v24  ;;  %v1700_v39 = vmul.f32 %v1699_v52, %v9001_v47  ;;  %v9129_v24 = vld [vmem:[%s7840_s24 + $0x118] sm:$0xff] }
 0x177   : > { %6917 = vst [vmem:[%s8053_s16 + $0xe0] sm:$0xff] %v6767_v12  ;;  %v1636_v20 = vmul.f32 %v1635_v30, %v1611_v34  ;;  %v1725_v11 = vmul.f32 %v1724_v63, %v9046_v6  ;;  %v1734_v22 = vmul.f32 %v1733_v43, %v9046_v6  ;;  %v9091_v59 = vmin.f32 %v1759_v56, 16.0 }
 0x178   : > { %v1671_v55 = vand.u32 2147483647, %v1661_v40  ;;  %v1689_v29 = vmul.f32 %v1688_v60, %v9001_v47  ;;  %v9094_v23 = vadd.f32 1.0, %v1700_v39  ;;  %v1651_v7 = vmul.f32 %v1650_v17, %v8975_v14  ;;  %v9102_v47 = vld [vmem:[%s7840_s24 + $0x110] sm:$0xff] }
 0x179   : > { %v7162_v9 = vclamps-f32 %v1636_v20, 1.0  ;;  %v1726_v8 = vadd.f32 0.05243302, %v1725_v11  ;;  %v1735_v42 = vadd.f32 0.014752088, %v1734_v22  ;;  %vm1667_vm8 = vweird.f32 %v1661_v40 }
 0x17a   : > { %v1761_v18 = vmul.f32 2.1237322e-06, %v9091_v59  ;;  %7404 = vrcp.f32 %v9094_v23  ;;  %v1673_v15 = vand.u32 2147483648, %v1661_v40  ;;  %vm9104_vm9 = vcmp.eq.f32.partialorder %v1671_v55, 8.507059e+37 }
 0x17b   : > { %v6468_v53 = vmul.f32 0.5, %v7162_v9  ;;  %v1727_v19 = vmul.f32 %v1726_v8, %v9046_v6  ;;  %v1736_v49 = vmul.f32 %v1735_v42, %v9046_v6  ;;  %v1690_v14 = vadd.f32 1.1283791, %v1689_v29  ;;  %v9149_v9 = vld [vmem:[%s7840_s24 + $0x120] sm:$0xff] }
 0x17c   : > { %v7403_v21 = vpop.eup %7402  ;;  %v1762_v25 = vadd.f32 0.00028619796, %v1761_v18  ;;  %v1713_v48 = vand.u32 2147483648, %v9094_v23  ;;  %v1772_v45 = vmul.f32 3.8918573e-05, %v9091_v59  ;;  %v1674_v46 = vor.u32 1.1754944e-38, %v1673_v15 }
 0x17d   : > { %v6618_v26 = vadd.f32 0.5, %v6468_v53  ;;  %v1663_v57 = vmul.f32 %v7403_v21, %v1661_v40  ;;  %vm1668_vm10 = vweird.f32 %v7403_v21  ;;  %v1737_v54 = vadd.f32 0.112945676, %v1736_v49 }
 0x17e   : > { %v1763_v3 = vmul.f32 %v1762_v25, %v9091_v59  ;;  %v9113_v27 = vmul.f32 0.70710677, %v9102_v47  ;;  %v1728_v41 = vadd.f32 0.18741608, %v1727_v19  ;;  %vm1707_vm11 = vweird.f32 %v9094_v23  ;;  %vm9122_vm12 = vmor %vm1667_vm8, %vm1668_vm10 }
 0x17f   : > { %v6768_v51 = vmul.f32 %v6618_v26, %v8863_v0  ;;  %v1664_v34 = vsub.f32 1.0, %v1663_v57  ;;  %v1738_v16 = vmul.f32 %v1737_v54, %v9046_v6  ;;  %v1773_v44 = vadd.f32 0.001143296, %v1772_v45 }
 0x180   : > { %v1764_v28 = vadd.f32 0.0036580483, %v1763_v3  ;;  %v7405_v5 = vpop.eup %7404  ;;  %v1799_v0 = vmul.f32 %v9113_v27, %v9113_v27  ;;  %v1711_v38 = vand.u32 2147483647, %v9094_v23  ;;  %v1714_v32 = vor.u32 1.1754944e-38, %v1713_v48 }
 0x181   : > { %6918 = vst [vmem:[%s8053_s16 + $0xe8] sm:$0xff] %v6768_v51  ;;  %v1665_v33 = vmul.f32 %v7403_v21, %v1664_v34  ;;  %v1703_v35 = vmul.f32 %v7405_v5, %v9094_v23  ;;  %v1739_v4 = vadd.f32 0.4994258, %v1738_v16  ;;  %v1774_v43 = vmul.f32 %v1773_v44, %v9091_v59 }
 0x182   : > { %v1765_v52 = vmul.f32 %v1764_v28, %v9091_v59  ;;  %v9133_v56 = vmin.f32 %v1799_v0, 16.0  ;;  %vm1708_vm13 = vweird.f32 %v7405_v5  ;;  %v1729_v12 = vmul.f32 %v1728_v41, %v9046_v6 }
 0x183   : > { %v1666_v10 = vadd.f32 %v7403_v21, %v1665_v33  ;;  %v1704_v40 = vsub.f32 1.0, %v1703_v35  ;;  %v1740_v61 = vmul.f32 %v1739_v4, %v9046_v6  ;;  %v1775_v63 = vadd.f32 0.014752088, %v1774_v43  ;;  %vm9153_vm14 = vmor %vm1707_vm11, %vm1708_vm13 }
 0x184   : > { %v1801_v30 = vmul.f32 2.1237322e-06, %v9133_v56  ;;  %v9141_v20 = vmul.f32 0.70710677, %v9129_v24  ;;  %v1812_v22 = vmul.f32 3.8918573e-05, %v9133_v56  ;;  %v1691_v18 = vmul.f32 %v1690_v14, %v8981_v2 }
 0x185   : > { %v1670_v60 = vsel %vm9122_vm12, %v7403_v21, %v1666_v10  ;;  %v1705_v39 = vmul.f32 %v7405_v5, %v1704_v40  ;;  %v9145_v11 = vadd.f32 1.0, %v1740_v61  ;;  %v1766_v29 = vadd.f32 0.05243302, %v1765_v52 }
 0x186   : > { %v1675_v17 = vsel %vm9104_vm9, %v1674_v46, %v1670_v60  ;;  %v1776_v8 = vmul.f32 %v1775_v63, %v9091_v59  ;;  %v1802_v42 = vadd.f32 0.00028619796, %v1801_v30  ;;  %vm1712_vm15 = vcmp.eq.f32.partialorder %v1711_v38, 8.507059e+37 }
 0x187   : > { %v1676_v6 = vmul.f32 %v1675_v17, %v1651_v7  ;;  %v1706_v53 = vadd.f32 %v7405_v5, %v1705_v39  ;;  %7406 = vrcp.f32 %v9145_v11  ;;  %v1839_v7 = vmul.f32 %v9141_v20, %v9141_v20 }
 0x188   : > { %v1777_v15 = vadd.f32 0.112945676, %v1776_v8  ;;  %v9163_v23 = vmul.f32 0.70710677, %v9149_v9  ;;  %v1730_v49 = vadd.f32 1.1283791, %v1729_v12  ;;  %v1803_v25 = vmul.f32 %v1802_v42, %v9133_v56 }
 0x189   : > { %v7163_v21 = vclamps-f32 %v1676_v6, 1.0  ;;  %v1710_v19 = vsel %vm9153_vm14, %v7405_v5, %v1706_v53  ;;  %v1813_v26 = vadd.f32 0.001143296, %v1812_v22  ;;  %vm1747_vm0 = vweird.f32 %v9145_v11 }
 0x18a   : > { %v1715_v57 = vsel %vm1712_vm15, %v1714_v32, %v1710_v19  ;;  %v1767_v36 = vmul.f32 %v1766_v29, %v9091_v59  ;;  %v1778_v48 = vmul.f32 %v1777_v15, %v9091_v59  ;;  %v1804_v54 = vadd.f32 0.0036580483, %v1803_v25  ;;  %v9206_v15 = vld [vmem:[%s7840_s24 + $0x128] sm:$0xff] }
 0x18b   : > { %v6469_v2 = vmul.f32 0.5, %v7163_v21  ;;  %v1716_v14 = vmul.f32 %v1715_v57, %v1691_v18  ;;  %v1814_v3 = vmul.f32 %v1813_v26, %v9133_v56  ;;  %v1751_v34 = vand.u32 2147483647, %v9145_v11 }
 0x18c   : > { %v1753_v45 = vand.u32 2147483648, %v9145_v11  ;;  %v9174_v46 = vmin.f32 %v1839_v7, 16.0  ;;  %v1779_v28 = vadd.f32 0.4994258, %v1778_v48  ;;  %v1805_v5 = vmul.f32 %v1804_v54, %v9133_v56 }
 0x18d   : > { %v6619_v51 = vadd.f32 0.5, %v6469_v2  ;;  %v7407_v41 = vpop.eup %7406  ;;  %v7164_v16 = vclamps-f32 %v1716_v14, 1.0  ;;  %v1815_v33 = vadd.f32 0.014752088, %v1814_v3  ;;  %v1768_v50 = vadd.f32 0.18741608, %v1767_v36 }
 0x18e   : > { %v1743_v0 = vmul.f32 %v7407_v41, %v9145_v11  ;;  %v1879_v35 = vmul.f32 %v9163_v23, %v9163_v23  ;;  %v1780_v32 = vmul.f32 %v1779_v28, %v9091_v59  ;;  %v1806_v4 = vadd.f32 0.05243302, %v1805_v5 }
 0x18f   : > { %v6769_v44 = vmul.f32 %v6619_v51, %v8962_v1  ;;  %v6470_v38 = vmul.f32 0.5, %v7164_v16  ;;  %v1816_v10 = vmul.f32 %v1815_v33, %v9133_v56  ;;  %vm1748_vm1 = vweird.f32 %v7407_v41 }
 0x190   : > { %v1744_v52 = vsub.f32 1.0, %v1743_v0  ;;  %v1841_v43 = vmul.f32 2.1237322e-06, %v9174_v46  ;;  %v1852_v40 = vmul.f32 3.8918573e-05, %v9174_v46  ;;  %v1731_v12 = vmul.f32 %v1730_v49, %v9004_v13  ;;  %vm9191_vm2 = vmor %vm1747_vm0, %vm1748_vm1 }
 0x191   : > { %6919 = vst [vmem:[%s8053_s16 + $0xf0] sm:$0xff] %v6769_v44  ;;  %v6620_v1 = vadd.f32 0.5, %v6470_v38  ;;  %v1781_v61 = vadd.f32 1.0, %v1780_v32  ;;  %v1817_v60 = vadd.f32 0.112945676, %v1816_v10  ;;  %v1769_v30 = vmul.f32 %v1768_v50, %v9091_v59 }
 0x192   : > { %v1745_v63 = vmul.f32 %v7407_v41, %v1744_v52  ;;  %v1842_v17 = vadd.f32 0.00028619796, %v1841_v43  ;;  %v1853_v39 = vadd.f32 0.001143296, %v1852_v40  ;;  %v1754_v55 = vor.u32 1.1754944e-38, %v1753_v45 }
 0x193   : > { %v6770_v22 = vmul.f32 %v6620_v1, %v8967_v37  ;;  %7408 = vrcp.f32 %v1781_v61  ;;  %v9195_v13 = vmin.f32 %v1879_v35, 16.0  ;;  %vm1752_vm3 = vcmp.eq.f32.partialorder %v1751_v34, 8.507059e+37 }
 0x194   : > { %v1746_v29 = vadd.f32 %v7407_v41, %v1745_v63  ;;  %v1807_v8 = vmul.f32 %v1806_v4, %v9133_v56  ;;  %v1818_v59 = vmul.f32 %v1817_v60, %v9133_v56  ;;  %v1843_v37 = vmul.f32 %v1842_v17, %v9174_v46 }
 0x195   : > { %6920 = vst [vmem:[%s8053_s16 + $0xf8] sm:$0xff] %v6770_v22  ;;  %v1854_v11 = vmul.f32 %v1853_v39, %v9174_v46  ;;  %v1881_v42 = vmul.f32 2.1237322e-06, %v9195_v13  ;;  %v1770_v53 = vadd.f32 1.1283791, %v1769_v30  ;;  %vm1787_vm4 = vweird.f32 %v1781_v61  ;;  %v9236_v22 = vld [vmem:[%s7840_s24 + $0x130] sm:$0xff] }
 0x196   : > { %v1750_v18 = vsel %vm9191_vm2, %v7407_v41, %v1746_v29  ;;  %v1819_v21 = vadd.f32 0.4994258, %v1818_v59  ;;  %v1844_v19 = vadd.f32 0.0036580483, %v1843_v37  ;;  %v1808_v2 = vadd.f32 0.18741608, %v1807_v8 }
 0x197   : > { %v1755_v7 = vsel %vm1752_vm3, %v1754_v55, %v1750_v18  ;;  %v1855_v49 = vadd.f32 0.014752088, %v1854_v11  ;;  %v1882_v25 = vadd.f32 0.00028619796, %v1881_v42  ;;  %v1892_v36 = vmul.f32 3.8918573e-05, %v9195_v13 }
 0x198   : > { %v1756_v26 = vmul.f32 %v1755_v7, %v1731_v12  ;;  %v1820_v57 = vmul.f32 %v1819_v21, %v9133_v56  ;;  %v1845_v48 = vmul.f32 %v1844_v19, %v9174_v46  ;;  %v9214_v51 = vmul.f32 0.70710677, %v9206_v15 }
 0x199   : > { %v7409_v14 = vpop.eup %7408  ;;  %v1856_v54 = vmul.f32 %v1855_v49, %v9174_v46  ;;  %v1883_v3 = vmul.f32 %v1882_v25, %v9195_v13  ;;  %v1791_v41 = vand.u32 2147483647, %v1781_v61  ;;  %v1793_v16 = vand.u32 2147483648, %v1781_v61 }
 0x19a   : > { %v7165_v34 = vclamps-f32 %v1756_v26, 1.0  ;;  %v1783_v45 = vmul.f32 %v7409_v14, %v1781_v61  ;;  %vm1788_vm5 = vweird.f32 %v7409_v14  ;;  %v1821_v28 = vadd.f32 1.0, %v1820_v57 }
 0x19b   : > { %v1846_v5 = vadd.f32 0.05243302, %v1845_v48  ;;  %v1857_v33 = vadd.f32 0.112945676, %v1856_v54  ;;  %v1884_v50 = vadd.f32 0.0036580483, %v1883_v3  ;;  %v1771_v38 = vmul.f32 %v1770_v53, %v9051_v31  ;;  %vm9224_vm6 = vmor %vm1787_vm4, %vm1788_vm5 }
 0x19c   : > { %v6471_v44 = vmul.f32 0.5, %v7165_v34  ;;  %v1784_v0 = vsub.f32 1.0, %v1783_v45  ;;  %v1893_v35 = vadd.f32 0.001143296, %v1892_v36  ;;  %v1809_v32 = vmul.f32 %v1808_v2, %v9133_v56 }
 0x19d   : > { %7410 = vrcp.f32 %v1821_v28  ;;  %v1919_v4 = vmul.f32 %v9214_v51, %v9214_v51  ;;  %v1847_v43 = vmul.f32 %v1846_v5, %v9174_v46  ;;  %v1858_v40 = vmul.f32 %v1857_v33, %v9174_v46 }
 0x19e   : > { %v6621_v10 = vadd.f32 0.5, %v6471_v44  ;;  %v1785_v52 = vmul.f32 %v7409_v14, %v1784_v0  ;;  %vm9228_vm7 = vcmp.eq.f32.partialorder %v1791_v41, 8.507059e+37  ;;  %v1794_v56 = vor.u32 1.1754944e-38, %v1793_v16 }
 0x19f   : > { %v1885_v12 = vmul.f32 %v1884_v50, %v9195_v13  ;;  %v1894_v60 = vmul.f32 %v1893_v35, %v9195_v13  ;;  %v1848_v17 = vadd.f32 0.18741608, %v1847_v43  ;;  %v1859_v39 = vadd.f32 0.4994258, %v1858_v40 }
 0x1a0   : > { %v6771_v63 = vmul.f32 %v6621_v10, %v8993_v58  ;;  %v1786_v30 = vadd.f32 %v7409_v14, %v1785_v52  ;;  %v9238_v55 = vmin.f32 %v1919_v4, 16.0  ;;  %v1810_v8 = vadd.f32 1.1283791, %v1809_v32 }
 0x1a1   : > { %v1886_v61 = vadd.f32 0.05243302, %v1885_v12  ;;  %v1895_v6 = vadd.f32 0.014752088, %v1894_v60  ;;  %v1831_v59 = vand.u32 2147483647, %v1821_v28  ;;  %v1860_v37 = vmul.f32 %v1859_v39, %v9174_v46 }
 0x1a2   : > { %6921 = vst [vmem:[%s8053_s16 + $0x100] sm:$0xff] %v6771_v63  ;;  %v1790_v29 = vsel %vm9224_vm6, %v7409_v14, %v1786_v30  ;;  %v1921_v18 = vmul.f32 2.1237322e-06, %v9238_v55  ;;  %v9249_v53 = vmul.f32 0.70710677, %v9236_v22  ;;  %vm1827_vm8 = vweird.f32 %v1821_v28 }
 0x1a3   : > { %v7411_v11 = vpop.eup %7410  ;;  %v1795_v58 = vsel %vm9228_vm7, %v1794_v56, %v1790_v29  ;;  %v1896_v42 = vmul.f32 %v1895_v6, %v9195_v13  ;;  %v1887_v19 = vmul.f32 %v1886_v61, %v9195_v13  ;;  %v1833_v49 = vand.u32 2147483648, %v1821_v28 }
 0x1a4   : > { %v1796_v21 = vmul.f32 %v1795_v58, %v1771_v38  ;;  %v1823_v7 = vmul.f32 %v7411_v11, %v1821_v28  ;;  %v1849_v25 = vmul.f32 %v1848_v17, %v9174_v46  ;;  %v1861_v26 = vadd.f32 1.0, %v1860_v37 }
 0x1a5   : > { %v1897_v2 = vadd.f32 0.112945676, %v1896_v42  ;;  %vm1828_vm9 = vweird.f32 %v7411_v11  ;;  %v1922_v14 = vadd.f32 0.00028619796, %v1921_v18  ;;  %v1811_v48 = vmul.f32 %v1810_v8, %v9113_v27 }
 0x1a6   : > { %v7166_v57 = vclamps-f32 %v1796_v21, 1.0  ;;  %v1824_v36 = vsub.f32 1.0, %v1823_v7  ;;  %vm9254_vm10 = vcmp.eq.f32.partialorder %v1831_v59, 8.507059e+37  ;;  %7412 = vrcp.f32 %v1861_v26  ;;  %vm9262_vm11 = vmor %vm1827_vm8, %vm1828_vm9  ;;  %v9293_v7 = vld [vmem:[%s7840_s24 + $0x138] sm:$0xff] }
 0x1a7   : > { %v1959_v3 = vmul.f32 %v9249_v53, %v9249_v53  ;;  %v1888_v41 = vadd.f32 0.18741608, %v1887_v19  ;;  %v1898_v46 = vmul.f32 %v1897_v2, %v9195_v13  ;;  %v1834_v5 = vor.u32 1.1754944e-38, %v1833_v49  ;;  %v9296_v19 = vld [vmem:[%s7840_s24 + $0x140] sm:$0xff] }
 0x1a8   : > { %v6472_v34 = vmul.f32 0.5, %v7166_v57  ;;  %v1825_v45 = vmul.f32 %v7411_v11, %v1824_v36  ;;  %v1850_v27 = vadd.f32 1.1283791, %v1849_v25  ;;  %v1923_v33 = vmul.f32 %v1922_v14, %v9238_v55 }
 0x1a9   : > { %v1932_v44 = vmul.f32 3.8918573e-05, %v9238_v55  ;;  %v1871_v35 = vand.u32 2147483647, %v1861_v26  ;;  %v1899_v38 = vadd.f32 0.4994258, %v1898_v46  ;;  %v1889_v40 = vmul.f32 %v1888_v41, %v9195_v13 }
 0x1aa   : > { %v6622_v0 = vadd.f32 0.5, %v6472_v34  ;;  %v1826_v50 = vadd.f32 %v7411_v11, %v1825_v45  ;;  %v1873_v32 = vand.u32 2147483648, %v1861_v26  ;;  %v1924_v4 = vadd.f32 0.0036580483, %v1923_v33 }
 0x1ab   : > { %v1933_v10 = vadd.f32 0.001143296, %v1932_v44  ;;  %v9268_v52 = vmin.f32 %v1959_v3, 16.0  ;;  %v1900_v1 = vmul.f32 %v1899_v38, %v9195_v13  ;;  %vm1867_vm12 = vweird.f32 %v1861_v26 }
 0x1ac   : > { %v6772_v28 = vmul.f32 %v6622_v0, %v9041_v62  ;;  %v1830_v43 = vsel %vm9262_vm11, %v7411_v11, %v1826_v50  ;;  %v7413_v31 = vpop.eup %7412  ;;  %v1925_v12 = vmul.f32 %v1924_v4, %v9238_v55  ;;  %v1851_v62 = vmul.f32 %v1850_v27, %v9141_v20 }
 0x1ad   : > { %v1835_v56 = vsel %vm9254_vm10, %v1834_v5, %v1830_v43  ;;  %v1934_v60 = vmul.f32 %v1933_v10, %v9238_v55  ;;  %v1961_v63 = vmul.f32 2.1237322e-06, %v9268_v52  ;;  %v1863_v17 = vmul.f32 %v7413_v31, %v1861_v26 }
 0x1ae   : > { %6922 = vst [vmem:[%s8053_s16 + $0x108] sm:$0xff] %v6772_v28  ;;  %v1836_v30 = vmul.f32 %v1835_v56, %v1811_v48  ;;  %v9282_v39 = vadd.f32 1.0, %v1900_v1  ;;  %v1926_v13 = vadd.f32 0.05243302, %v1925_v12  ;;  %vm1868_vm13 = vweird.f32 %v7413_v31 }
 0x1af   : > { %v1935_v61 = vadd.f32 0.014752088, %v1934_v60  ;;  %v1962_v6 = vadd.f32 0.00028619796, %v1961_v63  ;;  %v1864_v8 = vsub.f32 1.0, %v1863_v17  ;;  %vm9285_vm14 = vcmp.eq.f32.partialorder %v1871_v35, 8.507059e+37  ;;  %vm9299_vm15 = vmor %vm1867_vm12, %vm1868_vm13 }
 0x1b0   : > { %v7167_v29 = vclamps-f32 %v1836_v30, 1.0  ;;  %7414 = vrcp.f32 %v9282_v39  ;;  %v1874_v37 = vor.u32 1.1754944e-38, %v1873_v32  ;;  %v1890_v20 = vadd.f32 1.1283791, %v1889_v40 }
 0x1b1   : > { %v1936_v11 = vmul.f32 %v1935_v61, %v9238_v55  ;;  %v1865_v42 = vmul.f32 %v7413_v31, %v1864_v8  ;;  %v1963_v18 = vmul.f32 %v1962_v6, %v9268_v52  ;;  %v1972_v21 = vmul.f32 3.8918573e-05, %v9268_v52 }
 0x1b2   : > { %v6473_v58 = vmul.f32 0.5, %v7167_v29  ;;  %vm1907_vm0 = vweird.f32 %v9282_v39  ;;  %v1913_v25 = vand.u32 2147483648, %v9282_v39  ;;  %v1927_v2 = vmul.f32 %v1926_v13, %v9238_v55 }
 0x1b3   : > { %v1937_v57 = vadd.f32 0.112945676, %v1936_v11  ;;  %v1866_v14 = vadd.f32 %v7413_v31, %v1865_v42  ;;  %v1964_v48 = vadd.f32 0.0036580483, %v1963_v18  ;;  %v1973_v54 = vadd.f32 0.001143296, %v1972_v21 }
 0x1b4   : > { %v6623_v36 = vadd.f32 0.5, %v6473_v58  ;;  %v1911_v3 = vand.u32 2147483647, %v9282_v39  ;;  %v9309_v34 = vmul.f32 0.70710677, %v9293_v7  ;;  %v1914_v0 = vor.u32 1.1754944e-38, %v1913_v25 }
 0x1b5   : > { %v1938_v26 = vmul.f32 %v1937_v57, %v9238_v55  ;;  %v9312_v45 = vmul.f32 0.70710677, %v9296_v19  ;;  %v1870_v16 = vsel %vm9299_vm15, %v7413_v31, %v1866_v14  ;;  %v1965_v5 = vmul.f32 %v1964_v48, %v9268_v52 }
 0x1b6   : > { %v7415_v41 = vpop.eup %7414  ;;  %v6773_v46 = vmul.f32 %v6623_v36, %v9102_v47  ;;  %v1974_v27 = vmul.f32 %v1973_v54, %v9268_v52  ;;  %v1875_v33 = vsel %vm9285_vm14, %v1874_v37, %v1870_v16  ;;  %v1928_v50 = vadd.f32 0.18741608, %v1927_v2  ;;  %v9346_v37 = vld [vmem:[%s7840_s24 + $0x148] sm:$0xff] }
 0x1b7   : > { %v1903_v44 = vmul.f32 %v7415_v41, %v9282_v39  ;;  %v1876_v35 = vmul.f32 %v1875_v33, %v1851_v62  ;;  %v1939_v38 = vadd.f32 0.4994258, %v1938_v26  ;;  %v1966_v32 = vadd.f32 0.05243302, %v1965_v5 }
 0x1b8   : > { %6923 = vst [vmem:[%s8053_s16 + $0x110] sm:$0xff] %v6773_v46  ;;  %v1999_v47 = vmul.f32 %v9309_v34, %v9309_v34  ;;  %vm1908_vm1 = vweird.f32 %v7415_v41  ;;  %v1975_v10 = vadd.f32 0.014752088, %v1974_v27  ;;  %v2039_v28 = vmul.f32 %v9312_v45, %v9312_v45 }
 0x1b9   : > { %v1904_v4 = vsub.f32 1.0, %v1903_v44  ;;  %v7168_v43 = vclamps-f32 %v1876_v35, 1.0  ;;  %v1940_v40 = vmul.f32 %v1939_v38, %v9238_v55  ;;  %v1967_v1 = vmul.f32 %v1966_v32, %v9268_v52  ;;  %vm9337_vm2 = vmor %vm1907_vm0, %vm1908_vm1 }
 0x1ba   : > { %v9329_v31 = vmin.f32 %v1999_v47, 16.0  ;;  %v1929_v12 = vmul.f32 %v1928_v50, %v9238_v55  ;;  %v1976_v60 = vmul.f32 %v1975_v10, %v9268_v52  ;;  %v9333_v63 = vmin.f32 %v2039_v28, 16.0 }
 0x1bb   : > { %v1905_v56 = vmul.f32 %v7415_v41, %v1904_v4  ;;  %v6474_v30 = vmul.f32 0.5, %v7168_v43  ;;  %v1941_v17 = vadd.f32 1.0, %v1940_v40  ;;  %v1968_v13 = vadd.f32 0.18741608, %v1967_v1 }
 0x1bc   : > { %v2001_v61 = vmul.f32 2.1237322e-06, %v9329_v31  ;;  %v1891_v6 = vmul.f32 %v1890_v20, %v9163_v23  ;;  %vm1912_vm3 = vcmp.eq.f32.partialorder %v1911_v3, 8.507059e+37  ;;  %v1977_v55 = vadd.f32 0.112945676, %v1976_v60 }
 0x1bd   : > { %v1906_v29 = vadd.f32 %v7415_v41, %v1905_v56  ;;  %v6624_v8 = vadd.f32 0.5, %v6474_v30  ;;  %7416 = vrcp.f32 %v1941_v17  ;;  %v2012_v59 = vmul.f32 3.8918573e-05, %v9329_v31 }
 0x1be   : > { %v2041_v39 = vmul.f32 2.1237322e-06, %v9333_v63  ;;  %v1930_v58 = vadd.f32 1.1283791, %v1929_v12  ;;  %v1978_v42 = vmul.f32 %v1977_v55, %v9268_v52  ;;  %v1969_v18 = vmul.f32 %v1968_v13, %v9268_v52 }
 0x1bf   : > { %v1910_v11 = vsel %vm9337_vm2, %v7415_v41, %v1906_v29  ;;  %v6774_v23 = vmul.f32 %v6624_v8, %v9129_v24  ;;  %v2002_v21 = vadd.f32 0.00028619796, %v2001_v61  ;;  %v1951_v25 = vand.u32 2147483647, %v1941_v17  ;;  %v9388_v8 = vld [vmem:[%s7840_s24 + $0x150] sm:$0xff] }
 0x1c0   : > { %v1915_v20 = vsel %vm1912_vm3, %v1914_v0, %v1910_v11  ;;  %v1979_v2 = vadd.f32 0.4994258, %v1978_v42  ;;  %v9354_v57 = vmul.f32 0.70710677, %v9346_v37  ;;  %vm1947_vm4 = vweird.f32 %v1941_v17 }
 0x1c1   : > { %v1916_v49 = vmul.f32 %v1915_v20, %v1891_v6  ;;  %6924 = vst [vmem:[%s8053_s16 + $0x118] sm:$0xff] %v6774_v23  ;;  %v2003_v36 = vmul.f32 %v2002_v21, %v9329_v31  ;;  %v2013_v14 = vadd.f32 0.001143296, %v2012_v59  ;;  %v2042_v48 = vadd.f32 0.00028619796, %v2041_v39 }
 0x1c2   : > { %v1953_v3 = vand.u32 2147483648, %v1941_v17  ;;  %v1980_v24 = vmul.f32 %v1979_v2, %v9268_v52  ;;  %v2052_v26 = vmul.f32 3.8918573e-05, %v9333_v63  ;;  %v1970_v46 = vadd.f32 1.1283791, %v1969_v18 }
 0x1c3   : > { %v7169_v54 = vclamps-f32 %v1916_v49, 1.0  ;;  %v7417_v41 = vpop.eup %7416  ;;  %v2004_v16 = vadd.f32 0.0036580483, %v2003_v36  ;;  %v2014_v5 = vmul.f32 %v2013_v14, %v9329_v31  ;;  %v2043_v27 = vmul.f32 %v2042_v48, %v9333_v63 }
 0x1c4   : > { %v1943_v44 = vmul.f32 %v7417_v41, %v1941_v17  ;;  %v9362_v0 = vadd.f32 1.0, %v1980_v24  ;;  %v2079_v50 = vmul.f32 %v9354_v57, %v9354_v57  ;;  %v2053_v32 = vadd.f32 0.001143296, %v2052_v26 }
 0x1c5   : > { %v6475_v33 = vmul.f32 0.5, %v7169_v54  ;;  %v2005_v35 = vmul.f32 %v2004_v16, %v9329_v31  ;;  %v2015_v38 = vadd.f32 0.014752088, %v2014_v5  ;;  %v2044_v52 = vadd.f32 0.0036580483, %v2043_v27 }
 0x1c6   : > { %v1944_v4 = vsub.f32 1.0, %v1943_v44  ;;  %vm1948_vm5 = vweird.f32 %v7417_v41  ;;  %7418 = vrcp.f32 %v9362_v0  ;;  %v1931_v10 = vmul.f32 %v1930_v58, %v9214_v51 }
 0x1c7   : > { %v6625_v47 = vadd.f32 0.5, %v6475_v33  ;;  %vm9369_vm6 = vcmp.eq.f32.partialorder %v1951_v25, 8.507059e+37  ;;  %v2006_v43 = vadd.f32 0.05243302, %v2005_v35  ;;  %v2016_v40 = vmul.f32 %v2015_v38, %v9329_v31  ;;  %vm9378_vm7 = vmor %vm1947_vm4, %vm1948_vm5 }
 0x1c8   : > { %v1945_v56 = vmul.f32 %v7417_v41, %v1944_v4  ;;  %v2045_v12 = vmul.f32 %v2044_v52, %v9333_v63  ;;  %v2054_v60 = vmul.f32 %v2053_v32, %v9333_v63  ;;  %v1954_v51 = vor.u32 1.1754944e-38, %v1953_v3 }
 0x1c9   : > { %v6775_v1 = vmul.f32 %v6625_v47, %v9149_v9  ;;  %v2007_v62 = vmul.f32 %v2006_v43, %v9329_v31  ;;  %v2017_v13 = vadd.f32 0.112945676, %v2016_v40  ;;  %v9383_v61 = vmin.f32 %v2079_v50, 16.0 }
 0x1ca   : > { %v1946_v6 = vadd.f32 %v7417_v41, %v1945_v56  ;;  %v1971_v9 = vmul.f32 %v1970_v46, %v9249_v53  ;;  %v2046_v29 = vadd.f32 0.05243302, %v2045_v12  ;;  %v2055_v55 = vadd.f32 0.014752088, %v2054_v60 }
 0x1cb   : > { %6925 = vst [vmem:[%s8053_s16 + $0x120] sm:$0xff] %v6775_v1  ;;  %vm1987_vm8 = vweird.f32 %v9362_v0  ;;  %v2008_v17 = vadd.f32 0.18741608, %v2007_v62  ;;  %v2018_v59 = vmul.f32 %v2017_v13, %v9329_v31  ;;  %v2081_v39 = vmul.f32 2.1237322e-06, %v9383_v61 }
 0x1cc   : > { %v7419_v11 = vpop.eup %7418  ;;  %v1950_v58 = vsel %vm9378_vm7, %v7417_v41, %v1946_v6  ;;  %v1991_v42 = vand.u32 2147483647, %v9362_v0  ;;  %v2047_v23 = vmul.f32 %v2046_v29, %v9333_v63  ;;  %v2056_v53 = vmul.f32 %v2055_v55, %v9333_v63 }
 0x1cd   : > { %v1955_v20 = vsel %vm9369_vm6, %v1954_v51, %v1950_v58  ;;  %v1983_v18 = vmul.f32 %v7419_v11, %v9362_v0  ;;  %v2092_v21 = vmul.f32 3.8918573e-05, %v9383_v61  ;;  %v9403_v49 = vmul.f32 0.70710677, %v9388_v8 }
 0x1ce   : > { %v1956_v25 = vmul.f32 %v1955_v20, %v1931_v10  ;;  %v1993_v2 = vand.u32 2147483648, %v9362_v0  ;;  %v2019_v36 = vadd.f32 0.4994258, %v2018_v59  ;;  %v2057_v14 = vadd.f32 0.112945676, %v2056_v53 }
 0x1cf   : > { %v1984_v48 = vsub.f32 1.0, %v1983_v18  ;;  %vm1988_vm9 = vweird.f32 %v7419_v11  ;;  %v2009_v54 = vmul.f32 %v2008_v17, %v9329_v31  ;;  %v2082_v3 = vadd.f32 0.00028619796, %v2081_v39 }
 0x1d0   : > { %v7170_v24 = vclamps-f32 %v1956_v25, 1.0  ;;  %v2020_v26 = vmul.f32 %v2019_v36, %v9329_v31  ;;  %v2048_v41 = vadd.f32 0.18741608, %v2047_v23  ;;  %v2058_v46 = vmul.f32 %v2057_v14, %v9333_v63  ;;  %vm9414_vm10 = vmor %vm1987_vm8, %vm1988_vm9 }
 0x1d1   : > { %v1985_v16 = vmul.f32 %v7419_v11, %v1984_v48  ;;  %v2083_v5 = vmul.f32 %v2082_v3, %v9383_v61  ;;  %v2093_v27 = vadd.f32 0.001143296, %v2092_v21  ;;  %v2119_v33 = vmul.f32 %v9403_v49, %v9403_v49 }
 0x1d2   : > { %v6476_v44 = vmul.f32 0.5, %v7170_v24  ;;  %v1994_v35 = vor.u32 1.1754944e-38, %v1993_v2  ;;  %v2021_v38 = vadd.f32 1.0, %v2020_v26  ;;  %v2059_v31 = vadd.f32 0.4994258, %v2058_v46 }
 0x1d3   : > { %v1986_v52 = vadd.f32 %v7419_v11, %v1985_v16  ;;  %vm1992_vm11 = vcmp.eq.f32.partialorder %v1991_v42, 8.507059e+37  ;;  %v2084_v32 = vadd.f32 0.0036580483, %v2083_v5  ;;  %v2094_v47 = vmul.f32 %v2093_v27, %v9383_v61  ;;  %v9454_v16 = vld [vmem:[%s7840_s24 + $0x160] sm:$0xff] }
 0x1d4   : > { %v6626_v4 = vadd.f32 0.5, %v6476_v44  ;;  %v2010_v10 = vadd.f32 1.1283791, %v2009_v54  ;;  %7420 = vrcp.f32 %v2021_v38  ;;  %v2049_v0 = vmul.f32 %v2048_v41, %v9333_v63 }
 0x1d5   : > { %v1990_v28 = vsel %vm9414_vm10, %v7419_v11, %v1986_v52  ;;  %v2060_v43 = vmul.f32 %v2059_v31, %v9333_v63  ;;  %v9423_v40 = vmin.f32 %v2119_v33, 16.0  ;;  %v2031_v12 = vand.u32 2147483647, %v2021_v38  ;;  %v9436_v11 = vld [vmem:[%s7840_s24 + $0x158] sm:$0xff] }
 0x1d6   : > { %v6776_v1 = vmul.f32 %v6626_v4, %v9206_v15  ;;  %v1995_v56 = vsel %vm1992_vm11, %v1994_v35, %v1990_v28  ;;  %v2085_v60 = vmul.f32 %v2084_v32, %v9383_v61  ;;  %v2033_v51 = vand.u32 2147483648, %v2021_v38 }
 0x1d7   : > { %v1996_v30 = vmul.f32 %v1995_v56, %v1971_v9  ;;  %v9427_v62 = vadd.f32 1.0, %v2060_v43  ;;  %v2095_v13 = vadd.f32 0.014752088, %v2094_v47  ;;  %v2121_v29 = vmul.f32 2.1237322e-06, %v9423_v40 }
 0x1d8   : > { %6926 = vst [vmem:[%s8053_s16 + $0x128] sm:$0xff] %v6776_v1  ;;  %v2086_v6 = vadd.f32 0.05243302, %v2085_v60  ;;  %v2011_v63 = vmul.f32 %v2010_v10, %v9309_v34  ;;  %v2050_v17 = vadd.f32 1.1283791, %v2049_v0  ;;  %vm2027_vm12 = vweird.f32 %v2021_v38 }
 0x1d9   : > { %v7171_v55 = vclamps-f32 %v1996_v30, 1.0  ;;  %7422 = vrcp.f32 %v9427_v62  ;;  %v2096_v9 = vmul.f32 %v2095_v13, %v9383_v61  ;;  %v2122_v39 = vadd.f32 0.00028619796, %v2121_v29 }
 0x1da   : > { %v7421_v15 = vpop.eup %7420  ;;  %v2087_v59 = vmul.f32 %v2086_v6, %v9383_v61  ;;  %vm9438_vm13 = vcmp.eq.f32.partialorder %v2031_v12, 8.507059e+37  ;;  %v2034_v53 = vor.u32 1.1754944e-38, %v2033_v51  ;;  %v2132_v2 = vmul.f32 3.8918573e-05, %v9423_v40 }
 0x1db   : > { %v6477_v58 = vmul.f32 0.5, %v7171_v55  ;;  %v2023_v42 = vmul.f32 %v7421_v15, %v2021_v38  ;;  %vm2028_vm14 = vweird.f32 %v7421_v15  ;;  %v2097_v20 = vadd.f32 0.112945676, %v2096_v9 }
 0x1dc   : > { %v2088_v34 = vadd.f32 0.18741608, %v2087_v59  ;;  %v2123_v18 = vmul.f32 %v2122_v39, %v9423_v40  ;;  %v9445_v36 = vmul.f32 0.70710677, %v9436_v11  ;;  %vm2067_vm15 = vweird.f32 %v9427_v62  ;;  %vm9458_vm0 = vmor %vm2027_vm12, %vm2028_vm14 }
 0x1dd   : > { %v6627_v21 = vadd.f32 0.5, %v6477_v58  ;;  %v2024_v25 = vsub.f32 1.0, %v2023_v42  ;;  %v2071_v14 = vand.u32 2147483647, %v9427_v62  ;;  %v2098_v48 = vmul.f32 %v2097_v20, %v9383_v61  ;;  %v9498_v42 = vld [vmem:[%s7840_s24 + $0x168] sm:$0xff] }
 0x1de   : > { %v2124_v54 = vadd.f32 0.0036580483, %v2123_v18  ;;  %v2133_v41 = vadd.f32 0.001143296, %v2132_v2  ;;  %v2159_v46 = vmul.f32 %v9445_v36, %v9445_v36  ;;  %v2073_v33 = vand.u32 2147483648, %v9427_v62 }
 0x1df   : > { %v7423_v3 = vpop.eup %7422  ;;  %v6777_v24 = vmul.f32 %v6627_v21, %v9236_v22  ;;  %v2025_v26 = vmul.f32 %v7421_v15, %v2024_v25  ;;  %v2089_v44 = vmul.f32 %v2088_v34, %v9383_v61  ;;  %v2099_v22 = vadd.f32 0.4994258, %v2098_v48 }
 0x1e0   : > { %v2063_v27 = vmul.f32 %v7423_v3, %v9427_v62  ;;  %v2125_v35 = vmul.f32 %v2124_v54, %v9423_v40  ;;  %v2134_v31 = vmul.f32 %v2133_v41, %v9423_v40  ;;  %v9468_v52 = vmin.f32 %v2159_v46, 16.0 }
 0x1e1   : > { %6927 = vst [vmem:[%s8053_s16 + $0x130] sm:$0xff] %v6777_v24  ;;  %v2026_v50 = vadd.f32 %v7421_v15, %v2025_v26  ;;  %vm2068_vm1 = vweird.f32 %v7423_v3  ;;  %v2100_v32 = vmul.f32 %v2099_v22, %v9383_v61  ;;  %v9472_v47 = vmul.f32 0.70710677, %v9454_v16 }
 0x1e2   : > { %v2064_v38 = vsub.f32 1.0, %v2063_v27  ;;  %v2126_v10 = vadd.f32 0.05243302, %v2125_v35  ;;  %v2135_v28 = vadd.f32 0.014752088, %v2134_v31  ;;  %vm9484_vm2 = vmor %vm2067_vm15, %vm2068_vm1  ;;  %v2074_v30 = vor.u32 1.1754944e-38, %v2073_v33 }
 0x1e3   : > { %v2030_v4 = vsel %vm9458_vm0, %v7421_v15, %v2026_v50  ;;  %v2161_v0 = vmul.f32 2.1237322e-06, %v9468_v52  ;;  %v9479_v56 = vadd.f32 1.0, %v2100_v32  ;;  %v2172_v12 = vmul.f32 3.8918573e-05, %v9468_v52 }
 0x1e4   : > { %v2035_v43 = vsel %vm9438_vm13, %v2034_v53, %v2030_v4  ;;  %v2065_v1 = vmul.f32 %v7423_v3, %v2064_v38  ;;  %v2136_v51 = vmul.f32 %v2135_v28, %v9423_v40  ;;  %v2051_v6 = vmul.f32 %v2050_v17, %v9312_v45 }
 0x1e5   : > { %v2036_v60 = vmul.f32 %v2035_v43, %v2011_v63  ;;  %v2162_v13 = vadd.f32 0.00028619796, %v2161_v0  ;;  %vm2072_vm3 = vcmp.eq.f32.partialorder %v2071_v14, 8.507059e+37  ;;  %7424 = vrcp.f32 %v9479_v56 }
 0x1e6   : > { %v2066_v29 = vadd.f32 %v7423_v3, %v2065_v1  ;;  %v2090_v15 = vadd.f32 1.1283791, %v2089_v44  ;;  %v2137_v63 = vadd.f32 0.112945676, %v2136_v51  ;;  %v2199_v62 = vmul.f32 %v9472_v47, %v9472_v47 }
 0x1e7   : > { %v7172_v55 = vclamps-f32 %v2036_v60, 1.0  ;;  %v2127_v9 = vmul.f32 %v2126_v10, %v9423_v40  ;;  %v2163_v39 = vmul.f32 %v2162_v13, %v9468_v52  ;;  %v2173_v58 = vadd.f32 0.001143296, %v2172_v12 }
 0x1e8   : > { %v2070_v59 = vsel %vm9484_vm2, %v7423_v3, %v2066_v29  ;;  %vm2107_vm4 = vweird.f32 %v9479_v56  ;;  %v2111_v23 = vand.u32 2147483647, %v9479_v56  ;;  %v2138_v34 = vmul.f32 %v2137_v63, %v9423_v40 }
 0x1e9   : > { %v6478_v45 = vmul.f32 0.5, %v7172_v55  ;;  %v2075_v17 = vsel %vm2072_vm3, %v2074_v30, %v2070_v59  ;;  %v2164_v20 = vadd.f32 0.0036580483, %v2163_v39  ;;  %v2174_v18 = vmul.f32 %v2173_v58, %v9468_v52 }
 0x1ea   : > { %v2076_v53 = vmul.f32 %v2075_v17, %v2051_v6  ;;  %v2113_v25 = vand.u32 2147483648, %v9479_v56  ;;  %v9505_v2 = vmin.f32 %v2199_v62, 16.0  ;;  %v9508_v14 = vmul.f32 0.70710677, %v9498_v42 }
 0x1eb   : > { %v6628_v21 = vadd.f32 0.5, %v6478_v45  ;;  %v7425_v48 = vpop.eup %7424  ;;  %v2139_v3 = vadd.f32 0.4994258, %v2138_v34  ;;  %v2165_v24 = vmul.f32 %v2164_v20, %v9468_v52  ;;  %v2175_v26 = vadd.f32 0.014752088, %v2174_v18 }
 0x1ec   : > { %v7173_v54 = vclamps-f32 %v2076_v53, 1.0  ;;  %v2103_v46 = vmul.f32 %v7425_v48, %v9479_v56  ;;  %vm2108_vm5 = vweird.f32 %v7425_v48  ;;  %v2128_v5 = vadd.f32 0.18741608, %v2127_v9 }
 0x1ed   : > { %v6778_v41 = vmul.f32 %v6628_v21, %v9293_v7  ;;  %v2140_v33 = vmul.f32 %v2139_v3, %v9423_v40  ;;  %v2166_v44 = vadd.f32 0.05243302, %v2165_v24  ;;  %v2176_v22 = vmul.f32 %v2175_v26, %v9468_v52  ;;  %vm9526_vm6 = vmor %vm2107_vm4, %vm2108_vm5 }
 0x1ee   : > { %v6479_v27 = vmul.f32 0.5, %v7173_v54  ;;  %v2104_v50 = vsub.f32 1.0, %v2103_v46  ;;  %v2201_v35 = vmul.f32 2.1237322e-06, %v9505_v2  ;;  %v2212_v31 = vmul.f32 3.8918573e-05, %v9505_v2 }
 0x1ef   : > { %6928 = vst [vmem:[%s8053_s16 + $0x138] sm:$0xff] %v6778_v41  ;;  %v2239_v38 = vmul.f32 %v9508_v14, %v9508_v14  ;;  %v2091_v32 = vmul.f32 %v2090_v15, %v9354_v57  ;;  %v2141_v4 = vadd.f32 1.0, %v2140_v33  ;;  %v2177_v10 = vadd.f32 0.112945676, %v2176_v22  ;;  %v9541_v15 = vld [vmem:[%s7840_s24 + $0x170] sm:$0xff] }
 0x1f0   : > { %v6629_v7 = vadd.f32 0.5, %v6479_v27  ;;  %v2105_v28 = vmul.f32 %v7425_v48, %v2104_v50  ;;  %v2129_v0 = vmul.f32 %v2128_v5, %v9423_v40  ;;  %v2202_v43 = vadd.f32 0.00028619796, %v2201_v35 }
 0x1f1   : > { %v2213_v1 = vadd.f32 0.001143296, %v2212_v31  ;;  %v2114_v61 = vor.u32 1.1754944e-38, %v2113_v25  ;;  %7426 = vrcp.f32 %v2141_v4  ;;  %v9530_v57 = vmin.f32 %v2239_v38, 16.0 }
 0x1f2   : > { %v6779_v12 = vmul.f32 %v6629_v7, %v9296_v19  ;;  %v2106_v30 = vadd.f32 %v7425_v48, %v2105_v28  ;;  %vm2112_vm7 = vcmp.eq.f32.partialorder %v2111_v23, 8.507059e+37  ;;  %v2167_v40 = vmul.f32 %v2166_v44, %v9468_v52 }
 0x1f3   : > { %v2178_v51 = vmul.f32 %v2177_v10, %v9468_v52  ;;  %v2203_v19 = vmul.f32 %v2202_v43, %v9505_v2  ;;  %v2214_v56 = vmul.f32 %v2213_v1, %v9505_v2  ;;  %v2241_v13 = vmul.f32 2.1237322e-06, %v9530_v57 }
 0x1f4   : > { %6929 = vst [vmem:[%s8053_s16 + $0x140] sm:$0xff] %v6779_v12  ;;  %v2110_v6 = vsel %vm9526_vm6, %v7425_v48, %v2106_v30  ;;  %v2130_v29 = vadd.f32 1.1283791, %v2129_v0  ;;  %vm2147_vm8 = vweird.f32 %v2141_v4  ;;  %v2168_v58 = vadd.f32 0.18741608, %v2167_v40  ;;  %v9571_v12 = vld [vmem:[%s7840_s24 + $0x178] sm:$0xff] }
 0x1f5   : > { %v2179_v55 = vadd.f32 0.4994258, %v2178_v51  ;;  %v2115_v63 = vsel %vm2112_vm7, %v2114_v61, %v2110_v6  ;;  %v2204_v62 = vadd.f32 0.0036580483, %v2203_v19  ;;  %v2215_v59 = vadd.f32 0.014752088, %v2214_v56 }
 0x1f6   : > { %v2242_v9 = vadd.f32 0.00028619796, %v2241_v13  ;;  %v2116_v39 = vmul.f32 %v2115_v63, %v2091_v32  ;;  %v2252_v17 = vmul.f32 3.8918573e-05, %v9530_v57  ;;  %v9549_v18 = vmul.f32 0.70710677, %v9541_v15 }
 0x1f7   : > { %v2180_v45 = vmul.f32 %v2179_v55, %v9468_v52  ;;  %v7427_v23 = vpop.eup %7426  ;;  %v2205_v53 = vmul.f32 %v2204_v62, %v9505_v2  ;;  %v2216_v34 = vmul.f32 %v2215_v59, %v9505_v2  ;;  %v2151_v48 = vand.u32 2147483647, %v2141_v4 }
 0x1f8   : > { %v2243_v20 = vmul.f32 %v2242_v9, %v9530_v57  ;;  %v7174_v21 = vclamps-f32 %v2116_v39, 1.0  ;;  %v2143_v25 = vmul.f32 %v7427_v23, %v2141_v4  ;;  %v2153_v54 = vand.u32 2147483648, %v2141_v4 }
 0x1f9   : > { %vm2148_vm9 = vweird.f32 %v7427_v23  ;;  %v2181_v3 = vadd.f32 1.0, %v2180_v45  ;;  %v2206_v24 = vadd.f32 0.05243302, %v2205_v53  ;;  %v2217_v26 = vadd.f32 0.112945676, %v2216_v34 }
 0x1fa   : > { %v6480_v41 = vmul.f32 0.5, %v7174_v21  ;;  %v2144_v46 = vsub.f32 1.0, %v2143_v25  ;;  %v2244_v5 = vadd.f32 0.0036580483, %v2243_v20  ;;  %v2253_v27 = vadd.f32 0.001143296, %v2252_v17  ;;  %vm9559_vm10 = vmor %vm2147_vm8, %vm2148_vm9 }
 0x1fb   : > { %v2131_v33 = vmul.f32 %v2130_v29, %v9403_v49  ;;  %v2169_v44 = vmul.f32 %v2168_v58, %v9468_v52  ;;  %7428 = vrcp.f32 %v2181_v3  ;;  %v2279_v22 = vmul.f32 %v9549_v18, %v9549_v18 }
 0x1fc   : > { %v6630_v50 = vadd.f32 0.5, %v6480_v41  ;;  %v2145_v35 = vmul.f32 %v7427_v23, %v2144_v46  ;;  %v2207_v31 = vmul.f32 %v2206_v24, %v9505_v2  ;;  %v2218_v38 = vmul.f32 %v2217_v26, %v9505_v2 }
 0x1fd   : > { %vm9563_vm11 = vcmp.eq.f32.partialorder %v2151_v48, 8.507059e+37  ;;  %v2154_v52 = vor.u32 1.1754944e-38, %v2153_v54  ;;  %v2245_v32 = vmul.f32 %v2244_v5, %v9530_v57  ;;  %v2254_v10 = vmul.f32 %v2253_v27, %v9530_v57 }
 0x1fe   : > { %v6780_v28 = vmul.f32 %v6630_v50, %v9346_v37  ;;  %v2146_v0 = vadd.f32 %v7427_v23, %v2145_v35  ;;  %v2208_v43 = vadd.f32 0.18741608, %v2207_v31  ;;  %v2219_v1 = vadd.f32 0.4994258, %v2218_v38 }
 0x1ff   : > { %v2246_v4 = vadd.f32 0.05243302, %v2245_v32  ;;  %v2255_v60 = vadd.f32 0.014752088, %v2254_v10  ;;  %v9573_v61 = vmin.f32 %v2279_v22, 16.0  ;;  %vm2187_vm12 = vweird.f32 %v2181_v3 }
 0x200   : > { %6930 = vst [vmem:[%s8053_s16 + $0x148] sm:$0xff] %v6780_v28  ;;  %v2150_v30 = vsel %vm9559_vm10, %v7427_v23, %v2146_v0  ;;  %v2170_v40 = vadd.f32 1.1283791, %v2169_v44  ;;  %v2191_v51 = vand.u32 2147483647, %v2181_v3  ;;  %v2220_v19 = vmul.f32 %v2219_v1, %v9505_v2 }
 0x201   : > { %v7429_v56 = vpop.eup %7428  ;;  %v2155_v37 = vsel %vm9563_vm11, %v2154_v52, %v2150_v30  ;;  %v2256_v13 = vmul.f32 %v2255_v60, %v9530_v57  ;;  %v2281_v6 = vmul.f32 2.1237322e-06, %v9573_v61  ;;  %v9584_v29 = vmul.f32 0.70710677, %v9571_v12 }
 0x202   : > { %v2156_v55 = vmul.f32 %v2155_v37, %v2131_v33  ;;  %v2183_v63 = vmul.f32 %v7429_v56, %v2181_v3  ;;  %v2247_v62 = vmul.f32 %v2246_v4, %v9530_v57  ;;  %v2193_v59 = vand.u32 2147483648, %v2181_v3 }
 0x203   : > { %v2209_v9 = vmul.f32 %v2208_v43, %v9505_v2  ;;  %v2221_v39 = vadd.f32 1.0, %v2220_v19  ;;  %v2257_v58 = vadd.f32 0.112945676, %v2256_v13  ;;  %vm2188_vm13 = vweird.f32 %v7429_v56 }
 0x204   : > { %v7175_v45 = vclamps-f32 %v2156_v55, 1.0  ;;  %v2184_v17 = vsub.f32 1.0, %v2183_v63  ;;  %v2282_v23 = vadd.f32 0.00028619796, %v2281_v6  ;;  %v2171_v53 = vmul.f32 %v2170_v40, %v9445_v36  ;;  %vm9597_vm15 = vmor %vm2187_vm12, %vm2188_vm13  ;;  %v9628_v63 = vld [vmem:[%s7840_s24 + $0x180] sm:$0xff] }
 0x205   : > { %vm9589_vm14 = vcmp.eq.f32.partialorder %v2191_v51, 8.507059e+37  ;;  %7430 = vrcp.f32 %v2221_v39  ;;  %v2319_v20 = vmul.f32 %v9584_v29, %v9584_v29  ;;  %v2248_v48 = vadd.f32 0.18741608, %v2247_v62  ;;  %v9631_v62 = vld [vmem:[%s7840_s24 + $0x188] sm:$0xff] }
 0x206   : > { %v6481_v21 = vmul.f32 0.5, %v7175_v45  ;;  %v2185_v25 = vmul.f32 %v7429_v56, %v2184_v17  ;;  %v2258_v2 = vmul.f32 %v2257_v58, %v9530_v57  ;;  %v2194_v24 = vor.u32 1.1754944e-38, %v2193_v59 }
 0x207   : > { %v2210_v36 = vadd.f32 1.1283791, %v2209_v9  ;;  %v2283_v26 = vmul.f32 %v2282_v23, %v9573_v61  ;;  %v2292_v41 = vmul.f32 3.8918573e-05, %v9573_v61  ;;  %v2231_v27 = vand.u32 2147483647, %v2221_v39 }
 0x208   : > { %v6631_v46 = vadd.f32 0.5, %v6481_v21  ;;  %v2186_v5 = vadd.f32 %v7429_v56, %v2185_v25  ;;  %v2259_v33 = vadd.f32 0.4994258, %v2258_v2  ;;  %v2233_v44 = vand.u32 2147483648, %v2221_v39 }
 0x209   : > { %v2284_v22 = vadd.f32 0.0036580483, %v2283_v26  ;;  %v2293_v50 = vadd.f32 0.001143296, %v2292_v41  ;;  %v9603_v35 = vmin.f32 %v2319_v20, 16.0  ;;  %v2249_v38 = vmul.f32 %v2248_v48, %v9530_v57 }
 0x20a   : > { %v6781_v3 = vmul.f32 %v6631_v46, %v9388_v8  ;;  %v2190_v31 = vsel %vm9597_vm15, %v7429_v56, %v2186_v5  ;;  %v2260_v7 = vmul.f32 %v2259_v33, %v9530_v57  ;;  %v2211_v8 = vmul.f32 %v2210_v36, %v9472_v47 }
 0x20b   : > { %v7431_v49 = vpop.eup %7430  ;;  %v2195_v52 = vsel %vm9589_vm14, %v2194_v24, %v2190_v31  ;;  %v2285_v32 = vmul.f32 %v2284_v22, %v9573_v61  ;;  %v2294_v10 = vmul.f32 %v2293_v50, %v9573_v61  ;;  %v2321_v28 = vmul.f32 2.1237322e-06, %v9603_v35 }
 0x20c   : > { %6931 = vst [vmem:[%s8053_s16 + $0x150] sm:$0xff] %v6781_v3  ;;  %v2196_v0 = vmul.f32 %v2195_v52, %v2171_v53  ;;  %v2223_v43 = vmul.f32 %v7431_v49, %v2221_v39  ;;  %v9617_v1 = vadd.f32 1.0, %v2260_v7  ;;  %vm2227_vm0 = vweird.f32 %v2221_v39 }
 0x20d   : > { %v2286_v57 = vadd.f32 0.05243302, %v2285_v32  ;;  %v2295_v4 = vadd.f32 0.014752088, %v2294_v10  ;;  %v2322_v60 = vadd.f32 0.00028619796, %v2321_v28  ;;  %vm2228_vm1 = vweird.f32 %v7431_v49 }
 0x20e   : > { %v7176_v30 = vclamps-f32 %v2196_v0, 1.0  ;;  %v2224_v40 = vsub.f32 1.0, %v2223_v43  ;;  %7432 = vrcp.f32 %v9617_v1  ;;  %vm9620_vm2 = vcmp.eq.f32.partialorder %v2231_v27, 8.507059e+37  ;;  %vm9634_vm3 = vmor %vm2227_vm0, %vm2228_vm1 }
 0x20f   : > { %v2234_v19 = vor.u32 1.1754944e-38, %v2233_v44  ;;  %v2250_v47 = vadd.f32 1.1283791, %v2249_v38  ;;  %v2296_v56 = vmul.f32 %v2295_v4, %v9573_v61  ;;  %v2323_v6 = vmul.f32 %v2322_v60, %v9603_v35 }
 0x210   : > { %v6482_v37 = vmul.f32 0.5, %v7176_v30  ;;  %v2225_v13 = vmul.f32 %v7431_v49, %v2224_v40  ;;  %v2332_v55 = vmul.f32 3.8918573e-05, %v9603_v35  ;;  %vm2267_vm4 = vweird.f32 %v9617_v1 }
 0x211   : > { %v2273_v9 = vand.u32 2147483648, %v9617_v1  ;;  %v2287_v58 = vmul.f32 %v2286_v57, %v9573_v61  ;;  %v2297_v45 = vadd.f32 0.112945676, %v2296_v56  ;;  %v2324_v53 = vadd.f32 0.0036580483, %v2323_v6 }
 0x212   : > { %v6632_v17 = vadd.f32 0.5, %v6482_v37  ;;  %v2226_v23 = vadd.f32 %v7431_v49, %v2225_v13  ;;  %v2333_v34 = vadd.f32 0.001143296, %v2332_v55  ;;  %v2271_v20 = vand.u32 2147483647, %v9617_v1 }
 0x213   : > { %v2298_v39 = vmul.f32 %v2297_v45, %v9573_v61  ;;  %v9644_v21 = vmul.f32 0.70710677, %v9628_v63  ;;  %v9647_v25 = vmul.f32 0.70710677, %v9631_v62  ;;  %v2325_v24 = vmul.f32 %v2324_v53, %v9603_v35 }
 0x214   : > { %v7433_v48 = vpop.eup %7432  ;;  %v6782_v2 = vmul.f32 %v6632_v17, %v9436_v11  ;;  %v2230_v54 = vsel %vm9634_vm3, %v7431_v49, %v2226_v23  ;;  %v2334_v36 = vmul.f32 %v2333_v34, %v9603_v35  ;;  %v2274_v46 = vor.u32 1.1754944e-38, %v2273_v9 }
 0x215   : > { %v2235_v26 = vsel %vm9620_vm2, %v2234_v19, %v2230_v54  ;;  %v2263_v41 = vmul.f32 %v7433_v48, %v9617_v1  ;;  %v2288_v5 = vadd.f32 0.18741608, %v2287_v58  ;;  %v2299_v33 = vadd.f32 0.4994258, %v2298_v39  ;;  %v9681_v19 = vld [vmem:[%s7840_s24 + $0x190] sm:$0xff] }
 0x216   : > { %6932 = vst [vmem:[%s8053_s16 + $0x158] sm:$0xff] %v6782_v2  ;;  %v2236_v27 = vmul.f32 %v2235_v26, %v2211_v8  ;;  %v2326_v44 = vadd.f32 0.05243302, %v2325_v24  ;;  %v2359_v11 = vmul.f32 %v9644_v21, %v9644_v21  ;;  %vm2268_vm5 = vweird.f32 %v7433_v48 }
 0x217   : > { %v2264_v22 = vsub.f32 1.0, %v2263_v41  ;;  %v2335_v50 = vadd.f32 0.014752088, %v2334_v36  ;;  %v2399_v3 = vmul.f32 %v9647_v25, %v9647_v25  ;;  %v2300_v38 = vmul.f32 %v2299_v33, %v9573_v61  ;;  %vm9672_vm6 = vmor %vm2267_vm4, %vm2268_vm5 }
 0x218   : > { %v7177_v31 = vclamps-f32 %v2236_v27, 1.0  ;;  %v2327_v7 = vmul.f32 %v2326_v44, %v9603_v35  ;;  %v9664_v49 = vmin.f32 %v2359_v11, 16.0  ;;  %v2289_v32 = vmul.f32 %v2288_v5, %v9573_v61 }
 0x219   : > { %v2265_v52 = vmul.f32 %v7433_v48, %v2264_v22  ;;  %v2336_v10 = vmul.f32 %v2335_v50, %v9603_v35  ;;  %v9668_v28 = vmin.f32 %v2399_v3, 16.0  ;;  %v2301_v43 = vadd.f32 1.0, %v2300_v38 }
 0x21a   : > { %v6483_v0 = vmul.f32 0.5, %v7177_v31  ;;  %v2328_v57 = vadd.f32 0.18741608, %v2327_v7  ;;  %v2361_v4 = vmul.f32 2.1237322e-06, %v9664_v49  ;;  %v2251_v60 = vmul.f32 %v2250_v47, %v9508_v14 }
 0x21b   : > { %v2266_v30 = vadd.f32 %v7433_v48, %v2265_v52  ;;  %vm2272_vm7 = vcmp.eq.f32.partialorder %v2271_v20, 8.507059e+37  ;;  %v2337_v61 = vadd.f32 0.112945676, %v2336_v10  ;;  %7434 = vrcp.f32 %v2301_v43 }
 0x21c   : > { %v6633_v40 = vadd.f32 0.5, %v6483_v0  ;;  %v2372_v51 = vmul.f32 3.8918573e-05, %v9664_v49  ;;  %v2401_v1 = vmul.f32 2.1237322e-06, %v9668_v28  ;;  %v2329_v6 = vmul.f32 %v2328_v57, %v9603_v35 }
 0x21d   : > { %v2270_v56 = vsel %vm9672_vm6, %v7433_v48, %v2266_v30  ;;  %v2290_v37 = vadd.f32 1.1283791, %v2289_v32  ;;  %v2338_v13 = vmul.f32 %v2337_v61, %v9603_v35  ;;  %v2362_v55 = vadd.f32 0.00028619796, %v2361_v4 }
 0x21e   : > { %v6783_v14 = vmul.f32 %v6633_v40, %v9454_v16  ;;  %v2275_v47 = vsel %vm2272_vm7, %v2274_v46, %v2270_v56  ;;  %v2311_v9 = vand.u32 2147483647, %v2301_v43  ;;  %v9689_v45 = vmul.f32 0.70710677, %v9681_v19  ;;  %v9723_v40 = vld [vmem:[%s7840_s24 + $0x198] sm:$0xff] }
 0x21f   : > { %v2276_v59 = vmul.f32 %v2275_v47, %v2251_v60  ;;  %v2339_v58 = vadd.f32 0.4994258, %v2338_v13  ;;  %vm2307_vm8 = vweird.f32 %v2301_v43  ;;  %v2363_v17 = vmul.f32 %v2362_v55, %v9664_v49 }
 0x220   : > { %6933 = vst [vmem:[%s8053_s16 + $0x160] sm:$0xff] %v6783_v14  ;;  %v2373_v23 = vadd.f32 0.001143296, %v2372_v51  ;;  %v2402_v53 = vadd.f32 0.00028619796, %v2401_v1  ;;  %v2313_v20 = vand.u32 2147483648, %v2301_v43  ;;  %v2439_v5 = vmul.f32 %v9689_v45, %v9689_v45 }
 0x221   : > { %v7178_v34 = vclamps-f32 %v2276_v59, 1.0  ;;  %v2340_v16 = vmul.f32 %v2339_v58, %v9603_v35  ;;  %v2412_v39 = vmul.f32 3.8918573e-05, %v9668_v28  ;;  %v7435_v48 = vpop.eup %7434  ;;  %v2330_v2 = vadd.f32 1.1283791, %v2329_v6 }
 0x222   : > { %v2364_v54 = vadd.f32 0.0036580483, %v2363_v17  ;;  %v2374_v24 = vmul.f32 %v2373_v23, %v9664_v49  ;;  %v2403_v36 = vmul.f32 %v2402_v53, %v9668_v28  ;;  %v2303_v41 = vmul.f32 %v7435_v48, %v2301_v43 }
 0x223   : > { %v6484_v26 = vmul.f32 0.5, %v7178_v34  ;;  %v9697_v46 = vadd.f32 1.0, %v2340_v16  ;;  %v2413_v44 = vadd.f32 0.001143296, %v2412_v39  ;;  %vm2308_vm9 = vweird.f32 %v7435_v48 }
 0x224   : > { %v2365_v27 = vmul.f32 %v2364_v54, %v9664_v49  ;;  %v2375_v33 = vadd.f32 0.014752088, %v2374_v24  ;;  %v2404_v35 = vadd.f32 0.0036580483, %v2403_v36  ;;  %v2304_v22 = vsub.f32 1.0, %v2303_v41  ;;  %vm9713_vm11 = vmor %vm2307_vm8, %vm2308_vm9 }
 0x225   : > { %v6634_v11 = vadd.f32 0.5, %v6484_v26  ;;  %7436 = vrcp.f32 %v9697_v46  ;;  %v2291_v50 = vmul.f32 %v2290_v37, %v9549_v18  ;;  %vm9704_vm10 = vcmp.eq.f32.partialorder %v2311_v9, 8.507059e+37 }
 0x226   : > { %v2366_v31 = vadd.f32 0.05243302, %v2365_v27  ;;  %v2376_v38 = vmul.f32 %v2375_v33, %v9664_v49  ;;  %v2305_v52 = vmul.f32 %v7435_v48, %v2304_v22  ;;  %v2405_v32 = vmul.f32 %v2404_v35, %v9668_v28 }
 0x227   : > { %v6784_v7 = vmul.f32 %v6634_v11, %v9498_v42  ;;  %v2414_v10 = vmul.f32 %v2413_v44, %v9668_v28  ;;  %v2314_v18 = vor.u32 1.1754944e-38, %v2313_v20  ;;  %v9718_v4 = vmin.f32 %v2439_v5, 16.0 }
 0x228   : > { %v2367_v8 = vmul.f32 %v2366_v31, %v9664_v49  ;;  %v2377_v57 = vadd.f32 0.112945676, %v2376_v38  ;;  %v2306_v60 = vadd.f32 %v7435_v48, %v2305_v52  ;;  %v2331_v42 = vmul.f32 %v2330_v2, %v9584_v29 }
 0x229   : > { %6934 = vst [vmem:[%s8053_s16 + $0x168] sm:$0xff] %v6784_v7  ;;  %v2406_v30 = vadd.f32 0.05243302, %v2405_v32  ;;  %v2415_v61 = vadd.f32 0.014752088, %v2414_v10  ;;  %vm2347_vm12 = vweird.f32 %v9697_v46  ;;  %v2353_v58 = vand.u32 2147483648, %v9697_v46 }
 0x22a   : > { %v2368_v43 = vadd.f32 0.18741608, %v2367_v8  ;;  %v2378_v51 = vmul.f32 %v2377_v57, %v9664_v49  ;;  %v2441_v1 = vmul.f32 2.1237322e-06, %v9718_v4  ;;  %v2310_v37 = vsel %vm9713_vm11, %v7435_v48, %v2306_v60 }
 0x22b   : > { %v7437_v56 = vpop.eup %7436  ;;  %v2351_v13 = vand.u32 2147483647, %v9697_v46  ;;  %v2407_v14 = vmul.f32 %v2406_v30, %v9668_v28  ;;  %v2416_v29 = vmul.f32 %v2415_v61, %v9668_v28  ;;  %v2315_v47 = vsel %vm9704_vm10, %v2314_v18, %v2310_v37 }
 0x22c   : > { %v2343_v6 = vmul.f32 %v7437_v56, %v9697_v46  ;;  %v2452_v55 = vmul.f32 3.8918573e-05, %v9718_v4  ;;  %v9738_v59 = vmul.f32 0.70710677, %v9723_v40  ;;  %v2316_v9 = vmul.f32 %v2315_v47, %v2291_v50 }
 0x22d   : > { %v2379_v17 = vadd.f32 0.4994258, %v2378_v51  ;;  %v2417_v23 = vadd.f32 0.112945676, %v2416_v29  ;;  %vm2348_vm13 = vweird.f32 %v7437_v56  ;;  %v2369_v34 = vmul.f32 %v2368_v43, %v9664_v49 }
 0x22e   : > { %v2344_v53 = vsub.f32 1.0, %v2343_v6  ;;  %v2442_v20 = vadd.f32 0.00028619796, %v2441_v1  ;;  %v7179_v16 = vclamps-f32 %v2316_v9, 1.0  ;;  %v2408_v48 = vadd.f32 0.18741608, %v2407_v14  ;;  %vm9749_vm14 = vmor %vm2347_vm12, %vm2348_vm13 }
 0x22f   : > { %v2380_v39 = vmul.f32 %v2379_v17, %v9664_v49  ;;  %v2418_v2 = vmul.f32 %v2417_v23, %v9668_v28  ;;  %v2453_v36 = vadd.f32 0.001143296, %v2452_v55  ;;  %v2479_v26 = vmul.f32 %v9738_v59, %v9738_v59 }
 0x230   : > { %v2345_v54 = vmul.f32 %v7437_v56, %v2344_v53  ;;  %v2443_v24 = vmul.f32 %v2442_v20, %v9718_v4  ;;  %v6485_v41 = vmul.f32 0.5, %v7179_v16  ;;  %v2354_v27 = vor.u32 1.1754944e-38, %v2353_v58 }
 0x231   : > { %v2381_v33 = vadd.f32 1.0, %v2380_v39  ;;  %v2419_v49 = vadd.f32 0.4994258, %v2418_v2  ;;  %vm2352_vm15 = vcmp.eq.f32.partialorder %v2351_v13, 8.507059e+37  ;;  %v2454_v11 = vmul.f32 %v2453_v36, %v9718_v4 }
 0x232   : > { %v2346_v35 = vadd.f32 %v7437_v56, %v2345_v54  ;;  %v2444_v44 = vadd.f32 0.0036580483, %v2443_v24  ;;  %v6635_v22 = vadd.f32 0.5, %v6485_v41  ;;  %v2370_v50 = vadd.f32 1.1283791, %v2369_v34  ;;  %v9789_v54 = vld [vmem:[%s7840_s24 + $0x1a8] sm:$0xff] }
 0x233   : > { %7438 = vrcp.f32 %v2381_v33  ;;  %v2409_v46 = vmul.f32 %v2408_v48, %v9668_v28  ;;  %v2420_v31 = vmul.f32 %v2419_v49, %v9668_v28  ;;  %v9758_v38 = vmin.f32 %v2479_v26, 16.0 }
 0x234   : > { %v2350_v3 = vsel %vm9749_vm14, %v7437_v56, %v2346_v35  ;;  %v6785_v7 = vmul.f32 %v6635_v22, %v9541_v15  ;;  %v2391_v32 = vand.u32 2147483647, %v2381_v33  ;;  %v2445_v10 = vmul.f32 %v2444_v44, %v9718_v4  ;;  %v9771_v56 = vld [vmem:[%s7840_s24 + $0x1a0] sm:$0xff] }
 0x235   : > { %v2355_v52 = vsel %vm2352_vm15, %v2354_v27, %v2350_v3  ;;  %v2393_v18 = vand.u32 2147483648, %v2381_v33  ;;  %v9762_v8 = vadd.f32 1.0, %v2420_v31  ;;  %v2455_v57 = vadd.f32 0.014752088, %v2454_v11 }
 0x236   : > { %v2356_v0 = vmul.f32 %v2355_v52, %v2331_v42  ;;  %6935 = vst [vmem:[%s8053_s16 + $0x170] sm:$0xff] %v6785_v7  ;;  %v2446_v60 = vadd.f32 0.05243302, %v2445_v10  ;;  %v2481_v30 = vmul.f32 2.1237322e-06, %v9758_v38  ;;  %v2371_v28 = vmul.f32 %v2370_v50, %v9644_v21 }
 0x237   : > { %v2410_v43 = vadd.f32 1.1283791, %v2409_v46  ;;  %7440 = vrcp.f32 %v9762_v8  ;;  %vm2387_vm0 = vweird.f32 %v2381_v33  ;;  %v2456_v42 = vmul.f32 %v2455_v57, %v9718_v4 }
 0x238   : > { %v7180_v61 = vclamps-f32 %v2356_v0, 1.0  ;;  %v2447_v51 = vmul.f32 %v2446_v60, %v9718_v4  ;;  %v2482_v1 = vadd.f32 0.00028619796, %v2481_v30  ;;  %vm9773_vm1 = vcmp.eq.f32.partialorder %v2391_v32, 8.507059e+37 }
 0x239   : > { %v7439_v15 = vpop.eup %7438  ;;  %v2394_v29 = vor.u32 1.1754944e-38, %v2393_v18  ;;  %v2457_v47 = vadd.f32 0.112945676, %v2456_v42  ;;  %v2492_v58 = vmul.f32 3.8918573e-05, %v9758_v38  ;;  %vm2427_vm3 = vweird.f32 %v9762_v8 }
 0x23a   : > { %v6486_v37 = vmul.f32 0.5, %v7180_v61  ;;  %v2383_v13 = vmul.f32 %v7439_v15, %v2381_v33  ;;  %vm2388_vm2 = vweird.f32 %v7439_v15  ;;  %v2448_v21 = vadd.f32 0.18741608, %v2447_v51 }
 0x23b   : > { %v2483_v6 = vmul.f32 %v2482_v1, %v9758_v38  ;;  %v9780_v17 = vmul.f32 0.70710677, %v9771_v56  ;;  %v2431_v23 = vand.u32 2147483647, %v9762_v8  ;;  %v2458_v53 = vmul.f32 %v2457_v47, %v9718_v4  ;;  %vm9793_vm4 = vmor %vm2387_vm0, %vm2388_vm2 }
 0x23c   : > { %v6636_v55 = vadd.f32 0.5, %v6486_v37  ;;  %v2384_v9 = vsub.f32 1.0, %v2383_v13  ;;  %v2493_v48 = vadd.f32 0.001143296, %v2492_v58  ;;  %v2433_v26 = vand.u32 2147483648, %v9762_v8  ;;  %v9833_v13 = vld [vmem:[%s7840_s24 + $0x1b0] sm:$0xff] }
 0x23d   : > { %v2484_v34 = vadd.f32 0.0036580483, %v2483_v6  ;;  %v7441_v20 = vpop.eup %7440  ;;  %v2519_v2 = vmul.f32 %v9780_v17, %v9780_v17  ;;  %v2449_v41 = vmul.f32 %v2448_v21, %v9718_v4  ;;  %v9807_v11 = vmul.f32 0.70710677, %v9789_v54 }
 0x23e   : > { %v6786_v16 = vmul.f32 %v6636_v55, %v9571_v12  ;;  %v2385_v39 = vmul.f32 %v7439_v15, %v2384_v9  ;;  %v2423_v36 = vmul.f32 %v7441_v20, %v9762_v8  ;;  %v2459_v12 = vadd.f32 0.4994258, %v2458_v53 }
 0x23f   : > { %v2485_v27 = vmul.f32 %v2484_v34, %v9758_v38  ;;  %v2494_v49 = vmul.f32 %v2493_v48, %v9758_v38  ;;  %v9803_v35 = vmin.f32 %v2519_v2, 16.0  ;;  %vm2428_vm5 = vweird.f32 %v7441_v20 }
 0x240   : > { %6936 = vst [vmem:[%s8053_s16 + $0x178] sm:$0xff] %v6786_v16  ;;  %v2386_v5 = vadd.f32 %v7439_v15, %v2385_v39  ;;  %v2424_v33 = vsub.f32 1.0, %v2423_v36  ;;  %v2460_v44 = vmul.f32 %v2459_v12, %v9718_v4  ;;  %vm9819_vm6 = vmor %vm2427_vm3, %vm2428_vm5  ;;  %v2434_v0 = vor.u32 1.1754944e-38, %v2433_v26 }
 0x241   : > { %v2486_v50 = vadd.f32 0.05243302, %v2485_v27  ;;  %v2495_v3 = vadd.f32 0.014752088, %v2494_v49  ;;  %v2521_v46 = vmul.f32 2.1237322e-06, %v9803_v35  ;;  %v2411_v60 = vmul.f32 %v2410_v43, %v9647_v25 }
 0x242   : > { %v2390_v22 = vsel %vm9793_vm4, %v7439_v15, %v2386_v5  ;;  %v2425_v7 = vmul.f32 %v7441_v20, %v2424_v33  ;;  %v9814_v52 = vadd.f32 1.0, %v2460_v44  ;;  %v2532_v32 = vmul.f32 3.8918573e-05, %v9803_v35 }
 0x243   : > { %v2395_v31 = vsel %vm9773_vm1, %v2394_v29, %v2390_v22  ;;  %v2496_v18 = vmul.f32 %v2495_v3, %v9758_v38  ;;  %v2522_v57 = vadd.f32 0.00028619796, %v2521_v46  ;;  %vm2432_vm7 = vcmp.eq.f32.partialorder %v2431_v23, 8.507059e+37 }
 0x244   : > { %v2396_v10 = vmul.f32 %v2395_v31, %v2371_v28  ;;  %v2426_v30 = vadd.f32 %v7441_v20, %v2425_v7  ;;  %7442 = vrcp.f32 %v9814_v52  ;;  %v2450_v15 = vadd.f32 1.1283791, %v2449_v41 }
 0x245   : > { %v2497_v28 = vadd.f32 0.112945676, %v2496_v18  ;;  %v2559_v8 = vmul.f32 %v9807_v11, %v9807_v11  ;;  %v2487_v42 = vmul.f32 %v2486_v50, %v9758_v38  ;;  %v2523_v1 = vmul.f32 %v2522_v57, %v9803_v35 }
 0x246   : > { %v7181_v61 = vclamps-f32 %v2396_v10, 1.0  ;;  %v2430_v51 = vsel %vm9819_vm6, %v7441_v20, %v2426_v30  ;;  %v2533_v37 = vadd.f32 0.001143296, %v2532_v32  ;;  %vm2467_vm8 = vweird.f32 %v9814_v52 }
 0x247   : > { %v2435_v43 = vsel %vm2432_vm7, %v2434_v0, %v2430_v51  ;;  %v2471_v14 = vand.u32 2147483647, %v9814_v52  ;;  %v2498_v21 = vmul.f32 %v2497_v28, %v9758_v38  ;;  %v2524_v47 = vadd.f32 0.0036580483, %v2523_v1 }
 0x248   : > { %v6487_v25 = vmul.f32 0.5, %v7181_v61  ;;  %v2436_v29 = vmul.f32 %v2435_v43, %v2411_v60  ;;  %v2534_v6 = vmul.f32 %v2533_v37, %v9803_v35  ;;  %v2473_v9 = vand.u32 2147483648, %v9814_v52 }
 0x249   : > { %v9840_v58 = vmin.f32 %v2559_v8, 16.0  ;;  %v9843_v23 = vmul.f32 0.70710677, %v9833_v13  ;;  %v2499_v20 = vadd.f32 0.4994258, %v2498_v21  ;;  %v2525_v16 = vmul.f32 %v2524_v47, %v9803_v35 }
 0x24a   : > { %v6637_v55 = vadd.f32 0.5, %v6487_v25  ;;  %v7443_v53 = vpop.eup %7442  ;;  %v7182_v34 = vclamps-f32 %v2436_v29, 1.0  ;;  %v2535_v39 = vadd.f32 0.014752088, %v2534_v6  ;;  %v2488_v24 = vadd.f32 0.18741608, %v2487_v42 }
 0x24b   : > { %v2463_v2 = vmul.f32 %v7443_v53, %v9814_v52  ;;  %vm2468_vm9 = vweird.f32 %v7443_v53  ;;  %v2500_v26 = vmul.f32 %v2499_v20, %v9758_v38  ;;  %v2526_v41 = vadd.f32 0.05243302, %v2525_v16 }
 0x24c   : > { %v6787_v48 = vmul.f32 %v6637_v55, %v9628_v63  ;;  %v6488_v36 = vmul.f32 0.5, %v7182_v34  ;;  %v2536_v12 = vmul.f32 %v2535_v39, %v9803_v35  ;;  %v2561_v27 = vmul.f32 2.1237322e-06, %v9840_v58  ;;  %vm9861_vm10 = vmor %vm2467_vm8, %vm2468_vm9 }
 0x24d   : > { %v2464_v5 = vsub.f32 1.0, %v2463_v2  ;;  %v2572_v49 = vmul.f32 3.8918573e-05, %v9840_v58  ;;  %v2599_v33 = vmul.f32 %v9843_v23, %v9843_v23  ;;  %v2451_v44 = vmul.f32 %v2450_v15, %v9689_v45  ;;  %v9876_v15 = vld [vmem:[%s7840_s24 + $0x1b8] sm:$0xff] }
 0x24e   : > { %6937 = vst [vmem:[%s8053_s16 + $0x180] sm:$0xff] %v6787_v48  ;;  %v6638_v63 = vadd.f32 0.5, %v6488_v36  ;;  %v2501_v22 = vadd.f32 1.0, %v2500_v26  ;;  %v2537_v50 = vadd.f32 0.112945676, %v2536_v12  ;;  %v2489_v46 = vmul.f32 %v2488_v24, %v9758_v38 }
 0x24f   : > { %v2465_v3 = vmul.f32 %v7443_v53, %v2464_v5  ;;  %v2562_v31 = vadd.f32 0.00028619796, %v2561_v27  ;;  %v2573_v7 = vadd.f32 0.001143296, %v2572_v49  ;;  %v2474_v4 = vor.u32 1.1754944e-38, %v2473_v9 }
 0x250   : > { %v6788_v32 = vmul.f32 %v6638_v63, %v9631_v62  ;;  %7444 = vrcp.f32 %v2501_v22  ;;  %v9865_v45 = vmin.f32 %v2599_v33, 16.0  ;;  %vm2472_vm11 = vcmp.eq.f32.partialorder %v2471_v14, 8.507059e+37 }
 0x251   : > { %v2466_v0 = vadd.f32 %v7443_v53, %v2465_v3  ;;  %v2527_v38 = vmul.f32 %v2526_v41, %v9803_v35  ;;  %v2538_v18 = vmul.f32 %v2537_v50, %v9803_v35  ;;  %v2563_v62 = vmul.f32 %v2562_v31, %v9840_v58 }
 0x252   : > { %6938 = vst [vmem:[%s8053_s16 + $0x188] sm:$0xff] %v6788_v32  ;;  %v2574_v52 = vmul.f32 %v2573_v7, %v9840_v58  ;;  %v2601_v57 = vmul.f32 2.1237322e-06, %v9865_v45  ;;  %v2490_v30 = vadd.f32 1.1283791, %v2489_v46  ;;  %vm2507_vm12 = vweird.f32 %v2501_v22  ;;  %v9906_v32 = vld [vmem:[%s7840_s24 + $0x1c0] sm:$0xff] }
 0x253   : > { %v2470_v60 = vsel %vm9861_vm10, %v7443_v53, %v2466_v0  ;;  %v2539_v61 = vadd.f32 0.4994258, %v2538_v18  ;;  %v2564_v8 = vadd.f32 0.0036580483, %v2563_v62  ;;  %v2528_v37 = vadd.f32 0.18741608, %v2527_v38 }
 0x254   : > { %v2475_v28 = vsel %vm2472_vm11, %v2474_v4, %v2470_v60  ;;  %v2575_v51 = vadd.f32 0.014752088, %v2574_v52  ;;  %v2602_v42 = vadd.f32 0.00028619796, %v2601_v57  ;;  %v2612_v43 = vmul.f32 3.8918573e-05, %v9865_v45 }
 0x255   : > { %v2476_v1 = vmul.f32 %v2475_v28, %v2451_v44  ;;  %v2540_v25 = vmul.f32 %v2539_v61, %v9803_v35  ;;  %v2565_v29 = vmul.f32 %v2564_v8, %v9840_v58  ;;  %v9884_v6 = vmul.f32 0.70710677, %v9876_v15 }
 0x256   : > { %v7445_v14 = vpop.eup %7444  ;;  %v2576_v21 = vmul.f32 %v2575_v51, %v9840_v58  ;;  %v2603_v47 = vmul.f32 %v2602_v42, %v9865_v45  ;;  %v2511_v53 = vand.u32 2147483647, %v2501_v22  ;;  %v2513_v34 = vand.u32 2147483648, %v2501_v22 }
 0x257   : > { %v7183_v55 = vclamps-f32 %v2476_v1, 1.0  ;;  %v2503_v9 = vmul.f32 %v7445_v14, %v2501_v22  ;;  %vm2508_vm13 = vweird.f32 %v7445_v14  ;;  %v2541_v20 = vadd.f32 1.0, %v2540_v25 }
 0x258   : > { %v2566_v16 = vadd.f32 0.05243302, %v2565_v29  ;;  %v2577_v39 = vadd.f32 0.112945676, %v2576_v21  ;;  %v2604_v24 = vadd.f32 0.0036580483, %v2603_v47  ;;  %v2491_v26 = vmul.f32 %v2490_v30, %v9738_v59  ;;  %vm9894_vm14 = vmor %vm2507_vm12, %vm2508_vm13 }
 0x259   : > { %v6489_v48 = vmul.f32 0.5, %v7183_v55  ;;  %v2504_v2 = vsub.f32 1.0, %v2503_v9  ;;  %v2613_v36 = vadd.f32 0.001143296, %v2612_v43  ;;  %v2529_v41 = vmul.f32 %v2528_v37, %v9803_v35 }
 0x25a   : > { %7446 = vrcp.f32 %v2541_v20  ;;  %v2639_v12 = vmul.f32 %v9884_v6, %v9884_v6  ;;  %v2567_v49 = vmul.f32 %v2566_v16, %v9840_v58  ;;  %v2578_v33 = vmul.f32 %v2577_v39, %v9840_v58 }
 0x25b   : > { %v6639_v5 = vadd.f32 0.5, %v6489_v48  ;;  %v2505_v27 = vmul.f32 %v7445_v14, %v2504_v2  ;;  %vm9898_vm15 = vcmp.eq.f32.partialorder %v2511_v53, 8.507059e+37  ;;  %v2514_v35 = vor.u32 1.1754944e-38, %v2513_v34 }
 0x25c   : > { %v2605_v44 = vmul.f32 %v2604_v24, %v9865_v45  ;;  %v2614_v50 = vmul.f32 %v2613_v36, %v9865_v45  ;;  %v2568_v31 = vadd.f32 0.18741608, %v2567_v49  ;;  %v2579_v7 = vadd.f32 0.4994258, %v2578_v33 }
 0x25d   : > { %v6789_v3 = vmul.f32 %v6639_v5, %v9681_v19  ;;  %v2506_v46 = vadd.f32 %v7445_v14, %v2505_v27  ;;  %v9908_v4 = vmin.f32 %v2639_v12, 16.0  ;;  %v2530_v38 = vadd.f32 1.1283791, %v2529_v41 }
 0x25e   : > { %v2606_v22 = vadd.f32 0.05243302, %v2605_v44  ;;  %v2615_v10 = vadd.f32 0.014752088, %v2614_v50  ;;  %v2551_v18 = vand.u32 2147483647, %v2541_v20  ;;  %v2580_v62 = vmul.f32 %v2579_v7, %v9840_v58 }
 0x25f   : > { %6939 = vst [vmem:[%s8053_s16 + $0x190] sm:$0xff] %v6789_v3  ;;  %v2510_v0 = vsel %vm9894_vm14, %v7445_v14, %v2506_v46  ;;  %v2641_v60 = vmul.f32 2.1237322e-06, %v9908_v4  ;;  %v9919_v30 = vmul.f32 0.70710677, %v9906_v32  ;;  %vm2547_vm0 = vweird.f32 %v2541_v20 }
 0x260   : > { %v7447_v52 = vpop.eup %7446  ;;  %v2515_v19 = vsel %vm9898_vm15, %v2514_v35, %v2510_v0  ;;  %v2616_v57 = vmul.f32 %v2615_v10, %v9865_v45  ;;  %v2607_v8 = vmul.f32 %v2606_v22, %v9865_v45  ;;  %v2553_v51 = vand.u32 2147483648, %v2541_v20 }
 0x261   : > { %v2516_v61 = vmul.f32 %v2515_v19, %v2491_v26  ;;  %v2543_v28 = vmul.f32 %v7447_v52, %v2541_v20  ;;  %v2569_v42 = vmul.f32 %v2568_v31, %v9840_v58  ;;  %v2581_v1 = vadd.f32 1.0, %v2580_v62 }
 0x262   : > { %v2617_v37 = vadd.f32 0.112945676, %v2616_v57  ;;  %vm2548_vm1 = vweird.f32 %v7447_v52  ;;  %v2642_v14 = vadd.f32 0.00028619796, %v2641_v60  ;;  %v2531_v29 = vmul.f32 %v2530_v38, %v9780_v17 }
 0x263   : > { %v7184_v25 = vclamps-f32 %v2516_v61, 1.0  ;;  %v2544_v43 = vsub.f32 1.0, %v2543_v28  ;;  %vm9924_vm2 = vcmp.eq.f32.partialorder %v2551_v18, 8.507059e+37  ;;  %7448 = vrcp.f32 %v2581_v1  ;;  %vm9932_vm3 = vmor %vm2547_vm0, %vm2548_vm1  ;;  %v9963_v28 = vld [vmem:[%s7840_s24 + $0x1c8] sm:$0xff] }
 0x264   : > { %v2679_v47 = vmul.f32 %v9919_v30, %v9919_v30  ;;  %v2608_v53 = vadd.f32 0.18741608, %v2607_v8  ;;  %v2618_v58 = vmul.f32 %v2617_v37, %v9865_v45  ;;  %v2554_v16 = vor.u32 1.1754944e-38, %v2553_v51  ;;  %v9966_v8 = vld [vmem:[%s7840_s24 + $0x1d0] sm:$0xff] }
 0x265   : > { %v6490_v55 = vmul.f32 0.5, %v7184_v25  ;;  %v2545_v9 = vmul.f32 %v7447_v52, %v2544_v43  ;;  %v2570_v17 = vadd.f32 1.1283791, %v2569_v42  ;;  %v2643_v39 = vmul.f32 %v2642_v14, %v9908_v4 }
 0x266   : > { %v2652_v48 = vmul.f32 3.8918573e-05, %v9908_v4  ;;  %v2591_v36 = vand.u32 2147483647, %v2581_v1  ;;  %v2619_v26 = vadd.f32 0.4994258, %v2618_v58  ;;  %v2609_v33 = vmul.f32 %v2608_v53, %v9865_v45 }
 0x267   : > { %v6640_v2 = vadd.f32 0.5, %v6490_v55  ;;  %v2546_v24 = vadd.f32 %v7447_v52, %v2545_v9  ;;  %v2593_v41 = vand.u32 2147483648, %v2581_v1  ;;  %v2644_v12 = vadd.f32 0.0036580483, %v2643_v39 }
 0x268   : > { %v2653_v5 = vadd.f32 0.001143296, %v2652_v48  ;;  %v9938_v27 = vmin.f32 %v2679_v47, 16.0  ;;  %v2620_v63 = vmul.f32 %v2619_v26, %v9865_v45  ;;  %vm2587_vm4 = vweird.f32 %v2581_v1 }
 0x269   : > { %v6790_v20 = vmul.f32 %v6640_v2, %v9723_v40  ;;  %v2550_v49 = vsel %vm9932_vm3, %v7447_v52, %v2546_v24  ;;  %v7449_v59 = vpop.eup %7448  ;;  %v2645_v44 = vmul.f32 %v2644_v12, %v9908_v4  ;;  %v2571_v40 = vmul.f32 %v2570_v17, %v9807_v11 }
 0x26a   : > { %v2555_v35 = vsel %vm9924_vm2, %v2554_v16, %v2550_v49  ;;  %v2654_v50 = vmul.f32 %v2653_v5, %v9908_v4  ;;  %v2681_v3 = vmul.f32 2.1237322e-06, %v9938_v27  ;;  %v2583_v31 = vmul.f32 %v7449_v59, %v2581_v1 }
 0x26b   : > { %6940 = vst [vmem:[%s8053_s16 + $0x198] sm:$0xff] %v6790_v20  ;;  %v2556_v46 = vmul.f32 %v2555_v35, %v2531_v29  ;;  %v9952_v7 = vadd.f32 1.0, %v2620_v63  ;;  %v2646_v45 = vadd.f32 0.05243302, %v2645_v44  ;;  %vm2588_vm5 = vweird.f32 %v7449_v59 }
 0x26c   : > { %v2655_v22 = vadd.f32 0.014752088, %v2654_v50  ;;  %v2682_v10 = vadd.f32 0.00028619796, %v2681_v3  ;;  %v2584_v38 = vsub.f32 1.0, %v2583_v31  ;;  %vm9955_vm6 = vcmp.eq.f32.partialorder %v2591_v36, 8.507059e+37  ;;  %vm9969_vm7 = vmor %vm2587_vm4, %vm2588_vm5 }
 0x26d   : > { %v7185_v0 = vclamps-f32 %v2556_v46, 1.0  ;;  %7450 = vrcp.f32 %v9952_v7  ;;  %v2594_v62 = vor.u32 1.1754944e-38, %v2593_v41  ;;  %v2610_v11 = vadd.f32 1.1283791, %v2609_v33 }
 0x26e   : > { %v2656_v52 = vmul.f32 %v2655_v22, %v9908_v4  ;;  %v2585_v57 = vmul.f32 %v7449_v59, %v2584_v38  ;;  %v2683_v60 = vmul.f32 %v2682_v10, %v9938_v27  ;;  %v2692_v61 = vmul.f32 3.8918573e-05, %v9938_v27 }
 0x26f   : > { %v6491_v19 = vmul.f32 0.5, %v7185_v0  ;;  %vm2627_vm8 = vweird.f32 %v9952_v7  ;;  %v2633_v42 = vand.u32 2147483648, %v9952_v7  ;;  %v2647_v37 = vmul.f32 %v2646_v45, %v9908_v4 }
 0x270   : > { %v2657_v25 = vadd.f32 0.112945676, %v2656_v52  ;;  %v2586_v14 = vadd.f32 %v7449_v59, %v2585_v57  ;;  %v2684_v29 = vadd.f32 0.0036580483, %v2683_v60  ;;  %v2693_v21 = vadd.f32 0.001143296, %v2692_v61 }
 0x271   : > { %v6641_v43 = vadd.f32 0.5, %v6491_v19  ;;  %v2631_v47 = vand.u32 2147483647, %v9952_v7  ;;  %v9979_v55 = vmul.f32 0.70710677, %v9963_v28  ;;  %v2634_v2 = vor.u32 1.1754944e-38, %v2633_v42 }
 0x272   : > { %v2658_v1 = vmul.f32 %v2657_v25, %v9908_v4  ;;  %v9982_v9 = vmul.f32 0.70710677, %v9966_v8  ;;  %v2590_v34 = vsel %vm9969_vm7, %v7449_v59, %v2586_v14  ;;  %v2685_v16 = vmul.f32 %v2684_v29, %v9938_v27 }
 0x273   : > { %v7451_v53 = vpop.eup %7450  ;;  %v6791_v58 = vmul.f32 %v6641_v43, %v9771_v56  ;;  %v2694_v17 = vmul.f32 %v2693_v21, %v9938_v27  ;;  %v2595_v39 = vsel %vm9955_vm6, %v2594_v62, %v2590_v34  ;;  %v2648_v24 = vadd.f32 0.18741608, %v2647_v37  ;;  %v10016_v62 = vld [vmem:[%s7840_s24 + $0x1d8] sm:$0xff] }
 0x274   : > { %v2623_v48 = vmul.f32 %v7451_v53, %v9952_v7  ;;  %v2596_v36 = vmul.f32 %v2595_v39, %v2571_v40  ;;  %v2659_v26 = vadd.f32 0.4994258, %v2658_v1  ;;  %v2686_v41 = vadd.f32 0.05243302, %v2685_v16 }
 0x275   : > { %6941 = vst [vmem:[%s8053_s16 + $0x1a0] sm:$0xff] %v6791_v58  ;;  %v2719_v56 = vmul.f32 %v9979_v55, %v9979_v55  ;;  %vm2628_vm9 = vweird.f32 %v7451_v53  ;;  %v2695_v5 = vadd.f32 0.014752088, %v2694_v17  ;;  %v2759_v20 = vmul.f32 %v9982_v9, %v9982_v9 }
 0x276   : > { %v2624_v12 = vsub.f32 1.0, %v2623_v48  ;;  %v7186_v49 = vclamps-f32 %v2596_v36, 1.0  ;;  %v2660_v33 = vmul.f32 %v2659_v26, %v9908_v4  ;;  %v2687_v63 = vmul.f32 %v2686_v41, %v9938_v27  ;;  %vm10007_vm10 = vmor %vm2627_vm8, %vm2628_vm9 }
 0x277   : > { %v9999_v59 = vmin.f32 %v2719_v56, 16.0  ;;  %v2649_v44 = vmul.f32 %v2648_v24, %v9908_v4  ;;  %v2696_v50 = vmul.f32 %v2695_v5, %v9938_v27  ;;  %v10003_v3 = vmin.f32 %v2759_v20, 16.0 }
 0x278   : > { %v2625_v35 = vmul.f32 %v7451_v53, %v2624_v12  ;;  %v6492_v46 = vmul.f32 0.5, %v7186_v49  ;;  %v2661_v31 = vadd.f32 1.0, %v2660_v33  ;;  %v2688_v45 = vadd.f32 0.18741608, %v2687_v63 }
 0x279   : > { %v2721_v22 = vmul.f32 2.1237322e-06, %v9999_v59  ;;  %v2611_v10 = vmul.f32 %v2610_v11, %v9843_v23  ;;  %vm2632_vm11 = vcmp.eq.f32.partialorder %v2631_v47, 8.507059e+37  ;;  %v2697_v4 = vadd.f32 0.112945676, %v2696_v50 }
 0x27a   : > { %v2626_v0 = vadd.f32 %v7451_v53, %v2625_v35  ;;  %v6642_v38 = vadd.f32 0.5, %v6492_v46  ;;  %7452 = vrcp.f32 %v2661_v31  ;;  %v2732_v18 = vmul.f32 3.8918573e-05, %v9999_v59 }
 0x27b   : > { %v2761_v7 = vmul.f32 2.1237322e-06, %v10003_v3  ;;  %v2650_v19 = vadd.f32 1.1283791, %v2649_v44  ;;  %v2698_v57 = vmul.f32 %v2697_v4, %v9938_v27  ;;  %v2689_v60 = vmul.f32 %v2688_v45, %v9938_v27 }
 0x27c   : > { %v2630_v52 = vsel %vm10007_vm10, %v7451_v53, %v2626_v0  ;;  %v6792_v23 = vmul.f32 %v6642_v38, %v9789_v54  ;;  %v2722_v61 = vadd.f32 0.00028619796, %v2721_v22  ;;  %v2671_v42 = vand.u32 2147483647, %v2661_v31  ;;  %v10058_v38 = vld [vmem:[%s7840_s24 + $0x1e0] sm:$0xff] }
 0x27d   : > { %v2635_v11 = vsel %vm2632_vm11, %v2634_v2, %v2630_v52  ;;  %v2699_v37 = vadd.f32 0.4994258, %v2698_v57  ;;  %v10024_v25 = vmul.f32 0.70710677, %v10016_v62  ;;  %vm2667_vm12 = vweird.f32 %v2661_v31 }
 0x27e   : > { %v2636_v51 = vmul.f32 %v2635_v11, %v2611_v10  ;;  %6942 = vst [vmem:[%s8053_s16 + $0x1a8] sm:$0xff] %v6792_v23  ;;  %v2723_v43 = vmul.f32 %v2722_v61, %v9999_v59  ;;  %v2733_v14 = vadd.f32 0.001143296, %v2732_v18  ;;  %v2762_v29 = vadd.f32 0.00028619796, %v2761_v7 }
 0x27f   : > { %v2673_v47 = vand.u32 2147483648, %v2661_v31  ;;  %v2700_v54 = vmul.f32 %v2699_v37, %v9938_v27  ;;  %v2772_v1 = vmul.f32 3.8918573e-05, %v10003_v3  ;;  %v2690_v58 = vadd.f32 1.1283791, %v2689_v60 }
 0x280   : > { %v7187_v21 = vclamps-f32 %v2636_v51, 1.0  ;;  %v7453_v53 = vpop.eup %7452  ;;  %v2724_v34 = vadd.f32 0.0036580483, %v2723_v43  ;;  %v2734_v16 = vmul.f32 %v2733_v14, %v9999_v59  ;;  %v2763_v17 = vmul.f32 %v2762_v29, %v10003_v3 }
 0x281   : > { %v2663_v48 = vmul.f32 %v7453_v53, %v2661_v31  ;;  %v10032_v2 = vadd.f32 1.0, %v2700_v54  ;;  %v2799_v24 = vmul.f32 %v10024_v25, %v10024_v25  ;;  %v2773_v41 = vadd.f32 0.001143296, %v2772_v1 }
 0x282   : > { %v6493_v39 = vmul.f32 0.5, %v7187_v21  ;;  %v2725_v36 = vmul.f32 %v2724_v34, %v9999_v59  ;;  %v2735_v26 = vadd.f32 0.014752088, %v2734_v16  ;;  %v2764_v27 = vadd.f32 0.0036580483, %v2763_v17 }
 0x283   : > { %v2664_v12 = vsub.f32 1.0, %v2663_v48  ;;  %vm2668_vm13 = vweird.f32 %v7453_v53  ;;  %7454 = vrcp.f32 %v10032_v2  ;;  %v2651_v5 = vmul.f32 %v2650_v19, %v9884_v6 }
 0x284   : > { %v6643_v56 = vadd.f32 0.5, %v6493_v39  ;;  %vm10039_vm14 = vcmp.eq.f32.partialorder %v2671_v42, 8.507059e+37  ;;  %v2726_v49 = vadd.f32 0.05243302, %v2725_v36  ;;  %v2736_v33 = vmul.f32 %v2735_v26, %v9999_v59  ;;  %vm10048_vm15 = vmor %vm2667_vm12, %vm2668_vm13 }
 0x285   : > { %v2665_v35 = vmul.f32 %v7453_v53, %v2664_v12  ;;  %v2765_v44 = vmul.f32 %v2764_v27, %v10003_v3  ;;  %v2774_v50 = vmul.f32 %v2773_v41, %v10003_v3  ;;  %v2674_v6 = vor.u32 1.1754944e-38, %v2673_v47 }
 0x286   : > { %v6793_v63 = vmul.f32 %v6643_v56, %v9833_v13  ;;  %v2727_v40 = vmul.f32 %v2726_v49, %v9999_v59  ;;  %v2737_v45 = vadd.f32 0.112945676, %v2736_v33  ;;  %v10053_v22 = vmin.f32 %v2799_v24, 16.0 }
 0x287   : > { %v2666_v10 = vadd.f32 %v7453_v53, %v2665_v35  ;;  %v2691_v13 = vmul.f32 %v2690_v58, %v9919_v30  ;;  %v2766_v0 = vadd.f32 0.05243302, %v2765_v44  ;;  %v2775_v4 = vadd.f32 0.014752088, %v2774_v50 }
 0x288   : > { %6943 = vst [vmem:[%s8053_s16 + $0x1b0] sm:$0xff] %v6793_v63  ;;  %vm2707_vm0 = vweird.f32 %v10032_v2  ;;  %v2728_v31 = vadd.f32 0.18741608, %v2727_v40  ;;  %v2738_v18 = vmul.f32 %v2737_v45, %v9999_v59  ;;  %v2801_v7 = vmul.f32 2.1237322e-06, %v10053_v22 }
 0x289   : > { %v7455_v52 = vpop.eup %7454  ;;  %v2670_v19 = vsel %vm10048_vm15, %v7453_v53, %v2666_v10  ;;  %v2711_v57 = vand.u32 2147483647, %v10032_v2  ;;  %v2767_v23 = vmul.f32 %v2766_v0, %v10003_v3  ;;  %v2776_v30 = vmul.f32 %v2775_v4, %v10003_v3 }
 0x28a   : > { %v2675_v11 = vsel %vm10039_vm14, %v2674_v6, %v2670_v19  ;;  %v2703_v60 = vmul.f32 %v7455_v52, %v10032_v2  ;;  %v2812_v61 = vmul.f32 3.8918573e-05, %v10053_v22  ;;  %v10073_v51 = vmul.f32 0.70710677, %v10058_v38 }
 0x28b   : > { %v2676_v42 = vmul.f32 %v2675_v11, %v2651_v5  ;;  %v2713_v37 = vand.u32 2147483648, %v10032_v2  ;;  %v2739_v43 = vadd.f32 0.4994258, %v2738_v18  ;;  %v2777_v14 = vadd.f32 0.112945676, %v2776_v30 }
 0x28c   : > { %v2704_v29 = vsub.f32 1.0, %v2703_v60  ;;  %vm2708_vm1 = vweird.f32 %v7455_v52  ;;  %v2729_v21 = vmul.f32 %v2728_v31, %v9999_v59  ;;  %v2802_v47 = vadd.f32 0.00028619796, %v2801_v7 }
 0x28d   : > { %v7188_v54 = vclamps-f32 %v2676_v42, 1.0  ;;  %v2740_v1 = vmul.f32 %v2739_v43, %v9999_v59  ;;  %v2768_v53 = vadd.f32 0.18741608, %v2767_v23  ;;  %v2778_v58 = vmul.f32 %v2777_v14, %v10003_v3  ;;  %vm10084_vm2 = vmor %vm2707_vm0, %vm2708_vm1 }
 0x28e   : > { %v2705_v34 = vmul.f32 %v7455_v52, %v2704_v29  ;;  %v2803_v16 = vmul.f32 %v2802_v47, %v10053_v22  ;;  %v2813_v17 = vadd.f32 0.001143296, %v2812_v61  ;;  %v2839_v39 = vmul.f32 %v10073_v51, %v10073_v51 }
 0x28f   : > { %v6494_v48 = vmul.f32 0.5, %v7188_v54  ;;  %v2714_v36 = vor.u32 1.1754944e-38, %v2713_v37  ;;  %v2741_v26 = vadd.f32 1.0, %v2740_v1  ;;  %v2779_v59 = vadd.f32 0.4994258, %v2778_v58 }
 0x290   : > { %v2706_v27 = vadd.f32 %v7455_v52, %v2705_v34  ;;  %vm2712_vm3 = vcmp.eq.f32.partialorder %v2711_v57, 8.507059e+37  ;;  %v2804_v41 = vadd.f32 0.0036580483, %v2803_v16  ;;  %v2814_v56 = vmul.f32 %v2813_v17, %v10053_v22  ;;  %v10124_v34 = vld [vmem:[%s7840_s24 + $0x1f0] sm:$0xff] }
 0x291   : > { %v6644_v12 = vadd.f32 0.5, %v6494_v48  ;;  %v2730_v5 = vadd.f32 1.1283791, %v2729_v21  ;;  %7456 = vrcp.f32 %v2741_v26  ;;  %v2769_v2 = vmul.f32 %v2768_v53, %v10003_v3 }
 0x292   : > { %v2710_v20 = vsel %vm10084_vm2, %v7455_v52, %v2706_v27  ;;  %v2780_v49 = vmul.f32 %v2779_v59, %v10003_v3  ;;  %v10093_v33 = vmin.f32 %v2839_v39, 16.0  ;;  %v2751_v44 = vand.u32 2147483647, %v2741_v26  ;;  %v10106_v52 = vld [vmem:[%s7840_s24 + $0x1e8] sm:$0xff] }
 0x293   : > { %v6794_v63 = vmul.f32 %v6644_v12, %v9876_v15  ;;  %v2715_v35 = vsel %vm2712_vm3, %v2714_v36, %v2710_v20  ;;  %v2805_v50 = vmul.f32 %v2804_v41, %v10053_v22  ;;  %v2753_v6 = vand.u32 2147483648, %v2741_v26 }
 0x294   : > { %v2716_v46 = vmul.f32 %v2715_v35, %v2691_v13  ;;  %v10097_v40 = vadd.f32 1.0, %v2780_v49  ;;  %v2815_v45 = vadd.f32 0.014752088, %v2814_v56  ;;  %v2841_v0 = vmul.f32 2.1237322e-06, %v10093_v33 }
 0x295   : > { %6944 = vst [vmem:[%s8053_s16 + $0x1b8] sm:$0xff] %v6794_v63  ;;  %v2806_v10 = vadd.f32 0.05243302, %v2805_v50  ;;  %v2731_v3 = vmul.f32 %v2730_v5, %v9979_v55  ;;  %v2770_v31 = vadd.f32 1.1283791, %v2769_v2  ;;  %vm2747_vm4 = vweird.f32 %v2741_v26 }
 0x296   : > { %v7189_v4 = vclamps-f32 %v2716_v46, 1.0  ;;  %7458 = vrcp.f32 %v10097_v40  ;;  %v2816_v13 = vmul.f32 %v2815_v45, %v10053_v22  ;;  %v2842_v7 = vadd.f32 0.00028619796, %v2841_v0 }
 0x297   : > { %v7457_v15 = vpop.eup %7456  ;;  %v2807_v18 = vmul.f32 %v2806_v10, %v10053_v22  ;;  %vm10108_vm5 = vcmp.eq.f32.partialorder %v2751_v44, 8.507059e+37  ;;  %v2754_v30 = vor.u32 1.1754944e-38, %v2753_v6  ;;  %v2852_v37 = vmul.f32 3.8918573e-05, %v10093_v33 }
 0x298   : > { %v6495_v19 = vmul.f32 0.5, %v7189_v4  ;;  %v2743_v57 = vmul.f32 %v7457_v15, %v2741_v26  ;;  %vm2748_vm6 = vweird.f32 %v7457_v15  ;;  %v2817_v11 = vadd.f32 0.112945676, %v2816_v13 }
 0x299   : > { %v2808_v55 = vadd.f32 0.18741608, %v2807_v18  ;;  %v2843_v60 = vmul.f32 %v2842_v7, %v10093_v33  ;;  %v10115_v43 = vmul.f32 0.70710677, %v10106_v52  ;;  %vm2787_vm7 = vweird.f32 %v10097_v40  ;;  %vm10128_vm8 = vmor %vm2747_vm4, %vm2748_vm6 }
 0x29a   : > { %v6645_v61 = vadd.f32 0.5, %v6495_v19  ;;  %v2744_v42 = vsub.f32 1.0, %v2743_v57  ;;  %v2791_v14 = vand.u32 2147483647, %v10097_v40  ;;  %v2818_v29 = vmul.f32 %v2817_v11, %v10053_v22  ;;  %v10168_v57 = vld [vmem:[%s7840_s24 + $0x1f8] sm:$0xff] }
 0x29b   : > { %v2844_v21 = vadd.f32 0.0036580483, %v2843_v60  ;;  %v2853_v53 = vadd.f32 0.001143296, %v2852_v37  ;;  %v2879_v58 = vmul.f32 %v10115_v43, %v10115_v43  ;;  %v2793_v39 = vand.u32 2147483648, %v10097_v40 }
 0x29c   : > { %v7459_v47 = vpop.eup %7458  ;;  %v6795_v54 = vmul.f32 %v6645_v61, %v9906_v32  ;;  %v2745_v1 = vmul.f32 %v7457_v15, %v2744_v42  ;;  %v2809_v48 = vmul.f32 %v2808_v55, %v10053_v22  ;;  %v2819_v32 = vadd.f32 0.4994258, %v2818_v29 }
 0x29d   : > { %v2783_v17 = vmul.f32 %v7459_v47, %v10097_v40  ;;  %v2845_v36 = vmul.f32 %v2844_v21, %v10093_v33  ;;  %v2854_v59 = vmul.f32 %v2853_v53, %v10093_v33  ;;  %v10138_v27 = vmin.f32 %v2879_v58, 16.0 }
 0x29e   : > { %6945 = vst [vmem:[%s8053_s16 + $0x1c0] sm:$0xff] %v6795_v54  ;;  %v2746_v24 = vadd.f32 %v7457_v15, %v2745_v1  ;;  %vm2788_vm9 = vweird.f32 %v7459_v47  ;;  %v2820_v41 = vmul.f32 %v2819_v32, %v10053_v22  ;;  %v10142_v56 = vmul.f32 0.70710677, %v10124_v34 }
 0x29f   : > { %v2784_v26 = vsub.f32 1.0, %v2783_v17  ;;  %v2846_v5 = vadd.f32 0.05243302, %v2845_v36  ;;  %v2855_v20 = vadd.f32 0.014752088, %v2854_v59  ;;  %vm10154_vm10 = vmor %vm2787_vm7, %vm2788_vm9  ;;  %v2794_v46 = vor.u32 1.1754944e-38, %v2793_v39 }
 0x2a0   : > { %v2750_v12 = vsel %vm10128_vm8, %v7457_v15, %v2746_v24  ;;  %v2881_v2 = vmul.f32 2.1237322e-06, %v10138_v27  ;;  %v10149_v35 = vadd.f32 1.0, %v2820_v41  ;;  %v2892_v44 = vmul.f32 3.8918573e-05, %v10138_v27 }
 0x2a1   : > { %v2755_v49 = vsel %vm10108_vm5, %v2754_v30, %v2750_v12  ;;  %v2785_v63 = vmul.f32 %v7459_v47, %v2784_v26  ;;  %v2856_v6 = vmul.f32 %v2855_v20, %v10093_v33  ;;  %v2771_v10 = vmul.f32 %v2770_v31, %v9982_v9 }
 0x2a2   : > { %v2756_v50 = vmul.f32 %v2755_v49, %v2731_v3  ;;  %v2882_v45 = vadd.f32 0.00028619796, %v2881_v2  ;;  %vm2792_vm11 = vcmp.eq.f32.partialorder %v2791_v14, 8.507059e+37  ;;  %7460 = vrcp.f32 %v10149_v35 }
 0x2a3   : > { %v2786_v0 = vadd.f32 %v7459_v47, %v2785_v63  ;;  %v2810_v15 = vadd.f32 1.1283791, %v2809_v48  ;;  %v2857_v3 = vadd.f32 0.112945676, %v2856_v6  ;;  %v2919_v40 = vmul.f32 %v10142_v56, %v10142_v56 }
 0x2a4   : > { %v7190_v4 = vclamps-f32 %v2756_v50, 1.0  ;;  %v2847_v13 = vmul.f32 %v2846_v5, %v10093_v33  ;;  %v2883_v7 = vmul.f32 %v2882_v45, %v10138_v27  ;;  %v2893_v19 = vadd.f32 0.001143296, %v2892_v44 }
 0x2a5   : > { %v2790_v18 = vsel %vm10154_vm10, %v7459_v47, %v2786_v0  ;;  %vm2827_vm12 = vweird.f32 %v10149_v35  ;;  %v2831_v23 = vand.u32 2147483647, %v10149_v35  ;;  %v2858_v55 = vmul.f32 %v2857_v3, %v10093_v33 }
 0x2a6   : > { %v6496_v9 = vmul.f32 0.5, %v7190_v4  ;;  %v2795_v31 = vsel %vm2792_vm11, %v2794_v46, %v2790_v18  ;;  %v2884_v11 = vadd.f32 0.0036580483, %v2883_v7  ;;  %v2894_v60 = vmul.f32 %v2893_v19, %v10138_v27 }
 0x2a7   : > { %v2796_v30 = vmul.f32 %v2795_v31, %v2771_v10  ;;  %v2833_v42 = vand.u32 2147483648, %v10149_v35  ;;  %v10175_v37 = vmin.f32 %v2919_v40, 16.0  ;;  %v10178_v14 = vmul.f32 0.70710677, %v10168_v57 }
 0x2a8   : > { %v6646_v61 = vadd.f32 0.5, %v6496_v9  ;;  %v7461_v29 = vpop.eup %7460  ;;  %v2859_v47 = vadd.f32 0.4994258, %v2858_v55  ;;  %v2885_v54 = vmul.f32 %v2884_v11, %v10138_v27  ;;  %v2895_v1 = vadd.f32 0.014752088, %v2894_v60 }
 0x2a9   : > { %v7191_v21 = vclamps-f32 %v2796_v30, 1.0  ;;  %v2823_v58 = vmul.f32 %v7461_v29, %v10149_v35  ;;  %vm2828_vm13 = vweird.f32 %v7461_v29  ;;  %v2848_v16 = vadd.f32 0.18741608, %v2847_v13 }
 0x2aa   : > { %v6796_v53 = vmul.f32 %v6646_v61, %v9963_v28  ;;  %v2860_v39 = vmul.f32 %v2859_v47, %v10093_v33  ;;  %v2886_v48 = vadd.f32 0.05243302, %v2885_v54  ;;  %v2896_v32 = vmul.f32 %v2895_v1, %v10138_v27  ;;  %vm10196_vm14 = vmor %vm2827_vm12, %vm2828_vm13 }
 0x2ab   : > { %v6497_v17 = vmul.f32 0.5, %v7191_v21  ;;  %v2824_v24 = vsub.f32 1.0, %v2823_v58  ;;  %v2921_v36 = vmul.f32 2.1237322e-06, %v10175_v37  ;;  %v2932_v59 = vmul.f32 3.8918573e-05, %v10175_v37 }
 0x2ac   : > { %6946 = vst [vmem:[%s8053_s16 + $0x1c8] sm:$0xff] %v6796_v53  ;;  %v2959_v26 = vmul.f32 %v10178_v14, %v10178_v14  ;;  %v2811_v41 = vmul.f32 %v2810_v15, %v10024_v25  ;;  %v2861_v12 = vadd.f32 1.0, %v2860_v39  ;;  %v2897_v5 = vadd.f32 0.112945676, %v2896_v32  ;;  %v10211_v15 = vld [vmem:[%s7840_s24 + $0x200] sm:$0xff] }
 0x2ad   : > { %v6647_v28 = vadd.f32 0.5, %v6497_v17  ;;  %v2825_v20 = vmul.f32 %v7461_v29, %v2824_v24  ;;  %v2849_v2 = vmul.f32 %v2848_v16, %v10093_v33  ;;  %v2922_v49 = vadd.f32 0.00028619796, %v2921_v36 }
 0x2ae   : > { %v2933_v63 = vadd.f32 0.001143296, %v2932_v59  ;;  %v2834_v22 = vor.u32 1.1754944e-38, %v2833_v42  ;;  %7462 = vrcp.f32 %v2861_v12  ;;  %v10200_v25 = vmin.f32 %v2959_v26, 16.0 }
 0x2af   : > { %v6797_v44 = vmul.f32 %v6647_v28, %v9966_v8  ;;  %v2826_v46 = vadd.f32 %v7461_v29, %v2825_v20  ;;  %vm2832_vm15 = vcmp.eq.f32.partialorder %v2831_v23, 8.507059e+37  ;;  %v2887_v33 = vmul.f32 %v2886_v48, %v10138_v27 }
 0x2b0   : > { %v2898_v6 = vmul.f32 %v2897_v5, %v10138_v27  ;;  %v2923_v8 = vmul.f32 %v2922_v49, %v10175_v37  ;;  %v2934_v35 = vmul.f32 %v2933_v63, %v10175_v37  ;;  %v2961_v45 = vmul.f32 2.1237322e-06, %v10200_v25 }
 0x2b1   : > { %6947 = vst [vmem:[%s8053_s16 + $0x1d0] sm:$0xff] %v6797_v44  ;;  %v2830_v10 = vsel %vm10196_vm14, %v7461_v29, %v2826_v46  ;;  %v2850_v0 = vadd.f32 1.1283791, %v2849_v2  ;;  %vm2867_vm0 = vweird.f32 %v2861_v12  ;;  %v2888_v19 = vadd.f32 0.18741608, %v2887_v33  ;;  %v10241_v44 = vld [vmem:[%s7840_s24 + $0x208] sm:$0xff] }
 0x2b2   : > { %v2899_v4 = vadd.f32 0.4994258, %v2898_v6  ;;  %v2835_v3 = vsel %vm2832_vm15, %v2834_v22, %v2830_v10  ;;  %v2924_v40 = vadd.f32 0.0036580483, %v2923_v8  ;;  %v2935_v18 = vadd.f32 0.014752088, %v2934_v35 }
 0x2b3   : > { %v2962_v13 = vadd.f32 0.00028619796, %v2961_v45  ;;  %v2836_v7 = vmul.f32 %v2835_v3, %v2811_v41  ;;  %v2972_v31 = vmul.f32 3.8918573e-05, %v10200_v25  ;;  %v10219_v60 = vmul.f32 0.70710677, %v10211_v15 }
 0x2b4   : > { %v2900_v9 = vmul.f32 %v2899_v4, %v10138_v27  ;;  %v7463_v23 = vpop.eup %7462  ;;  %v2925_v30 = vmul.f32 %v2924_v40, %v10175_v37  ;;  %v2936_v55 = vmul.f32 %v2935_v18, %v10175_v37  ;;  %v2871_v29 = vand.u32 2147483647, %v2861_v12 }
 0x2b5   : > { %v2963_v11 = vmul.f32 %v2962_v13, %v10200_v25  ;;  %v7192_v61 = vclamps-f32 %v2836_v7, 1.0  ;;  %v2863_v42 = vmul.f32 %v7463_v23, %v2861_v12  ;;  %v2873_v21 = vand.u32 2147483648, %v2861_v12 }
 0x2b6   : > { %vm2868_vm1 = vweird.f32 %v7463_v23  ;;  %v2901_v47 = vadd.f32 1.0, %v2900_v9  ;;  %v2926_v54 = vadd.f32 0.05243302, %v2925_v30  ;;  %v2937_v1 = vadd.f32 0.112945676, %v2936_v55 }
 0x2b7   : > { %v6498_v53 = vmul.f32 0.5, %v7192_v61  ;;  %v2864_v58 = vsub.f32 1.0, %v2863_v42  ;;  %v2964_v16 = vadd.f32 0.0036580483, %v2963_v11  ;;  %v2973_v17 = vadd.f32 0.001143296, %v2972_v31  ;;  %vm10229_vm2 = vmor %vm2867_vm0, %vm2868_vm1 }
 0x2b8   : > { %v2851_v39 = vmul.f32 %v2850_v0, %v10073_v51  ;;  %v2889_v48 = vmul.f32 %v2888_v19, %v10138_v27  ;;  %7464 = vrcp.f32 %v2901_v47  ;;  %v2999_v32 = vmul.f32 %v10219_v60, %v10219_v60 }
 0x2b9   : > { %v6648_v24 = vadd.f32 0.5, %v6498_v53  ;;  %v2865_v36 = vmul.f32 %v7463_v23, %v2864_v58  ;;  %v2927_v59 = vmul.f32 %v2926_v54, %v10175_v37  ;;  %v2938_v26 = vmul.f32 %v2937_v1, %v10175_v37 }
 0x2ba   : > { %vm10233_vm3 = vcmp.eq.f32.partialorder %v2871_v29, 8.507059e+37  ;;  %v2874_v27 = vor.u32 1.1754944e-38, %v2873_v21  ;;  %v2965_v41 = vmul.f32 %v2964_v16, %v10200_v25  ;;  %v2974_v5 = vmul.f32 %v2973_v17, %v10200_v25 }
 0x2bb   : > { %v6798_v20 = vmul.f32 %v6648_v24, %v10016_v62  ;;  %v2866_v2 = vadd.f32 %v7463_v23, %v2865_v36  ;;  %v2928_v49 = vadd.f32 0.18741608, %v2927_v59  ;;  %v2939_v63 = vadd.f32 0.4994258, %v2938_v26 }
 0x2bc   : > { %v2966_v12 = vadd.f32 0.05243302, %v2965_v41  ;;  %v2975_v50 = vadd.f32 0.014752088, %v2974_v5  ;;  %v10243_v22 = vmin.f32 %v2999_v32, 16.0  ;;  %vm2907_vm4 = vweird.f32 %v2901_v47 }
 0x2bd   : > { %6948 = vst [vmem:[%s8053_s16 + $0x1d8] sm:$0xff] %v6798_v20  ;;  %v2870_v46 = vsel %vm10229_vm2, %v7463_v23, %v2866_v2  ;;  %v2890_v33 = vadd.f32 1.1283791, %v2889_v48  ;;  %v2911_v6 = vand.u32 2147483647, %v2901_v47  ;;  %v2940_v8 = vmul.f32 %v2939_v63, %v10175_v37 }
 0x2be   : > { %v7465_v35 = vpop.eup %7464  ;;  %v2875_v62 = vsel %vm10233_vm3, %v2874_v27, %v2870_v46  ;;  %v2976_v45 = vmul.f32 %v2975_v50, %v10200_v25  ;;  %v3001_v10 = vmul.f32 2.1237322e-06, %v10243_v22  ;;  %v10254_v0 = vmul.f32 0.70710677, %v10241_v44 }
 0x2bf   : > { %v2876_v4 = vmul.f32 %v2875_v62, %v2851_v39  ;;  %v2903_v3 = vmul.f32 %v7465_v35, %v2901_v47  ;;  %v2967_v40 = vmul.f32 %v2966_v12, %v10200_v25  ;;  %v2913_v18 = vand.u32 2147483648, %v2901_v47 }
 0x2c0   : > { %v2929_v13 = vmul.f32 %v2928_v49, %v10175_v37  ;;  %v2941_v7 = vadd.f32 1.0, %v2940_v8  ;;  %v2977_v19 = vadd.f32 0.112945676, %v2976_v45  ;;  %vm2908_vm5 = vweird.f32 %v7465_v35 }
 0x2c1   : > { %v7193_v9 = vclamps-f32 %v2876_v4, 1.0  ;;  %v2904_v31 = vsub.f32 1.0, %v2903_v3  ;;  %v3002_v23 = vadd.f32 0.00028619796, %v3001_v10  ;;  %v2891_v30 = vmul.f32 %v2890_v33, %v10115_v43  ;;  %vm10267_vm7 = vmor %vm2907_vm4, %vm2908_vm5  ;;  %v10298_v3 = vld [vmem:[%s7840_s24 + $0x210] sm:$0xff] }
 0x2c2   : > { %vm10259_vm6 = vcmp.eq.f32.partialorder %v2911_v6, 8.507059e+37  ;;  %7466 = vrcp.f32 %v2941_v7  ;;  %v3039_v11 = vmul.f32 %v10254_v0, %v10254_v0  ;;  %v2968_v29 = vadd.f32 0.18741608, %v2967_v40  ;;  %v10301_v40 = vld [vmem:[%s7840_s24 + $0x218] sm:$0xff] }
 0x2c3   : > { %v6499_v61 = vmul.f32 0.5, %v7193_v9  ;;  %v2905_v42 = vmul.f32 %v7465_v35, %v2904_v31  ;;  %v2978_v37 = vmul.f32 %v2977_v19, %v10200_v25  ;;  %v2914_v54 = vor.u32 1.1754944e-38, %v2913_v18 }
 0x2c4   : > { %v2930_v43 = vadd.f32 1.1283791, %v2929_v13  ;;  %v3003_v1 = vmul.f32 %v3002_v23, %v10243_v22  ;;  %v3012_v53 = vmul.f32 3.8918573e-05, %v10243_v22  ;;  %v2951_v17 = vand.u32 2147483647, %v2941_v7 }
 0x2c5   : > { %v6649_v58 = vadd.f32 0.5, %v6499_v61  ;;  %v2906_v16 = vadd.f32 %v7465_v35, %v2905_v42  ;;  %v2979_v39 = vadd.f32 0.4994258, %v2978_v37  ;;  %v2953_v48 = vand.u32 2147483648, %v2941_v7 }
 0x2c6   : > { %v3004_v32 = vadd.f32 0.0036580483, %v3003_v1  ;;  %v3013_v24 = vadd.f32 0.001143296, %v3012_v53  ;;  %v10273_v36 = vmin.f32 %v3039_v11, 16.0  ;;  %v2969_v26 = vmul.f32 %v2968_v29, %v10200_v25 }
 0x2c7   : > { %v6799_v47 = vmul.f32 %v6649_v58, %v10058_v38  ;;  %v2910_v59 = vsel %vm10267_vm7, %v7465_v35, %v2906_v16  ;;  %v2980_v28 = vmul.f32 %v2979_v39, %v10200_v25  ;;  %v2931_v38 = vmul.f32 %v2930_v43, %v10142_v56 }
 0x2c8   : > { %v7467_v51 = vpop.eup %7466  ;;  %v2915_v27 = vsel %vm10259_vm6, %v2914_v54, %v2910_v59  ;;  %v3005_v41 = vmul.f32 %v3004_v32, %v10243_v22  ;;  %v3014_v5 = vmul.f32 %v3013_v24, %v10243_v22  ;;  %v3041_v20 = vmul.f32 2.1237322e-06, %v10273_v36 }
 0x2c9   : > { %6949 = vst [vmem:[%s8053_s16 + $0x1e0] sm:$0xff] %v6799_v47  ;;  %v2916_v2 = vmul.f32 %v2915_v27, %v2891_v30  ;;  %v2943_v49 = vmul.f32 %v7467_v51, %v2941_v7  ;;  %v10287_v63 = vadd.f32 1.0, %v2980_v28  ;;  %vm2947_vm8 = vweird.f32 %v2941_v7 }
 0x2ca   : > { %v3006_v25 = vadd.f32 0.05243302, %v3005_v41  ;;  %v3015_v12 = vadd.f32 0.014752088, %v3014_v5  ;;  %v3042_v50 = vadd.f32 0.00028619796, %v3041_v20  ;;  %vm2948_vm9 = vweird.f32 %v7467_v51 }
 0x2cb   : > { %v7194_v46 = vclamps-f32 %v2916_v2, 1.0  ;;  %v2944_v33 = vsub.f32 1.0, %v2943_v49  ;;  %7468 = vrcp.f32 %v10287_v63  ;;  %vm10290_vm10 = vcmp.eq.f32.partialorder %v2951_v17, 8.507059e+37  ;;  %vm10304_vm11 = vmor %vm2947_vm8, %vm2948_vm9 }
 0x2cc   : > { %v2954_v8 = vor.u32 1.1754944e-38, %v2953_v48  ;;  %v2970_v56 = vadd.f32 1.1283791, %v2969_v26  ;;  %v3016_v35 = vmul.f32 %v3015_v12, %v10243_v22  ;;  %v3043_v10 = vmul.f32 %v3042_v50, %v10273_v36 }
 0x2cd   : > { %v6500_v62 = vmul.f32 0.5, %v7194_v46  ;;  %v2945_v45 = vmul.f32 %v7467_v51, %v2944_v33  ;;  %v3052_v4 = vmul.f32 3.8918573e-05, %v10273_v36  ;;  %vm2987_vm12 = vweird.f32 %v10287_v63 }
 0x2ce   : > { %v2993_v13 = vand.u32 2147483648, %v10287_v63  ;;  %v3007_v19 = vmul.f32 %v3006_v25, %v10243_v22  ;;  %v3017_v9 = vadd.f32 0.112945676, %v3016_v35  ;;  %v3044_v30 = vadd.f32 0.0036580483, %v3043_v10 }
 0x2cf   : > { %v6650_v31 = vadd.f32 0.5, %v6500_v62  ;;  %v2946_v23 = vadd.f32 %v7467_v51, %v2945_v45  ;;  %v3053_v55 = vadd.f32 0.001143296, %v3052_v4  ;;  %v2991_v11 = vand.u32 2147483647, %v10287_v63 }
 0x2d0   : > { %v3018_v7 = vmul.f32 %v3017_v9, %v10243_v22  ;;  %v10314_v61 = vmul.f32 0.70710677, %v10298_v3  ;;  %v10317_v42 = vmul.f32 0.70710677, %v10301_v40  ;;  %v3045_v54 = vmul.f32 %v3044_v30, %v10273_v36 }
 0x2d1   : > { %v7469_v29 = vpop.eup %7468  ;;  %v6800_v37 = vmul.f32 %v6650_v31, %v10106_v52  ;;  %v2950_v21 = vsel %vm10304_vm11, %v7467_v51, %v2946_v23  ;;  %v3054_v43 = vmul.f32 %v3053_v55, %v10273_v36  ;;  %v2994_v58 = vor.u32 1.1754944e-38, %v2993_v13 }
 0x2d2   : > { %v2955_v1 = vsel %vm10290_vm10, %v2954_v8, %v2950_v21  ;;  %v2983_v53 = vmul.f32 %v7469_v29, %v10287_v63  ;;  %v3008_v16 = vadd.f32 0.18741608, %v3007_v19  ;;  %v3019_v39 = vadd.f32 0.4994258, %v3018_v7  ;;  %v10351_v8 = vld [vmem:[%s7840_s24 + $0x220] sm:$0xff] }
 0x2d3   : > { %6950 = vst [vmem:[%s8053_s16 + $0x1e8] sm:$0xff] %v6800_v37  ;;  %v2956_v17 = vmul.f32 %v2955_v1, %v2931_v38  ;;  %v3046_v48 = vadd.f32 0.05243302, %v3045_v54  ;;  %v3079_v52 = vmul.f32 %v10314_v61, %v10314_v61  ;;  %vm2988_vm13 = vweird.f32 %v7469_v29 }
 0x2d4   : > { %v2984_v32 = vsub.f32 1.0, %v2983_v53  ;;  %v3055_v24 = vadd.f32 0.014752088, %v3054_v43  ;;  %v3119_v47 = vmul.f32 %v10317_v42, %v10317_v42  ;;  %v3020_v26 = vmul.f32 %v3019_v39, %v10243_v22  ;;  %vm10342_vm14 = vmor %vm2987_vm12, %vm2988_vm13 }
 0x2d5   : > { %v7195_v59 = vclamps-f32 %v2956_v17, 1.0  ;;  %v3047_v28 = vmul.f32 %v3046_v48, %v10273_v36  ;;  %v10334_v51 = vmin.f32 %v3079_v52, 16.0  ;;  %v3009_v41 = vmul.f32 %v3008_v16, %v10243_v22 }
 0x2d6   : > { %v2985_v27 = vmul.f32 %v7469_v29, %v2984_v32  ;;  %v3056_v5 = vmul.f32 %v3055_v24, %v10273_v36  ;;  %v10338_v20 = vmin.f32 %v3119_v47, 16.0  ;;  %v3021_v49 = vadd.f32 1.0, %v3020_v26 }
 0x2d7   : > { %v6501_v2 = vmul.f32 0.5, %v7195_v59  ;;  %v3048_v25 = vadd.f32 0.18741608, %v3047_v28  ;;  %v3081_v12 = vmul.f32 2.1237322e-06, %v10334_v51  ;;  %v2971_v50 = vmul.f32 %v2970_v56, %v10178_v14 }
 0x2d8   : > { %v2986_v46 = vadd.f32 %v7469_v29, %v2985_v27  ;;  %vm2992_vm15 = vcmp.eq.f32.partialorder %v2991_v11, 8.507059e+37  ;;  %v3057_v22 = vadd.f32 0.112945676, %v3056_v5  ;;  %7470 = vrcp.f32 %v3021_v49 }
 0x2d9   : > { %v6651_v33 = vadd.f32 0.5, %v6501_v2  ;;  %v3092_v6 = vmul.f32 3.8918573e-05, %v10334_v51  ;;  %v3121_v63 = vmul.f32 2.1237322e-06, %v10338_v20  ;;  %v3049_v10 = vmul.f32 %v3048_v25, %v10273_v36 }
 0x2da   : > { %v2990_v35 = vsel %vm10342_vm14, %v7469_v29, %v2986_v46  ;;  %v3010_v62 = vadd.f32 1.1283791, %v3009_v41  ;;  %v3058_v45 = vmul.f32 %v3057_v22, %v10273_v36  ;;  %v3082_v4 = vadd.f32 0.00028619796, %v3081_v12 }
 0x2db   : > { %v6801_v14 = vmul.f32 %v6651_v33, %v10124_v34  ;;  %v2995_v56 = vsel %vm2992_vm15, %v2994_v58, %v2990_v35  ;;  %v3031_v13 = vand.u32 2147483647, %v3021_v49  ;;  %v10359_v9 = vmul.f32 0.70710677, %v10351_v8  ;;  %v10393_v33 = vld [vmem:[%s7840_s24 + $0x228] sm:$0xff] }
 0x2dc   : > { %v2996_v18 = vmul.f32 %v2995_v56, %v2971_v50  ;;  %v3059_v19 = vadd.f32 0.4994258, %v3058_v45  ;;  %vm3027_vm0 = vweird.f32 %v3021_v49  ;;  %v3083_v31 = vmul.f32 %v3082_v4, %v10334_v51 }
 0x2dd   : > { %6951 = vst [vmem:[%s8053_s16 + $0x1f0] sm:$0xff] %v6801_v14  ;;  %v3093_v23 = vadd.f32 0.001143296, %v3092_v6  ;;  %v3122_v30 = vadd.f32 0.00028619796, %v3121_v63  ;;  %v3033_v11 = vand.u32 2147483648, %v3021_v49  ;;  %v3159_v16 = vmul.f32 %v10359_v9, %v10359_v9 }
 0x2de   : > { %v7196_v55 = vclamps-f32 %v2996_v18, 1.0  ;;  %v3060_v34 = vmul.f32 %v3059_v19, %v10273_v36  ;;  %v3132_v7 = vmul.f32 3.8918573e-05, %v10338_v20  ;;  %v7471_v29 = vpop.eup %7470  ;;  %v3050_v37 = vadd.f32 1.1283791, %v3049_v10 }
 0x2df   : > { %v3084_v21 = vadd.f32 0.0036580483, %v3083_v31  ;;  %v3094_v54 = vmul.f32 %v3093_v23, %v10334_v51  ;;  %v3123_v43 = vmul.f32 %v3122_v30, %v10338_v20  ;;  %v3023_v53 = vmul.f32 %v7471_v29, %v3021_v49 }
 0x2e0   : > { %v6502_v1 = vmul.f32 0.5, %v7196_v55  ;;  %v10367_v58 = vadd.f32 1.0, %v3060_v34  ;;  %v3133_v48 = vadd.f32 0.001143296, %v3132_v7  ;;  %vm3028_vm1 = vweird.f32 %v7471_v29 }
 0x2e1   : > { %v3085_v17 = vmul.f32 %v3084_v21, %v10334_v51  ;;  %v3095_v39 = vadd.f32 0.014752088, %v3094_v54  ;;  %v3124_v36 = vadd.f32 0.0036580483, %v3123_v43  ;;  %v3024_v32 = vsub.f32 1.0, %v3023_v53  ;;  %vm10383_vm3 = vmor %vm3027_vm0, %vm3028_vm1 }
 0x2e2   : > { %v6652_v52 = vadd.f32 0.5, %v6502_v1  ;;  %7472 = vrcp.f32 %v10367_v58  ;;  %v3011_v24 = vmul.f32 %v3010_v62, %v10219_v60  ;;  %vm10374_vm2 = vcmp.eq.f32.partialorder %v3031_v13, 8.507059e+37 }
 0x2e3   : > { %v3086_v59 = vadd.f32 0.05243302, %v3085_v17  ;;  %v3096_v26 = vmul.f32 %v3095_v39, %v10334_v51  ;;  %v3025_v27 = vmul.f32 %v7471_v29, %v3024_v32  ;;  %v3125_v41 = vmul.f32 %v3124_v36, %v10338_v20 }
 0x2e4   : > { %v6802_v28 = vmul.f32 %v6652_v52, %v10168_v57  ;;  %v3134_v5 = vmul.f32 %v3133_v48, %v10338_v20  ;;  %v3034_v60 = vor.u32 1.1754944e-38, %v3033_v11  ;;  %v10388_v12 = vmin.f32 %v3159_v16, 16.0 }
 0x2e5   : > { %v3087_v38 = vmul.f32 %v3086_v59, %v10334_v51  ;;  %v3097_v25 = vadd.f32 0.112945676, %v3096_v26  ;;  %v3026_v50 = vadd.f32 %v7471_v29, %v3025_v27  ;;  %v3051_v57 = vmul.f32 %v3050_v37, %v10254_v0 }
 0x2e6   : > { %6952 = vst [vmem:[%s8053_s16 + $0x1f8] sm:$0xff] %v6802_v28  ;;  %v3126_v46 = vadd.f32 0.05243302, %v3125_v41  ;;  %v3135_v22 = vadd.f32 0.014752088, %v3134_v5  ;;  %vm3067_vm4 = vweird.f32 %v10367_v58  ;;  %v3073_v19 = vand.u32 2147483648, %v10367_v58 }
 0x2e7   : > { %v3088_v49 = vadd.f32 0.18741608, %v3087_v38  ;;  %v3098_v6 = vmul.f32 %v3097_v25, %v10334_v51  ;;  %v3161_v63 = vmul.f32 2.1237322e-06, %v10388_v12  ;;  %v3030_v62 = vsel %vm10383_vm3, %v7471_v29, %v3026_v50 }
 0x2e8   : > { %v7473_v35 = vpop.eup %7472  ;;  %v3071_v45 = vand.u32 2147483647, %v10367_v58  ;;  %v3127_v14 = vmul.f32 %v3126_v46, %v10338_v20  ;;  %v3136_v0 = vmul.f32 %v3135_v22, %v10338_v20  ;;  %v3035_v56 = vsel %vm10374_vm2, %v3034_v60, %v3030_v62 }
 0x2e9   : > { %v3063_v10 = vmul.f32 %v7473_v35, %v10367_v58  ;;  %v3172_v4 = vmul.f32 3.8918573e-05, %v10388_v12  ;;  %v10408_v18 = vmul.f32 0.70710677, %v10393_v33  ;;  %v3036_v13 = vmul.f32 %v3035_v56, %v3011_v24 }
 0x2ea   : > { %v3099_v31 = vadd.f32 0.4994258, %v3098_v6  ;;  %v3137_v23 = vadd.f32 0.112945676, %v3136_v0  ;;  %vm3068_vm5 = vweird.f32 %v7473_v35  ;;  %v3089_v55 = vmul.f32 %v3088_v49, %v10334_v51 }
 0x2eb   : > { %v3064_v30 = vsub.f32 1.0, %v3063_v10  ;;  %v3162_v11 = vadd.f32 0.00028619796, %v3161_v63  ;;  %v7197_v34 = vclamps-f32 %v3036_v13, 1.0  ;;  %v3128_v29 = vadd.f32 0.18741608, %v3127_v14  ;;  %vm10419_vm6 = vmor %vm3067_vm4, %vm3068_vm5 }
 0x2ec   : > { %v3100_v7 = vmul.f32 %v3099_v31, %v10334_v51  ;;  %v3138_v37 = vmul.f32 %v3137_v23, %v10338_v20  ;;  %v3173_v43 = vadd.f32 0.001143296, %v3172_v4  ;;  %v3199_v1 = vmul.f32 %v10408_v18, %v10408_v18 }
 0x2ed   : > { %v3065_v21 = vmul.f32 %v7473_v35, %v3064_v30  ;;  %v3163_v54 = vmul.f32 %v3162_v11, %v10388_v12  ;;  %v6503_v53 = vmul.f32 0.5, %v7197_v34  ;;  %v3074_v17 = vor.u32 1.1754944e-38, %v3073_v19 }
 0x2ee   : > { %v3101_v39 = vadd.f32 1.0, %v3100_v7  ;;  %v3139_v51 = vadd.f32 0.4994258, %v3138_v37  ;;  %vm3072_vm7 = vcmp.eq.f32.partialorder %v3071_v45, 8.507059e+37  ;;  %v3174_v52 = vmul.f32 %v3173_v43, %v10388_v12 }
 0x2ef   : > { %v3066_v36 = vadd.f32 %v7473_v35, %v3065_v21  ;;  %v3164_v48 = vadd.f32 0.0036580483, %v3163_v54  ;;  %v6653_v32 = vadd.f32 0.5, %v6503_v53  ;;  %v3090_v24 = vadd.f32 1.1283791, %v3089_v55  ;;  %v10459_v21 = vld [vmem:[%s7840_s24 + $0x238] sm:$0xff] }
 0x2f0   : > { %7474 = vrcp.f32 %v3101_v39  ;;  %v3129_v58 = vmul.f32 %v3128_v29, %v10338_v20  ;;  %v3140_v59 = vmul.f32 %v3139_v51, %v10338_v20  ;;  %v10428_v26 = vmin.f32 %v3199_v1, 16.0 }
 0x2f1   : > { %v3070_v47 = vsel %vm10419_vm6, %v7473_v35, %v3066_v36  ;;  %v6803_v28 = vmul.f32 %v6653_v32, %v10211_v15  ;;  %v3111_v41 = vand.u32 2147483647, %v3101_v39  ;;  %v3165_v5 = vmul.f32 %v3164_v48, %v10388_v12  ;;  %v10441_v35 = vld [vmem:[%s7840_s24 + $0x230] sm:$0xff] }
 0x2f2   : > { %v3075_v27 = vsel %vm3072_vm7, %v3074_v17, %v3070_v47  ;;  %v3113_v60 = vand.u32 2147483648, %v3101_v39  ;;  %v10432_v38 = vadd.f32 1.0, %v3140_v59  ;;  %v3175_v25 = vadd.f32 0.014752088, %v3174_v52 }
 0x2f3   : > { %v3076_v2 = vmul.f32 %v3075_v27, %v3051_v57  ;;  %6953 = vst [vmem:[%s8053_s16 + $0x200] sm:$0xff] %v6803_v28  ;;  %v3166_v50 = vadd.f32 0.05243302, %v3165_v5  ;;  %v3201_v46 = vmul.f32 2.1237322e-06, %v10428_v26  ;;  %v3091_v20 = vmul.f32 %v3090_v24, %v10314_v61 }
 0x2f4   : > { %v3130_v49 = vadd.f32 1.1283791, %v3129_v58  ;;  %7476 = vrcp.f32 %v10432_v38  ;;  %vm3107_vm8 = vweird.f32 %v3101_v39  ;;  %v3176_v57 = vmul.f32 %v3175_v25, %v10388_v12 }
 0x2f5   : > { %v7198_v22 = vclamps-f32 %v3076_v2, 1.0  ;;  %v3167_v6 = vmul.f32 %v3166_v50, %v10388_v12  ;;  %v3202_v63 = vadd.f32 0.00028619796, %v3201_v46  ;;  %vm10443_vm9 = vcmp.eq.f32.partialorder %v3111_v41, 8.507059e+37 }
 0x2f6   : > { %v7475_v15 = vpop.eup %7474  ;;  %v3114_v0 = vor.u32 1.1754944e-38, %v3113_v60  ;;  %v3177_v56 = vadd.f32 0.112945676, %v3176_v57  ;;  %v3212_v19 = vmul.f32 3.8918573e-05, %v10428_v26  ;;  %vm3147_vm11 = vweird.f32 %v10432_v38 }
 0x2f7   : > { %v6504_v62 = vmul.f32 0.5, %v7198_v22  ;;  %v3103_v45 = vmul.f32 %v7475_v15, %v3101_v39  ;;  %vm3108_vm10 = vweird.f32 %v7475_v15  ;;  %v3168_v61 = vadd.f32 0.18741608, %v3167_v6 }
 0x2f8   : > { %v3203_v10 = vmul.f32 %v3202_v63, %v10428_v26  ;;  %v10450_v31 = vmul.f32 0.70710677, %v10441_v35  ;;  %v3151_v23 = vand.u32 2147483647, %v10432_v38  ;;  %v3178_v30 = vmul.f32 %v3177_v56, %v10388_v12  ;;  %vm10463_vm12 = vmor %vm3107_vm8, %vm3108_vm10 }
 0x2f9   : > { %v6654_v4 = vadd.f32 0.5, %v6504_v62  ;;  %v3104_v13 = vsub.f32 1.0, %v3103_v45  ;;  %v3213_v29 = vadd.f32 0.001143296, %v3212_v19  ;;  %v3153_v1 = vand.u32 2147483648, %v10432_v38  ;;  %v10503_v45 = vld [vmem:[%s7840_s24 + $0x240] sm:$0xff] }
 0x2fa   : > { %v3204_v55 = vadd.f32 0.0036580483, %v3203_v10  ;;  %v7477_v11 = vpop.eup %7476  ;;  %v3239_v37 = vmul.f32 %v10450_v31, %v10450_v31  ;;  %v3169_v53 = vmul.f32 %v3168_v61, %v10388_v12  ;;  %v10477_v52 = vmul.f32 0.70710677, %v10459_v21 }
 0x2fb   : > { %v6804_v34 = vmul.f32 %v6654_v4, %v10241_v44  ;;  %v3105_v7 = vmul.f32 %v7475_v15, %v3104_v13  ;;  %v3143_v43 = vmul.f32 %v7477_v11, %v10432_v38  ;;  %v3179_v44 = vadd.f32 0.4994258, %v3178_v30 }
 0x2fc   : > { %v3205_v17 = vmul.f32 %v3204_v55, %v10428_v26  ;;  %v3214_v51 = vmul.f32 %v3213_v29, %v10428_v26  ;;  %v10473_v36 = vmin.f32 %v3239_v37, 16.0  ;;  %vm3148_vm13 = vweird.f32 %v7477_v11 }
 0x2fd   : > { %6954 = vst [vmem:[%s8053_s16 + $0x208] sm:$0xff] %v6804_v34  ;;  %v3106_v16 = vadd.f32 %v7475_v15, %v3105_v7  ;;  %v3144_v39 = vsub.f32 1.0, %v3143_v43  ;;  %v3180_v48 = vmul.f32 %v3179_v44, %v10388_v12  ;;  %vm10489_vm14 = vmor %vm3147_vm11, %vm3148_vm13  ;;  %v3154_v2 = vor.u32 1.1754944e-38, %v3153_v1 }
 0x2fe   : > { %v3206_v24 = vadd.f32 0.05243302, %v3205_v17  ;;  %v3215_v47 = vadd.f32 0.014752088, %v3214_v51  ;;  %v3241_v58 = vmul.f32 2.1237322e-06, %v10473_v36  ;;  %v3131_v50 = vmul.f32 %v3130_v49, %v10317_v42 }
 0x2ff   : > { %v3110_v32 = vsel %vm10463_vm12, %v7475_v15, %v3106_v16  ;;  %v3145_v28 = vmul.f32 %v7477_v11, %v3144_v39  ;;  %v10484_v27 = vadd.f32 1.0, %v3180_v48  ;;  %v3252_v41 = vmul.f32 3.8918573e-05, %v10473_v36 }
 0x300   : > { %v3115_v59 = vsel %vm10443_vm9, %v3114_v0, %v3110_v32  ;;  %v3216_v60 = vmul.f32 %v3215_v47, %v10428_v26  ;;  %v3242_v25 = vadd.f32 0.00028619796, %v3241_v58  ;;  %vm3152_vm15 = vcmp.eq.f32.partialorder %v3151_v23, 8.507059e+37 }
 0x301   : > { %v3116_v5 = vmul.f32 %v3115_v59, %v3091_v20  ;;  %v3146_v46 = vadd.f32 %v7477_v11, %v3145_v28  ;;  %7478 = vrcp.f32 %v10484_v27  ;;  %v3170_v15 = vadd.f32 1.1283791, %v3169_v53 }
 0x302   : > { %v3217_v20 = vadd.f32 0.112945676, %v3216_v60  ;;  %v3279_v38 = vmul.f32 %v10477_v52, %v10477_v52  ;;  %v3207_v57 = vmul.f32 %v3206_v24, %v10428_v26  ;;  %v3243_v63 = vmul.f32 %v3242_v25, %v10473_v36 }
 0x303   : > { %v7199_v22 = vclamps-f32 %v3116_v5, 1.0  ;;  %v3150_v6 = vsel %vm10489_vm14, %v7477_v11, %v3146_v46  ;;  %v3253_v62 = vadd.f32 0.001143296, %v3252_v41  ;;  %vm3187_vm0 = vweird.f32 %v10484_v27 }
 0x304   : > { %v3155_v49 = vsel %vm3152_vm15, %v3154_v2, %v3150_v6  ;;  %v3191_v14 = vand.u32 2147483647, %v10484_v27  ;;  %v3218_v61 = vmul.f32 %v3217_v20, %v10428_v26  ;;  %v3244_v56 = vadd.f32 0.0036580483, %v3243_v63 }
 0x305   : > { %v6505_v42 = vmul.f32 0.5, %v7199_v22  ;;  %v3156_v0 = vmul.f32 %v3155_v49, %v3131_v50  ;;  %v3254_v10 = vmul.f32 %v3253_v62, %v10473_v36  ;;  %v3193_v13 = vand.u32 2147483648, %v10484_v27 }
 0x306   : > { %v10510_v19 = vmin.f32 %v3279_v38, 16.0  ;;  %v10513_v23 = vmul.f32 0.70710677, %v10503_v45  ;;  %v3219_v11 = vadd.f32 0.4994258, %v3218_v61  ;;  %v3245_v34 = vmul.f32 %v3244_v56, %v10473_v36 }
 0x307   : > { %v6655_v4 = vadd.f32 0.5, %v6505_v42  ;;  %v7479_v30 = vpop.eup %7478  ;;  %v7200_v55 = vclamps-f32 %v3156_v0, 1.0  ;;  %v3255_v7 = vadd.f32 0.014752088, %v3254_v10  ;;  %v3208_v54 = vadd.f32 0.18741608, %v3207_v57 }
 0x308   : > { %v3183_v37 = vmul.f32 %v7479_v30, %v10484_v27  ;;  %vm3188_vm1 = vweird.f32 %v7479_v30  ;;  %v3220_v1 = vmul.f32 %v3219_v11, %v10428_v26  ;;  %v3246_v53 = vadd.f32 0.05243302, %v3245_v34 }
 0x309   : > { %v6805_v29 = vmul.f32 %v6655_v4, %v10298_v3  ;;  %v6506_v43 = vmul.f32 0.5, %v7200_v55  ;;  %v3256_v44 = vmul.f32 %v3255_v7, %v10473_v36  ;;  %v3281_v17 = vmul.f32 2.1237322e-06, %v10510_v19  ;;  %vm10531_vm2 = vmor %vm3187_vm0, %vm3188_vm1 }
 0x30a   : > { %v3184_v16 = vsub.f32 1.0, %v3183_v37  ;;  %v3292_v51 = vmul.f32 3.8918573e-05, %v10510_v19  ;;  %v3319_v39 = vmul.f32 %v10513_v23, %v10513_v23  ;;  %v3171_v48 = vmul.f32 %v3170_v15, %v10359_v9  ;;  %v10546_v15 = vld [vmem:[%s7840_s24 + $0x248] sm:$0xff] }
 0x30b   : > { %6955 = vst [vmem:[%s8053_s16 + $0x210] sm:$0xff] %v6805_v29  ;;  %v6656_v3 = vadd.f32 0.5, %v6506_v43  ;;  %v3221_v32 = vadd.f32 1.0, %v3220_v1  ;;  %v3257_v24 = vadd.f32 0.112945676, %v3256_v44  ;;  %v3209_v58 = vmul.f32 %v3208_v54, %v10428_v26 }
 0x30c   : > { %v3185_v47 = vmul.f32 %v7479_v30, %v3184_v16  ;;  %v3282_v59 = vadd.f32 0.00028619796, %v3281_v17  ;;  %v3293_v28 = vadd.f32 0.001143296, %v3292_v51  ;;  %v3194_v12 = vor.u32 1.1754944e-38, %v3193_v13 }
 0x30d   : > { %v6806_v41 = vmul.f32 %v6656_v3, %v10301_v40  ;;  %7480 = vrcp.f32 %v3221_v32  ;;  %v10535_v9 = vmin.f32 %v3319_v39, 16.0  ;;  %vm3192_vm3 = vcmp.eq.f32.partialorder %v3191_v14, 8.507059e+37 }
 0x30e   : > { %v3186_v2 = vadd.f32 %v7479_v30, %v3185_v47  ;;  %v3247_v26 = vmul.f32 %v3246_v53, %v10473_v36  ;;  %v3258_v60 = vmul.f32 %v3257_v24, %v10473_v36  ;;  %v3283_v40 = vmul.f32 %v3282_v59, %v10510_v19 }
 0x30f   : > { %6956 = vst [vmem:[%s8053_s16 + $0x218] sm:$0xff] %v6806_v41  ;;  %v3294_v27 = vmul.f32 %v3293_v28, %v10510_v19  ;;  %v3321_v25 = vmul.f32 2.1237322e-06, %v10535_v9  ;;  %v3210_v46 = vadd.f32 1.1283791, %v3209_v58  ;;  %vm3227_vm4 = vweird.f32 %v3221_v32  ;;  %v10576_v41 = vld [vmem:[%s7840_s24 + $0x250] sm:$0xff] }
 0x310   : > { %v3190_v50 = vsel %vm10531_vm2, %v7479_v30, %v3186_v2  ;;  %v3259_v22 = vadd.f32 0.4994258, %v3258_v60  ;;  %v3284_v38 = vadd.f32 0.0036580483, %v3283_v40  ;;  %v3248_v62 = vadd.f32 0.18741608, %v3247_v26 }
 0x311   : > { %v3195_v20 = vsel %vm3192_vm3, %v3194_v12, %v3190_v50  ;;  %v3295_v6 = vadd.f32 0.014752088, %v3294_v27  ;;  %v3322_v57 = vadd.f32 0.00028619796, %v3321_v25  ;;  %v3332_v49 = vmul.f32 3.8918573e-05, %v10535_v9 }
 0x312   : > { %v3196_v63 = vmul.f32 %v3195_v20, %v3171_v48  ;;  %v3260_v42 = vmul.f32 %v3259_v22, %v10473_v36  ;;  %v3285_v0 = vmul.f32 %v3284_v38, %v10510_v19  ;;  %v10554_v10 = vmul.f32 0.70710677, %v10546_v15 }
 0x313   : > { %v7481_v14 = vpop.eup %7480  ;;  %v3296_v61 = vmul.f32 %v3295_v6, %v10510_v19  ;;  %v3323_v56 = vmul.f32 %v3322_v57, %v10535_v9  ;;  %v3231_v30 = vand.u32 2147483647, %v3221_v32  ;;  %v3233_v55 = vand.u32 2147483648, %v3221_v32 }
 0x314   : > { %v7201_v4 = vclamps-f32 %v3196_v63, 1.0  ;;  %v3223_v13 = vmul.f32 %v7481_v14, %v3221_v32  ;;  %vm3228_vm5 = vweird.f32 %v7481_v14  ;;  %v3261_v11 = vadd.f32 1.0, %v3260_v42 }
 0x315   : > { %v3286_v34 = vadd.f32 0.05243302, %v3285_v0  ;;  %v3297_v7 = vadd.f32 0.112945676, %v3296_v61  ;;  %v3324_v54 = vadd.f32 0.0036580483, %v3323_v56  ;;  %v3211_v1 = vmul.f32 %v3210_v46, %v10408_v18  ;;  %vm10564_vm6 = vmor %vm3227_vm4, %vm3228_vm5 }
 0x316   : > { %v6507_v29 = vmul.f32 0.5, %v7201_v4  ;;  %v3224_v37 = vsub.f32 1.0, %v3223_v13  ;;  %v3333_v43 = vadd.f32 0.001143296, %v3332_v49  ;;  %v3249_v53 = vmul.f32 %v3248_v62, %v10473_v36 }
 0x317   : > { %7482 = vrcp.f32 %v3261_v11  ;;  %v3359_v44 = vmul.f32 %v10554_v10, %v10554_v10  ;;  %v3287_v51 = vmul.f32 %v3286_v34, %v10510_v19  ;;  %v3298_v39 = vmul.f32 %v3297_v7, %v10510_v19 }
 0x318   : > { %v6657_v16 = vadd.f32 0.5, %v6507_v29  ;;  %v3225_v17 = vmul.f32 %v7481_v14, %v3224_v37  ;;  %vm10568_vm7 = vcmp.eq.f32.partialorder %v3231_v30, 8.507059e+37  ;;  %v3234_v36 = vor.u32 1.1754944e-38, %v3233_v55 }
 0x319   : > { %v3325_v48 = vmul.f32 %v3324_v54, %v10535_v9  ;;  %v3334_v24 = vmul.f32 %v3333_v43, %v10535_v9  ;;  %v3288_v59 = vadd.f32 0.18741608, %v3287_v51  ;;  %v3299_v28 = vadd.f32 0.4994258, %v3298_v39 }
 0x31a   : > { %v6807_v47 = vmul.f32 %v6657_v16, %v10351_v8  ;;  %v3226_v58 = vadd.f32 %v7481_v14, %v3225_v17  ;;  %v10578_v12 = vmin.f32 %v3359_v44, 16.0  ;;  %v3250_v26 = vadd.f32 1.1283791, %v3249_v53 }
 0x31b   : > { %v3326_v32 = vadd.f32 0.05243302, %v3325_v48  ;;  %v3335_v5 = vadd.f32 0.014752088, %v3334_v24  ;;  %v3271_v60 = vand.u32 2147483647, %v3261_v11  ;;  %v3300_v40 = vmul.f32 %v3299_v28, %v10510_v19 }
 0x31c   : > { %6957 = vst [vmem:[%s8053_s16 + $0x220] sm:$0xff] %v6807_v47  ;;  %v3230_v2 = vsel %vm10564_vm6, %v7481_v14, %v3226_v58  ;;  %v3361_v50 = vmul.f32 2.1237322e-06, %v10578_v12  ;;  %v10589_v46 = vmul.f32 0.70710677, %v10576_v41  ;;  %vm3267_vm8 = vweird.f32 %v3261_v11 }
 0x31d   : > { %v7483_v27 = vpop.eup %7482  ;;  %v3235_v8 = vsel %vm10568_vm7, %v3234_v36, %v3230_v2  ;;  %v3336_v25 = vmul.f32 %v3335_v5, %v10535_v9  ;;  %v3327_v38 = vmul.f32 %v3326_v32, %v10535_v9  ;;  %v3273_v6 = vand.u32 2147483648, %v3261_v11 }
 0x31e   : > { %v3236_v22 = vmul.f32 %v3235_v8, %v3211_v1  ;;  %v3263_v20 = vmul.f32 %v7483_v27, %v3261_v11  ;;  %v3289_v57 = vmul.f32 %v3288_v59, %v10510_v19  ;;  %v3301_v63 = vadd.f32 1.0, %v3300_v40 }
 0x31f   : > { %v3337_v62 = vadd.f32 0.112945676, %v3336_v25  ;;  %vm3268_vm9 = vweird.f32 %v7483_v27  ;;  %v3362_v14 = vadd.f32 0.00028619796, %v3361_v50  ;;  %v3251_v0 = vmul.f32 %v3250_v26, %v10450_v31 }
 0x320   : > { %v7202_v42 = vclamps-f32 %v3236_v22, 1.0  ;;  %v3264_v49 = vsub.f32 1.0, %v3263_v20  ;;  %vm10594_vm10 = vcmp.eq.f32.partialorder %v3271_v60, 8.507059e+37  ;;  %7484 = vrcp.f32 %v3301_v63  ;;  %vm10602_vm11 = vmor %vm3267_vm8, %vm3268_vm9  ;;  %v10633_v20 = vld [vmem:[%s7840_s24 + $0x258] sm:$0xff] }
 0x321   : > { %v3399_v56 = vmul.f32 %v10589_v46, %v10589_v46  ;;  %v3328_v30 = vadd.f32 0.18741608, %v3327_v38  ;;  %v3338_v19 = vmul.f32 %v3337_v62, %v10535_v9  ;;  %v3274_v34 = vor.u32 1.1754944e-38, %v3273_v6  ;;  %v10636_v38 = vld [vmem:[%s7840_s24 + $0x260] sm:$0xff] }
 0x322   : > { %v6508_v4 = vmul.f32 0.5, %v7202_v42  ;;  %v3265_v13 = vmul.f32 %v7483_v27, %v3264_v49  ;;  %v3290_v31 = vadd.f32 1.1283791, %v3289_v57  ;;  %v3363_v7 = vmul.f32 %v3362_v14, %v10578_v12 }
 0x323   : > { %v3372_v29 = vmul.f32 3.8918573e-05, %v10578_v12  ;;  %v3311_v43 = vand.u32 2147483647, %v3301_v63  ;;  %v3339_v1 = vadd.f32 0.4994258, %v3338_v19  ;;  %v3329_v39 = vmul.f32 %v3328_v30, %v10535_v9 }
 0x324   : > { %v6658_v37 = vadd.f32 0.5, %v6508_v4  ;;  %v3266_v54 = vadd.f32 %v7483_v27, %v3265_v13  ;;  %v3313_v53 = vand.u32 2147483648, %v3301_v63  ;;  %v3364_v44 = vadd.f32 0.0036580483, %v3363_v7 }
 0x325   : > { %v3373_v16 = vadd.f32 0.001143296, %v3372_v29  ;;  %v10608_v17 = vmin.f32 %v3399_v56, 16.0  ;;  %v3340_v3 = vmul.f32 %v3339_v1, %v10535_v9  ;;  %vm3307_vm12 = vweird.f32 %v3301_v63 }
 0x326   : > { %v6808_v11 = vmul.f32 %v6658_v37, %v10393_v33  ;;  %v3270_v51 = vsel %vm10602_vm11, %v7483_v27, %v3266_v54  ;;  %v7485_v18 = vpop.eup %7484  ;;  %v3365_v48 = vmul.f32 %v3364_v44, %v10578_v12  ;;  %v3291_v33 = vmul.f32 %v3290_v31, %v10477_v52 }
 0x327   : > { %v3275_v36 = vsel %vm10594_vm10, %v3274_v34, %v3270_v51  ;;  %v3374_v24 = vmul.f32 %v3373_v16, %v10578_v12  ;;  %v3401_v47 = vmul.f32 2.1237322e-06, %v10608_v17  ;;  %v3303_v59 = vmul.f32 %v7485_v18, %v3301_v63 }
 0x328   : > { %6958 = vst [vmem:[%s8053_s16 + $0x228] sm:$0xff] %v6808_v11  ;;  %v3276_v58 = vmul.f32 %v3275_v36, %v3251_v0  ;;  %v10622_v28 = vadd.f32 1.0, %v3340_v3  ;;  %v3366_v9 = vadd.f32 0.05243302, %v3365_v48  ;;  %vm3308_vm13 = vweird.f32 %v7485_v18 }
 0x329   : > { %v3375_v32 = vadd.f32 0.014752088, %v3374_v24  ;;  %v3402_v5 = vadd.f32 0.00028619796, %v3401_v47  ;;  %v3304_v26 = vsub.f32 1.0, %v3303_v59  ;;  %vm10625_vm14 = vcmp.eq.f32.partialorder %v3311_v43, 8.507059e+37  ;;  %vm10639_vm15 = vmor %vm3307_vm12, %vm3308_vm13 }
 0x32a   : > { %v7203_v2 = vclamps-f32 %v3276_v58, 1.0  ;;  %7486 = vrcp.f32 %v10622_v28  ;;  %v3314_v40 = vor.u32 1.1754944e-38, %v3313_v53  ;;  %v3330_v52 = vadd.f32 1.1283791, %v3329_v39 }
 0x32b   : > { %v3376_v27 = vmul.f32 %v3375_v32, %v10578_v12  ;;  %v3305_v25 = vmul.f32 %v7485_v18, %v3304_v26  ;;  %v3403_v50 = vmul.f32 %v3402_v5, %v10608_v17  ;;  %v3412_v22 = vmul.f32 3.8918573e-05, %v10608_v17 }
 0x32c   : > { %v6509_v8 = vmul.f32 0.5, %v7203_v2  ;;  %vm3347_vm0 = vweird.f32 %v10622_v28  ;;  %v3353_v57 = vand.u32 2147483648, %v10622_v28  ;;  %v3367_v62 = vmul.f32 %v3366_v9, %v10578_v12 }
 0x32d   : > { %v3377_v42 = vadd.f32 0.112945676, %v3376_v27  ;;  %v3306_v14 = vadd.f32 %v7485_v18, %v3305_v25  ;;  %v3404_v0 = vadd.f32 0.0036580483, %v3403_v50  ;;  %v3413_v61 = vadd.f32 0.001143296, %v3412_v22 }
 0x32e   : > { %v6659_v49 = vadd.f32 0.5, %v6509_v8  ;;  %v3351_v56 = vand.u32 2147483647, %v10622_v28  ;;  %v10649_v4 = vmul.f32 0.70710677, %v10633_v20  ;;  %v3354_v37 = vor.u32 1.1754944e-38, %v3353_v57 }
 0x32f   : > { %v3378_v63 = vmul.f32 %v3377_v42, %v10578_v12  ;;  %v10652_v13 = vmul.f32 0.70710677, %v10636_v38  ;;  %v3310_v55 = vsel %vm10639_vm15, %v7485_v18, %v3306_v14  ;;  %v3405_v34 = vmul.f32 %v3404_v0, %v10608_v17 }
 0x330   : > { %v7487_v30 = vpop.eup %7486  ;;  %v6809_v19 = vmul.f32 %v6659_v49, %v10441_v35  ;;  %v3414_v31 = vmul.f32 %v3413_v61, %v10608_v17  ;;  %v3315_v7 = vsel %vm10625_vm14, %v3314_v40, %v3310_v55  ;;  %v3368_v54 = vadd.f32 0.18741608, %v3367_v62  ;;  %v10686_v40 = vld [vmem:[%s7840_s24 + $0x268] sm:$0xff] }
 0x331   : > { %v3343_v29 = vmul.f32 %v7487_v30, %v10622_v28  ;;  %v3316_v43 = vmul.f32 %v3315_v7, %v3291_v33  ;;  %v3379_v1 = vadd.f32 0.4994258, %v3378_v63  ;;  %v3406_v53 = vadd.f32 0.05243302, %v3405_v34 }
 0x332   : > { %6959 = vst [vmem:[%s8053_s16 + $0x230] sm:$0xff] %v6809_v19  ;;  %v3439_v35 = vmul.f32 %v10649_v4, %v10649_v4  ;;  %vm3348_vm1 = vweird.f32 %v7487_v30  ;;  %v3415_v16 = vadd.f32 0.014752088, %v3414_v31  ;;  %v3479_v11 = vmul.f32 %v10652_v13, %v10652_v13 }
 0x333   : > { %v3344_v44 = vsub.f32 1.0, %v3343_v29  ;;  %v7204_v51 = vclamps-f32 %v3316_v43, 1.0  ;;  %v3380_v39 = vmul.f32 %v3379_v1, %v10578_v12  ;;  %v3407_v3 = vmul.f32 %v3406_v53, %v10608_v17  ;;  %vm10677_vm2 = vmor %vm3347_vm0, %vm3348_vm1 }
 0x334   : > { %v10669_v18 = vmin.f32 %v3439_v35, 16.0  ;;  %v3369_v48 = vmul.f32 %v3368_v54, %v10578_v12  ;;  %v3416_v24 = vmul.f32 %v3415_v16, %v10608_v17  ;;  %v10673_v47 = vmin.f32 %v3479_v11, 16.0 }
 0x335   : > { %v3345_v36 = vmul.f32 %v7487_v30, %v3344_v44  ;;  %v6510_v58 = vmul.f32 0.5, %v7204_v51  ;;  %v3381_v59 = vadd.f32 1.0, %v3380_v39  ;;  %v3408_v9 = vadd.f32 0.18741608, %v3407_v3 }
 0x336   : > { %v3441_v32 = vmul.f32 2.1237322e-06, %v10669_v18  ;;  %v3331_v5 = vmul.f32 %v3330_v52, %v10513_v23  ;;  %vm3352_vm3 = vcmp.eq.f32.partialorder %v3351_v56, 8.507059e+37  ;;  %v3417_v12 = vadd.f32 0.112945676, %v3416_v24 }
 0x337   : > { %v3346_v2 = vadd.f32 %v7487_v30, %v3345_v36  ;;  %v6660_v26 = vadd.f32 0.5, %v6510_v58  ;;  %7488 = vrcp.f32 %v3381_v59  ;;  %v3452_v60 = vmul.f32 3.8918573e-05, %v10669_v18 }
 0x338   : > { %v3481_v28 = vmul.f32 2.1237322e-06, %v10673_v47  ;;  %v3370_v8 = vadd.f32 1.1283791, %v3369_v48  ;;  %v3418_v25 = vmul.f32 %v3417_v12, %v10608_v17  ;;  %v3409_v50 = vmul.f32 %v3408_v9, %v10608_v17 }
 0x339   : > { %v3350_v27 = vsel %vm10677_vm2, %v7487_v30, %v3346_v2  ;;  %v6810_v23 = vmul.f32 %v6660_v26, %v10459_v21  ;;  %v3442_v22 = vadd.f32 0.00028619796, %v3441_v32  ;;  %v3391_v57 = vand.u32 2147483647, %v3381_v59  ;;  %v10728_v26 = vld [vmem:[%s7840_s24 + $0x270] sm:$0xff] }
 0x33a   : > { %v3355_v52 = vsel %vm3352_vm3, %v3354_v37, %v3350_v27  ;;  %v3419_v62 = vadd.f32 0.4994258, %v3418_v25  ;;  %v10694_v42 = vmul.f32 0.70710677, %v10686_v40  ;;  %vm3387_vm4 = vweird.f32 %v3381_v59 }
 0x33b   : > { %v3356_v6 = vmul.f32 %v3355_v52, %v3331_v5  ;;  %6960 = vst [vmem:[%s8053_s16 + $0x238] sm:$0xff] %v6810_v23  ;;  %v3443_v49 = vmul.f32 %v3442_v22, %v10669_v18  ;;  %v3453_v14 = vadd.f32 0.001143296, %v3452_v60  ;;  %v3482_v0 = vadd.f32 0.00028619796, %v3481_v28 }
 0x33c   : > { %v3393_v56 = vand.u32 2147483648, %v3381_v59  ;;  %v3420_v21 = vmul.f32 %v3419_v62, %v10608_v17  ;;  %v3492_v63 = vmul.f32 3.8918573e-05, %v10673_v47  ;;  %v3410_v19 = vadd.f32 1.1283791, %v3409_v50 }
 0x33d   : > { %v7205_v61 = vclamps-f32 %v3356_v6, 1.0  ;;  %v7489_v30 = vpop.eup %7488  ;;  %v3444_v55 = vadd.f32 0.0036580483, %v3443_v49  ;;  %v3454_v34 = vmul.f32 %v3453_v14, %v10669_v18  ;;  %v3483_v31 = vmul.f32 %v3482_v0, %v10673_v47 }
 0x33e   : > { %v3383_v29 = vmul.f32 %v7489_v30, %v3381_v59  ;;  %v10702_v37 = vadd.f32 1.0, %v3420_v21  ;;  %v3519_v54 = vmul.f32 %v10694_v42, %v10694_v42  ;;  %v3493_v53 = vadd.f32 0.001143296, %v3492_v63 }
 0x33f   : > { %v6511_v7 = vmul.f32 0.5, %v7205_v61  ;;  %v3445_v43 = vmul.f32 %v3444_v55, %v10669_v18  ;;  %v3455_v1 = vadd.f32 0.014752088, %v3454_v34  ;;  %v3484_v17 = vadd.f32 0.0036580483, %v3483_v31 }
 0x340   : > { %v3384_v44 = vsub.f32 1.0, %v3383_v29  ;;  %vm3388_vm5 = vweird.f32 %v7489_v30  ;;  %7490 = vrcp.f32 %v10702_v37  ;;  %v3371_v16 = vmul.f32 %v3370_v8, %v10554_v10 }
 0x341   : > { %v6661_v35 = vadd.f32 0.5, %v6511_v7  ;;  %vm10709_vm6 = vcmp.eq.f32.partialorder %v3391_v57, 8.507059e+37  ;;  %v3446_v51 = vadd.f32 0.05243302, %v3445_v43  ;;  %v3456_v39 = vmul.f32 %v3455_v1, %v10669_v18  ;;  %vm10718_vm7 = vmor %vm3387_vm4, %vm3388_vm5 }
 0x342   : > { %v3385_v36 = vmul.f32 %v7489_v30, %v3384_v44  ;;  %v3485_v48 = vmul.f32 %v3484_v17, %v10673_v47  ;;  %v3494_v24 = vmul.f32 %v3493_v53, %v10673_v47  ;;  %v3394_v10 = vor.u32 1.1754944e-38, %v3393_v56 }
 0x343   : > { %v6811_v3 = vmul.f32 %v6661_v35, %v10503_v45  ;;  %v3447_v33 = vmul.f32 %v3446_v51, %v10669_v18  ;;  %v3457_v9 = vadd.f32 0.112945676, %v3456_v39  ;;  %v10723_v32 = vmin.f32 %v3519_v54, 16.0 }
 0x344   : > { %v3386_v5 = vadd.f32 %v7489_v30, %v3385_v36  ;;  %v3411_v45 = vmul.f32 %v3410_v19, %v10589_v46  ;;  %v3486_v2 = vadd.f32 0.05243302, %v3485_v48  ;;  %v3495_v12 = vadd.f32 0.014752088, %v3494_v24 }
 0x345   : > { %6961 = vst [vmem:[%s8053_s16 + $0x240] sm:$0xff] %v6811_v3  ;;  %vm3427_vm8 = vweird.f32 %v10702_v37  ;;  %v3448_v59 = vadd.f32 0.18741608, %v3447_v33  ;;  %v3458_v60 = vmul.f32 %v3457_v9, %v10669_v18  ;;  %v3521_v28 = vmul.f32 2.1237322e-06, %v10723_v32 }
 0x346   : > { %v7491_v27 = vpop.eup %7490  ;;  %v3390_v8 = vsel %vm10718_vm7, %v7489_v30, %v3386_v5  ;;  %v3431_v25 = vand.u32 2147483647, %v10702_v37  ;;  %v3487_v23 = vmul.f32 %v3486_v2, %v10673_v47  ;;  %v3496_v46 = vmul.f32 %v3495_v12, %v10673_v47 }
 0x347   : > { %v3395_v52 = vsel %vm10709_vm6, %v3394_v10, %v3390_v8  ;;  %v3423_v50 = vmul.f32 %v7491_v27, %v10702_v37  ;;  %v3532_v22 = vmul.f32 3.8918573e-05, %v10723_v32  ;;  %v10743_v6 = vmul.f32 0.70710677, %v10728_v26 }
 0x348   : > { %v3396_v57 = vmul.f32 %v3395_v52, %v3371_v16  ;;  %v3433_v62 = vand.u32 2147483648, %v10702_v37  ;;  %v3459_v49 = vadd.f32 0.4994258, %v3458_v60  ;;  %v3497_v14 = vadd.f32 0.112945676, %v3496_v46 }
 0x349   : > { %v3424_v0 = vsub.f32 1.0, %v3423_v50  ;;  %vm3428_vm9 = vweird.f32 %v7491_v27  ;;  %v3449_v61 = vmul.f32 %v3448_v59, %v10669_v18  ;;  %v3522_v56 = vadd.f32 0.00028619796, %v3521_v28 }
 0x34a   : > { %v7206_v21 = vclamps-f32 %v3396_v57, 1.0  ;;  %v3460_v63 = vmul.f32 %v3459_v49, %v10669_v18  ;;  %v3488_v30 = vadd.f32 0.18741608, %v3487_v23  ;;  %v3498_v19 = vmul.f32 %v3497_v14, %v10673_v47  ;;  %vm10754_vm10 = vmor %vm3427_vm8, %vm3428_vm9 }
 0x34b   : > { %v3425_v55 = vmul.f32 %v7491_v27, %v3424_v0  ;;  %v3523_v34 = vmul.f32 %v3522_v56, %v10723_v32  ;;  %v3533_v31 = vadd.f32 0.001143296, %v3532_v22  ;;  %v3559_v7 = vmul.f32 %v10743_v6, %v10743_v6 }
 0x34c   : > { %v6512_v29 = vmul.f32 0.5, %v7206_v21  ;;  %v3434_v43 = vor.u32 1.1754944e-38, %v3433_v62  ;;  %v3461_v1 = vadd.f32 1.0, %v3460_v63  ;;  %v3499_v18 = vadd.f32 0.4994258, %v3498_v19 }
 0x34d   : > { %v3426_v17 = vadd.f32 %v7491_v27, %v3425_v55  ;;  %vm3432_vm11 = vcmp.eq.f32.partialorder %v3431_v25, 8.507059e+37  ;;  %v3524_v53 = vadd.f32 0.0036580483, %v3523_v34  ;;  %v3534_v35 = vmul.f32 %v3533_v31, %v10723_v32  ;;  %v10794_v55 = vld [vmem:[%s7840_s24 + $0x280] sm:$0xff] }
 0x34e   : > { %v6662_v44 = vadd.f32 0.5, %v6512_v29  ;;  %v3450_v16 = vadd.f32 1.1283791, %v3449_v61  ;;  %7492 = vrcp.f32 %v3461_v1  ;;  %v3489_v37 = vmul.f32 %v3488_v30, %v10673_v47 }
 0x34f   : > { %v3430_v11 = vsel %vm10754_vm10, %v7491_v27, %v3426_v17  ;;  %v3500_v51 = vmul.f32 %v3499_v18, %v10673_v47  ;;  %v10763_v39 = vmin.f32 %v3559_v7, 16.0  ;;  %v3471_v48 = vand.u32 2147483647, %v3461_v1  ;;  %v10776_v27 = vld [vmem:[%s7840_s24 + $0x278] sm:$0xff] }
 0x350   : > { %v6812_v3 = vmul.f32 %v6662_v44, %v10546_v15  ;;  %v3435_v36 = vsel %vm3432_vm11, %v3434_v43, %v3430_v11  ;;  %v3525_v24 = vmul.f32 %v3524_v53, %v10723_v32  ;;  %v3473_v10 = vand.u32 2147483648, %v3461_v1 }
 0x351   : > { %v3436_v58 = vmul.f32 %v3435_v36, %v3411_v45  ;;  %v10767_v33 = vadd.f32 1.0, %v3500_v51  ;;  %v3535_v9 = vadd.f32 0.014752088, %v3534_v35  ;;  %v3561_v2 = vmul.f32 2.1237322e-06, %v10763_v39 }
 0x352   : > { %6962 = vst [vmem:[%s8053_s16 + $0x248] sm:$0xff] %v6812_v3  ;;  %v3526_v5 = vadd.f32 0.05243302, %v3525_v24  ;;  %v3451_v47 = vmul.f32 %v3450_v16, %v10649_v4  ;;  %v3490_v59 = vadd.f32 1.1283791, %v3489_v37  ;;  %vm3467_vm12 = vweird.f32 %v3461_v1 }
 0x353   : > { %v7207_v12 = vclamps-f32 %v3436_v58, 1.0  ;;  %7494 = vrcp.f32 %v10767_v33  ;;  %v3536_v45 = vmul.f32 %v3535_v9, %v10723_v32  ;;  %v3562_v28 = vadd.f32 0.00028619796, %v3561_v2 }
 0x354   : > { %v7493_v15 = vpop.eup %7492  ;;  %v3527_v60 = vmul.f32 %v3526_v5, %v10723_v32  ;;  %vm10778_vm13 = vcmp.eq.f32.partialorder %v3471_v48, 8.507059e+37  ;;  %v3474_v46 = vor.u32 1.1754944e-38, %v3473_v10  ;;  %v3572_v62 = vmul.f32 3.8918573e-05, %v10763_v39 }
 0x355   : > { %v6513_v8 = vmul.f32 0.5, %v7207_v12  ;;  %v3463_v25 = vmul.f32 %v7493_v15, %v3461_v1  ;;  %vm3468_vm14 = vweird.f32 %v7493_v15  ;;  %v3537_v52 = vadd.f32 0.112945676, %v3536_v45 }
 0x356   : > { %v3528_v4 = vadd.f32 0.18741608, %v3527_v60  ;;  %v3563_v50 = vmul.f32 %v3562_v28, %v10763_v39  ;;  %v10785_v49 = vmul.f32 0.70710677, %v10776_v27  ;;  %vm3507_vm15 = vweird.f32 %v10767_v33  ;;  %vm10798_vm0 = vmor %vm3467_vm12, %vm3468_vm14 }
 0x357   : > { %v6663_v22 = vadd.f32 0.5, %v6513_v8  ;;  %v3464_v57 = vsub.f32 1.0, %v3463_v25  ;;  %v3511_v14 = vand.u32 2147483647, %v10767_v33  ;;  %v3538_v0 = vmul.f32 %v3537_v52, %v10723_v32  ;;  %v10838_v25 = vld [vmem:[%s7840_s24 + $0x288] sm:$0xff] }
 0x358   : > { %v3564_v61 = vadd.f32 0.0036580483, %v3563_v50  ;;  %v3573_v30 = vadd.f32 0.001143296, %v3572_v62  ;;  %v3599_v19 = vmul.f32 %v10785_v49, %v10785_v49  ;;  %v3513_v7 = vand.u32 2147483648, %v10767_v33 }
 0x359   : > { %v7495_v56 = vpop.eup %7494  ;;  %v6813_v21 = vmul.f32 %v6663_v22, %v10576_v41  ;;  %v3465_v63 = vmul.f32 %v7493_v15, %v3464_v57  ;;  %v3529_v29 = vmul.f32 %v3528_v4, %v10723_v32  ;;  %v3539_v41 = vadd.f32 0.4994258, %v3538_v0 }
 0x35a   : > { %v3503_v31 = vmul.f32 %v7495_v56, %v10767_v33  ;;  %v3565_v43 = vmul.f32 %v3564_v61, %v10763_v39  ;;  %v3574_v18 = vmul.f32 %v3573_v30, %v10763_v39  ;;  %v10808_v17 = vmin.f32 %v3599_v19, 16.0 }
 0x35b   : > { %6963 = vst [vmem:[%s8053_s16 + $0x250] sm:$0xff] %v6813_v21  ;;  %v3466_v54 = vadd.f32 %v7493_v15, %v3465_v63  ;;  %vm3508_vm1 = vweird.f32 %v7495_v56  ;;  %v3540_v53 = vmul.f32 %v3539_v41, %v10723_v32  ;;  %v10812_v35 = vmul.f32 0.70710677, %v10794_v55 }
 0x35c   : > { %v3504_v1 = vsub.f32 1.0, %v3503_v31  ;;  %v3566_v16 = vadd.f32 0.05243302, %v3565_v43  ;;  %v3575_v11 = vadd.f32 0.014752088, %v3574_v18  ;;  %vm10824_vm2 = vmor %vm3507_vm15, %vm3508_vm1  ;;  %v3514_v58 = vor.u32 1.1754944e-38, %v3513_v7 }
 0x35d   : > { %v3470_v44 = vsel %vm10798_vm0, %v7493_v15, %v3466_v54  ;;  %v3601_v37 = vmul.f32 2.1237322e-06, %v10808_v17  ;;  %v10819_v36 = vadd.f32 1.0, %v3540_v53  ;;  %v3612_v48 = vmul.f32 3.8918573e-05, %v10808_v17 }
 0x35e   : > { %v3475_v51 = vsel %vm10778_vm13, %v3474_v46, %v3470_v44  ;;  %v3505_v3 = vmul.f32 %v7495_v56, %v3504_v1  ;;  %v3576_v10 = vmul.f32 %v3575_v11, %v10763_v39  ;;  %v3491_v5 = vmul.f32 %v3490_v59, %v10652_v13 }
 0x35f   : > { %v3476_v24 = vmul.f32 %v3475_v51, %v3451_v47  ;;  %v3602_v9 = vadd.f32 0.00028619796, %v3601_v37  ;;  %vm3512_vm3 = vcmp.eq.f32.partialorder %v3511_v14, 8.507059e+37  ;;  %7496 = vrcp.f32 %v10819_v36 }
 0x360   : > { %v3506_v2 = vadd.f32 %v7495_v56, %v3505_v3  ;;  %v3530_v15 = vadd.f32 1.1283791, %v3529_v29  ;;  %v3577_v47 = vadd.f32 0.112945676, %v3576_v10  ;;  %v3639_v33 = vmul.f32 %v10812_v35, %v10812_v35 }
 0x361   : > { %v7208_v12 = vclamps-f32 %v3476_v24, 1.0  ;;  %v3567_v45 = vmul.f32 %v3566_v16, %v10763_v39  ;;  %v3603_v28 = vmul.f32 %v3602_v9, %v10808_v17  ;;  %v3613_v8 = vadd.f32 0.001143296, %v3612_v48 }
 0x362   : > { %v3510_v60 = vsel %vm10824_vm2, %v7495_v56, %v3506_v2  ;;  %vm3547_vm4 = vweird.f32 %v10819_v36  ;;  %v3551_v23 = vand.u32 2147483647, %v10819_v36  ;;  %v3578_v4 = vmul.f32 %v3577_v47, %v10763_v39 }
 0x363   : > { %v6514_v13 = vmul.f32 0.5, %v7208_v12  ;;  %v3515_v59 = vsel %vm3512_vm3, %v3514_v58, %v3510_v60  ;;  %v3604_v52 = vadd.f32 0.0036580483, %v3603_v28  ;;  %v3614_v50 = vmul.f32 %v3613_v8, %v10808_v17 }
 0x364   : > { %v3516_v46 = vmul.f32 %v3515_v59, %v3491_v5  ;;  %v3553_v57 = vand.u32 2147483648, %v10819_v36  ;;  %v10845_v62 = vmin.f32 %v3639_v33, 16.0  ;;  %v10848_v14 = vmul.f32 0.70710677, %v10838_v25 }
 0x365   : > { %v6664_v22 = vadd.f32 0.5, %v6514_v13  ;;  %v7497_v0 = vpop.eup %7496  ;;  %v3579_v56 = vadd.f32 0.4994258, %v3578_v4  ;;  %v3605_v21 = vmul.f32 %v3604_v52, %v10808_v17  ;;  %v3615_v63 = vadd.f32 0.014752088, %v3614_v50 }
 0x366   : > { %v7209_v61 = vclamps-f32 %v3516_v46, 1.0  ;;  %v3543_v19 = vmul.f32 %v7497_v0, %v10819_v36  ;;  %vm3548_vm5 = vweird.f32 %v7497_v0  ;;  %v3568_v34 = vadd.f32 0.18741608, %v3567_v45 }
 0x367   : > { %v6814_v30 = vmul.f32 %v6664_v22, %v10633_v20  ;;  %v3580_v7 = vmul.f32 %v3579_v56, %v10763_v39  ;;  %v3606_v29 = vadd.f32 0.05243302, %v3605_v21  ;;  %v3616_v41 = vmul.f32 %v3615_v63, %v10808_v17  ;;  %vm10866_vm6 = vmor %vm3547_vm4, %vm3548_vm5 }
 0x368   : > { %v6515_v31 = vmul.f32 0.5, %v7209_v61  ;;  %v3544_v54 = vsub.f32 1.0, %v3543_v19  ;;  %v3641_v43 = vmul.f32 2.1237322e-06, %v10845_v62  ;;  %v3652_v18 = vmul.f32 3.8918573e-05, %v10845_v62 }
 0x369   : > { %6964 = vst [vmem:[%s8053_s16 + $0x258] sm:$0xff] %v6814_v30  ;;  %v3679_v1 = vmul.f32 %v10848_v14, %v10848_v14  ;;  %v3531_v53 = vmul.f32 %v3530_v15, %v10694_v42  ;;  %v3581_v44 = vadd.f32 1.0, %v3580_v7  ;;  %v3617_v16 = vadd.f32 0.112945676, %v3616_v41  ;;  %v10881_v15 = vld [vmem:[%s7840_s24 + $0x290] sm:$0xff] }
 0x36a   : > { %v6665_v20 = vadd.f32 0.5, %v6515_v31  ;;  %v3545_v11 = vmul.f32 %v7497_v0, %v3544_v54  ;;  %v3569_v37 = vmul.f32 %v3568_v34, %v10763_v39  ;;  %v3642_v51 = vadd.f32 0.00028619796, %v3641_v43 }
 0x36b   : > { %v3653_v3 = vadd.f32 0.001143296, %v3652_v18  ;;  %v3554_v32 = vor.u32 1.1754944e-38, %v3553_v57  ;;  %7498 = vrcp.f32 %v3581_v44  ;;  %v10870_v42 = vmin.f32 %v3679_v1, 16.0 }
 0x36c   : > { %v6815_v48 = vmul.f32 %v6665_v20, %v10636_v38  ;;  %v3546_v58 = vadd.f32 %v7497_v0, %v3545_v11  ;;  %vm3552_vm7 = vcmp.eq.f32.partialorder %v3551_v23, 8.507059e+37  ;;  %v3607_v39 = vmul.f32 %v3606_v29, %v10808_v17 }
 0x36d   : > { %v3618_v10 = vmul.f32 %v3617_v16, %v10808_v17  ;;  %v3643_v38 = vmul.f32 %v3642_v51, %v10845_v62  ;;  %v3654_v36 = vmul.f32 %v3653_v3, %v10845_v62  ;;  %v3681_v9 = vmul.f32 2.1237322e-06, %v10870_v42 }
 0x36e   : > { %6965 = vst [vmem:[%s8053_s16 + $0x260] sm:$0xff] %v6815_v48  ;;  %v3550_v5 = vsel %vm10866_vm6, %v7497_v0, %v3546_v58  ;;  %v3570_v2 = vadd.f32 1.1283791, %v3569_v37  ;;  %vm3587_vm8 = vweird.f32 %v3581_v44  ;;  %v3608_v8 = vadd.f32 0.18741608, %v3607_v39  ;;  %v10911_v48 = vld [vmem:[%s7840_s24 + $0x298] sm:$0xff] }
 0x36f   : > { %v3619_v12 = vadd.f32 0.4994258, %v3618_v10  ;;  %v3555_v47 = vsel %vm3552_vm7, %v3554_v32, %v3550_v5  ;;  %v3644_v33 = vadd.f32 0.0036580483, %v3643_v38  ;;  %v3655_v60 = vadd.f32 0.014752088, %v3654_v36 }
 0x370   : > { %v3682_v45 = vadd.f32 0.00028619796, %v3681_v9  ;;  %v3556_v28 = vmul.f32 %v3555_v47, %v3531_v53  ;;  %v3692_v59 = vmul.f32 3.8918573e-05, %v10870_v42  ;;  %v10889_v50 = vmul.f32 0.70710677, %v10881_v15 }
 0x371   : > { %v3620_v13 = vmul.f32 %v3619_v12, %v10808_v17  ;;  %v7499_v23 = vpop.eup %7498  ;;  %v3645_v46 = vmul.f32 %v3644_v33, %v10845_v62  ;;  %v3656_v4 = vmul.f32 %v3655_v60, %v10845_v62  ;;  %v3591_v0 = vand.u32 2147483647, %v3581_v44 }
 0x372   : > { %v3683_v52 = vmul.f32 %v3682_v45, %v10870_v42  ;;  %v7210_v22 = vclamps-f32 %v3556_v28, 1.0  ;;  %v3583_v57 = vmul.f32 %v7499_v23, %v3581_v44  ;;  %v3593_v61 = vand.u32 2147483648, %v3581_v44 }
 0x373   : > { %vm3588_vm9 = vweird.f32 %v7499_v23  ;;  %v3621_v56 = vadd.f32 1.0, %v3620_v13  ;;  %v3646_v21 = vadd.f32 0.05243302, %v3645_v46  ;;  %v3657_v63 = vadd.f32 0.112945676, %v3656_v4 }
 0x374   : > { %v6516_v30 = vmul.f32 0.5, %v7210_v22  ;;  %v3584_v19 = vsub.f32 1.0, %v3583_v57  ;;  %v3684_v34 = vadd.f32 0.0036580483, %v3683_v52  ;;  %v3693_v31 = vadd.f32 0.001143296, %v3692_v59  ;;  %vm10899_vm10 = vmor %vm3587_vm8, %vm3588_vm9 }
 0x375   : > { %v3571_v7 = vmul.f32 %v3570_v2, %v10743_v6  ;;  %v3609_v29 = vmul.f32 %v3608_v8, %v10808_v17  ;;  %7500 = vrcp.f32 %v3621_v56  ;;  %v3719_v41 = vmul.f32 %v10889_v50, %v10889_v50 }
 0x376   : > { %v6666_v54 = vadd.f32 0.5, %v6516_v30  ;;  %v3585_v43 = vmul.f32 %v7499_v23, %v3584_v19  ;;  %v3647_v18 = vmul.f32 %v3646_v21, %v10845_v62  ;;  %v3658_v1 = vmul.f32 %v3657_v63, %v10845_v62 }
 0x377   : > { %vm10903_vm11 = vcmp.eq.f32.partialorder %v3591_v0, 8.507059e+37  ;;  %v3594_v17 = vor.u32 1.1754944e-38, %v3593_v61  ;;  %v3685_v53 = vmul.f32 %v3684_v34, %v10870_v42  ;;  %v3694_v16 = vmul.f32 %v3693_v31, %v10870_v42 }
 0x378   : > { %v6816_v11 = vmul.f32 %v6666_v54, %v10686_v40  ;;  %v3586_v37 = vadd.f32 %v7499_v23, %v3585_v43  ;;  %v3648_v51 = vadd.f32 0.18741608, %v3647_v18  ;;  %v3659_v3 = vadd.f32 0.4994258, %v3658_v1 }
 0x379   : > { %v3686_v44 = vadd.f32 0.05243302, %v3685_v53  ;;  %v3695_v24 = vadd.f32 0.014752088, %v3694_v16  ;;  %v10913_v32 = vmin.f32 %v3719_v41, 16.0  ;;  %vm3627_vm12 = vweird.f32 %v3621_v56 }
 0x37a   : > { %6966 = vst [vmem:[%s8053_s16 + $0x268] sm:$0xff] %v6816_v11  ;;  %v3590_v58 = vsel %vm10899_vm10, %v7499_v23, %v3586_v37  ;;  %v3610_v39 = vadd.f32 1.1283791, %v3609_v29  ;;  %v3631_v10 = vand.u32 2147483647, %v3621_v56  ;;  %v3660_v38 = vmul.f32 %v3659_v3, %v10845_v62 }
 0x37b   : > { %v7501_v36 = vpop.eup %7500  ;;  %v3595_v40 = vsel %vm10903_vm11, %v3594_v17, %v3590_v58  ;;  %v3696_v9 = vmul.f32 %v3695_v24, %v10870_v42  ;;  %v3721_v5 = vmul.f32 2.1237322e-06, %v10913_v32  ;;  %v10924_v2 = vmul.f32 0.70710677, %v10911_v48 }
 0x37c   : > { %v3596_v12 = vmul.f32 %v3595_v40, %v3571_v7  ;;  %v3623_v47 = vmul.f32 %v7501_v36, %v3621_v56  ;;  %v3687_v33 = vmul.f32 %v3686_v44, %v10870_v42  ;;  %v3633_v60 = vand.u32 2147483648, %v3621_v56 }
 0x37d   : > { %v3649_v45 = vmul.f32 %v3648_v51, %v10845_v62  ;;  %v3661_v28 = vadd.f32 1.0, %v3660_v38  ;;  %v3697_v8 = vadd.f32 0.112945676, %v3696_v9  ;;  %vm3628_vm13 = vweird.f32 %v7501_v36 }
 0x37e   : > { %v7211_v13 = vclamps-f32 %v3596_v12, 1.0  ;;  %v3624_v59 = vsub.f32 1.0, %v3623_v47  ;;  %v3722_v23 = vadd.f32 0.00028619796, %v3721_v5  ;;  %v3611_v46 = vmul.f32 %v3610_v39, %v10785_v49  ;;  %vm10937_vm15 = vmor %vm3627_vm12, %vm3628_vm13  ;;  %v10968_v47 = vld [vmem:[%s7840_s24 + $0x2a0] sm:$0xff] }
 0x37f   : > { %vm10929_vm14 = vcmp.eq.f32.partialorder %v3631_v10, 8.507059e+37  ;;  %7502 = vrcp.f32 %v3661_v28  ;;  %v3759_v52 = vmul.f32 %v10924_v2, %v10924_v2  ;;  %v3688_v0 = vadd.f32 0.18741608, %v3687_v33  ;;  %v10971_v33 = vld [vmem:[%s7840_s24 + $0x2a8] sm:$0xff] }
 0x380   : > { %v6517_v22 = vmul.f32 0.5, %v7211_v13  ;;  %v3625_v57 = vmul.f32 %v7501_v36, %v3624_v59  ;;  %v3698_v62 = vmul.f32 %v3697_v8, %v10870_v42  ;;  %v3634_v21 = vor.u32 1.1754944e-38, %v3633_v60 }
 0x381   : > { %v3650_v49 = vadd.f32 1.1283791, %v3649_v45  ;;  %v3723_v63 = vmul.f32 %v3722_v23, %v10913_v32  ;;  %v3732_v30 = vmul.f32 3.8918573e-05, %v10913_v32  ;;  %v3671_v31 = vand.u32 2147483647, %v3661_v28 }
 0x382   : > { %v6667_v19 = vadd.f32 0.5, %v6517_v22  ;;  %v3626_v34 = vadd.f32 %v7501_v36, %v3625_v57  ;;  %v3699_v7 = vadd.f32 0.4994258, %v3698_v62  ;;  %v3673_v29 = vand.u32 2147483648, %v3661_v28 }
 0x383   : > { %v3724_v41 = vadd.f32 0.0036580483, %v3723_v63  ;;  %v3733_v54 = vadd.f32 0.001143296, %v3732_v30  ;;  %v10943_v43 = vmin.f32 %v3759_v52, 16.0  ;;  %v3689_v1 = vmul.f32 %v3688_v0, %v10870_v42 }
 0x384   : > { %v6817_v56 = vmul.f32 %v6667_v19, %v10728_v26  ;;  %v3630_v18 = vsel %vm10937_vm15, %v7501_v36, %v3626_v34  ;;  %v3700_v20 = vmul.f32 %v3699_v7, %v10870_v42  ;;  %v3651_v26 = vmul.f32 %v3650_v49, %v10812_v35 }
 0x385   : > { %v7503_v6 = vpop.eup %7502  ;;  %v3635_v17 = vsel %vm10929_vm14, %v3634_v21, %v3630_v18  ;;  %v3725_v53 = vmul.f32 %v3724_v41, %v10913_v32  ;;  %v3734_v16 = vmul.f32 %v3733_v54, %v10913_v32  ;;  %v3761_v11 = vmul.f32 2.1237322e-06, %v10943_v43 }
 0x386   : > { %6967 = vst [vmem:[%s8053_s16 + $0x270] sm:$0xff] %v6817_v56  ;;  %v3636_v37 = vmul.f32 %v3635_v17, %v3611_v46  ;;  %v3663_v51 = vmul.f32 %v7503_v6, %v3661_v28  ;;  %v10957_v3 = vadd.f32 1.0, %v3700_v20  ;;  %vm3667_vm0 = vweird.f32 %v3661_v28 }
 0x387   : > { %v3726_v42 = vadd.f32 0.05243302, %v3725_v53  ;;  %v3735_v44 = vadd.f32 0.014752088, %v3734_v16  ;;  %v3762_v24 = vadd.f32 0.00028619796, %v3761_v11  ;;  %vm3668_vm1 = vweird.f32 %v7503_v6 }
 0x388   : > { %v7212_v58 = vclamps-f32 %v3636_v37, 1.0  ;;  %v3664_v39 = vsub.f32 1.0, %v3663_v51  ;;  %7504 = vrcp.f32 %v10957_v3  ;;  %vm10960_vm2 = vcmp.eq.f32.partialorder %v3671_v31, 8.507059e+37  ;;  %vm10974_vm3 = vmor %vm3667_vm0, %vm3668_vm1 }
 0x389   : > { %v3674_v38 = vor.u32 1.1754944e-38, %v3673_v29  ;;  %v3690_v35 = vadd.f32 1.1283791, %v3689_v1  ;;  %v3736_v36 = vmul.f32 %v3735_v44, %v10913_v32  ;;  %v3763_v5 = vmul.f32 %v3762_v24, %v10943_v43 }
 0x38a   : > { %v6518_v40 = vmul.f32 0.5, %v7212_v58  ;;  %v3665_v9 = vmul.f32 %v7503_v6, %v3664_v39  ;;  %v3772_v12 = vmul.f32 3.8918573e-05, %v10943_v43  ;;  %vm3707_vm4 = vweird.f32 %v10957_v3 }
 0x38b   : > { %v3713_v45 = vand.u32 2147483648, %v10957_v3  ;;  %v3727_v8 = vmul.f32 %v3726_v42, %v10913_v32  ;;  %v3737_v13 = vadd.f32 0.112945676, %v3736_v36  ;;  %v3764_v46 = vadd.f32 0.0036580483, %v3763_v5 }
 0x38c   : > { %v6668_v59 = vadd.f32 0.5, %v6518_v40  ;;  %v3666_v23 = vadd.f32 %v7503_v6, %v3665_v9  ;;  %v3773_v4 = vadd.f32 0.001143296, %v3772_v12  ;;  %v3711_v52 = vand.u32 2147483647, %v10957_v3 }
 0x38d   : > { %v3738_v28 = vmul.f32 %v3737_v13, %v10913_v32  ;;  %v10984_v22 = vmul.f32 0.70710677, %v10968_v47  ;;  %v10987_v57 = vmul.f32 0.70710677, %v10971_v33  ;;  %v3765_v21 = vmul.f32 %v3764_v46, %v10943_v43 }
 0x38e   : > { %v7505_v0 = vpop.eup %7504  ;;  %v6818_v62 = vmul.f32 %v6668_v59, %v10776_v27  ;;  %v3670_v61 = vsel %vm10974_vm3, %v7503_v6, %v3666_v23  ;;  %v3774_v49 = vmul.f32 %v3773_v4, %v10943_v43  ;;  %v3714_v19 = vor.u32 1.1754944e-38, %v3713_v45 }
 0x38f   : > { %v3675_v63 = vsel %vm10960_vm2, %v3674_v38, %v3670_v61  ;;  %v3703_v30 = vmul.f32 %v7505_v0, %v10957_v3  ;;  %v3728_v34 = vadd.f32 0.18741608, %v3727_v8  ;;  %v3739_v7 = vadd.f32 0.4994258, %v3738_v28  ;;  %v11021_v38 = vld [vmem:[%s7840_s24 + $0x2b0] sm:$0xff] }
 0x390   : > { %6968 = vst [vmem:[%s8053_s16 + $0x278] sm:$0xff] %v6818_v62  ;;  %v3676_v31 = vmul.f32 %v3675_v63, %v3651_v26  ;;  %v3766_v29 = vadd.f32 0.05243302, %v3765_v21  ;;  %v3799_v27 = vmul.f32 %v10984_v22, %v10984_v22  ;;  %vm3708_vm5 = vweird.f32 %v7505_v0 }
 0x391   : > { %v3704_v41 = vsub.f32 1.0, %v3703_v30  ;;  %v3775_v54 = vadd.f32 0.014752088, %v3774_v49  ;;  %v3839_v56 = vmul.f32 %v10987_v57, %v10987_v57  ;;  %v3740_v1 = vmul.f32 %v3739_v7, %v10913_v32  ;;  %vm11012_vm6 = vmor %vm3707_vm4, %vm3708_vm5 }
 0x392   : > { %v7213_v18 = vclamps-f32 %v3676_v31, 1.0  ;;  %v3767_v20 = vmul.f32 %v3766_v29, %v10943_v43  ;;  %v11004_v6 = vmin.f32 %v3799_v27, 16.0  ;;  %v3729_v53 = vmul.f32 %v3728_v34, %v10913_v32 }
 0x393   : > { %v3705_v17 = vmul.f32 %v7505_v0, %v3704_v41  ;;  %v3776_v16 = vmul.f32 %v3775_v54, %v10943_v43  ;;  %v11008_v11 = vmin.f32 %v3839_v56, 16.0  ;;  %v3741_v51 = vadd.f32 1.0, %v3740_v1 }
 0x394   : > { %v6519_v37 = vmul.f32 0.5, %v7213_v18  ;;  %v3768_v42 = vadd.f32 0.18741608, %v3767_v20  ;;  %v3801_v44 = vmul.f32 2.1237322e-06, %v11004_v6  ;;  %v3691_v24 = vmul.f32 %v3690_v35, %v10848_v14 }
 0x395   : > { %v3706_v58 = vadd.f32 %v7505_v0, %v3705_v17  ;;  %vm3712_vm7 = vcmp.eq.f32.partialorder %v3711_v52, 8.507059e+37  ;;  %v3777_v32 = vadd.f32 0.112945676, %v3776_v16  ;;  %7506 = vrcp.f32 %v3741_v51 }
 0x396   : > { %v6669_v39 = vadd.f32 0.5, %v6519_v37  ;;  %v3812_v10 = vmul.f32 3.8918573e-05, %v11004_v6  ;;  %v3841_v3 = vmul.f32 2.1237322e-06, %v11008_v11  ;;  %v3769_v5 = vmul.f32 %v3768_v42, %v10943_v43 }
 0x397   : > { %v3710_v36 = vsel %vm11012_vm6, %v7505_v0, %v3706_v58  ;;  %v3730_v40 = vadd.f32 1.1283791, %v3729_v53  ;;  %v3778_v9 = vmul.f32 %v3777_v32, %v10943_v43  ;;  %v3802_v12 = vadd.f32 0.00028619796, %v3801_v44 }
 0x398   : > { %v6819_v14 = vmul.f32 %v6669_v39, %v10794_v55  ;;  %v3715_v35 = vsel %vm3712_vm7, %v3714_v19, %v3710_v36  ;;  %v3751_v45 = vand.u32 2147483647, %v3741_v51  ;;  %v11029_v13 = vmul.f32 0.70710677, %v11021_v38  ;;  %v11063_v39 = vld [vmem:[%s7840_s24 + $0x2b8] sm:$0xff] }
 0x399   : > { %v3716_v60 = vmul.f32 %v3715_v35, %v3691_v24  ;;  %v3779_v8 = vadd.f32 0.4994258, %v3778_v9  ;;  %vm3747_vm8 = vweird.f32 %v3741_v51  ;;  %v3803_v59 = vmul.f32 %v3802_v12, %v11004_v6 }
 0x39a   : > { %6969 = vst [vmem:[%s8053_s16 + $0x280] sm:$0xff] %v6819_v14  ;;  %v3813_v23 = vadd.f32 0.001143296, %v3812_v10  ;;  %v3842_v46 = vadd.f32 0.00028619796, %v3841_v3  ;;  %v3753_v52 = vand.u32 2147483648, %v3741_v51  ;;  %v3879_v34 = vmul.f32 %v11029_v13, %v11029_v13 }
 0x39b   : > { %v7214_v4 = vclamps-f32 %v3716_v60, 1.0  ;;  %v3780_v55 = vmul.f32 %v3779_v8, %v10943_v43  ;;  %v3852_v28 = vmul.f32 3.8918573e-05, %v11008_v11  ;;  %v7507_v0 = vpop.eup %7506  ;;  %v3770_v62 = vadd.f32 1.1283791, %v3769_v5 }
 0x39c   : > { %v3804_v61 = vadd.f32 0.0036580483, %v3803_v59  ;;  %v3814_v21 = vmul.f32 %v3813_v23, %v11004_v6  ;;  %v3843_v49 = vmul.f32 %v3842_v46, %v11008_v11  ;;  %v3743_v30 = vmul.f32 %v7507_v0, %v3741_v51 }
 0x39d   : > { %v6520_v63 = vmul.f32 0.5, %v7214_v4  ;;  %v11037_v19 = vadd.f32 1.0, %v3780_v55  ;;  %v3853_v29 = vadd.f32 0.001143296, %v3852_v28  ;;  %vm3748_vm9 = vweird.f32 %v7507_v0 }
 0x39e   : > { %v3805_v31 = vmul.f32 %v3804_v61, %v11004_v6  ;;  %v3815_v7 = vadd.f32 0.014752088, %v3814_v21  ;;  %v3844_v43 = vadd.f32 0.0036580483, %v3843_v49  ;;  %v3744_v41 = vsub.f32 1.0, %v3743_v30  ;;  %vm11053_vm11 = vmor %vm3747_vm8, %vm3748_vm9 }
 0x39f   : > { %v6670_v27 = vadd.f32 0.5, %v6520_v63  ;;  %7508 = vrcp.f32 %v11037_v19  ;;  %v3731_v54 = vmul.f32 %v3730_v40, %v10889_v50  ;;  %vm11044_vm10 = vcmp.eq.f32.partialorder %v3751_v45, 8.507059e+37 }
 0x3a0   : > { %v3806_v18 = vadd.f32 0.05243302, %v3805_v31  ;;  %v3816_v1 = vmul.f32 %v3815_v7, %v11004_v6  ;;  %v3745_v17 = vmul.f32 %v7507_v0, %v3744_v41  ;;  %v3845_v53 = vmul.f32 %v3844_v43, %v11008_v11 }
 0x3a1   : > { %v6820_v20 = vmul.f32 %v6670_v27, %v10838_v25  ;;  %v3854_v16 = vmul.f32 %v3853_v29, %v11008_v11  ;;  %v3754_v50 = vor.u32 1.1754944e-38, %v3753_v52  ;;  %v11058_v44 = vmin.f32 %v3879_v34, 16.0 }
 0x3a2   : > { %v3807_v26 = vmul.f32 %v3806_v18, %v11004_v6  ;;  %v3817_v42 = vadd.f32 0.112945676, %v3816_v1  ;;  %v3746_v24 = vadd.f32 %v7507_v0, %v3745_v17  ;;  %v3771_v25 = vmul.f32 %v3770_v62, %v10924_v2 }
 0x3a3   : > { %6970 = vst [vmem:[%s8053_s16 + $0x288] sm:$0xff] %v6820_v20  ;;  %v3846_v58 = vadd.f32 0.05243302, %v3845_v53  ;;  %v3855_v32 = vadd.f32 0.014752088, %v3854_v16  ;;  %vm3787_vm12 = vweird.f32 %v11037_v19  ;;  %v3793_v8 = vand.u32 2147483648, %v11037_v19 }
 0x3a4   : > { %v3808_v51 = vadd.f32 0.18741608, %v3807_v26  ;;  %v3818_v10 = vmul.f32 %v3817_v42, %v11004_v6  ;;  %v3881_v3 = vmul.f32 2.1237322e-06, %v11058_v44  ;;  %v3750_v40 = vsel %vm11053_vm11, %v7507_v0, %v3746_v24 }
 0x3a5   : > { %v7509_v36 = vpop.eup %7508  ;;  %v3791_v9 = vand.u32 2147483647, %v11037_v19  ;;  %v3847_v14 = vmul.f32 %v3846_v58, %v11008_v11  ;;  %v3856_v2 = vmul.f32 %v3855_v32, %v11008_v11  ;;  %v3755_v35 = vsel %vm11044_vm10, %v3754_v50, %v3750_v40 }
 0x3a6   : > { %v3783_v5 = vmul.f32 %v7509_v36, %v11037_v19  ;;  %v3892_v12 = vmul.f32 3.8918573e-05, %v11058_v44  ;;  %v11078_v60 = vmul.f32 0.70710677, %v11063_v39  ;;  %v3756_v45 = vmul.f32 %v3755_v35, %v3731_v54 }
 0x3a7   : > { %v3819_v59 = vadd.f32 0.4994258, %v3818_v10  ;;  %v3857_v23 = vadd.f32 0.112945676, %v3856_v2  ;;  %vm3788_vm13 = vweird.f32 %v7509_v36  ;;  %v3809_v4 = vmul.f32 %v3808_v51, %v11004_v6 }
 0x3a8   : > { %v3784_v46 = vsub.f32 1.0, %v3783_v5  ;;  %v3882_v52 = vadd.f32 0.00028619796, %v3881_v3  ;;  %v7215_v55 = vclamps-f32 %v3756_v45, 1.0  ;;  %v3848_v0 = vadd.f32 0.18741608, %v3847_v14  ;;  %vm11089_vm14 = vmor %vm3787_vm12, %vm3788_vm13 }
 0x3a9   : > { %v3820_v28 = vmul.f32 %v3819_v59, %v11004_v6  ;;  %v3858_v62 = vmul.f32 %v3857_v23, %v11008_v11  ;;  %v3893_v49 = vadd.f32 0.001143296, %v3892_v12  ;;  %v3919_v63 = vmul.f32 %v11078_v60, %v11078_v60 }
 0x3aa   : > { %v3785_v61 = vmul.f32 %v7509_v36, %v3784_v46  ;;  %v3883_v21 = vmul.f32 %v3882_v52, %v11058_v44  ;;  %v6521_v30 = vmul.f32 0.5, %v7215_v55  ;;  %v3794_v31 = vor.u32 1.1754944e-38, %v3793_v8 }
 0x3ab   : > { %v3821_v7 = vadd.f32 1.0, %v3820_v28  ;;  %v3859_v6 = vadd.f32 0.4994258, %v3858_v62  ;;  %vm3792_vm15 = vcmp.eq.f32.partialorder %v3791_v9, 8.507059e+37  ;;  %v3894_v27 = vmul.f32 %v3893_v49, %v11058_v44 }
 0x3ac   : > { %v3786_v43 = vadd.f32 %v7509_v36, %v3785_v61  ;;  %v3884_v29 = vadd.f32 0.0036580483, %v3883_v21  ;;  %v6671_v41 = vadd.f32 0.5, %v6521_v30  ;;  %v3810_v54 = vadd.f32 1.1283791, %v3809_v4  ;;  %v11129_v61 = vld [vmem:[%s7840_s24 + $0x2c8] sm:$0xff] }
 0x3ad   : > { %7510 = vrcp.f32 %v3821_v7  ;;  %v3849_v19 = vmul.f32 %v3848_v0, %v11008_v11  ;;  %v3860_v18 = vmul.f32 %v3859_v6, %v11008_v11  ;;  %v11098_v1 = vmin.f32 %v3919_v63, 16.0 }
 0x3ae   : > { %v3790_v56 = vsel %vm11089_vm14, %v7509_v36, %v3786_v43  ;;  %v6821_v20 = vmul.f32 %v6671_v41, %v10881_v15  ;;  %v3831_v53 = vand.u32 2147483647, %v3821_v7  ;;  %v3885_v16 = vmul.f32 %v3884_v29, %v11058_v44  ;;  %v11111_v36 = vld [vmem:[%s7840_s24 + $0x2c0] sm:$0xff] }
 0x3af   : > { %v3795_v17 = vsel %vm3792_vm15, %v3794_v31, %v3790_v56  ;;  %v3833_v50 = vand.u32 2147483648, %v3821_v7  ;;  %v11102_v26 = vadd.f32 1.0, %v3860_v18  ;;  %v3895_v42 = vadd.f32 0.014752088, %v3894_v27 }
 0x3b0   : > { %v3796_v37 = vmul.f32 %v3795_v17, %v3771_v25  ;;  %6971 = vst [vmem:[%s8053_s16 + $0x290] sm:$0xff] %v6821_v20  ;;  %v3886_v24 = vadd.f32 0.05243302, %v3885_v16  ;;  %v3921_v58 = vmul.f32 2.1237322e-06, %v11098_v1  ;;  %v3811_v11 = vmul.f32 %v3810_v54, %v10984_v22 }
 0x3b1   : > { %v3850_v51 = vadd.f32 1.1283791, %v3849_v19  ;;  %7512 = vrcp.f32 %v11102_v26  ;;  %vm3827_vm0 = vweird.f32 %v3821_v7  ;;  %v3896_v25 = vmul.f32 %v3895_v42, %v11058_v44 }
 0x3b2   : > { %v7216_v32 = vclamps-f32 %v3796_v37, 1.0  ;;  %v3887_v10 = vmul.f32 %v3886_v24, %v11058_v44  ;;  %v3922_v3 = vadd.f32 0.00028619796, %v3921_v58  ;;  %vm11113_vm1 = vcmp.eq.f32.partialorder %v3831_v53, 8.507059e+37 }
 0x3b3   : > { %v7511_v15 = vpop.eup %7510  ;;  %v3834_v2 = vor.u32 1.1754944e-38, %v3833_v50  ;;  %v3897_v35 = vadd.f32 0.112945676, %v3896_v25  ;;  %v3932_v8 = vmul.f32 3.8918573e-05, %v11098_v1  ;;  %vm3867_vm3 = vweird.f32 %v11102_v26 }
 0x3b4   : > { %v6522_v40 = vmul.f32 0.5, %v7216_v32  ;;  %v3823_v9 = vmul.f32 %v7511_v15, %v3821_v7  ;;  %vm3828_vm2 = vweird.f32 %v7511_v15  ;;  %v3888_v22 = vadd.f32 0.18741608, %v3887_v10 }
 0x3b5   : > { %v3923_v5 = vmul.f32 %v3922_v3, %v11098_v1  ;;  %v11120_v59 = vmul.f32 0.70710677, %v11111_v36  ;;  %v3871_v23 = vand.u32 2147483647, %v11102_v26  ;;  %v3898_v46 = vmul.f32 %v3897_v35, %v11058_v44  ;;  %vm11133_vm4 = vmor %vm3827_vm0, %vm3828_vm2 }
 0x3b6   : > { %v6672_v12 = vadd.f32 0.5, %v6522_v40  ;;  %v3824_v45 = vsub.f32 1.0, %v3823_v9  ;;  %v3933_v0 = vadd.f32 0.001143296, %v3932_v8  ;;  %v3873_v63 = vand.u32 2147483648, %v11102_v26  ;;  %v11173_v9 = vld [vmem:[%s7840_s24 + $0x2d0] sm:$0xff] }
 0x3b7   : > { %v3924_v4 = vadd.f32 0.0036580483, %v3923_v5  ;;  %v7513_v52 = vpop.eup %7512  ;;  %v3959_v62 = vmul.f32 %v11120_v59, %v11120_v59  ;;  %v3889_v30 = vmul.f32 %v3888_v22, %v11058_v44  ;;  %v11147_v27 = vmul.f32 0.70710677, %v11129_v61 }
 0x3b8   : > { %v6822_v55 = vmul.f32 %v6672_v12, %v10911_v48  ;;  %v3825_v28 = vmul.f32 %v7511_v15, %v3824_v45  ;;  %v3863_v49 = vmul.f32 %v7513_v52, %v11102_v26  ;;  %v3899_v48 = vadd.f32 0.4994258, %v3898_v46 }
 0x3b9   : > { %v3925_v31 = vmul.f32 %v3924_v4, %v11098_v1  ;;  %v3934_v6 = vmul.f32 %v3933_v0, %v11098_v1  ;;  %v11143_v43 = vmin.f32 %v3959_v62, 16.0  ;;  %vm3868_vm5 = vweird.f32 %v7513_v52 }
 0x3ba   : > { %6972 = vst [vmem:[%s8053_s16 + $0x298] sm:$0xff] %v6822_v55  ;;  %v3826_v34 = vadd.f32 %v7511_v15, %v3825_v28  ;;  %v3864_v7 = vsub.f32 1.0, %v3863_v49  ;;  %v3900_v29 = vmul.f32 %v3899_v48, %v11058_v44  ;;  %vm11159_vm6 = vmor %vm3867_vm3, %vm3868_vm5  ;;  %v3874_v37 = vor.u32 1.1754944e-38, %v3873_v63 }
 0x3bb   : > { %v3926_v54 = vadd.f32 0.05243302, %v3925_v31  ;;  %v3935_v56 = vadd.f32 0.014752088, %v3934_v6  ;;  %v3961_v19 = vmul.f32 2.1237322e-06, %v11143_v43  ;;  %v3851_v24 = vmul.f32 %v3850_v51, %v10987_v57 }
 0x3bc   : > { %v3830_v41 = vsel %vm11133_vm4, %v7511_v15, %v3826_v34  ;;  %v3865_v20 = vmul.f32 %v7513_v52, %v3864_v7  ;;  %v11154_v17 = vadd.f32 1.0, %v3900_v29  ;;  %v3972_v53 = vmul.f32 3.8918573e-05, %v11143_v43 }
 0x3bd   : > { %v3835_v18 = vsel %vm11113_vm1, %v3834_v2, %v3830_v41  ;;  %v3936_v50 = vmul.f32 %v3935_v56, %v11098_v1  ;;  %v3962_v42 = vadd.f32 0.00028619796, %v3961_v19  ;;  %vm3872_vm7 = vcmp.eq.f32.partialorder %v3871_v23, 8.507059e+37 }
 0x3be   : > { %v3836_v16 = vmul.f32 %v3835_v18, %v3811_v11  ;;  %v3866_v58 = vadd.f32 %v7513_v52, %v3865_v20  ;;  %7514 = vrcp.f32 %v11154_v17  ;;  %v3890_v15 = vadd.f32 1.1283791, %v3889_v30 }
 0x3bf   : > { %v3937_v11 = vadd.f32 0.112945676, %v3936_v50  ;;  %v3999_v26 = vmul.f32 %v11147_v27, %v11147_v27  ;;  %v3927_v25 = vmul.f32 %v3926_v54, %v11098_v1  ;;  %v3963_v3 = vmul.f32 %v3962_v42, %v11143_v43 }
 0x3c0   : > { %v7217_v32 = vclamps-f32 %v3836_v16, 1.0  ;;  %v3870_v10 = vsel %vm11159_vm6, %v7513_v52, %v3866_v58  ;;  %v3973_v40 = vadd.f32 0.001143296, %v3972_v53  ;;  %vm3907_vm8 = vweird.f32 %v11154_v17 }
 0x3c1   : > { %v3875_v51 = vsel %vm3872_vm7, %v3874_v37, %v3870_v10  ;;  %v3911_v14 = vand.u32 2147483647, %v11154_v17  ;;  %v3938_v22 = vmul.f32 %v3937_v11, %v11098_v1  ;;  %v3964_v35 = vadd.f32 0.0036580483, %v3963_v3 }
 0x3c2   : > { %v6523_v57 = vmul.f32 0.5, %v7217_v32  ;;  %v3876_v2 = vmul.f32 %v3875_v51, %v3851_v24  ;;  %v3974_v5 = vmul.f32 %v3973_v40, %v11143_v43  ;;  %v3913_v45 = vand.u32 2147483648, %v11154_v17 }
 0x3c3   : > { %v11180_v8 = vmin.f32 %v3999_v26, 16.0  ;;  %v11183_v23 = vmul.f32 0.70710677, %v11173_v9  ;;  %v3939_v52 = vadd.f32 0.4994258, %v3938_v22  ;;  %v3965_v55 = vmul.f32 %v3964_v35, %v11143_v43 }
 0x3c4   : > { %v6673_v12 = vadd.f32 0.5, %v6523_v57  ;;  %v7515_v46 = vpop.eup %7514  ;;  %v7218_v4 = vclamps-f32 %v3876_v2, 1.0  ;;  %v3975_v28 = vadd.f32 0.014752088, %v3974_v5  ;;  %v3928_v21 = vadd.f32 0.18741608, %v3927_v25 }
 0x3c5   : > { %v3903_v62 = vmul.f32 %v7515_v46, %v11154_v17  ;;  %vm3908_vm9 = vweird.f32 %v7515_v46  ;;  %v3940_v63 = vmul.f32 %v3939_v52, %v11098_v1  ;;  %v3966_v30 = vadd.f32 0.05243302, %v3965_v55 }
 0x3c6   : > { %v6823_v0 = vmul.f32 %v6673_v12, %v10968_v47  ;;  %v6524_v49 = vmul.f32 0.5, %v7218_v4  ;;  %v3976_v48 = vmul.f32 %v3975_v28, %v11143_v43  ;;  %v4001_v31 = vmul.f32 2.1237322e-06, %v11180_v8  ;;  %vm11201_vm10 = vmor %vm3907_vm8, %vm3908_vm9 }
 0x3c7   : > { %v3904_v34 = vsub.f32 1.0, %v3903_v62  ;;  %v4012_v6 = vmul.f32 3.8918573e-05, %v11180_v8  ;;  %v4039_v7 = vmul.f32 %v11183_v23, %v11183_v23  ;;  %v3891_v29 = vmul.f32 %v3890_v15, %v11029_v13  ;;  %v11216_v15 = vld [vmem:[%s7840_s24 + $0x2d8] sm:$0xff] }
 0x3c8   : > { %6973 = vst [vmem:[%s8053_s16 + $0x2a0] sm:$0xff] %v6823_v0  ;;  %v6674_v47 = vadd.f32 0.5, %v6524_v49  ;;  %v3941_v41 = vadd.f32 1.0, %v3940_v63  ;;  %v3977_v54 = vadd.f32 0.112945676, %v3976_v48  ;;  %v3929_v19 = vmul.f32 %v3928_v21, %v11098_v1 }
 0x3c9   : > { %v3905_v56 = vmul.f32 %v7515_v46, %v3904_v34  ;;  %v4002_v18 = vadd.f32 0.00028619796, %v4001_v31  ;;  %v4013_v20 = vadd.f32 0.001143296, %v4012_v6  ;;  %v3914_v44 = vor.u32 1.1754944e-38, %v3913_v45 }
 0x3ca   : > { %v6824_v53 = vmul.f32 %v6674_v47, %v10971_v33  ;;  %7516 = vrcp.f32 %v3941_v41  ;;  %v11205_v13 = vmin.f32 %v4039_v7, 16.0  ;;  %vm3912_vm11 = vcmp.eq.f32.partialorder %v3911_v14, 8.507059e+37 }
 0x3cb   : > { %v3906_v37 = vadd.f32 %v7515_v46, %v3905_v56  ;;  %v3967_v1 = vmul.f32 %v3966_v30, %v11143_v43  ;;  %v3978_v50 = vmul.f32 %v3977_v54, %v11143_v43  ;;  %v4003_v33 = vmul.f32 %v4002_v18, %v11180_v8 }
 0x3cc   : > { %6974 = vst [vmem:[%s8053_s16 + $0x2a8] sm:$0xff] %v6824_v53  ;;  %v4014_v17 = vmul.f32 %v4013_v20, %v11180_v8  ;;  %v4041_v42 = vmul.f32 2.1237322e-06, %v11205_v13  ;;  %v3930_v58 = vadd.f32 1.1283791, %v3929_v19  ;;  %vm3947_vm12 = vweird.f32 %v3941_v41  ;;  %v11246_v53 = vld [vmem:[%s7840_s24 + $0x2e0] sm:$0xff] }
 0x3cd   : > { %v3910_v24 = vsel %vm11201_vm10, %v7515_v46, %v3906_v37  ;;  %v3979_v32 = vadd.f32 0.4994258, %v3978_v50  ;;  %v4004_v26 = vadd.f32 0.0036580483, %v4003_v33  ;;  %v3968_v40 = vadd.f32 0.18741608, %v3967_v1 }
 0x3ce   : > { %v3915_v11 = vsel %vm3912_vm11, %v3914_v44, %v3910_v24  ;;  %v4015_v10 = vadd.f32 0.014752088, %v4014_v17  ;;  %v4042_v25 = vadd.f32 0.00028619796, %v4041_v42  ;;  %v4052_v51 = vmul.f32 3.8918573e-05, %v11205_v13 }
 0x3cf   : > { %v3916_v3 = vmul.f32 %v3915_v11, %v3891_v29  ;;  %v3980_v57 = vmul.f32 %v3979_v32, %v11143_v43  ;;  %v4005_v2 = vmul.f32 %v4004_v26, %v11180_v8  ;;  %v11224_v5 = vmul.f32 0.70710677, %v11216_v15 }
 0x3d0   : > { %v7517_v14 = vpop.eup %7516  ;;  %v4016_v22 = vmul.f32 %v4015_v10, %v11180_v8  ;;  %v4043_v35 = vmul.f32 %v4042_v25, %v11205_v13  ;;  %v3951_v46 = vand.u32 2147483647, %v3941_v41  ;;  %v3953_v4 = vand.u32 2147483648, %v3941_v41 }
 0x3d1   : > { %v7219_v12 = vclamps-f32 %v3916_v3, 1.0  ;;  %v3943_v45 = vmul.f32 %v7517_v14, %v3941_v41  ;;  %vm3948_vm13 = vweird.f32 %v7517_v14  ;;  %v3981_v52 = vadd.f32 1.0, %v3980_v57 }
 0x3d2   : > { %v4006_v55 = vadd.f32 0.05243302, %v4005_v2  ;;  %v4017_v28 = vadd.f32 0.112945676, %v4016_v22  ;;  %v4044_v21 = vadd.f32 0.0036580483, %v4043_v35  ;;  %v3931_v63 = vmul.f32 %v3930_v58, %v11078_v60  ;;  %vm11234_vm14 = vmor %vm3947_vm12, %vm3948_vm13 }
 0x3d3   : > { %v6525_v0 = vmul.f32 0.5, %v7219_v12  ;;  %v3944_v62 = vsub.f32 1.0, %v3943_v45  ;;  %v4053_v49 = vadd.f32 0.001143296, %v4052_v51  ;;  %v3969_v30 = vmul.f32 %v3968_v40, %v11143_v43 }
 0x3d4   : > { %7518 = vrcp.f32 %v3981_v52  ;;  %v4079_v48 = vmul.f32 %v11224_v5, %v11224_v5  ;;  %v4007_v6 = vmul.f32 %v4006_v55, %v11180_v8  ;;  %v4018_v7 = vmul.f32 %v4017_v28, %v11180_v8 }
 0x3d5   : > { %v6675_v34 = vadd.f32 0.5, %v6525_v0  ;;  %v3945_v31 = vmul.f32 %v7517_v14, %v3944_v62  ;;  %vm11238_vm15 = vcmp.eq.f32.partialorder %v3951_v46, 8.507059e+37  ;;  %v3954_v43 = vor.u32 1.1754944e-38, %v3953_v4 }
 0x3d6   : > { %v4045_v29 = vmul.f32 %v4044_v21, %v11205_v13  ;;  %v4054_v54 = vmul.f32 %v4053_v49, %v11205_v13  ;;  %v4008_v18 = vadd.f32 0.18741608, %v4007_v6  ;;  %v4019_v20 = vadd.f32 0.4994258, %v4018_v7 }
 0x3d7   : > { %v6825_v56 = vmul.f32 %v6675_v34, %v11021_v38  ;;  %v3946_v19 = vadd.f32 %v7517_v14, %v3945_v31  ;;  %v11248_v44 = vmin.f32 %v4079_v48, 16.0  ;;  %v3970_v1 = vadd.f32 1.1283791, %v3969_v30 }
 0x3d8   : > { %v4046_v41 = vadd.f32 0.05243302, %v4045_v29  ;;  %v4055_v16 = vadd.f32 0.014752088, %v4054_v54  ;;  %v3991_v50 = vand.u32 2147483647, %v3981_v52  ;;  %v4020_v33 = vmul.f32 %v4019_v20, %v11180_v8 }
 0x3d9   : > { %6975 = vst [vmem:[%s8053_s16 + $0x2b0] sm:$0xff] %v6825_v56  ;;  %v3950_v37 = vsel %vm11234_vm14, %v7517_v14, %v3946_v19  ;;  %v4081_v24 = vmul.f32 2.1237322e-06, %v11248_v44  ;;  %v11259_v58 = vmul.f32 0.70710677, %v11246_v53  ;;  %vm3987_vm0 = vweird.f32 %v3981_v52 }
 0x3da   : > { %v7519_v17 = vpop.eup %7518  ;;  %v3955_v38 = vsel %vm11238_vm15, %v3954_v43, %v3950_v37  ;;  %v4056_v42 = vmul.f32 %v4055_v16, %v11205_v13  ;;  %v4047_v26 = vmul.f32 %v4046_v41, %v11205_v13  ;;  %v3993_v10 = vand.u32 2147483648, %v3981_v52 }
 0x3db   : > { %v3956_v32 = vmul.f32 %v3955_v38, %v3931_v63  ;;  %v3983_v11 = vmul.f32 %v7519_v17, %v3981_v52  ;;  %v4009_v25 = vmul.f32 %v4008_v18, %v11180_v8  ;;  %v4021_v3 = vadd.f32 1.0, %v4020_v33 }
 0x3dc   : > { %v4057_v40 = vadd.f32 0.112945676, %v4056_v42  ;;  %vm3988_vm1 = vweird.f32 %v7519_v17  ;;  %v4082_v14 = vadd.f32 0.00028619796, %v4081_v24  ;;  %v3971_v2 = vmul.f32 %v3970_v1, %v11120_v59 }
 0x3dd   : > { %v7220_v57 = vclamps-f32 %v3956_v32, 1.0  ;;  %v3984_v51 = vsub.f32 1.0, %v3983_v11  ;;  %vm11264_vm2 = vcmp.eq.f32.partialorder %v3991_v50, 8.507059e+37  ;;  %7520 = vrcp.f32 %v4021_v3  ;;  %vm11272_vm3 = vmor %vm3987_vm0, %vm3988_vm1  ;;  %v11303_v11 = vld [vmem:[%s7840_s24 + $0x2e8] sm:$0xff] }
 0x3de   : > { %v4119_v35 = vmul.f32 %v11259_v58, %v11259_v58  ;;  %v4048_v46 = vadd.f32 0.18741608, %v4047_v26  ;;  %v4058_v8 = vmul.f32 %v4057_v40, %v11205_v13  ;;  %v3994_v55 = vor.u32 1.1754944e-38, %v3993_v10  ;;  %v11306_v26 = vld [vmem:[%s7840_s24 + $0x2f0] sm:$0xff] }
 0x3df   : > { %v6526_v12 = vmul.f32 0.5, %v7220_v57  ;;  %v3985_v45 = vmul.f32 %v7519_v17, %v3984_v51  ;;  %v4010_v59 = vadd.f32 1.1283791, %v4009_v25  ;;  %v4083_v28 = vmul.f32 %v4082_v14, %v11248_v44 }
 0x3e0   : > { %v4092_v0 = vmul.f32 3.8918573e-05, %v11248_v44  ;;  %v4031_v49 = vand.u32 2147483647, %v4021_v3  ;;  %v4059_v63 = vadd.f32 0.4994258, %v4058_v8  ;;  %v4049_v7 = vmul.f32 %v4048_v46, %v11205_v13 }
 0x3e1   : > { %v6676_v62 = vadd.f32 0.5, %v6526_v12  ;;  %v3986_v21 = vadd.f32 %v7519_v17, %v3985_v45  ;;  %v4033_v30 = vand.u32 2147483648, %v4021_v3  ;;  %v4084_v48 = vadd.f32 0.0036580483, %v4083_v28 }
 0x3e2   : > { %v4093_v34 = vadd.f32 0.001143296, %v4092_v0  ;;  %v11278_v31 = vmin.f32 %v4119_v35, 16.0  ;;  %v4060_v47 = vmul.f32 %v4059_v63, %v11205_v13  ;;  %vm4027_vm4 = vweird.f32 %v4021_v3 }
 0x3e3   : > { %v6826_v52 = vmul.f32 %v6676_v62, %v11063_v39  ;;  %v3990_v6 = vsel %vm11272_vm3, %v7519_v17, %v3986_v21  ;;  %v7521_v60 = vpop.eup %7520  ;;  %v4085_v29 = vmul.f32 %v4084_v48, %v11248_v44  ;;  %v4011_v39 = vmul.f32 %v4010_v59, %v11147_v27 }
 0x3e4   : > { %v3995_v43 = vsel %vm11264_vm2, %v3994_v55, %v3990_v6  ;;  %v4094_v54 = vmul.f32 %v4093_v34, %v11248_v44  ;;  %v4121_v56 = vmul.f32 2.1237322e-06, %v11278_v31  ;;  %v4023_v18 = vmul.f32 %v7521_v60, %v4021_v3 }
 0x3e5   : > { %6976 = vst [vmem:[%s8053_s16 + $0x2b8] sm:$0xff] %v6826_v52  ;;  %v3996_v19 = vmul.f32 %v3995_v43, %v3971_v2  ;;  %v11292_v20 = vadd.f32 1.0, %v4060_v47  ;;  %v4086_v13 = vadd.f32 0.05243302, %v4085_v29  ;;  %vm4028_vm5 = vweird.f32 %v7521_v60 }
 0x3e6   : > { %v4095_v41 = vadd.f32 0.014752088, %v4094_v54  ;;  %v4122_v16 = vadd.f32 0.00028619796, %v4121_v56  ;;  %v4024_v1 = vsub.f32 1.0, %v4023_v18  ;;  %vm11295_vm6 = vcmp.eq.f32.partialorder %v4031_v49, 8.507059e+37  ;;  %vm11309_vm7 = vmor %vm4027_vm4, %vm4028_vm5 }
 0x3e7   : > { %v7221_v37 = vclamps-f32 %v3996_v19, 1.0  ;;  %7522 = vrcp.f32 %v11292_v20  ;;  %v4034_v33 = vor.u32 1.1754944e-38, %v4033_v30  ;;  %v4050_v27 = vadd.f32 1.1283791, %v4049_v7 }
 0x3e8   : > { %v4096_v17 = vmul.f32 %v4095_v41, %v11248_v44  ;;  %v4025_v42 = vmul.f32 %v7521_v60, %v4024_v1  ;;  %v4123_v24 = vmul.f32 %v4122_v16, %v11278_v31  ;;  %v4132_v32 = vmul.f32 3.8918573e-05, %v11278_v31 }
 0x3e9   : > { %v6527_v38 = vmul.f32 0.5, %v7221_v37  ;;  %vm4067_vm8 = vweird.f32 %v11292_v20  ;;  %v4073_v25 = vand.u32 2147483648, %v11292_v20  ;;  %v4087_v40 = vmul.f32 %v4086_v13, %v11248_v44 }
 0x3ea   : > { %v4097_v57 = vadd.f32 0.112945676, %v4096_v17  ;;  %v4026_v14 = vadd.f32 %v7521_v60, %v4025_v42  ;;  %v4124_v2 = vadd.f32 0.0036580483, %v4123_v24  ;;  %v4133_v22 = vadd.f32 0.001143296, %v4132_v32 }
 0x3eb   : > { %v6677_v51 = vadd.f32 0.5, %v6527_v38  ;;  %v4071_v35 = vand.u32 2147483647, %v11292_v20  ;;  %v11319_v12 = vmul.f32 0.70710677, %v11303_v11  ;;  %v4074_v62 = vor.u32 1.1754944e-38, %v4073_v25 }
 0x3ec   : > { %v4098_v3 = vmul.f32 %v4097_v57, %v11248_v44  ;;  %v11322_v45 = vmul.f32 0.70710677, %v11306_v26  ;;  %v4030_v4 = vsel %vm11309_vm7, %v7521_v60, %v4026_v14  ;;  %v4125_v55 = vmul.f32 %v4124_v2, %v11278_v31 }
 0x3ed   : > { %v7523_v46 = vpop.eup %7522  ;;  %v6827_v8 = vmul.f32 %v6677_v51, %v11111_v36  ;;  %v4134_v59 = vmul.f32 %v4133_v22, %v11278_v31  ;;  %v4035_v28 = vsel %vm11295_vm6, %v4034_v33, %v4030_v4  ;;  %v4088_v21 = vadd.f32 0.18741608, %v4087_v40  ;;  %v11356_v33 = vld [vmem:[%s7840_s24 + $0x2f8] sm:$0xff] }
 0x3ee   : > { %v4063_v0 = vmul.f32 %v7523_v46, %v11292_v20  ;;  %v4036_v49 = vmul.f32 %v4035_v28, %v4011_v39  ;;  %v4099_v63 = vadd.f32 0.4994258, %v4098_v3  ;;  %v4126_v30 = vadd.f32 0.05243302, %v4125_v55 }
 0x3ef   : > { %6977 = vst [vmem:[%s8053_s16 + $0x2c0] sm:$0xff] %v6827_v8  ;;  %v4159_v36 = vmul.f32 %v11319_v12, %v11319_v12  ;;  %vm4068_vm9 = vweird.f32 %v7523_v46  ;;  %v4135_v34 = vadd.f32 0.014752088, %v4134_v59  ;;  %v4199_v52 = vmul.f32 %v11322_v45, %v11322_v45 }
 0x3f0   : > { %v4064_v48 = vsub.f32 1.0, %v4063_v0  ;;  %v7222_v6 = vclamps-f32 %v4036_v49, 1.0  ;;  %v4100_v7 = vmul.f32 %v4099_v63, %v11248_v44  ;;  %v4127_v47 = vmul.f32 %v4126_v30, %v11278_v31  ;;  %vm11347_vm10 = vmor %vm4067_vm8, %vm4068_vm9 }
 0x3f1   : > { %v11339_v60 = vmin.f32 %v4159_v36, 16.0  ;;  %v4089_v29 = vmul.f32 %v4088_v21, %v11248_v44  ;;  %v4136_v54 = vmul.f32 %v4135_v34, %v11278_v31  ;;  %v11343_v56 = vmin.f32 %v4199_v52, 16.0 }
 0x3f2   : > { %v4065_v43 = vmul.f32 %v7523_v46, %v4064_v48  ;;  %v6528_v19 = vmul.f32 0.5, %v7222_v6  ;;  %v4101_v18 = vadd.f32 1.0, %v4100_v7  ;;  %v4128_v13 = vadd.f32 0.18741608, %v4127_v47 }
 0x3f3   : > { %v4161_v41 = vmul.f32 2.1237322e-06, %v11339_v60  ;;  %v4051_v16 = vmul.f32 %v4050_v27, %v11183_v23  ;;  %vm4072_vm11 = vcmp.eq.f32.partialorder %v4071_v35, 8.507059e+37  ;;  %v4137_v44 = vadd.f32 0.112945676, %v4136_v54 }
 0x3f4   : > { %v4066_v37 = vadd.f32 %v7523_v46, %v4065_v43  ;;  %v6678_v1 = vadd.f32 0.5, %v6528_v19  ;;  %7524 = vrcp.f32 %v4101_v18  ;;  %v4172_v50 = vmul.f32 3.8918573e-05, %v11339_v60 }
 0x3f5   : > { %v4201_v20 = vmul.f32 2.1237322e-06, %v11343_v56  ;;  %v4090_v38 = vadd.f32 1.1283791, %v4089_v29  ;;  %v4138_v42 = vmul.f32 %v4137_v44, %v11278_v31  ;;  %v4129_v24 = vmul.f32 %v4128_v13, %v11278_v31 }
 0x3f6   : > { %v4070_v17 = vsel %vm11347_vm10, %v7523_v46, %v4066_v37  ;;  %v6828_v23 = vmul.f32 %v6678_v1, %v11129_v61  ;;  %v4162_v32 = vadd.f32 0.00028619796, %v4161_v41  ;;  %v4111_v25 = vand.u32 2147483647, %v4101_v18  ;;  %v11398_v1 = vld [vmem:[%s7840_s24 + $0x300] sm:$0xff] }
 0x3f7   : > { %v4075_v27 = vsel %vm4072_vm11, %v4074_v62, %v4070_v17  ;;  %v4139_v40 = vadd.f32 0.4994258, %v4138_v42  ;;  %v11364_v57 = vmul.f32 0.70710677, %v11356_v33  ;;  %vm4107_vm12 = vweird.f32 %v4101_v18 }
 0x3f8   : > { %v4076_v10 = vmul.f32 %v4075_v27, %v4051_v16  ;;  %6978 = vst [vmem:[%s8053_s16 + $0x2c8] sm:$0xff] %v6828_v23  ;;  %v4163_v51 = vmul.f32 %v4162_v32, %v11339_v60  ;;  %v4173_v14 = vadd.f32 0.001143296, %v4172_v50  ;;  %v4202_v2 = vadd.f32 0.00028619796, %v4201_v20 }
 0x3f9   : > { %v4113_v35 = vand.u32 2147483648, %v4101_v18  ;;  %v4140_v61 = vmul.f32 %v4139_v40, %v11278_v31  ;;  %v4212_v3 = vmul.f32 3.8918573e-05, %v11343_v56  ;;  %v4130_v8 = vadd.f32 1.1283791, %v4129_v24 }
 0x3fa   : > { %v7223_v22 = vclamps-f32 %v4076_v10, 1.0  ;;  %v7525_v46 = vpop.eup %7524  ;;  %v4164_v4 = vadd.f32 0.0036580483, %v4163_v51  ;;  %v4174_v55 = vmul.f32 %v4173_v14, %v11339_v60  ;;  %v4203_v59 = vmul.f32 %v4202_v2, %v11343_v56 }
 0x3fb   : > { %v4103_v0 = vmul.f32 %v7525_v46, %v4101_v18  ;;  %v11372_v62 = vadd.f32 1.0, %v4140_v61  ;;  %v4239_v21 = vmul.f32 %v11364_v57, %v11364_v57  ;;  %v4213_v30 = vadd.f32 0.001143296, %v4212_v3 }
 0x3fc   : > { %v6529_v28 = vmul.f32 0.5, %v7223_v22  ;;  %v4165_v49 = vmul.f32 %v4164_v4, %v11339_v60  ;;  %v4175_v63 = vadd.f32 0.014752088, %v4174_v55  ;;  %v4204_v31 = vadd.f32 0.0036580483, %v4203_v59 }
 0x3fd   : > { %v4104_v48 = vsub.f32 1.0, %v4103_v0  ;;  %vm4108_vm13 = vweird.f32 %v7525_v46  ;;  %7526 = vrcp.f32 %v11372_v62  ;;  %v4091_v34 = vmul.f32 %v4090_v38, %v11224_v5 }
 0x3fe   : > { %v6679_v36 = vadd.f32 0.5, %v6529_v28  ;;  %vm11379_vm14 = vcmp.eq.f32.partialorder %v4111_v25, 8.507059e+37  ;;  %v4166_v6 = vadd.f32 0.05243302, %v4165_v49  ;;  %v4176_v7 = vmul.f32 %v4175_v63, %v11339_v60  ;;  %vm11388_vm15 = vmor %vm4107_vm12, %vm4108_vm13 }
 0x3ff   : > { %v4105_v43 = vmul.f32 %v7525_v46, %v4104_v48  ;;  %v4205_v29 = vmul.f32 %v4204_v31, %v11343_v56  ;;  %v4214_v54 = vmul.f32 %v4213_v30, %v11343_v56  ;;  %v4114_v5 = vor.u32 1.1754944e-38, %v4113_v35 }
 0x400   : > { %v6829_v47 = vmul.f32 %v6679_v36, %v11173_v9  ;;  %v4167_v39 = vmul.f32 %v4166_v6, %v11339_v60  ;;  %v4177_v13 = vadd.f32 0.112945676, %v4176_v7  ;;  %v11393_v41 = vmin.f32 %v4239_v21, 16.0 }
 0x401   : > { %v4106_v16 = vadd.f32 %v7525_v46, %v4105_v43  ;;  %v4131_v9 = vmul.f32 %v4130_v8, %v11259_v58  ;;  %v4206_v37 = vadd.f32 0.05243302, %v4205_v29  ;;  %v4215_v44 = vadd.f32 0.014752088, %v4214_v54 }
 0x402   : > { %6979 = vst [vmem:[%s8053_s16 + $0x2d0] sm:$0xff] %v6829_v47  ;;  %vm4147_vm0 = vweird.f32 %v11372_v62  ;;  %v4168_v18 = vadd.f32 0.18741608, %v4167_v39  ;;  %v4178_v50 = vmul.f32 %v4177_v13, %v11339_v60  ;;  %v4241_v20 = vmul.f32 2.1237322e-06, %v11393_v41 }
 0x403   : > { %v7527_v17 = vpop.eup %7526  ;;  %v4110_v38 = vsel %vm11388_vm15, %v7525_v46, %v4106_v16  ;;  %v4151_v42 = vand.u32 2147483647, %v11372_v62  ;;  %v4207_v23 = vmul.f32 %v4206_v37, %v11343_v56  ;;  %v4216_v58 = vmul.f32 %v4215_v44, %v11343_v56 }
 0x404   : > { %v4115_v27 = vsel %vm11379_vm14, %v4114_v5, %v4110_v38  ;;  %v4143_v24 = vmul.f32 %v7527_v17, %v11372_v62  ;;  %v4252_v32 = vmul.f32 3.8918573e-05, %v11393_v41  ;;  %v11413_v10 = vmul.f32 0.70710677, %v11398_v1 }
 0x405   : > { %v4116_v25 = vmul.f32 %v4115_v27, %v4091_v34  ;;  %v4153_v40 = vand.u32 2147483648, %v11372_v62  ;;  %v4179_v51 = vadd.f32 0.4994258, %v4178_v50  ;;  %v4217_v14 = vadd.f32 0.112945676, %v4216_v58 }
 0x406   : > { %v4144_v2 = vsub.f32 1.0, %v4143_v24  ;;  %vm4148_vm1 = vweird.f32 %v7527_v17  ;;  %v4169_v22 = vmul.f32 %v4168_v18, %v11339_v60  ;;  %v4242_v35 = vadd.f32 0.00028619796, %v4241_v20 }
 0x407   : > { %v7224_v61 = vclamps-f32 %v4116_v25, 1.0  ;;  %v4180_v3 = vmul.f32 %v4179_v51, %v11339_v60  ;;  %v4208_v46 = vadd.f32 0.18741608, %v4207_v23  ;;  %v4218_v8 = vmul.f32 %v4217_v14, %v11343_v56  ;;  %vm11424_vm2 = vmor %vm4147_vm0, %vm4148_vm1 }
 0x408   : > { %v4145_v4 = vmul.f32 %v7527_v17, %v4144_v2  ;;  %v4243_v55 = vmul.f32 %v4242_v35, %v11393_v41  ;;  %v4253_v59 = vadd.f32 0.001143296, %v4252_v32  ;;  %v4279_v28 = vmul.f32 %v11413_v10, %v11413_v10 }
 0x409   : > { %v6530_v0 = vmul.f32 0.5, %v7224_v61  ;;  %v4154_v49 = vor.u32 1.1754944e-38, %v4153_v40  ;;  %v4181_v63 = vadd.f32 1.0, %v4180_v3  ;;  %v4219_v60 = vadd.f32 0.4994258, %v4218_v8 }
 0x40a   : > { %v4146_v31 = vadd.f32 %v7527_v17, %v4145_v4  ;;  %vm4152_vm3 = vcmp.eq.f32.partialorder %v4151_v42, 8.507059e+37  ;;  %v4244_v30 = vadd.f32 0.0036580483, %v4243_v55  ;;  %v4254_v36 = vmul.f32 %v4253_v59, %v11393_v41  ;;  %v11464_v4 = vld [vmem:[%s7840_s24 + $0x310] sm:$0xff] }
 0x40b   : > { %v6680_v48 = vadd.f32 0.5, %v6530_v0  ;;  %v4170_v34 = vadd.f32 1.1283791, %v4169_v22  ;;  %7528 = vrcp.f32 %v4181_v63  ;;  %v4209_v62 = vmul.f32 %v4208_v46, %v11343_v56 }
 0x40c   : > { %v4150_v52 = vsel %vm11424_vm2, %v7527_v17, %v4146_v31  ;;  %v4220_v6 = vmul.f32 %v4219_v60, %v11343_v56  ;;  %v11433_v7 = vmin.f32 %v4279_v28, 16.0  ;;  %v4191_v29 = vand.u32 2147483647, %v4181_v63  ;;  %v11446_v17 = vld [vmem:[%s7840_s24 + $0x308] sm:$0xff] }
 0x40d   : > { %v6830_v47 = vmul.f32 %v6680_v48, %v11216_v15  ;;  %v4155_v43 = vsel %vm4152_vm3, %v4154_v49, %v4150_v52  ;;  %v4245_v54 = vmul.f32 %v4244_v30, %v11393_v41  ;;  %v4193_v5 = vand.u32 2147483648, %v4181_v63 }
 0x40e   : > { %v4156_v19 = vmul.f32 %v4155_v43, %v4131_v9  ;;  %v11437_v39 = vadd.f32 1.0, %v4220_v6  ;;  %v4255_v13 = vadd.f32 0.014752088, %v4254_v36  ;;  %v4281_v37 = vmul.f32 2.1237322e-06, %v11433_v7 }
 0x40f   : > { %6980 = vst [vmem:[%s8053_s16 + $0x2d8] sm:$0xff] %v6830_v47  ;;  %v4246_v16 = vadd.f32 0.05243302, %v4245_v54  ;;  %v4171_v56 = vmul.f32 %v4170_v34, %v11319_v12  ;;  %v4210_v18 = vadd.f32 1.1283791, %v4209_v62  ;;  %vm4187_vm4 = vweird.f32 %v4181_v63 }
 0x410   : > { %v7225_v44 = vclamps-f32 %v4156_v19, 1.0  ;;  %7530 = vrcp.f32 %v11437_v39  ;;  %v4256_v9 = vmul.f32 %v4255_v13, %v11393_v41  ;;  %v4282_v20 = vadd.f32 0.00028619796, %v4281_v37 }
 0x411   : > { %v7529_v15 = vpop.eup %7528  ;;  %v4247_v50 = vmul.f32 %v4246_v16, %v11393_v41  ;;  %vm11448_vm5 = vcmp.eq.f32.partialorder %v4191_v29, 8.507059e+37  ;;  %v4194_v58 = vor.u32 1.1754944e-38, %v4193_v5  ;;  %v4292_v40 = vmul.f32 3.8918573e-05, %v11433_v7 }
 0x412   : > { %v6531_v38 = vmul.f32 0.5, %v7225_v44  ;;  %v4183_v42 = vmul.f32 %v7529_v15, %v4181_v63  ;;  %vm4188_vm6 = vweird.f32 %v7529_v15  ;;  %v4257_v27 = vadd.f32 0.112945676, %v4256_v9 }
 0x413   : > { %v4248_v12 = vadd.f32 0.18741608, %v4247_v50  ;;  %v4283_v24 = vmul.f32 %v4282_v20, %v11433_v7  ;;  %v11455_v51 = vmul.f32 0.70710677, %v11446_v17  ;;  %vm4227_vm7 = vweird.f32 %v11437_v39  ;;  %vm11468_vm8 = vmor %vm4187_vm4, %vm4188_vm6 }
 0x414   : > { %v6681_v32 = vadd.f32 0.5, %v6531_v38  ;;  %v4184_v25 = vsub.f32 1.0, %v4183_v42  ;;  %v4231_v14 = vand.u32 2147483647, %v11437_v39  ;;  %v4258_v2 = vmul.f32 %v4257_v27, %v11393_v41  ;;  %v11508_v42 = vld [vmem:[%s7840_s24 + $0x318] sm:$0xff] }
 0x415   : > { %v4284_v22 = vadd.f32 0.0036580483, %v4283_v24  ;;  %v4293_v46 = vadd.f32 0.001143296, %v4292_v40  ;;  %v4319_v8 = vmul.f32 %v11455_v51, %v11455_v51  ;;  %v4233_v28 = vand.u32 2147483648, %v11437_v39 }
 0x416   : > { %v7531_v35 = vpop.eup %7530  ;;  %v6831_v61 = vmul.f32 %v6681_v32, %v11246_v53  ;;  %v4185_v3 = vmul.f32 %v7529_v15, %v4184_v25  ;;  %v4249_v0 = vmul.f32 %v4248_v12, %v11393_v41  ;;  %v4259_v53 = vadd.f32 0.4994258, %v4258_v2 }
 0x417   : > { %v4223_v59 = vmul.f32 %v7531_v35, %v11437_v39  ;;  %v4285_v49 = vmul.f32 %v4284_v22, %v11433_v7  ;;  %v4294_v60 = vmul.f32 %v4293_v46, %v11433_v7  ;;  %v11478_v31 = vmin.f32 %v4319_v8, 16.0 }
 0x418   : > { %6981 = vst [vmem:[%s8053_s16 + $0x2e0] sm:$0xff] %v6831_v61  ;;  %v4186_v21 = vadd.f32 %v7529_v15, %v4185_v3  ;;  %vm4228_vm9 = vweird.f32 %v7531_v35  ;;  %v4260_v30 = vmul.f32 %v4259_v53, %v11393_v41  ;;  %v11482_v36 = vmul.f32 0.70710677, %v11464_v4 }
 0x419   : > { %v4224_v63 = vsub.f32 1.0, %v4223_v59  ;;  %v4286_v34 = vadd.f32 0.05243302, %v4285_v49  ;;  %v4295_v52 = vadd.f32 0.014752088, %v4294_v60  ;;  %vm11494_vm10 = vmor %vm4227_vm7, %vm4228_vm9  ;;  %v4234_v19 = vor.u32 1.1754944e-38, %v4233_v28 }
 0x41a   : > { %v4190_v48 = vsel %vm11468_vm8, %v7529_v15, %v4186_v21  ;;  %v4321_v62 = vmul.f32 2.1237322e-06, %v11478_v31  ;;  %v11489_v43 = vadd.f32 1.0, %v4260_v30  ;;  %v4332_v29 = vmul.f32 3.8918573e-05, %v11478_v31 }
 0x41b   : > { %v4195_v6 = vsel %vm11448_vm5, %v4194_v58, %v4190_v48  ;;  %v4225_v47 = vmul.f32 %v7531_v35, %v4224_v63  ;;  %v4296_v5 = vmul.f32 %v4295_v52, %v11433_v7  ;;  %v4211_v16 = vmul.f32 %v4210_v18, %v11322_v45 }
 0x41c   : > { %v4196_v54 = vmul.f32 %v4195_v6, %v4171_v56  ;;  %v4322_v13 = vadd.f32 0.00028619796, %v4321_v62  ;;  %vm4232_vm11 = vcmp.eq.f32.partialorder %v4231_v14, 8.507059e+37  ;;  %7532 = vrcp.f32 %v11489_v43 }
 0x41d   : > { %v4226_v37 = vadd.f32 %v7531_v35, %v4225_v47  ;;  %v4250_v15 = vadd.f32 1.1283791, %v4249_v0  ;;  %v4297_v56 = vadd.f32 0.112945676, %v4296_v5  ;;  %v4359_v39 = vmul.f32 %v11482_v36, %v11482_v36 }
 0x41e   : > { %v7226_v44 = vclamps-f32 %v4196_v54, 1.0  ;;  %v4287_v9 = vmul.f32 %v4286_v34, %v11433_v7  ;;  %v4323_v20 = vmul.f32 %v4322_v13, %v11478_v31  ;;  %v4333_v38 = vadd.f32 0.001143296, %v4332_v29 }
 0x41f   : > { %v4230_v50 = vsel %vm11494_vm10, %v7531_v35, %v4226_v37  ;;  %vm4267_vm12 = vweird.f32 %v11489_v43  ;;  %v4271_v23 = vand.u32 2147483647, %v11489_v43  ;;  %v4298_v12 = vmul.f32 %v4297_v56, %v11433_v7 }
 0x420   : > { %v6532_v45 = vmul.f32 0.5, %v7226_v44  ;;  %v4235_v18 = vsel %vm4232_vm11, %v4234_v19, %v4230_v50  ;;  %v4324_v27 = vadd.f32 0.0036580483, %v4323_v20  ;;  %v4334_v24 = vmul.f32 %v4333_v38, %v11478_v31 }
 0x421   : > { %v4236_v58 = vmul.f32 %v4235_v18, %v4211_v16  ;;  %v4273_v25 = vand.u32 2147483648, %v11489_v43  ;;  %v11515_v40 = vmin.f32 %v4359_v39, 16.0  ;;  %v11518_v14 = vmul.f32 0.70710677, %v11508_v42 }
 0x422   : > { %v6682_v32 = vadd.f32 0.5, %v6532_v45  ;;  %v7533_v2 = vpop.eup %7532  ;;  %v4299_v35 = vadd.f32 0.4994258, %v4298_v12  ;;  %v4325_v61 = vmul.f32 %v4324_v27, %v11478_v31  ;;  %v4335_v3 = vadd.f32 0.014752088, %v4334_v24 }
 0x423   : > { %v7227_v22 = vclamps-f32 %v4236_v58, 1.0  ;;  %v4263_v8 = vmul.f32 %v7533_v2, %v11489_v43  ;;  %vm4268_vm13 = vweird.f32 %v7533_v2  ;;  %v4288_v55 = vadd.f32 0.18741608, %v4287_v9 }
 0x424   : > { %v6832_v46 = vmul.f32 %v6682_v32, %v11303_v11  ;;  %v4300_v28 = vmul.f32 %v4299_v35, %v11433_v7  ;;  %v4326_v0 = vadd.f32 0.05243302, %v4325_v61  ;;  %v4336_v53 = vmul.f32 %v4335_v3, %v11478_v31  ;;  %vm11536_vm14 = vmor %vm4267_vm12, %vm4268_vm13 }
 0x425   : > { %v6533_v59 = vmul.f32 0.5, %v7227_v22  ;;  %v4264_v21 = vsub.f32 1.0, %v4263_v8  ;;  %v4361_v49 = vmul.f32 2.1237322e-06, %v11515_v40  ;;  %v4372_v60 = vmul.f32 3.8918573e-05, %v11515_v40 }
 0x426   : > { %6982 = vst [vmem:[%s8053_s16 + $0x2e8] sm:$0xff] %v6832_v46  ;;  %v4399_v63 = vmul.f32 %v11518_v14, %v11518_v14  ;;  %v4251_v30 = vmul.f32 %v4250_v15, %v11364_v57  ;;  %v4301_v48 = vadd.f32 1.0, %v4300_v28  ;;  %v4337_v34 = vadd.f32 0.112945676, %v4336_v53  ;;  %v11551_v15 = vld [vmem:[%s7840_s24 + $0x320] sm:$0xff] }
 0x427   : > { %v6683_v11 = vadd.f32 0.5, %v6533_v59  ;;  %v4265_v52 = vmul.f32 %v7533_v2, %v4264_v21  ;;  %v4289_v62 = vmul.f32 %v4288_v55, %v11433_v7  ;;  %v4362_v6 = vadd.f32 0.00028619796, %v4361_v49 }
 0x428   : > { %v4373_v47 = vadd.f32 0.001143296, %v4372_v60  ;;  %v4274_v41 = vor.u32 1.1754944e-38, %v4273_v25  ;;  %7534 = vrcp.f32 %v4301_v48  ;;  %v11540_v57 = vmin.f32 %v4399_v63, 16.0 }
 0x429   : > { %v6833_v29 = vmul.f32 %v6683_v11, %v11306_v26  ;;  %v4266_v19 = vadd.f32 %v7533_v2, %v4265_v52  ;;  %vm4272_vm15 = vcmp.eq.f32.partialorder %v4271_v23, 8.507059e+37  ;;  %v4327_v7 = vmul.f32 %v4326_v0, %v11478_v31 }
 0x42a   : > { %v4338_v5 = vmul.f32 %v4337_v34, %v11478_v31  ;;  %v4363_v26 = vmul.f32 %v4362_v6, %v11515_v40  ;;  %v4374_v43 = vmul.f32 %v4373_v47, %v11515_v40  ;;  %v4401_v13 = vmul.f32 2.1237322e-06, %v11540_v57 }
 0x42b   : > { %6983 = vst [vmem:[%s8053_s16 + $0x2f0] sm:$0xff] %v6833_v29  ;;  %v4270_v16 = vsel %vm11536_vm14, %v7533_v2, %v4266_v19  ;;  %v4290_v37 = vadd.f32 1.1283791, %v4289_v62  ;;  %vm4307_vm0 = vweird.f32 %v4301_v48  ;;  %v4328_v38 = vadd.f32 0.18741608, %v4327_v7  ;;  %v11581_v29 = vld [vmem:[%s7840_s24 + $0x328] sm:$0xff] }
 0x42c   : > { %v4339_v44 = vadd.f32 0.4994258, %v4338_v5  ;;  %v4275_v56 = vsel %vm4272_vm15, %v4274_v41, %v4270_v16  ;;  %v4364_v39 = vadd.f32 0.0036580483, %v4363_v26  ;;  %v4375_v50 = vadd.f32 0.014752088, %v4374_v43 }
 0x42d   : > { %v4402_v9 = vadd.f32 0.00028619796, %v4401_v13  ;;  %v4276_v20 = vmul.f32 %v4275_v56, %v4251_v30  ;;  %v4412_v18 = vmul.f32 3.8918573e-05, %v11540_v57  ;;  %v11559_v24 = vmul.f32 0.70710677, %v11551_v15 }
 0x42e   : > { %v4340_v45 = vmul.f32 %v4339_v44, %v11478_v31  ;;  %v7535_v23 = vpop.eup %7534  ;;  %v4365_v58 = vmul.f32 %v4364_v39, %v11515_v40  ;;  %v4376_v12 = vmul.f32 %v4375_v50, %v11515_v40  ;;  %v4311_v2 = vand.u32 2147483647, %v4301_v48 }
 0x42f   : > { %v4403_v27 = vmul.f32 %v4402_v9, %v11540_v57  ;;  %v7228_v32 = vclamps-f32 %v4276_v20, 1.0  ;;  %v4303_v25 = vmul.f32 %v7535_v23, %v4301_v48  ;;  %v4313_v22 = vand.u32 2147483648, %v4301_v48 }
 0x430   : > { %vm4308_vm1 = vweird.f32 %v7535_v23  ;;  %v4341_v35 = vadd.f32 1.0, %v4340_v45  ;;  %v4366_v61 = vadd.f32 0.05243302, %v4365_v58  ;;  %v4377_v3 = vadd.f32 0.112945676, %v4376_v12 }
 0x431   : > { %v6534_v46 = vmul.f32 0.5, %v7228_v32  ;;  %v4304_v8 = vsub.f32 1.0, %v4303_v25  ;;  %v4404_v55 = vadd.f32 0.0036580483, %v4403_v27  ;;  %v4413_v59 = vadd.f32 0.001143296, %v4412_v18  ;;  %vm11569_vm2 = vmor %vm4307_vm0, %vm4308_vm1 }
 0x432   : > { %v4291_v28 = vmul.f32 %v4290_v37, %v11413_v10  ;;  %v4329_v0 = vmul.f32 %v4328_v38, %v11478_v31  ;;  %7536 = vrcp.f32 %v4341_v35  ;;  %v4439_v53 = vmul.f32 %v11559_v24, %v11559_v24 }
 0x433   : > { %v6684_v21 = vadd.f32 0.5, %v6534_v46  ;;  %v4305_v49 = vmul.f32 %v7535_v23, %v4304_v8  ;;  %v4367_v60 = vmul.f32 %v4366_v61, %v11515_v40  ;;  %v4378_v63 = vmul.f32 %v4377_v3, %v11515_v40 }
 0x434   : > { %vm11573_vm3 = vcmp.eq.f32.partialorder %v4311_v2, 8.507059e+37  ;;  %v4314_v31 = vor.u32 1.1754944e-38, %v4313_v22  ;;  %v4405_v30 = vmul.f32 %v4404_v55, %v11540_v57  ;;  %v4414_v34 = vmul.f32 %v4413_v59, %v11540_v57 }
 0x435   : > { %v6834_v52 = vmul.f32 %v6684_v21, %v11356_v33  ;;  %v4306_v62 = vadd.f32 %v7535_v23, %v4305_v49  ;;  %v4368_v6 = vadd.f32 0.18741608, %v4367_v60  ;;  %v4379_v47 = vadd.f32 0.4994258, %v4378_v63 }
 0x436   : > { %v4406_v48 = vadd.f32 0.05243302, %v4405_v30  ;;  %v4415_v54 = vadd.f32 0.014752088, %v4414_v34  ;;  %v11583_v41 = vmin.f32 %v4439_v53, 16.0  ;;  %vm4347_vm4 = vweird.f32 %v4341_v35 }
 0x437   : > { %6984 = vst [vmem:[%s8053_s16 + $0x2f8] sm:$0xff] %v6834_v52  ;;  %v4310_v19 = vsel %vm11569_vm2, %v7535_v23, %v4306_v62  ;;  %v4330_v7 = vadd.f32 1.1283791, %v4329_v0  ;;  %v4351_v5 = vand.u32 2147483647, %v4341_v35  ;;  %v4380_v26 = vmul.f32 %v4379_v47, %v11515_v40 }
 0x438   : > { %v7537_v43 = vpop.eup %7536  ;;  %v4315_v33 = vsel %vm11573_vm3, %v4314_v31, %v4310_v19  ;;  %v4416_v13 = vmul.f32 %v4415_v54, %v11540_v57  ;;  %v4441_v16 = vmul.f32 2.1237322e-06, %v11583_v41  ;;  %v11594_v37 = vmul.f32 0.70710677, %v11581_v29 }
 0x439   : > { %v4316_v44 = vmul.f32 %v4315_v33, %v4291_v28  ;;  %v4343_v56 = vmul.f32 %v7537_v43, %v4341_v35  ;;  %v4407_v39 = vmul.f32 %v4406_v48, %v11540_v57  ;;  %v4353_v50 = vand.u32 2147483648, %v4341_v35 }
 0x43a   : > { %v4369_v9 = vmul.f32 %v4368_v6, %v11515_v40  ;;  %v4381_v20 = vadd.f32 1.0, %v4380_v26  ;;  %v4417_v38 = vadd.f32 0.112945676, %v4416_v13  ;;  %vm4348_vm5 = vweird.f32 %v7537_v43 }
 0x43b   : > { %v7229_v45 = vclamps-f32 %v4316_v44, 1.0  ;;  %v4344_v18 = vsub.f32 1.0, %v4343_v56  ;;  %v4442_v23 = vadd.f32 0.00028619796, %v4441_v16  ;;  %v4331_v58 = vmul.f32 %v4330_v7, %v11455_v51  ;;  %vm11607_vm7 = vmor %vm4347_vm4, %vm4348_vm5  ;;  %v11638_v56 = vld [vmem:[%s7840_s24 + $0x330] sm:$0xff] }
 0x43c   : > { %vm11599_vm6 = vcmp.eq.f32.partialorder %v4351_v5, 8.507059e+37  ;;  %7538 = vrcp.f32 %v4381_v20  ;;  %v4479_v27 = vmul.f32 %v11594_v37, %v11594_v37  ;;  %v4408_v2 = vadd.f32 0.18741608, %v4407_v39  ;;  %v11641_v39 = vld [vmem:[%s7840_s24 + $0x338] sm:$0xff] }
 0x43d   : > { %v6535_v32 = vmul.f32 0.5, %v7229_v45  ;;  %v4345_v25 = vmul.f32 %v7537_v43, %v4344_v18  ;;  %v4418_v40 = vmul.f32 %v4417_v38, %v11540_v57  ;;  %v4354_v61 = vor.u32 1.1754944e-38, %v4353_v50 }
 0x43e   : > { %v4370_v51 = vadd.f32 1.1283791, %v4369_v9  ;;  %v4443_v3 = vmul.f32 %v4442_v23, %v11583_v41  ;;  %v4452_v46 = vmul.f32 3.8918573e-05, %v11583_v41  ;;  %v4391_v59 = vand.u32 2147483647, %v4381_v20 }
 0x43f   : > { %v6685_v8 = vadd.f32 0.5, %v6535_v32  ;;  %v4346_v55 = vadd.f32 %v7537_v43, %v4345_v25  ;;  %v4419_v28 = vadd.f32 0.4994258, %v4418_v40  ;;  %v4393_v0 = vand.u32 2147483648, %v4381_v20 }
 0x440   : > { %v4444_v53 = vadd.f32 0.0036580483, %v4443_v3  ;;  %v4453_v21 = vadd.f32 0.001143296, %v4452_v46  ;;  %v11613_v49 = vmin.f32 %v4479_v27, 16.0  ;;  %v4409_v63 = vmul.f32 %v4408_v2, %v11540_v57 }
 0x441   : > { %v6835_v35 = vmul.f32 %v6685_v8, %v11398_v1  ;;  %v4350_v60 = vsel %vm11607_vm7, %v7537_v43, %v4346_v55  ;;  %v4420_v11 = vmul.f32 %v4419_v28, %v11540_v57  ;;  %v4371_v1 = vmul.f32 %v4370_v51, %v11482_v36 }
 0x442   : > { %v7539_v10 = vpop.eup %7538  ;;  %v4355_v31 = vsel %vm11599_vm6, %v4354_v61, %v4350_v60  ;;  %v4445_v30 = vmul.f32 %v4444_v53, %v11583_v41  ;;  %v4454_v34 = vmul.f32 %v4453_v21, %v11583_v41  ;;  %v4481_v52 = vmul.f32 2.1237322e-06, %v11613_v49 }
 0x443   : > { %6985 = vst [vmem:[%s8053_s16 + $0x300] sm:$0xff] %v6835_v35  ;;  %v4356_v62 = vmul.f32 %v4355_v31, %v4331_v58  ;;  %v4383_v6 = vmul.f32 %v7539_v10, %v4381_v20  ;;  %v11627_v47 = vadd.f32 1.0, %v4420_v11  ;;  %vm4387_vm8 = vweird.f32 %v4381_v20 }
 0x444   : > { %v4446_v57 = vadd.f32 0.05243302, %v4445_v30  ;;  %v4455_v48 = vadd.f32 0.014752088, %v4454_v34  ;;  %v4482_v54 = vadd.f32 0.00028619796, %v4481_v52  ;;  %vm4388_vm9 = vweird.f32 %v7539_v10 }
 0x445   : > { %v7230_v19 = vclamps-f32 %v4356_v62, 1.0  ;;  %v4384_v7 = vsub.f32 1.0, %v4383_v6  ;;  %7540 = vrcp.f32 %v11627_v47  ;;  %vm11630_vm10 = vcmp.eq.f32.partialorder %v4391_v59, 8.507059e+37  ;;  %vm11644_vm11 = vmor %vm4387_vm8, %vm4388_vm9 }
 0x446   : > { %v4394_v26 = vor.u32 1.1754944e-38, %v4393_v0  ;;  %v4410_v36 = vadd.f32 1.1283791, %v4409_v63  ;;  %v4456_v43 = vmul.f32 %v4455_v48, %v11583_v41  ;;  %v4483_v16 = vmul.f32 %v4482_v54, %v11613_v49 }
 0x447   : > { %v6536_v33 = vmul.f32 0.5, %v7230_v19  ;;  %v4385_v13 = vmul.f32 %v7539_v10, %v4384_v7  ;;  %v4492_v44 = vmul.f32 3.8918573e-05, %v11613_v49  ;;  %vm4427_vm12 = vweird.f32 %v11627_v47 }
 0x448   : > { %v4433_v9 = vand.u32 2147483648, %v11627_v47  ;;  %v4447_v38 = vmul.f32 %v4446_v57, %v11583_v41  ;;  %v4457_v45 = vadd.f32 0.112945676, %v4456_v43  ;;  %v4484_v58 = vadd.f32 0.0036580483, %v4483_v16 }
 0x449   : > { %v6686_v18 = vadd.f32 0.5, %v6536_v33  ;;  %v4386_v23 = vadd.f32 %v7539_v10, %v4385_v13  ;;  %v4493_v12 = vadd.f32 0.001143296, %v4492_v44  ;;  %v4431_v27 = vand.u32 2147483647, %v11627_v47 }
 0x44a   : > { %v4458_v20 = vmul.f32 %v4457_v45, %v11583_v41  ;;  %v11654_v32 = vmul.f32 0.70710677, %v11638_v56  ;;  %v11657_v25 = vmul.f32 0.70710677, %v11641_v39  ;;  %v4485_v61 = vmul.f32 %v4484_v58, %v11613_v49 }
 0x44b   : > { %v7541_v2 = vpop.eup %7540  ;;  %v6836_v40 = vmul.f32 %v6686_v18, %v11446_v17  ;;  %v4390_v22 = vsel %vm11644_vm11, %v7539_v10, %v4386_v23  ;;  %v4494_v51 = vmul.f32 %v4493_v12, %v11613_v49  ;;  %v4434_v8 = vor.u32 1.1754944e-38, %v4433_v9 }
 0x44c   : > { %v4395_v3 = vsel %vm11630_vm10, %v4394_v26, %v4390_v22  ;;  %v4423_v46 = vmul.f32 %v7541_v2, %v11627_v47  ;;  %v4448_v55 = vadd.f32 0.18741608, %v4447_v38  ;;  %v4459_v28 = vadd.f32 0.4994258, %v4458_v20  ;;  %v11691_v26 = vld [vmem:[%s7840_s24 + $0x340] sm:$0xff] }
 0x44d   : > { %6986 = vst [vmem:[%s8053_s16 + $0x308] sm:$0xff] %v6836_v40  ;;  %v4396_v59 = vmul.f32 %v4395_v3, %v4371_v1  ;;  %v4486_v0 = vadd.f32 0.05243302, %v4485_v61  ;;  %v4519_v17 = vmul.f32 %v11654_v32, %v11654_v32  ;;  %vm4428_vm13 = vweird.f32 %v7541_v2 }
 0x44e   : > { %v4424_v53 = vsub.f32 1.0, %v4423_v46  ;;  %v4495_v21 = vadd.f32 0.014752088, %v4494_v51  ;;  %v4559_v35 = vmul.f32 %v11657_v25, %v11657_v25  ;;  %v4460_v63 = vmul.f32 %v4459_v28, %v11583_v41  ;;  %vm11682_vm14 = vmor %vm4427_vm12, %vm4428_vm13 }
 0x44f   : > { %v7231_v60 = vclamps-f32 %v4396_v59, 1.0  ;;  %v4487_v11 = vmul.f32 %v4486_v0, %v11613_v49  ;;  %v11674_v10 = vmin.f32 %v4519_v17, 16.0  ;;  %v4449_v30 = vmul.f32 %v4448_v55, %v11583_v41 }
 0x450   : > { %v4425_v31 = vmul.f32 %v7541_v2, %v4424_v53  ;;  %v4496_v34 = vmul.f32 %v4495_v21, %v11613_v49  ;;  %v11678_v52 = vmin.f32 %v4559_v35, 16.0  ;;  %v4461_v6 = vadd.f32 1.0, %v4460_v63 }
 0x451   : > { %v6537_v62 = vmul.f32 0.5, %v7231_v60  ;;  %v4488_v57 = vadd.f32 0.18741608, %v4487_v11  ;;  %v4521_v48 = vmul.f32 2.1237322e-06, %v11674_v10  ;;  %v4411_v54 = vmul.f32 %v4410_v36, %v11518_v14 }
 0x452   : > { %v4426_v19 = vadd.f32 %v7541_v2, %v4425_v31  ;;  %vm4432_vm15 = vcmp.eq.f32.partialorder %v4431_v27, 8.507059e+37  ;;  %v4497_v41 = vadd.f32 0.112945676, %v4496_v34  ;;  %7542 = vrcp.f32 %v4461_v6 }
 0x453   : > { %v6687_v7 = vadd.f32 0.5, %v6537_v62  ;;  %v4532_v5 = vmul.f32 3.8918573e-05, %v11674_v10  ;;  %v4561_v47 = vmul.f32 2.1237322e-06, %v11678_v52  ;;  %v4489_v16 = vmul.f32 %v4488_v57, %v11613_v49 }
 0x454   : > { %v4430_v43 = vsel %vm11682_vm14, %v7541_v2, %v4426_v19  ;;  %v4450_v33 = vadd.f32 1.1283791, %v4449_v30  ;;  %v4498_v13 = vmul.f32 %v4497_v41, %v11613_v49  ;;  %v4522_v44 = vadd.f32 0.00028619796, %v4521_v48 }
 0x455   : > { %v6837_v14 = vmul.f32 %v6687_v7, %v11464_v4  ;;  %v4435_v36 = vsel %vm4432_vm15, %v4434_v8, %v4430_v43  ;;  %v4471_v9 = vand.u32 2147483647, %v4461_v6  ;;  %v11699_v45 = vmul.f32 0.70710677, %v11691_v26  ;;  %v11733_v7 = vld [vmem:[%s7840_s24 + $0x348] sm:$0xff] }
 0x456   : > { %v4436_v50 = vmul.f32 %v4435_v36, %v4411_v54  ;;  %v4499_v38 = vadd.f32 0.4994258, %v4498_v13  ;;  %vm4467_vm0 = vweird.f32 %v4461_v6  ;;  %v4523_v18 = vmul.f32 %v4522_v44, %v11674_v10 }
 0x457   : > { %6987 = vst [vmem:[%s8053_s16 + $0x310] sm:$0xff] %v6837_v14  ;;  %v4533_v23 = vadd.f32 0.001143296, %v4532_v5  ;;  %v4562_v58 = vadd.f32 0.00028619796, %v4561_v47  ;;  %v4473_v27 = vand.u32 2147483648, %v4461_v6  ;;  %v4599_v55 = vmul.f32 %v11699_v45, %v11699_v45 }
 0x458   : > { %v7232_v12 = vclamps-f32 %v4436_v50, 1.0  ;;  %v4500_v4 = vmul.f32 %v4499_v38, %v11613_v49  ;;  %v4572_v20 = vmul.f32 3.8918573e-05, %v11678_v52  ;;  %v7543_v2 = vpop.eup %7542  ;;  %v4490_v40 = vadd.f32 1.1283791, %v4489_v16 }
 0x459   : > { %v4524_v22 = vadd.f32 0.0036580483, %v4523_v18  ;;  %v4534_v61 = vmul.f32 %v4533_v23, %v11674_v10  ;;  %v4563_v51 = vmul.f32 %v4562_v58, %v11678_v52  ;;  %v4463_v46 = vmul.f32 %v7543_v2, %v4461_v6 }
 0x45a   : > { %v6538_v3 = vmul.f32 0.5, %v7232_v12  ;;  %v11707_v8 = vadd.f32 1.0, %v4500_v4  ;;  %v4573_v0 = vadd.f32 0.001143296, %v4572_v20  ;;  %vm4468_vm1 = vweird.f32 %v7543_v2 }
 0x45b   : > { %v4525_v59 = vmul.f32 %v4524_v22, %v11674_v10  ;;  %v4535_v28 = vadd.f32 0.014752088, %v4534_v61  ;;  %v4564_v49 = vadd.f32 0.0036580483, %v4563_v51  ;;  %v4464_v53 = vsub.f32 1.0, %v4463_v46  ;;  %vm11723_vm3 = vmor %vm4467_vm0, %vm4468_vm1 }
 0x45c   : > { %v6688_v17 = vadd.f32 0.5, %v6538_v3  ;;  %7544 = vrcp.f32 %v11707_v8  ;;  %v4451_v21 = vmul.f32 %v4450_v33, %v11559_v24  ;;  %vm11714_vm2 = vcmp.eq.f32.partialorder %v4471_v9, 8.507059e+37 }
 0x45d   : > { %v4526_v60 = vadd.f32 0.05243302, %v4525_v59  ;;  %v4536_v63 = vmul.f32 %v4535_v28, %v11674_v10  ;;  %v4465_v31 = vmul.f32 %v7543_v2, %v4464_v53  ;;  %v4565_v30 = vmul.f32 %v4564_v49, %v11678_v52 }
 0x45e   : > { %v6838_v11 = vmul.f32 %v6688_v17, %v11508_v42  ;;  %v4574_v34 = vmul.f32 %v4573_v0, %v11678_v52  ;;  %v4474_v24 = vor.u32 1.1754944e-38, %v4473_v27  ;;  %v11728_v48 = vmin.f32 %v4599_v55, 16.0 }
 0x45f   : > { %v4527_v1 = vmul.f32 %v4526_v60, %v11674_v10  ;;  %v4537_v57 = vadd.f32 0.112945676, %v4536_v63  ;;  %v4466_v54 = vadd.f32 %v7543_v2, %v4465_v31  ;;  %v4491_v42 = vmul.f32 %v4490_v40, %v11594_v37 }
 0x460   : > { %6988 = vst [vmem:[%s8053_s16 + $0x318] sm:$0xff] %v6838_v11  ;;  %v4566_v19 = vadd.f32 0.05243302, %v4565_v30  ;;  %v4575_v41 = vadd.f32 0.014752088, %v4574_v34  ;;  %vm4507_vm4 = vweird.f32 %v11707_v8  ;;  %v4513_v38 = vand.u32 2147483648, %v11707_v8 }
 0x461   : > { %v4528_v6 = vadd.f32 0.18741608, %v4527_v1  ;;  %v4538_v5 = vmul.f32 %v4537_v57, %v11674_v10  ;;  %v4601_v47 = vmul.f32 2.1237322e-06, %v11728_v48  ;;  %v4470_v33 = vsel %vm11723_vm3, %v7543_v2, %v4466_v54 }
 0x462   : > { %v7545_v43 = vpop.eup %7544  ;;  %v4511_v13 = vand.u32 2147483647, %v11707_v8  ;;  %v4567_v14 = vmul.f32 %v4566_v19, %v11678_v52  ;;  %v4576_v37 = vmul.f32 %v4575_v41, %v11678_v52  ;;  %v4475_v36 = vsel %vm11714_vm2, %v4474_v24, %v4470_v33 }
 0x463   : > { %v4503_v16 = vmul.f32 %v7545_v43, %v11707_v8  ;;  %v4612_v44 = vmul.f32 3.8918573e-05, %v11728_v48  ;;  %v11748_v50 = vmul.f32 0.70710677, %v11733_v7  ;;  %v4476_v9 = vmul.f32 %v4475_v36, %v4451_v21 }
 0x464   : > { %v4539_v18 = vadd.f32 0.4994258, %v4538_v5  ;;  %v4577_v23 = vadd.f32 0.112945676, %v4576_v37  ;;  %vm4508_vm5 = vweird.f32 %v7545_v43  ;;  %v4529_v12 = vmul.f32 %v4528_v6, %v11674_v10 }
 0x465   : > { %v4504_v58 = vsub.f32 1.0, %v4503_v16  ;;  %v4602_v27 = vadd.f32 0.00028619796, %v4601_v47  ;;  %v7233_v4 = vclamps-f32 %v4476_v9, 1.0  ;;  %v4568_v2 = vadd.f32 0.18741608, %v4567_v14  ;;  %vm11759_vm6 = vmor %vm4507_vm4, %vm4508_vm5 }
 0x466   : > { %v4540_v20 = vmul.f32 %v4539_v18, %v11674_v10  ;;  %v4578_v40 = vmul.f32 %v4577_v23, %v11678_v52  ;;  %v4613_v51 = vadd.f32 0.001143296, %v4612_v44  ;;  %v4639_v3 = vmul.f32 %v11748_v50, %v11748_v50 }
 0x467   : > { %v4505_v22 = vmul.f32 %v7545_v43, %v4504_v58  ;;  %v4603_v61 = vmul.f32 %v4602_v27, %v11728_v48  ;;  %v6539_v46 = vmul.f32 0.5, %v7233_v4  ;;  %v4514_v59 = vor.u32 1.1754944e-38, %v4513_v38 }
 0x468   : > { %v4541_v28 = vadd.f32 1.0, %v4540_v20  ;;  %v4579_v10 = vadd.f32 0.4994258, %v4578_v40  ;;  %vm4512_vm7 = vcmp.eq.f32.partialorder %v4511_v13, 8.507059e+37  ;;  %v4614_v17 = vmul.f32 %v4613_v51, %v11728_v48 }
 0x469   : > { %v4506_v49 = vadd.f32 %v7545_v43, %v4505_v22  ;;  %v4604_v0 = vadd.f32 0.0036580483, %v4603_v61  ;;  %v6689_v53 = vadd.f32 0.5, %v6539_v46  ;;  %v4530_v21 = vadd.f32 1.1283791, %v4529_v12  ;;  %v11799_v22 = vld [vmem:[%s7840_s24 + $0x358] sm:$0xff] }
 0x46a   : > { %7546 = vrcp.f32 %v4541_v28  ;;  %v4569_v8 = vmul.f32 %v4568_v2, %v11678_v52  ;;  %v4580_v60 = vmul.f32 %v4579_v10, %v11678_v52  ;;  %v11768_v63 = vmin.f32 %v4639_v3, 16.0 }
 0x46b   : > { %v4510_v35 = vsel %vm11759_vm6, %v7545_v43, %v4506_v49  ;;  %v6839_v11 = vmul.f32 %v6689_v53, %v11551_v15  ;;  %v4551_v30 = vand.u32 2147483647, %v4541_v28  ;;  %v4605_v34 = vmul.f32 %v4604_v0, %v11728_v48  ;;  %v11781_v43 = vld [vmem:[%s7840_s24 + $0x350] sm:$0xff] }
 0x46c   : > { %v4515_v31 = vsel %vm4512_vm7, %v4514_v59, %v4510_v35  ;;  %v4553_v24 = vand.u32 2147483648, %v4541_v28  ;;  %v11772_v1 = vadd.f32 1.0, %v4580_v60  ;;  %v4615_v57 = vadd.f32 0.014752088, %v4614_v17 }
 0x46d   : > { %v4516_v62 = vmul.f32 %v4515_v31, %v4491_v42  ;;  %6989 = vst [vmem:[%s8053_s16 + $0x320] sm:$0xff] %v6839_v11  ;;  %v4606_v54 = vadd.f32 0.05243302, %v4605_v34  ;;  %v4641_v19 = vmul.f32 2.1237322e-06, %v11768_v63  ;;  %v4531_v52 = vmul.f32 %v4530_v21, %v11654_v32 }
 0x46e   : > { %v4570_v6 = vadd.f32 1.1283791, %v4569_v8  ;;  %7548 = vrcp.f32 %v11772_v1  ;;  %vm4547_vm8 = vweird.f32 %v4541_v28  ;;  %v4616_v42 = vmul.f32 %v4615_v57, %v11728_v48 }
 0x46f   : > { %v7234_v41 = vclamps-f32 %v4516_v62, 1.0  ;;  %v4607_v5 = vmul.f32 %v4606_v54, %v11728_v48  ;;  %v4642_v47 = vadd.f32 0.00028619796, %v4641_v19  ;;  %vm11783_vm9 = vcmp.eq.f32.partialorder %v4551_v30, 8.507059e+37 }
 0x470   : > { %v7547_v15 = vpop.eup %7546  ;;  %v4554_v37 = vor.u32 1.1754944e-38, %v4553_v24  ;;  %v4617_v36 = vadd.f32 0.112945676, %v4616_v42  ;;  %v4652_v38 = vmul.f32 3.8918573e-05, %v11768_v63  ;;  %vm4587_vm11 = vweird.f32 %v11772_v1 }
 0x471   : > { %v6540_v33 = vmul.f32 0.5, %v7234_v41  ;;  %v4543_v13 = vmul.f32 %v7547_v15, %v4541_v28  ;;  %vm4548_vm10 = vweird.f32 %v7547_v15  ;;  %v4608_v32 = vadd.f32 0.18741608, %v4607_v5 }
 0x472   : > { %v4643_v16 = vmul.f32 %v4642_v47, %v11768_v63  ;;  %v11790_v18 = vmul.f32 0.70710677, %v11781_v43  ;;  %v4591_v23 = vand.u32 2147483647, %v11772_v1  ;;  %v4618_v58 = vmul.f32 %v4617_v36, %v11728_v48  ;;  %vm11803_vm12 = vmor %vm4547_vm8, %vm4548_vm10 }
 0x473   : > { %v6690_v44 = vadd.f32 0.5, %v6540_v33  ;;  %v4544_v9 = vsub.f32 1.0, %v4543_v13  ;;  %v4653_v2 = vadd.f32 0.001143296, %v4652_v38  ;;  %v4593_v3 = vand.u32 2147483648, %v11772_v1  ;;  %v11843_v13 = vld [vmem:[%s7840_s24 + $0x360] sm:$0xff] }
 0x474   : > { %v4644_v12 = vadd.f32 0.0036580483, %v4643_v16  ;;  %v7549_v27 = vpop.eup %7548  ;;  %v4679_v40 = vmul.f32 %v11790_v18, %v11790_v18  ;;  %v4609_v46 = vmul.f32 %v4608_v32, %v11728_v48  ;;  %v11817_v17 = vmul.f32 0.70710677, %v11799_v22 }
 0x475   : > { %v6840_v4 = vmul.f32 %v6690_v44, %v11581_v29  ;;  %v4545_v20 = vmul.f32 %v7547_v15, %v4544_v9  ;;  %v4583_v51 = vmul.f32 %v7549_v27, %v11772_v1  ;;  %v4619_v29 = vadd.f32 0.4994258, %v4618_v58 }
 0x476   : > { %v4645_v59 = vmul.f32 %v4644_v12, %v11768_v63  ;;  %v4654_v10 = vmul.f32 %v4653_v2, %v11768_v63  ;;  %v11813_v49 = vmin.f32 %v4679_v40, 16.0  ;;  %vm4588_vm13 = vweird.f32 %v7549_v27 }
 0x477   : > { %6990 = vst [vmem:[%s8053_s16 + $0x328] sm:$0xff] %v6840_v4  ;;  %v4546_v55 = vadd.f32 %v7547_v15, %v4545_v20  ;;  %v4584_v28 = vsub.f32 1.0, %v4583_v51  ;;  %v4620_v0 = vmul.f32 %v4619_v29, %v11728_v48  ;;  %vm11829_vm14 = vmor %vm4587_vm11, %vm4588_vm13  ;;  %v4594_v62 = vor.u32 1.1754944e-38, %v4593_v3 }
 0x478   : > { %v4646_v21 = vadd.f32 0.05243302, %v4645_v59  ;;  %v4655_v35 = vadd.f32 0.014752088, %v4654_v10  ;;  %v4681_v8 = vmul.f32 2.1237322e-06, %v11813_v49  ;;  %v4571_v54 = vmul.f32 %v4570_v6, %v11657_v25 }
 0x479   : > { %v4550_v53 = vsel %vm11803_vm12, %v7547_v15, %v4546_v55  ;;  %v4585_v11 = vmul.f32 %v7549_v27, %v4584_v28  ;;  %v11824_v31 = vadd.f32 1.0, %v4620_v0  ;;  %v4692_v30 = vmul.f32 3.8918573e-05, %v11813_v49 }
 0x47a   : > { %v4555_v60 = vsel %vm11783_vm9, %v4554_v37, %v4550_v53  ;;  %v4656_v24 = vmul.f32 %v4655_v35, %v11768_v63  ;;  %v4682_v57 = vadd.f32 0.00028619796, %v4681_v8  ;;  %vm4592_vm15 = vcmp.eq.f32.partialorder %v4591_v23, 8.507059e+37 }
 0x47b   : > { %v4556_v34 = vmul.f32 %v4555_v60, %v4531_v52  ;;  %v4586_v19 = vadd.f32 %v7549_v27, %v4585_v11  ;;  %7550 = vrcp.f32 %v11824_v31  ;;  %v4610_v15 = vadd.f32 1.1283791, %v4609_v46 }
 0x47c   : > { %v4657_v52 = vadd.f32 0.112945676, %v4656_v24  ;;  %v4719_v1 = vmul.f32 %v11817_v17, %v11817_v17  ;;  %v4647_v42 = vmul.f32 %v4646_v21, %v11768_v63  ;;  %v4683_v47 = vmul.f32 %v4682_v57, %v11813_v49 }
 0x47d   : > { %v7235_v41 = vclamps-f32 %v4556_v34, 1.0  ;;  %v4590_v5 = vsel %vm11829_vm14, %v7549_v27, %v4586_v19  ;;  %v4693_v33 = vadd.f32 0.001143296, %v4692_v30  ;;  %vm4627_vm0 = vweird.f32 %v11824_v31 }
 0x47e   : > { %v4595_v6 = vsel %vm4592_vm15, %v4594_v62, %v4590_v5  ;;  %v4631_v14 = vand.u32 2147483647, %v11824_v31  ;;  %v4658_v32 = vmul.f32 %v4657_v52, %v11768_v63  ;;  %v4684_v36 = vadd.f32 0.0036580483, %v4683_v47 }
 0x47f   : > { %v6541_v25 = vmul.f32 0.5, %v7235_v41  ;;  %v4596_v37 = vmul.f32 %v4595_v6, %v4571_v54  ;;  %v4694_v16 = vmul.f32 %v4693_v33, %v11813_v49  ;;  %v4633_v9 = vand.u32 2147483648, %v11824_v31 }
 0x480   : > { %v11850_v38 = vmin.f32 %v4719_v1, 16.0  ;;  %v11853_v23 = vmul.f32 0.70710677, %v11843_v13  ;;  %v4659_v27 = vadd.f32 0.4994258, %v4658_v32  ;;  %v4685_v4 = vmul.f32 %v4684_v36, %v11813_v49 }
 0x481   : > { %v6691_v44 = vadd.f32 0.5, %v6541_v25  ;;  %v7551_v58 = vpop.eup %7550  ;;  %v7236_v12 = vclamps-f32 %v4596_v37, 1.0  ;;  %v4695_v20 = vadd.f32 0.014752088, %v4694_v16  ;;  %v4648_v61 = vadd.f32 0.18741608, %v4647_v42 }
 0x482   : > { %v4623_v40 = vmul.f32 %v7551_v58, %v11824_v31  ;;  %vm4628_vm1 = vweird.f32 %v7551_v58  ;;  %v4660_v3 = vmul.f32 %v4659_v27, %v11768_v63  ;;  %v4686_v46 = vadd.f32 0.05243302, %v4685_v4 }
 0x483   : > { %v6841_v2 = vmul.f32 %v6691_v44, %v11638_v56  ;;  %v6542_v51 = vmul.f32 0.5, %v7236_v12  ;;  %v4696_v29 = vmul.f32 %v4695_v20, %v11813_v49  ;;  %v4721_v59 = vmul.f32 2.1237322e-06, %v11850_v38  ;;  %vm11871_vm2 = vmor %vm4627_vm0, %vm4628_vm1 }
 0x484   : > { %v4624_v55 = vsub.f32 1.0, %v4623_v40  ;;  %v4732_v10 = vmul.f32 3.8918573e-05, %v11850_v38  ;;  %v4759_v28 = vmul.f32 %v11853_v23, %v11853_v23  ;;  %v4611_v0 = vmul.f32 %v4610_v15, %v11699_v45  ;;  %v11886_v15 = vld [vmem:[%s7840_s24 + $0x368] sm:$0xff] }
 0x485   : > { %6991 = vst [vmem:[%s8053_s16 + $0x330] sm:$0xff] %v6841_v2  ;;  %v6692_v56 = vadd.f32 0.5, %v6542_v51  ;;  %v4661_v53 = vadd.f32 1.0, %v4660_v3  ;;  %v4697_v21 = vadd.f32 0.112945676, %v4696_v29  ;;  %v4649_v8 = vmul.f32 %v4648_v61, %v11768_v63 }
 0x486   : > { %v4625_v35 = vmul.f32 %v7551_v58, %v4624_v55  ;;  %v4722_v60 = vadd.f32 0.00028619796, %v4721_v59  ;;  %v4733_v11 = vadd.f32 0.001143296, %v4732_v10  ;;  %v4634_v48 = vor.u32 1.1754944e-38, %v4633_v9 }
 0x487   : > { %v6842_v30 = vmul.f32 %v6692_v56, %v11641_v39  ;;  %7552 = vrcp.f32 %v4661_v53  ;;  %v11875_v45 = vmin.f32 %v4759_v28, 16.0  ;;  %vm4632_vm3 = vcmp.eq.f32.partialorder %v4631_v14, 8.507059e+37 }
 0x488   : > { %v4626_v62 = vadd.f32 %v7551_v58, %v4625_v35  ;;  %v4687_v63 = vmul.f32 %v4686_v46, %v11813_v49  ;;  %v4698_v24 = vmul.f32 %v4697_v21, %v11813_v49  ;;  %v4723_v39 = vmul.f32 %v4722_v60, %v11850_v38 }
 0x489   : > { %6992 = vst [vmem:[%s8053_s16 + $0x338] sm:$0xff] %v6842_v30  ;;  %v4734_v31 = vmul.f32 %v4733_v11, %v11850_v38  ;;  %v4761_v57 = vmul.f32 2.1237322e-06, %v11875_v45  ;;  %v4650_v19 = vadd.f32 1.1283791, %v4649_v8  ;;  %vm4667_vm4 = vweird.f32 %v4661_v53  ;;  %v11916_v30 = vld [vmem:[%s7840_s24 + $0x370] sm:$0xff] }
 0x48a   : > { %v4630_v54 = vsel %vm11871_vm2, %v7551_v58, %v4626_v62  ;;  %v4699_v41 = vadd.f32 0.4994258, %v4698_v24  ;;  %v4724_v1 = vadd.f32 0.0036580483, %v4723_v39  ;;  %v4688_v33 = vadd.f32 0.18741608, %v4687_v63 }
 0x48b   : > { %v4635_v52 = vsel %vm4632_vm3, %v4634_v48, %v4630_v54  ;;  %v4735_v5 = vadd.f32 0.014752088, %v4734_v31  ;;  %v4762_v42 = vadd.f32 0.00028619796, %v4761_v57  ;;  %v4772_v6 = vmul.f32 3.8918573e-05, %v11875_v45 }
 0x48c   : > { %v4636_v47 = vmul.f32 %v4635_v52, %v4611_v0  ;;  %v4700_v25 = vmul.f32 %v4699_v41, %v11813_v49  ;;  %v4725_v37 = vmul.f32 %v4724_v1, %v11850_v38  ;;  %v11894_v16 = vmul.f32 0.70710677, %v11886_v15 }
 0x48d   : > { %v7553_v14 = vpop.eup %7552  ;;  %v4736_v32 = vmul.f32 %v4735_v5, %v11850_v38  ;;  %v4763_v36 = vmul.f32 %v4762_v42, %v11875_v45  ;;  %v4671_v58 = vand.u32 2147483647, %v4661_v53  ;;  %v4673_v12 = vand.u32 2147483648, %v4661_v53 }
 0x48e   : > { %v7237_v44 = vclamps-f32 %v4636_v47, 1.0  ;;  %v4663_v9 = vmul.f32 %v7553_v14, %v4661_v53  ;;  %vm4668_vm5 = vweird.f32 %v7553_v14  ;;  %v4701_v27 = vadd.f32 1.0, %v4700_v25 }
 0x48f   : > { %v4726_v4 = vadd.f32 0.05243302, %v4725_v37  ;;  %v4737_v20 = vadd.f32 0.112945676, %v4736_v32  ;;  %v4764_v61 = vadd.f32 0.0036580483, %v4763_v36  ;;  %v4651_v3 = vmul.f32 %v4650_v19, %v11748_v50  ;;  %vm11904_vm6 = vmor %vm4667_vm4, %vm4668_vm5 }
 0x490   : > { %v6543_v2 = vmul.f32 0.5, %v7237_v44  ;;  %v4664_v40 = vsub.f32 1.0, %v4663_v9  ;;  %v4773_v51 = vadd.f32 0.001143296, %v4772_v6  ;;  %v4689_v46 = vmul.f32 %v4688_v33, %v11813_v49 }
 0x491   : > { %7554 = vrcp.f32 %v4701_v27  ;;  %v4799_v29 = vmul.f32 %v11894_v16, %v11894_v16  ;;  %v4727_v10 = vmul.f32 %v4726_v4, %v11850_v38  ;;  %v4738_v28 = vmul.f32 %v4737_v20, %v11850_v38 }
 0x492   : > { %v6693_v55 = vadd.f32 0.5, %v6543_v2  ;;  %v4665_v59 = vmul.f32 %v7553_v14, %v4664_v40  ;;  %vm11908_vm7 = vcmp.eq.f32.partialorder %v4671_v58, 8.507059e+37  ;;  %v4674_v49 = vor.u32 1.1754944e-38, %v4673_v12 }
 0x493   : > { %v4765_v0 = vmul.f32 %v4764_v61, %v11875_v45  ;;  %v4774_v21 = vmul.f32 %v4773_v51, %v11875_v45  ;;  %v4728_v60 = vadd.f32 0.18741608, %v4727_v10  ;;  %v4739_v11 = vadd.f32 0.4994258, %v4738_v28 }
 0x494   : > { %v6843_v35 = vmul.f32 %v6693_v55, %v11691_v26  ;;  %v4666_v8 = vadd.f32 %v7553_v14, %v4665_v59  ;;  %v11918_v48 = vmin.f32 %v4799_v29, 16.0  ;;  %v4690_v63 = vadd.f32 1.1283791, %v4689_v46 }
 0x495   : > { %v4766_v53 = vadd.f32 0.05243302, %v4765_v0  ;;  %v4775_v34 = vadd.f32 0.014752088, %v4774_v21  ;;  %v4711_v24 = vand.u32 2147483647, %v4701_v27  ;;  %v4740_v39 = vmul.f32 %v4739_v11, %v11850_v38 }
 0x496   : > { %6993 = vst [vmem:[%s8053_s16 + $0x340] sm:$0xff] %v6843_v35  ;;  %v4670_v62 = vsel %vm11904_vm6, %v7553_v14, %v4666_v8  ;;  %v4801_v54 = vmul.f32 2.1237322e-06, %v11918_v48  ;;  %v11929_v19 = vmul.f32 0.70710677, %v11916_v30  ;;  %vm4707_vm8 = vweird.f32 %v4701_v27 }
 0x497   : > { %v7555_v31 = vpop.eup %7554  ;;  %v4675_v26 = vsel %vm11908_vm7, %v4674_v49, %v4670_v62  ;;  %v4776_v57 = vmul.f32 %v4775_v34, %v11875_v45  ;;  %v4767_v1 = vmul.f32 %v4766_v53, %v11875_v45  ;;  %v4713_v5 = vand.u32 2147483648, %v4701_v27 }
 0x498   : > { %v4676_v41 = vmul.f32 %v4675_v26, %v4651_v3  ;;  %v4703_v52 = vmul.f32 %v7555_v31, %v4701_v27  ;;  %v4729_v42 = vmul.f32 %v4728_v60, %v11850_v38  ;;  %v4741_v47 = vadd.f32 1.0, %v4740_v39 }
 0x499   : > { %v4777_v33 = vadd.f32 0.112945676, %v4776_v57  ;;  %vm4708_vm9 = vweird.f32 %v7555_v31  ;;  %v4802_v14 = vadd.f32 0.00028619796, %v4801_v54  ;;  %v4691_v37 = vmul.f32 %v4690_v63, %v11790_v18 }
 0x49a   : > { %v7238_v25 = vclamps-f32 %v4676_v41, 1.0  ;;  %v4704_v6 = vsub.f32 1.0, %v4703_v52  ;;  %vm11934_vm10 = vcmp.eq.f32.partialorder %v4711_v24, 8.507059e+37  ;;  %7556 = vrcp.f32 %v4741_v47  ;;  %vm11942_vm11 = vmor %vm4707_vm8, %vm4708_vm9  ;;  %v11973_v52 = vld [vmem:[%s7840_s24 + $0x378] sm:$0xff] }
 0x49b   : > { %v4839_v36 = vmul.f32 %v11929_v19, %v11929_v19  ;;  %v4768_v58 = vadd.f32 0.18741608, %v4767_v1  ;;  %v4778_v38 = vmul.f32 %v4777_v33, %v11875_v45  ;;  %v4714_v4 = vor.u32 1.1754944e-38, %v4713_v5  ;;  %v11976_v1 = vld [vmem:[%s7840_s24 + $0x380] sm:$0xff] }
 0x49c   : > { %v6544_v44 = vmul.f32 0.5, %v7238_v25  ;;  %v4705_v9 = vmul.f32 %v7555_v31, %v4704_v6  ;;  %v4730_v18 = vadd.f32 1.1283791, %v4729_v42  ;;  %v4803_v20 = vmul.f32 %v4802_v14, %v11918_v48 }
 0x49d   : > { %v4812_v2 = vmul.f32 3.8918573e-05, %v11918_v48  ;;  %v4751_v51 = vand.u32 2147483647, %v4741_v47  ;;  %v4779_v3 = vadd.f32 0.4994258, %v4778_v38  ;;  %v4769_v28 = vmul.f32 %v4768_v58, %v11875_v45 }
 0x49e   : > { %v6694_v40 = vadd.f32 0.5, %v6544_v44  ;;  %v4706_v61 = vadd.f32 %v7555_v31, %v4705_v9  ;;  %v4753_v46 = vand.u32 2147483648, %v4741_v47  ;;  %v4804_v29 = vadd.f32 0.0036580483, %v4803_v20 }
 0x49f   : > { %v4813_v55 = vadd.f32 0.001143296, %v4812_v2  ;;  %v11948_v59 = vmin.f32 %v4839_v36, 16.0  ;;  %v4780_v56 = vmul.f32 %v4779_v3, %v11875_v45  ;;  %vm4747_vm12 = vweird.f32 %v4741_v47 }
 0x4a0   : > { %v6844_v27 = vmul.f32 %v6694_v40, %v11733_v7  ;;  %v4710_v10 = vsel %vm11942_vm11, %v7555_v31, %v4706_v61  ;;  %v7557_v50 = vpop.eup %7556  ;;  %v4805_v0 = vmul.f32 %v4804_v29, %v11918_v48  ;;  %v4731_v7 = vmul.f32 %v4730_v18, %v11817_v17 }
 0x4a1   : > { %v4715_v49 = vsel %vm11934_vm10, %v4714_v4, %v4710_v10  ;;  %v4814_v21 = vmul.f32 %v4813_v55, %v11918_v48  ;;  %v4841_v35 = vmul.f32 2.1237322e-06, %v11948_v59  ;;  %v4743_v60 = vmul.f32 %v7557_v50, %v4741_v47 }
 0x4a2   : > { %6994 = vst [vmem:[%s8053_s16 + $0x348] sm:$0xff] %v6844_v27  ;;  %v4716_v8 = vmul.f32 %v4715_v49, %v4691_v37  ;;  %v11962_v11 = vadd.f32 1.0, %v4780_v56  ;;  %v4806_v45 = vadd.f32 0.05243302, %v4805_v0  ;;  %vm4748_vm13 = vweird.f32 %v7557_v50 }
 0x4a3   : > { %v4815_v53 = vadd.f32 0.014752088, %v4814_v21  ;;  %v4842_v34 = vadd.f32 0.00028619796, %v4841_v35  ;;  %v4744_v63 = vsub.f32 1.0, %v4743_v60  ;;  %vm11965_vm14 = vcmp.eq.f32.partialorder %v4751_v51, 8.507059e+37  ;;  %vm11979_vm15 = vmor %vm4747_vm12, %vm4748_vm13 }
 0x4a4   : > { %v7239_v62 = vclamps-f32 %v4716_v8, 1.0  ;;  %7558 = vrcp.f32 %v11962_v11  ;;  %v4754_v39 = vor.u32 1.1754944e-38, %v4753_v46  ;;  %v4770_v17 = vadd.f32 1.1283791, %v4769_v28 }
 0x4a5   : > { %v4816_v31 = vmul.f32 %v4815_v53, %v11918_v48  ;;  %v4745_v57 = vmul.f32 %v7557_v50, %v4744_v63  ;;  %v4843_v54 = vmul.f32 %v4842_v34, %v11948_v59  ;;  %v4852_v41 = vmul.f32 3.8918573e-05, %v11948_v59 }
 0x4a6   : > { %v6545_v26 = vmul.f32 0.5, %v7239_v62  ;;  %vm4787_vm0 = vweird.f32 %v11962_v11  ;;  %v4793_v42 = vand.u32 2147483648, %v11962_v11  ;;  %v4807_v33 = vmul.f32 %v4806_v45, %v11918_v48 }
 0x4a7   : > { %v4817_v25 = vadd.f32 0.112945676, %v4816_v31  ;;  %v4746_v14 = vadd.f32 %v7557_v50, %v4745_v57  ;;  %v4844_v37 = vadd.f32 0.0036580483, %v4843_v54  ;;  %v4853_v32 = vadd.f32 0.001143296, %v4852_v41 }
 0x4a8   : > { %v6695_v6 = vadd.f32 0.5, %v6545_v26  ;;  %v4791_v36 = vand.u32 2147483647, %v11962_v11  ;;  %v11989_v44 = vmul.f32 0.70710677, %v11973_v52  ;;  %v4794_v40 = vor.u32 1.1754944e-38, %v4793_v42 }
 0x4a9   : > { %v4818_v47 = vmul.f32 %v4817_v25, %v11918_v48  ;;  %v11992_v9 = vmul.f32 0.70710677, %v11976_v1  ;;  %v4750_v12 = vsel %vm11979_vm15, %v7557_v50, %v4746_v14  ;;  %v4845_v4 = vmul.f32 %v4844_v37, %v11948_v59 }
 0x4aa   : > { %v7559_v58 = vpop.eup %7558  ;;  %v6845_v38 = vmul.f32 %v6695_v6, %v11781_v43  ;;  %v4854_v18 = vmul.f32 %v4853_v32, %v11948_v59  ;;  %v4755_v20 = vsel %vm11965_vm14, %v4754_v39, %v4750_v12  ;;  %v4808_v61 = vadd.f32 0.18741608, %v4807_v33  ;;  %v12026_v39 = vld [vmem:[%s7840_s24 + $0x388] sm:$0xff] }
 0x4ab   : > { %v4783_v2 = vmul.f32 %v7559_v58, %v11962_v11  ;;  %v4756_v51 = vmul.f32 %v4755_v20, %v4731_v7  ;;  %v4819_v3 = vadd.f32 0.4994258, %v4818_v47  ;;  %v4846_v46 = vadd.f32 0.05243302, %v4845_v4 }
 0x4ac   : > { %6995 = vst [vmem:[%s8053_s16 + $0x350] sm:$0xff] %v6845_v38  ;;  %v4879_v43 = vmul.f32 %v11989_v44, %v11989_v44  ;;  %vm4788_vm1 = vweird.f32 %v7559_v58  ;;  %v4855_v55 = vadd.f32 0.014752088, %v4854_v18  ;;  %v4919_v27 = vmul.f32 %v11992_v9, %v11992_v9 }
 0x4ad   : > { %v4784_v29 = vsub.f32 1.0, %v4783_v2  ;;  %v7240_v10 = vclamps-f32 %v4756_v51, 1.0  ;;  %v4820_v28 = vmul.f32 %v4819_v3, %v11918_v48  ;;  %v4847_v56 = vmul.f32 %v4846_v46, %v11948_v59  ;;  %vm12017_vm2 = vmor %vm4787_vm0, %vm4788_vm1 }
 0x4ae   : > { %v12009_v50 = vmin.f32 %v4879_v43, 16.0  ;;  %v4809_v0 = vmul.f32 %v4808_v61, %v11918_v48  ;;  %v4856_v21 = vmul.f32 %v4855_v55, %v11948_v59  ;;  %v12013_v35 = vmin.f32 %v4919_v27, 16.0 }
 0x4af   : > { %v4785_v49 = vmul.f32 %v7559_v58, %v4784_v29  ;;  %v6546_v8 = vmul.f32 0.5, %v7240_v10  ;;  %v4821_v60 = vadd.f32 1.0, %v4820_v28  ;;  %v4848_v45 = vadd.f32 0.18741608, %v4847_v56 }
 0x4b0   : > { %v4881_v53 = vmul.f32 2.1237322e-06, %v12009_v50  ;;  %v4771_v34 = vmul.f32 %v4770_v17, %v11853_v23  ;;  %vm4792_vm3 = vcmp.eq.f32.partialorder %v4791_v36, 8.507059e+37  ;;  %v4857_v48 = vadd.f32 0.112945676, %v4856_v21 }
 0x4b1   : > { %v4786_v62 = vadd.f32 %v7559_v58, %v4785_v49  ;;  %v6696_v63 = vadd.f32 0.5, %v6546_v8  ;;  %7560 = vrcp.f32 %v4821_v60  ;;  %v4892_v24 = vmul.f32 3.8918573e-05, %v12009_v50 }
 0x4b2   : > { %v4921_v11 = vmul.f32 2.1237322e-06, %v12013_v35  ;;  %v4810_v26 = vadd.f32 1.1283791, %v4809_v0  ;;  %v4858_v57 = vmul.f32 %v4857_v48, %v11948_v59  ;;  %v4849_v54 = vmul.f32 %v4848_v45, %v11948_v59 }
 0x4b3   : > { %v4790_v31 = vsel %vm12017_vm2, %v7559_v58, %v4786_v62  ;;  %v6846_v23 = vmul.f32 %v6696_v63, %v11799_v22  ;;  %v4882_v41 = vadd.f32 0.00028619796, %v4881_v53  ;;  %v4831_v42 = vand.u32 2147483647, %v4821_v60  ;;  %v12068_v63 = vld [vmem:[%s7840_s24 + $0x390] sm:$0xff] }
 0x4b4   : > { %v4795_v17 = vsel %vm4792_vm3, %v4794_v40, %v4790_v31  ;;  %v4859_v33 = vadd.f32 0.4994258, %v4858_v57  ;;  %v12034_v25 = vmul.f32 0.70710677, %v12026_v39  ;;  %vm4827_vm4 = vweird.f32 %v4821_v60 }
 0x4b5   : > { %v4796_v5 = vmul.f32 %v4795_v17, %v4771_v34  ;;  %6996 = vst [vmem:[%s8053_s16 + $0x358] sm:$0xff] %v6846_v23  ;;  %v4883_v6 = vmul.f32 %v4882_v41, %v12009_v50  ;;  %v4893_v14 = vadd.f32 0.001143296, %v4892_v24  ;;  %v4922_v37 = vadd.f32 0.00028619796, %v4921_v11 }
 0x4b6   : > { %v4833_v36 = vand.u32 2147483648, %v4821_v60  ;;  %v4860_v22 = vmul.f32 %v4859_v33, %v11948_v59  ;;  %v4932_v47 = vmul.f32 3.8918573e-05, %v12013_v35  ;;  %v4850_v38 = vadd.f32 1.1283791, %v4849_v54 }
 0x4b7   : > { %v7241_v32 = vclamps-f32 %v4796_v5, 1.0  ;;  %v7561_v58 = vpop.eup %7560  ;;  %v4884_v12 = vadd.f32 0.0036580483, %v4883_v6  ;;  %v4894_v4 = vmul.f32 %v4893_v14, %v12009_v50  ;;  %v4923_v18 = vmul.f32 %v4922_v37, %v12013_v35 }
 0x4b8   : > { %v4823_v2 = vmul.f32 %v7561_v58, %v4821_v60  ;;  %v12042_v40 = vadd.f32 1.0, %v4860_v22  ;;  %v4959_v61 = vmul.f32 %v12034_v25, %v12034_v25  ;;  %v4933_v46 = vadd.f32 0.001143296, %v4932_v47 }
 0x4b9   : > { %v6547_v20 = vmul.f32 0.5, %v7241_v32  ;;  %v4885_v51 = vmul.f32 %v4884_v12, %v12009_v50  ;;  %v4895_v3 = vadd.f32 0.014752088, %v4894_v4  ;;  %v4924_v59 = vadd.f32 0.0036580483, %v4923_v18 }
 0x4ba   : > { %v4824_v29 = vsub.f32 1.0, %v4823_v2  ;;  %vm4828_vm5 = vweird.f32 %v7561_v58  ;;  %7562 = vrcp.f32 %v12042_v40  ;;  %v4811_v55 = vmul.f32 %v4810_v26, %v11894_v16 }
 0x4bb   : > { %v6697_v43 = vadd.f32 0.5, %v6547_v20  ;;  %vm12049_vm6 = vcmp.eq.f32.partialorder %v4831_v42, 8.507059e+37  ;;  %v4886_v10 = vadd.f32 0.05243302, %v4885_v51  ;;  %v4896_v28 = vmul.f32 %v4895_v3, %v12009_v50  ;;  %vm12058_vm7 = vmor %vm4827_vm4, %vm4828_vm5 }
 0x4bc   : > { %v4825_v49 = vmul.f32 %v7561_v58, %v4824_v29  ;;  %v4925_v0 = vmul.f32 %v4924_v59, %v12013_v35  ;;  %v4934_v21 = vmul.f32 %v4933_v46, %v12013_v35  ;;  %v4834_v16 = vor.u32 1.1754944e-38, %v4833_v36 }
 0x4bd   : > { %v6847_v56 = vmul.f32 %v6697_v43, %v11843_v13  ;;  %v4887_v7 = vmul.f32 %v4886_v10, %v12009_v50  ;;  %v4897_v45 = vadd.f32 0.112945676, %v4896_v28  ;;  %v12063_v53 = vmin.f32 %v4959_v61, 16.0 }
 0x4be   : > { %v4826_v34 = vadd.f32 %v7561_v58, %v4825_v49  ;;  %v4851_v13 = vmul.f32 %v4850_v38, %v11929_v19  ;;  %v4926_v62 = vadd.f32 0.05243302, %v4925_v0  ;;  %v4935_v48 = vadd.f32 0.014752088, %v4934_v21 }
 0x4bf   : > { %6997 = vst [vmem:[%s8053_s16 + $0x360] sm:$0xff] %v6847_v56  ;;  %vm4867_vm8 = vweird.f32 %v12042_v40  ;;  %v4888_v60 = vadd.f32 0.18741608, %v4887_v7  ;;  %v4898_v24 = vmul.f32 %v4897_v45, %v12009_v50  ;;  %v4961_v11 = vmul.f32 2.1237322e-06, %v12063_v53 }
 0x4c0   : > { %v7563_v31 = vpop.eup %7562  ;;  %v4830_v26 = vsel %vm12058_vm7, %v7561_v58, %v4826_v34  ;;  %v4871_v57 = vand.u32 2147483647, %v12042_v40  ;;  %v4927_v23 = vmul.f32 %v4926_v62, %v12013_v35  ;;  %v4936_v19 = vmul.f32 %v4935_v48, %v12013_v35 }
 0x4c1   : > { %v4835_v17 = vsel %vm12049_vm6, %v4834_v16, %v4830_v26  ;;  %v4863_v54 = vmul.f32 %v7563_v31, %v12042_v40  ;;  %v4972_v41 = vmul.f32 3.8918573e-05, %v12063_v53  ;;  %v12083_v5 = vmul.f32 0.70710677, %v12068_v63 }
 0x4c2   : > { %v4836_v42 = vmul.f32 %v4835_v17, %v4811_v55  ;;  %v4873_v33 = vand.u32 2147483648, %v12042_v40  ;;  %v4899_v6 = vadd.f32 0.4994258, %v4898_v24  ;;  %v4937_v14 = vadd.f32 0.112945676, %v4936_v19 }
 0x4c3   : > { %v4864_v37 = vsub.f32 1.0, %v4863_v54  ;;  %vm4868_vm9 = vweird.f32 %v7563_v31  ;;  %v4889_v32 = vmul.f32 %v4888_v60, %v12009_v50  ;;  %v4962_v36 = vadd.f32 0.00028619796, %v4961_v11 }
 0x4c4   : > { %v7242_v22 = vclamps-f32 %v4836_v42, 1.0  ;;  %v4900_v47 = vmul.f32 %v4899_v6, %v12009_v50  ;;  %v4928_v58 = vadd.f32 0.18741608, %v4927_v23  ;;  %v4938_v38 = vmul.f32 %v4937_v14, %v12013_v35  ;;  %vm12094_vm10 = vmor %vm4867_vm8, %vm4868_vm9 }
 0x4c5   : > { %v4865_v12 = vmul.f32 %v7563_v31, %v4864_v37  ;;  %v4963_v4 = vmul.f32 %v4962_v36, %v12063_v53  ;;  %v4973_v18 = vadd.f32 0.001143296, %v4972_v41  ;;  %v4999_v20 = vmul.f32 %v12083_v5, %v12083_v5 }
 0x4c6   : > { %v6548_v2 = vmul.f32 0.5, %v7242_v22  ;;  %v4874_v51 = vor.u32 1.1754944e-38, %v4873_v33  ;;  %v4901_v3 = vadd.f32 1.0, %v4900_v47  ;;  %v4939_v50 = vadd.f32 0.4994258, %v4938_v38 }
 0x4c7   : > { %v4866_v59 = vadd.f32 %v7563_v31, %v4865_v12  ;;  %vm4872_vm11 = vcmp.eq.f32.partialorder %v4871_v57, 8.507059e+37  ;;  %v4964_v46 = vadd.f32 0.0036580483, %v4963_v4  ;;  %v4974_v43 = vmul.f32 %v4973_v18, %v12063_v53  ;;  %v12134_v12 = vld [vmem:[%s7840_s24 + $0x3a0] sm:$0xff] }
 0x4c8   : > { %v6698_v29 = vadd.f32 0.5, %v6548_v2  ;;  %v4890_v55 = vadd.f32 1.1283791, %v4889_v32  ;;  %7564 = vrcp.f32 %v4901_v3  ;;  %v4929_v40 = vmul.f32 %v4928_v58, %v12013_v35 }
 0x4c9   : > { %v4870_v27 = vsel %vm12094_vm10, %v7563_v31, %v4866_v59  ;;  %v4940_v10 = vmul.f32 %v4939_v50, %v12013_v35  ;;  %v12103_v28 = vmin.f32 %v4999_v20, 16.0  ;;  %v4911_v0 = vand.u32 2147483647, %v4901_v3  ;;  %v12116_v31 = vld [vmem:[%s7840_s24 + $0x398] sm:$0xff] }
 0x4ca   : > { %v6848_v56 = vmul.f32 %v6698_v29, %v11886_v15  ;;  %v4875_v49 = vsel %vm4872_vm11, %v4874_v51, %v4870_v27  ;;  %v4965_v21 = vmul.f32 %v4964_v46, %v12063_v53  ;;  %v4913_v16 = vand.u32 2147483648, %v4901_v3 }
 0x4cb   : > { %v4876_v8 = vmul.f32 %v4875_v49, %v4851_v13  ;;  %v12107_v7 = vadd.f32 1.0, %v4940_v10  ;;  %v4975_v45 = vadd.f32 0.014752088, %v4974_v43  ;;  %v5001_v62 = vmul.f32 2.1237322e-06, %v12103_v28 }
 0x4cc   : > { %6998 = vst [vmem:[%s8053_s16 + $0x368] sm:$0xff] %v6848_v56  ;;  %v4966_v34 = vadd.f32 0.05243302, %v4965_v21  ;;  %v4891_v35 = vmul.f32 %v4890_v55, %v11989_v44  ;;  %v4930_v60 = vadd.f32 1.1283791, %v4929_v40  ;;  %vm4907_vm12 = vweird.f32 %v4901_v3 }
 0x4cd   : > { %v7243_v48 = vclamps-f32 %v4876_v8, 1.0  ;;  %7566 = vrcp.f32 %v12107_v7  ;;  %v4976_v13 = vmul.f32 %v4975_v45, %v12063_v53  ;;  %v5002_v11 = vadd.f32 0.00028619796, %v5001_v62 }
 0x4ce   : > { %v7565_v15 = vpop.eup %7564  ;;  %v4967_v24 = vmul.f32 %v4966_v34, %v12063_v53  ;;  %vm12118_vm13 = vcmp.eq.f32.partialorder %v4911_v0, 8.507059e+37  ;;  %v4914_v19 = vor.u32 1.1754944e-38, %v4913_v16  ;;  %v5012_v33 = vmul.f32 3.8918573e-05, %v12103_v28 }
 0x4cf   : > { %v6549_v26 = vmul.f32 0.5, %v7243_v48  ;;  %v4903_v57 = vmul.f32 %v7565_v15, %v4901_v3  ;;  %vm4908_vm14 = vweird.f32 %v7565_v15  ;;  %v4977_v17 = vadd.f32 0.112945676, %v4976_v13 }
 0x4d0   : > { %v4968_v44 = vadd.f32 0.18741608, %v4967_v24  ;;  %v5003_v54 = vmul.f32 %v5002_v11, %v12103_v28  ;;  %v12125_v6 = vmul.f32 0.70710677, %v12116_v31  ;;  %vm4947_vm15 = vweird.f32 %v12107_v7  ;;  %vm12138_vm0 = vmor %vm4907_vm12, %vm4908_vm14 }
 0x4d1   : > { %v6699_v41 = vadd.f32 0.5, %v6549_v26  ;;  %v4904_v42 = vsub.f32 1.0, %v4903_v57  ;;  %v4951_v14 = vand.u32 2147483647, %v12107_v7  ;;  %v4978_v37 = vmul.f32 %v4977_v17, %v12063_v53  ;;  %v12178_v57 = vld [vmem:[%s7840_s24 + $0x3a8] sm:$0xff] }
 0x4d2   : > { %v5004_v32 = vadd.f32 0.0036580483, %v5003_v54  ;;  %v5013_v58 = vadd.f32 0.001143296, %v5012_v33  ;;  %v5039_v38 = vmul.f32 %v12125_v6, %v12125_v6  ;;  %v4953_v20 = vand.u32 2147483648, %v12107_v7 }
 0x4d3   : > { %v7567_v36 = vpop.eup %7566  ;;  %v6849_v22 = vmul.f32 %v6699_v41, %v11916_v30  ;;  %v4905_v47 = vmul.f32 %v7565_v15, %v4904_v42  ;;  %v4969_v2 = vmul.f32 %v4968_v44, %v12063_v53  ;;  %v4979_v30 = vadd.f32 0.4994258, %v4978_v37 }
 0x4d4   : > { %v4943_v18 = vmul.f32 %v7567_v36, %v12107_v7  ;;  %v5005_v51 = vmul.f32 %v5004_v32, %v12103_v28  ;;  %v5014_v50 = vmul.f32 %v5013_v58, %v12103_v28  ;;  %v12148_v59 = vmin.f32 %v5039_v38, 16.0 }
 0x4d5   : > { %6999 = vst [vmem:[%s8053_s16 + $0x370] sm:$0xff] %v6849_v22  ;;  %v4906_v61 = vadd.f32 %v7565_v15, %v4905_v47  ;;  %vm4948_vm1 = vweird.f32 %v7567_v36  ;;  %v4980_v46 = vmul.f32 %v4979_v30, %v12063_v53  ;;  %v12152_v43 = vmul.f32 0.70710677, %v12134_v12 }
 0x4d6   : > { %v4944_v3 = vsub.f32 1.0, %v4943_v18  ;;  %v5006_v55 = vadd.f32 0.05243302, %v5005_v51  ;;  %v5015_v27 = vadd.f32 0.014752088, %v5014_v50  ;;  %vm12164_vm2 = vmor %vm4947_vm15, %vm4948_vm1  ;;  %v4954_v8 = vor.u32 1.1754944e-38, %v4953_v20 }
 0x4d7   : > { %v4910_v29 = vsel %vm12138_vm0, %v7565_v15, %v4906_v61  ;;  %v5041_v40 = vmul.f32 2.1237322e-06, %v12148_v59  ;;  %v12159_v49 = vadd.f32 1.0, %v4980_v46  ;;  %v5052_v0 = vmul.f32 3.8918573e-05, %v12148_v59 }
 0x4d8   : > { %v4915_v10 = vsel %vm12118_vm13, %v4914_v19, %v4910_v29  ;;  %v4945_v56 = vmul.f32 %v7567_v36, %v4944_v3  ;;  %v5016_v16 = vmul.f32 %v5015_v27, %v12103_v28  ;;  %v4931_v34 = vmul.f32 %v4930_v60, %v11992_v9 }
 0x4d9   : > { %v4916_v21 = vmul.f32 %v4915_v10, %v4891_v35  ;;  %v5042_v45 = vadd.f32 0.00028619796, %v5041_v40  ;;  %vm4952_vm3 = vcmp.eq.f32.partialorder %v4951_v14, 8.507059e+37  ;;  %7568 = vrcp.f32 %v12159_v49 }
 0x4da   : > { %v4946_v62 = vadd.f32 %v7567_v36, %v4945_v56  ;;  %v4970_v15 = vadd.f32 1.1283791, %v4969_v2  ;;  %v5017_v35 = vadd.f32 0.112945676, %v5016_v16  ;;  %v5079_v7 = vmul.f32 %v12152_v43, %v12152_v43 }
 0x4db   : > { %v7244_v48 = vclamps-f32 %v4916_v21, 1.0  ;;  %v5007_v13 = vmul.f32 %v5006_v55, %v12103_v28  ;;  %v5043_v11 = vmul.f32 %v5042_v45, %v12148_v59  ;;  %v5053_v26 = vadd.f32 0.001143296, %v5052_v0 }
 0x4dc   : > { %v4950_v24 = vsel %vm12164_vm2, %v7567_v36, %v4946_v62  ;;  %vm4987_vm4 = vweird.f32 %v12159_v49  ;;  %v4991_v23 = vand.u32 2147483647, %v12159_v49  ;;  %v5018_v44 = vmul.f32 %v5017_v35, %v12103_v28 }
 0x4dd   : > { %v6550_v9 = vmul.f32 0.5, %v7244_v48  ;;  %v4955_v60 = vsel %vm4952_vm3, %v4954_v8, %v4950_v24  ;;  %v5044_v17 = vadd.f32 0.0036580483, %v5043_v11  ;;  %v5054_v54 = vmul.f32 %v5053_v26, %v12148_v59 }
 0x4de   : > { %v4956_v19 = vmul.f32 %v4955_v60, %v4931_v34  ;;  %v4993_v42 = vand.u32 2147483648, %v12159_v49  ;;  %v12185_v33 = vmin.f32 %v5079_v7, 16.0  ;;  %v12188_v14 = vmul.f32 0.70710677, %v12178_v57 }
 0x4df   : > { %v6700_v41 = vadd.f32 0.5, %v6550_v9  ;;  %v7569_v37 = vpop.eup %7568  ;;  %v5019_v36 = vadd.f32 0.4994258, %v5018_v44  ;;  %v5045_v22 = vmul.f32 %v5044_v17, %v12148_v59  ;;  %v5055_v47 = vadd.f32 0.014752088, %v5054_v54 }
 0x4e0   : > { %v7245_v32 = vclamps-f32 %v4956_v19, 1.0  ;;  %v4983_v38 = vmul.f32 %v7569_v37, %v12159_v49  ;;  %vm4988_vm5 = vweird.f32 %v7569_v37  ;;  %v5008_v4 = vadd.f32 0.18741608, %v5007_v13 }
 0x4e1   : > { %v6850_v58 = vmul.f32 %v6700_v41, %v11973_v52  ;;  %v5020_v20 = vmul.f32 %v5019_v36, %v12103_v28  ;;  %v5046_v2 = vadd.f32 0.05243302, %v5045_v22  ;;  %v5056_v30 = vmul.f32 %v5055_v47, %v12148_v59  ;;  %vm12206_vm6 = vmor %vm4987_vm4, %vm4988_vm5 }
 0x4e2   : > { %v6551_v18 = vmul.f32 0.5, %v7245_v32  ;;  %v4984_v61 = vsub.f32 1.0, %v4983_v38  ;;  %v5081_v51 = vmul.f32 2.1237322e-06, %v12185_v33  ;;  %v5092_v50 = vmul.f32 3.8918573e-05, %v12185_v33 }
 0x4e3   : > { %7000 = vst [vmem:[%s8053_s16 + $0x378] sm:$0xff] %v6850_v58  ;;  %v5119_v3 = vmul.f32 %v12188_v14, %v12188_v14  ;;  %v4971_v46 = vmul.f32 %v4970_v15, %v12034_v25  ;;  %v5021_v29 = vadd.f32 1.0, %v5020_v20  ;;  %v5057_v55 = vadd.f32 0.112945676, %v5056_v30  ;;  %v12221_v15 = vld [vmem:[%s7840_s24 + $0x3b0] sm:$0xff] }
 0x4e4   : > { %v6701_v52 = vadd.f32 0.5, %v6551_v18  ;;  %v4985_v27 = vmul.f32 %v7569_v37, %v4984_v61  ;;  %v5009_v40 = vmul.f32 %v5008_v4, %v12103_v28  ;;  %v5082_v10 = vadd.f32 0.00028619796, %v5081_v51 }
 0x4e5   : > { %v5093_v56 = vadd.f32 0.001143296, %v5092_v50  ;;  %v4994_v53 = vor.u32 1.1754944e-38, %v4993_v42  ;;  %7570 = vrcp.f32 %v5021_v29  ;;  %v12210_v25 = vmin.f32 %v5119_v3, 16.0 }
 0x4e6   : > { %v6851_v0 = vmul.f32 %v6701_v52, %v11976_v1  ;;  %v4986_v8 = vadd.f32 %v7569_v37, %v4985_v27  ;;  %vm4992_vm7 = vcmp.eq.f32.partialorder %v4991_v23, 8.507059e+37  ;;  %v5047_v28 = vmul.f32 %v5046_v2, %v12148_v59 }
 0x4e7   : > { %v5058_v16 = vmul.f32 %v5057_v55, %v12148_v59  ;;  %v5083_v1 = vmul.f32 %v5082_v10, %v12185_v33  ;;  %v5094_v49 = vmul.f32 %v5093_v56, %v12185_v33  ;;  %v5121_v45 = vmul.f32 2.1237322e-06, %v12210_v25 }
 0x4e8   : > { %7001 = vst [vmem:[%s8053_s16 + $0x380] sm:$0xff] %v6851_v0  ;;  %v4990_v34 = vsel %vm12206_vm6, %v7569_v37, %v4986_v8  ;;  %v5010_v62 = vadd.f32 1.1283791, %v5009_v40  ;;  %vm5027_vm8 = vweird.f32 %v5021_v29  ;;  %v5048_v26 = vadd.f32 0.18741608, %v5047_v28  ;;  %v12251_v0 = vld [vmem:[%s7840_s24 + $0x3b8] sm:$0xff] }
 0x4e9   : > { %v5059_v48 = vadd.f32 0.4994258, %v5058_v16  ;;  %v4995_v35 = vsel %vm4992_vm7, %v4994_v53, %v4990_v34  ;;  %v5084_v7 = vadd.f32 0.0036580483, %v5083_v1  ;;  %v5095_v24 = vadd.f32 0.014752088, %v5094_v49 }
 0x4ea   : > { %v5122_v13 = vadd.f32 0.00028619796, %v5121_v45  ;;  %v4996_v11 = vmul.f32 %v4995_v35, %v4971_v46  ;;  %v5132_v60 = vmul.f32 3.8918573e-05, %v12210_v25  ;;  %v12229_v54 = vmul.f32 0.70710677, %v12221_v15 }
 0x4eb   : > { %v5060_v9 = vmul.f32 %v5059_v48, %v12148_v59  ;;  %v7571_v23 = vpop.eup %7570  ;;  %v5085_v19 = vmul.f32 %v5084_v7, %v12185_v33  ;;  %v5096_v44 = vmul.f32 %v5095_v24, %v12185_v33  ;;  %v5031_v37 = vand.u32 2147483647, %v5021_v29 }
 0x4ec   : > { %v5123_v17 = vmul.f32 %v5122_v13, %v12210_v25  ;;  %v7246_v41 = vclamps-f32 %v4996_v11, 1.0  ;;  %v5023_v42 = vmul.f32 %v7571_v23, %v5021_v29  ;;  %v5033_v32 = vand.u32 2147483648, %v5021_v29 }
 0x4ed   : > { %vm5028_vm9 = vweird.f32 %v7571_v23  ;;  %v5061_v36 = vadd.f32 1.0, %v5060_v9  ;;  %v5086_v22 = vadd.f32 0.05243302, %v5085_v19  ;;  %v5097_v47 = vadd.f32 0.112945676, %v5096_v44 }
 0x4ee   : > { %v6552_v58 = vmul.f32 0.5, %v7246_v41  ;;  %v5024_v38 = vsub.f32 1.0, %v5023_v42  ;;  %v5124_v4 = vadd.f32 0.0036580483, %v5123_v17  ;;  %v5133_v18 = vadd.f32 0.001143296, %v5132_v60  ;;  %vm12239_vm10 = vmor %vm5027_vm8, %vm5028_vm9 }
 0x4ef   : > { %v5011_v20 = vmul.f32 %v5010_v62, %v12083_v5  ;;  %v5049_v2 = vmul.f32 %v5048_v26, %v12148_v59  ;;  %7572 = vrcp.f32 %v5061_v36  ;;  %v5159_v30 = vmul.f32 %v12229_v54, %v12229_v54 }
 0x4f0   : > { %v6702_v61 = vadd.f32 0.5, %v6552_v58  ;;  %v5025_v51 = vmul.f32 %v7571_v23, %v5024_v38  ;;  %v5087_v50 = vmul.f32 %v5086_v22, %v12185_v33  ;;  %v5098_v3 = vmul.f32 %v5097_v47, %v12185_v33 }
 0x4f1   : > { %vm12243_vm11 = vcmp.eq.f32.partialorder %v5031_v37, 8.507059e+37  ;;  %v5034_v59 = vor.u32 1.1754944e-38, %v5033_v32  ;;  %v5125_v46 = vmul.f32 %v5124_v4, %v12210_v25  ;;  %v5134_v55 = vmul.f32 %v5133_v18, %v12210_v25 }
 0x4f2   : > { %v6852_v27 = vmul.f32 %v6702_v61, %v12026_v39  ;;  %v5026_v40 = vadd.f32 %v7571_v23, %v5025_v51  ;;  %v5088_v10 = vadd.f32 0.18741608, %v5087_v50  ;;  %v5099_v56 = vadd.f32 0.4994258, %v5098_v3 }
 0x4f3   : > { %v5126_v29 = vadd.f32 0.05243302, %v5125_v46  ;;  %v5135_v21 = vadd.f32 0.014752088, %v5134_v55  ;;  %v12253_v53 = vmin.f32 %v5159_v30, 16.0  ;;  %vm5067_vm12 = vweird.f32 %v5061_v36 }
 0x4f4   : > { %7002 = vst [vmem:[%s8053_s16 + $0x388] sm:$0xff] %v6852_v27  ;;  %v5030_v8 = vsel %vm12239_vm10, %v7571_v23, %v5026_v40  ;;  %v5050_v28 = vadd.f32 1.1283791, %v5049_v2  ;;  %v5071_v16 = vand.u32 2147483647, %v5061_v36  ;;  %v5100_v1 = vmul.f32 %v5099_v56, %v12185_v33 }
 0x4f5   : > { %v7573_v49 = vpop.eup %7572  ;;  %v5035_v39 = vsel %vm12243_vm11, %v5034_v59, %v5030_v8  ;;  %v5136_v45 = vmul.f32 %v5135_v21, %v12210_v25  ;;  %v5161_v34 = vmul.f32 2.1237322e-06, %v12253_v53  ;;  %v12264_v62 = vmul.f32 0.70710677, %v12251_v0 }
 0x4f6   : > { %v5036_v48 = vmul.f32 %v5035_v39, %v5011_v20  ;;  %v5063_v35 = vmul.f32 %v7573_v49, %v5061_v36  ;;  %v5127_v7 = vmul.f32 %v5126_v29, %v12210_v25  ;;  %v5073_v24 = vand.u32 2147483648, %v5061_v36 }
 0x4f7   : > { %v5089_v13 = vmul.f32 %v5088_v10, %v12185_v33  ;;  %v5101_v11 = vadd.f32 1.0, %v5100_v1  ;;  %v5137_v26 = vadd.f32 0.112945676, %v5136_v45  ;;  %vm5068_vm13 = vweird.f32 %v7573_v49 }
 0x4f8   : > { %v7247_v9 = vclamps-f32 %v5036_v48, 1.0  ;;  %v5064_v60 = vsub.f32 1.0, %v5063_v35  ;;  %v5162_v23 = vadd.f32 0.00028619796, %v5161_v34  ;;  %v5051_v19 = vmul.f32 %v5050_v28, %v12125_v6  ;;  %vm12277_vm15 = vmor %vm5067_vm12, %vm5068_vm13  ;;  %v12308_v35 = vld [vmem:[%s7840_s24 + $0x3c0] sm:$0xff] }
 0x4f9   : > { %vm12269_vm14 = vcmp.eq.f32.partialorder %v5071_v16, 8.507059e+37  ;;  %7574 = vrcp.f32 %v5101_v11  ;;  %v5199_v17 = vmul.f32 %v12264_v62, %v12264_v62  ;;  %v5128_v37 = vadd.f32 0.18741608, %v5127_v7  ;;  %v12311_v7 = vld [vmem:[%s7840_s24 + $0x3c8] sm:$0xff] }
 0x4fa   : > { %v6553_v41 = vmul.f32 0.5, %v7247_v9  ;;  %v5065_v42 = vmul.f32 %v7573_v49, %v5064_v60  ;;  %v5138_v33 = vmul.f32 %v5137_v26, %v12210_v25  ;;  %v5074_v22 = vor.u32 1.1754944e-38, %v5073_v24 }
 0x4fb   : > { %v5090_v6 = vadd.f32 1.1283791, %v5089_v13  ;;  %v5163_v47 = vmul.f32 %v5162_v23, %v12253_v53  ;;  %v5172_v58 = vmul.f32 3.8918573e-05, %v12253_v53  ;;  %v5111_v18 = vand.u32 2147483647, %v5101_v11 }
 0x4fc   : > { %v6703_v38 = vadd.f32 0.5, %v6553_v41  ;;  %v5066_v4 = vadd.f32 %v7573_v49, %v5065_v42  ;;  %v5139_v20 = vadd.f32 0.4994258, %v5138_v33  ;;  %v5113_v2 = vand.u32 2147483648, %v5101_v11 }
 0x4fd   : > { %v5164_v30 = vadd.f32 0.0036580483, %v5163_v47  ;;  %v5173_v61 = vadd.f32 0.001143296, %v5172_v58  ;;  %v12283_v51 = vmin.f32 %v5199_v17, 16.0  ;;  %v5129_v3 = vmul.f32 %v5128_v37, %v12210_v25 }
 0x4fe   : > { %v6853_v36 = vmul.f32 %v6703_v38, %v12068_v63  ;;  %v5070_v50 = vsel %vm12277_vm15, %v7573_v49, %v5066_v4  ;;  %v5140_v52 = vmul.f32 %v5139_v20, %v12210_v25  ;;  %v5091_v63 = vmul.f32 %v5090_v6, %v12152_v43 }
 0x4ff   : > { %v7575_v5 = vpop.eup %7574  ;;  %v5075_v59 = vsel %vm12269_vm14, %v5074_v22, %v5070_v50  ;;  %v5165_v46 = vmul.f32 %v5164_v30, %v12253_v53  ;;  %v5174_v55 = vmul.f32 %v5173_v61, %v12253_v53  ;;  %v5201_v27 = vmul.f32 2.1237322e-06, %v12283_v51 }
 0x500   : > { %7003 = vst [vmem:[%s8053_s16 + $0x390] sm:$0xff] %v6853_v36  ;;  %v5076_v40 = vmul.f32 %v5075_v59, %v5051_v19  ;;  %v5103_v10 = vmul.f32 %v7575_v5, %v5101_v11  ;;  %v12297_v56 = vadd.f32 1.0, %v5140_v52  ;;  %vm5107_vm0 = vweird.f32 %v5101_v11 }
 0x501   : > { %v5166_v25 = vadd.f32 0.05243302, %v5165_v46  ;;  %v5175_v29 = vadd.f32 0.014752088, %v5174_v55  ;;  %v5202_v21 = vadd.f32 0.00028619796, %v5201_v27  ;;  %vm5108_vm1 = vweird.f32 %v7575_v5 }
 0x502   : > { %v7248_v8 = vclamps-f32 %v5076_v40, 1.0  ;;  %v5104_v28 = vsub.f32 1.0, %v5103_v10  ;;  %7576 = vrcp.f32 %v12297_v56  ;;  %vm12300_vm2 = vcmp.eq.f32.partialorder %v5111_v18, 8.507059e+37  ;;  %vm12314_vm3 = vmor %vm5107_vm0, %vm5108_vm1 }
 0x503   : > { %v5114_v1 = vor.u32 1.1754944e-38, %v5113_v2  ;;  %v5130_v43 = vadd.f32 1.1283791, %v5129_v3  ;;  %v5176_v49 = vmul.f32 %v5175_v29, %v12253_v53  ;;  %v5203_v34 = vmul.f32 %v5202_v21, %v12283_v51 }
 0x504   : > { %v6554_v39 = vmul.f32 0.5, %v7248_v8  ;;  %v5105_v45 = vmul.f32 %v7575_v5, %v5104_v28  ;;  %v5212_v48 = vmul.f32 3.8918573e-05, %v12283_v51  ;;  %vm5147_vm4 = vweird.f32 %v12297_v56 }
 0x505   : > { %v5153_v13 = vand.u32 2147483648, %v12297_v56  ;;  %v5167_v26 = vmul.f32 %v5166_v25, %v12253_v53  ;;  %v5177_v9 = vadd.f32 0.112945676, %v5176_v49  ;;  %v5204_v19 = vadd.f32 0.0036580483, %v5203_v34 }
 0x506   : > { %v6704_v60 = vadd.f32 0.5, %v6554_v39  ;;  %v5106_v23 = vadd.f32 %v7575_v5, %v5105_v45  ;;  %v5213_v44 = vadd.f32 0.001143296, %v5212_v48  ;;  %v5151_v17 = vand.u32 2147483647, %v12297_v56 }
 0x507   : > { %v5178_v11 = vmul.f32 %v5177_v9, %v12253_v53  ;;  %v12324_v41 = vmul.f32 0.70710677, %v12308_v35  ;;  %v12327_v42 = vmul.f32 0.70710677, %v12311_v7  ;;  %v5205_v22 = vmul.f32 %v5204_v19, %v12283_v51 }
 0x508   : > { %v7577_v37 = vpop.eup %7576  ;;  %v6854_v33 = vmul.f32 %v6704_v60, %v12116_v31  ;;  %v5110_v32 = vsel %vm12314_vm3, %v7575_v5, %v5106_v23  ;;  %v5214_v6 = vmul.f32 %v5213_v44, %v12283_v51  ;;  %v5154_v38 = vor.u32 1.1754944e-38, %v5153_v13 }
 0x509   : > { %v5115_v47 = vsel %vm12300_vm2, %v5114_v1, %v5110_v32  ;;  %v5143_v58 = vmul.f32 %v7577_v37, %v12297_v56  ;;  %v5168_v4 = vadd.f32 0.18741608, %v5167_v26  ;;  %v5179_v20 = vadd.f32 0.4994258, %v5178_v11  ;;  %v12361_v1 = vld [vmem:[%s7840_s24 + $0x3d0] sm:$0xff] }
 0x50a   : > { %7004 = vst [vmem:[%s8053_s16 + $0x398] sm:$0xff] %v6854_v33  ;;  %v5116_v18 = vmul.f32 %v5115_v47, %v5091_v63  ;;  %v5206_v2 = vadd.f32 0.05243302, %v5205_v22  ;;  %v5239_v31 = vmul.f32 %v12324_v41, %v12324_v41  ;;  %vm5148_vm5 = vweird.f32 %v7577_v37 }
 0x50b   : > { %v5144_v30 = vsub.f32 1.0, %v5143_v58  ;;  %v5215_v61 = vadd.f32 0.014752088, %v5214_v6  ;;  %v5279_v36 = vmul.f32 %v12327_v42, %v12327_v42  ;;  %v5180_v3 = vmul.f32 %v5179_v20, %v12253_v53  ;;  %vm12352_vm6 = vmor %vm5147_vm4, %vm5148_vm5 }
 0x50c   : > { %v7249_v50 = vclamps-f32 %v5116_v18, 1.0  ;;  %v5207_v52 = vmul.f32 %v5206_v2, %v12283_v51  ;;  %v12344_v5 = vmin.f32 %v5239_v31, 16.0  ;;  %v5169_v46 = vmul.f32 %v5168_v4, %v12253_v53 }
 0x50d   : > { %v5145_v59 = vmul.f32 %v7577_v37, %v5144_v30  ;;  %v5216_v55 = vmul.f32 %v5215_v61, %v12283_v51  ;;  %v12348_v27 = vmin.f32 %v5279_v36, 16.0  ;;  %v5181_v10 = vadd.f32 1.0, %v5180_v3 }
 0x50e   : > { %v6555_v40 = vmul.f32 0.5, %v7249_v50  ;;  %v5208_v25 = vadd.f32 0.18741608, %v5207_v52  ;;  %v5241_v29 = vmul.f32 2.1237322e-06, %v12344_v5  ;;  %v5131_v21 = vmul.f32 %v5130_v43, %v12188_v14 }
 0x50f   : > { %v5146_v8 = vadd.f32 %v7577_v37, %v5145_v59  ;;  %vm5152_vm7 = vcmp.eq.f32.partialorder %v5151_v17, 8.507059e+37  ;;  %v5217_v53 = vadd.f32 0.112945676, %v5216_v55  ;;  %7578 = vrcp.f32 %v5181_v10 }
 0x510   : > { %v6705_v28 = vadd.f32 0.5, %v6555_v40  ;;  %v5252_v16 = vmul.f32 3.8918573e-05, %v12344_v5  ;;  %v5281_v56 = vmul.f32 2.1237322e-06, %v12348_v27  ;;  %v5209_v34 = vmul.f32 %v5208_v25, %v12283_v51 }
 0x511   : > { %v5150_v49 = vsel %vm12352_vm6, %v7577_v37, %v5146_v8  ;;  %v5170_v39 = vadd.f32 1.1283791, %v5169_v46  ;;  %v5218_v45 = vmul.f32 %v5217_v53, %v12283_v51  ;;  %v5242_v48 = vadd.f32 0.00028619796, %v5241_v29 }
 0x512   : > { %v6855_v14 = vmul.f32 %v6705_v28, %v12134_v12  ;;  %v5155_v43 = vsel %vm5152_vm7, %v5154_v38, %v5150_v49  ;;  %v5191_v13 = vand.u32 2147483647, %v5181_v10  ;;  %v12369_v9 = vmul.f32 0.70710677, %v12361_v1  ;;  %v12403_v28 = vld [vmem:[%s7840_s24 + $0x3d8] sm:$0xff] }
 0x513   : > { %v5156_v24 = vmul.f32 %v5155_v43, %v5131_v21  ;;  %v5219_v26 = vadd.f32 0.4994258, %v5218_v45  ;;  %vm5187_vm8 = vweird.f32 %v5181_v10  ;;  %v5243_v60 = vmul.f32 %v5242_v48, %v12344_v5 }
 0x514   : > { %7005 = vst [vmem:[%s8053_s16 + $0x3a0] sm:$0xff] %v6855_v14  ;;  %v5253_v23 = vadd.f32 0.001143296, %v5252_v16  ;;  %v5282_v19 = vadd.f32 0.00028619796, %v5281_v56  ;;  %v5193_v17 = vand.u32 2147483648, %v5181_v10  ;;  %v5319_v4 = vmul.f32 %v12369_v9, %v12369_v9 }
 0x515   : > { %v7250_v44 = vclamps-f32 %v5156_v24, 1.0  ;;  %v5220_v12 = vmul.f32 %v5219_v26, %v12283_v51  ;;  %v5292_v11 = vmul.f32 3.8918573e-05, %v12348_v27  ;;  %v7579_v37 = vpop.eup %7578  ;;  %v5210_v33 = vadd.f32 1.1283791, %v5209_v34 }
 0x516   : > { %v5244_v32 = vadd.f32 0.0036580483, %v5243_v60  ;;  %v5254_v22 = vmul.f32 %v5253_v23, %v12344_v5  ;;  %v5283_v6 = vmul.f32 %v5282_v19, %v12348_v27  ;;  %v5183_v58 = vmul.f32 %v7579_v37, %v5181_v10 }
 0x517   : > { %v6556_v47 = vmul.f32 0.5, %v7250_v44  ;;  %v12377_v38 = vadd.f32 1.0, %v5220_v12  ;;  %v5293_v2 = vadd.f32 0.001143296, %v5292_v11  ;;  %vm5188_vm9 = vweird.f32 %v7579_v37 }
 0x518   : > { %v5245_v18 = vmul.f32 %v5244_v32, %v12344_v5  ;;  %v5255_v20 = vadd.f32 0.014752088, %v5254_v22  ;;  %v5284_v51 = vadd.f32 0.0036580483, %v5283_v6  ;;  %v5184_v30 = vsub.f32 1.0, %v5183_v58  ;;  %vm12393_vm11 = vmor %vm5187_vm8, %vm5188_vm9 }
 0x519   : > { %v6706_v31 = vadd.f32 0.5, %v6556_v47  ;;  %7580 = vrcp.f32 %v12377_v38  ;;  %v5171_v61 = vmul.f32 %v5170_v39, %v12229_v54  ;;  %vm12384_vm10 = vcmp.eq.f32.partialorder %v5191_v13, 8.507059e+37 }
 0x51a   : > { %v5246_v50 = vadd.f32 0.05243302, %v5245_v18  ;;  %v5256_v3 = vmul.f32 %v5255_v20, %v12344_v5  ;;  %v5185_v59 = vmul.f32 %v7579_v37, %v5184_v30  ;;  %v5285_v46 = vmul.f32 %v5284_v51, %v12348_v27 }
 0x51b   : > { %v6856_v52 = vmul.f32 %v6706_v31, %v12178_v57  ;;  %v5294_v55 = vmul.f32 %v5293_v2, %v12348_v27  ;;  %v5194_v54 = vor.u32 1.1754944e-38, %v5193_v17  ;;  %v12398_v29 = vmin.f32 %v5319_v4, 16.0 }
 0x51c   : > { %v5247_v63 = vmul.f32 %v5246_v50, %v12344_v5  ;;  %v5257_v25 = vadd.f32 0.112945676, %v5256_v3  ;;  %v5186_v21 = vadd.f32 %v7579_v37, %v5185_v59  ;;  %v5211_v57 = vmul.f32 %v5210_v33, %v12264_v62 }
 0x51d   : > { %7006 = vst [vmem:[%s8053_s16 + $0x3a8] sm:$0xff] %v6856_v52  ;;  %v5286_v8 = vadd.f32 0.05243302, %v5285_v46  ;;  %v5295_v53 = vadd.f32 0.014752088, %v5294_v55  ;;  %vm5227_vm12 = vweird.f32 %v12377_v38  ;;  %v5233_v26 = vand.u32 2147483648, %v12377_v38 }
 0x51e   : > { %v5248_v10 = vadd.f32 0.18741608, %v5247_v63  ;;  %v5258_v16 = vmul.f32 %v5257_v25, %v12344_v5  ;;  %v5321_v56 = vmul.f32 2.1237322e-06, %v12398_v29  ;;  %v5190_v39 = vsel %vm12393_vm11, %v7579_v37, %v5186_v21 }
 0x51f   : > { %v7581_v49 = vpop.eup %7580  ;;  %v5231_v45 = vand.u32 2147483647, %v12377_v38  ;;  %v5287_v14 = vmul.f32 %v5286_v8, %v12348_v27  ;;  %v5296_v62 = vmul.f32 %v5295_v53, %v12348_v27  ;;  %v5195_v43 = vsel %vm12384_vm10, %v5194_v54, %v5190_v39 }
 0x520   : > { %v5223_v34 = vmul.f32 %v7581_v49, %v12377_v38  ;;  %v5332_v48 = vmul.f32 3.8918573e-05, %v12398_v29  ;;  %v12418_v24 = vmul.f32 0.70710677, %v12403_v28  ;;  %v5196_v13 = vmul.f32 %v5195_v43, %v5171_v61 }
 0x521   : > { %v5259_v60 = vadd.f32 0.4994258, %v5258_v16  ;;  %v5297_v23 = vadd.f32 0.112945676, %v5296_v62  ;;  %vm5228_vm13 = vweird.f32 %v7581_v49  ;;  %v5249_v44 = vmul.f32 %v5248_v10, %v12344_v5 }
 0x522   : > { %v5224_v19 = vsub.f32 1.0, %v5223_v34  ;;  %v5322_v17 = vadd.f32 0.00028619796, %v5321_v56  ;;  %v7251_v12 = vclamps-f32 %v5196_v13, 1.0  ;;  %v5288_v37 = vadd.f32 0.18741608, %v5287_v14  ;;  %vm12429_vm14 = vmor %vm5227_vm12, %vm5228_vm13 }
 0x523   : > { %v5260_v11 = vmul.f32 %v5259_v60, %v12344_v5  ;;  %v5298_v33 = vmul.f32 %v5297_v23, %v12348_v27  ;;  %v5333_v6 = vadd.f32 0.001143296, %v5332_v48  ;;  %v5359_v47 = vmul.f32 %v12418_v24, %v12418_v24 }
 0x524   : > { %v5225_v32 = vmul.f32 %v7581_v49, %v5224_v19  ;;  %v5323_v22 = vmul.f32 %v5322_v17, %v12398_v29  ;;  %v6557_v58 = vmul.f32 0.5, %v7251_v12  ;;  %v5234_v18 = vor.u32 1.1754944e-38, %v5233_v26 }
 0x525   : > { %v5261_v20 = vadd.f32 1.0, %v5260_v11  ;;  %v5299_v5 = vadd.f32 0.4994258, %v5298_v33  ;;  %vm5232_vm15 = vcmp.eq.f32.partialorder %v5231_v45, 8.507059e+37  ;;  %v5334_v31 = vmul.f32 %v5333_v6, %v12398_v29 }
 0x526   : > { %v5226_v51 = vadd.f32 %v7581_v49, %v5225_v32  ;;  %v5324_v2 = vadd.f32 0.0036580483, %v5323_v22  ;;  %v6707_v30 = vadd.f32 0.5, %v6557_v58  ;;  %v5250_v61 = vadd.f32 1.1283791, %v5249_v44  ;;  %v12469_v32 = vld [vmem:[%s7840_s24 + $0x3e8] sm:$0xff] }
 0x527   : > { %7582 = vrcp.f32 %v5261_v20  ;;  %v5289_v38 = vmul.f32 %v5288_v37, %v12348_v27  ;;  %v5300_v50 = vmul.f32 %v5299_v5, %v12348_v27  ;;  %v12438_v3 = vmin.f32 %v5359_v47, 16.0 }
 0x528   : > { %v5230_v36 = vsel %vm12429_vm14, %v7581_v49, %v5226_v51  ;;  %v6857_v52 = vmul.f32 %v6707_v30, %v12221_v15  ;;  %v5271_v46 = vand.u32 2147483647, %v5261_v20  ;;  %v5325_v55 = vmul.f32 %v5324_v2, %v12398_v29  ;;  %v12451_v49 = vld [vmem:[%s7840_s24 + $0x3e0] sm:$0xff] }
 0x529   : > { %v5235_v59 = vsel %vm5232_vm15, %v5234_v18, %v5230_v36  ;;  %v5273_v54 = vand.u32 2147483648, %v5261_v20  ;;  %v12442_v63 = vadd.f32 1.0, %v5300_v50  ;;  %v5335_v25 = vadd.f32 0.014752088, %v5334_v31 }
 0x52a   : > { %v5236_v40 = vmul.f32 %v5235_v59, %v5211_v57  ;;  %7007 = vst [vmem:[%s8053_s16 + $0x3b0] sm:$0xff] %v6857_v52  ;;  %v5326_v21 = vadd.f32 0.05243302, %v5325_v55  ;;  %v5361_v8 = vmul.f32 2.1237322e-06, %v12438_v3  ;;  %v5251_v27 = vmul.f32 %v5250_v61, %v12324_v41 }
 0x52b   : > { %v5290_v10 = vadd.f32 1.1283791, %v5289_v38  ;;  %7584 = vrcp.f32 %v12442_v63  ;;  %vm5267_vm0 = vweird.f32 %v5261_v20  ;;  %v5336_v57 = vmul.f32 %v5335_v25, %v12398_v29 }
 0x52c   : > { %v7252_v53 = vclamps-f32 %v5236_v40, 1.0  ;;  %v5327_v16 = vmul.f32 %v5326_v21, %v12398_v29  ;;  %v5362_v56 = vadd.f32 0.00028619796, %v5361_v8  ;;  %vm12453_vm1 = vcmp.eq.f32.partialorder %v5271_v46, 8.507059e+37 }
 0x52d   : > { %v7583_v15 = vpop.eup %7582  ;;  %v5274_v62 = vor.u32 1.1754944e-38, %v5273_v54  ;;  %v5337_v43 = vadd.f32 0.112945676, %v5336_v57  ;;  %v5372_v26 = vmul.f32 3.8918573e-05, %v12438_v3  ;;  %vm5307_vm3 = vweird.f32 %v12442_v63 }
 0x52e   : > { %v6558_v39 = vmul.f32 0.5, %v7252_v53  ;;  %v5263_v45 = vmul.f32 %v7583_v15, %v5261_v20  ;;  %vm5268_vm2 = vweird.f32 %v7583_v15  ;;  %v5328_v41 = vadd.f32 0.18741608, %v5327_v16 }
 0x52f   : > { %v5363_v34 = vmul.f32 %v5362_v56, %v12438_v3  ;;  %v12460_v60 = vmul.f32 0.70710677, %v12451_v49  ;;  %v5311_v23 = vand.u32 2147483647, %v12442_v63  ;;  %v5338_v19 = vmul.f32 %v5337_v43, %v12398_v29  ;;  %vm12473_vm4 = vmor %vm5267_vm0, %vm5268_vm2 }
 0x530   : > { %v6708_v48 = vadd.f32 0.5, %v6558_v39  ;;  %v5264_v13 = vsub.f32 1.0, %v5263_v45  ;;  %v5373_v37 = vadd.f32 0.001143296, %v5372_v26  ;;  %v5313_v47 = vand.u32 2147483648, %v12442_v63  ;;  %v12513_v45 = vld [vmem:[%s7840_s24 + $0x3f0] sm:$0xff] }
 0x531   : > { %v5364_v44 = vadd.f32 0.0036580483, %v5363_v34  ;;  %v7585_v17 = vpop.eup %7584  ;;  %v5399_v33 = vmul.f32 %v12460_v60, %v12460_v60  ;;  %v5329_v58 = vmul.f32 %v5328_v41, %v12398_v29  ;;  %v12487_v31 = vmul.f32 0.70710677, %v12469_v32 }
 0x532   : > { %v6858_v12 = vmul.f32 %v6708_v48, %v12251_v0  ;;  %v5265_v11 = vmul.f32 %v7583_v15, %v5264_v13  ;;  %v5303_v6 = vmul.f32 %v7585_v17, %v12442_v63  ;;  %v5339_v0 = vadd.f32 0.4994258, %v5338_v19 }
 0x533   : > { %v5365_v18 = vmul.f32 %v5364_v44, %v12438_v3  ;;  %v5374_v5 = vmul.f32 %v5373_v37, %v12438_v3  ;;  %v12483_v51 = vmin.f32 %v5399_v33, 16.0  ;;  %vm5308_vm5 = vweird.f32 %v7585_v17 }
 0x534   : > { %7008 = vst [vmem:[%s8053_s16 + $0x3b8] sm:$0xff] %v6858_v12  ;;  %v5266_v4 = vadd.f32 %v7583_v15, %v5265_v11  ;;  %v5304_v20 = vsub.f32 1.0, %v5303_v6  ;;  %v5340_v2 = vmul.f32 %v5339_v0, %v12398_v29  ;;  %vm12499_vm6 = vmor %vm5307_vm3, %vm5308_vm5  ;;  %v5314_v40 = vor.u32 1.1754944e-38, %v5313_v47 }
 0x535   : > { %v5366_v61 = vadd.f32 0.05243302, %v5365_v18  ;;  %v5375_v36 = vadd.f32 0.014752088, %v5374_v5  ;;  %v5401_v38 = vmul.f32 2.1237322e-06, %v12483_v51  ;;  %v5291_v21 = vmul.f32 %v5290_v10, %v12327_v42 }
 0x536   : > { %v5270_v30 = vsel %vm12473_vm4, %v7583_v15, %v5266_v4  ;;  %v5305_v52 = vmul.f32 %v7585_v17, %v5304_v20  ;;  %v12494_v59 = vadd.f32 1.0, %v5340_v2  ;;  %v5412_v46 = vmul.f32 3.8918573e-05, %v12483_v51 }
 0x537   : > { %v5275_v50 = vsel %vm12453_vm1, %v5274_v62, %v5270_v30  ;;  %v5376_v54 = vmul.f32 %v5375_v36, %v12438_v3  ;;  %v5402_v25 = vadd.f32 0.00028619796, %v5401_v38  ;;  %vm5312_vm7 = vcmp.eq.f32.partialorder %v5311_v23, 8.507059e+37 }
 0x538   : > { %v5276_v55 = vmul.f32 %v5275_v50, %v5251_v27  ;;  %v5306_v8 = vadd.f32 %v7585_v17, %v5305_v52  ;;  %7586 = vrcp.f32 %v12494_v59  ;;  %v5330_v15 = vadd.f32 1.1283791, %v5329_v58 }
 0x539   : > { %v5377_v27 = vadd.f32 0.112945676, %v5376_v54  ;;  %v5439_v63 = vmul.f32 %v12487_v31, %v12487_v31  ;;  %v5367_v57 = vmul.f32 %v5366_v61, %v12438_v3  ;;  %v5403_v56 = vmul.f32 %v5402_v25, %v12483_v51 }
 0x53a   : > { %v7253_v53 = vclamps-f32 %v5276_v55, 1.0  ;;  %v5310_v16 = vsel %vm12499_vm6, %v7585_v17, %v5306_v8  ;;  %v5413_v39 = vadd.f32 0.001143296, %v5412_v46  ;;  %vm5347_vm8 = vweird.f32 %v12494_v59 }
 0x53b   : > { %v5315_v10 = vsel %vm5312_vm7, %v5314_v40, %v5310_v16  ;;  %v5351_v14 = vand.u32 2147483647, %v12494_v59  ;;  %v5378_v41 = vmul.f32 %v5377_v27, %v12438_v3  ;;  %v5404_v43 = vadd.f32 0.0036580483, %v5403_v56 }
 0x53c   : > { %v6559_v42 = vmul.f32 0.5, %v7253_v53  ;;  %v5316_v62 = vmul.f32 %v5315_v10, %v5291_v21  ;;  %v5414_v34 = vmul.f32 %v5413_v39, %v12483_v51  ;;  %v5353_v13 = vand.u32 2147483648, %v12494_v59 }
 0x53d   : > { %v12520_v26 = vmin.f32 %v5439_v63, 16.0  ;;  %v12523_v23 = vmul.f32 0.70710677, %v12513_v45  ;;  %v5379_v17 = vadd.f32 0.4994258, %v5378_v41  ;;  %v5405_v12 = vmul.f32 %v5404_v43, %v12483_v51 }
 0x53e   : > { %v6709_v48 = vadd.f32 0.5, %v6559_v42  ;;  %v7587_v19 = vpop.eup %7586  ;;  %v7254_v44 = vclamps-f32 %v5316_v62, 1.0  ;;  %v5415_v11 = vadd.f32 0.014752088, %v5414_v34  ;;  %v5368_v22 = vadd.f32 0.18741608, %v5367_v57 }
 0x53f   : > { %v5343_v33 = vmul.f32 %v7587_v19, %v12494_v59  ;;  %vm5348_vm9 = vweird.f32 %v7587_v19  ;;  %v5380_v47 = vmul.f32 %v5379_v17, %v12438_v3  ;;  %v5406_v58 = vadd.f32 0.05243302, %v5405_v12 }
 0x540   : > { %v6859_v37 = vmul.f32 %v6709_v48, %v12308_v35  ;;  %v6560_v6 = vmul.f32 0.5, %v7254_v44  ;;  %v5416_v0 = vmul.f32 %v5415_v11, %v12483_v51  ;;  %v5441_v18 = vmul.f32 2.1237322e-06, %v12520_v26  ;;  %vm12541_vm10 = vmor %vm5347_vm8, %vm5348_vm9 }
 0x541   : > { %v5344_v4 = vsub.f32 1.0, %v5343_v33  ;;  %v5452_v5 = vmul.f32 3.8918573e-05, %v12520_v26  ;;  %v5479_v20 = vmul.f32 %v12523_v23, %v12523_v23  ;;  %v5331_v2 = vmul.f32 %v5330_v15, %v12369_v9  ;;  %v12556_v15 = vld [vmem:[%s7840_s24 + $0x3f8] sm:$0xff] }
 0x542   : > { %7009 = vst [vmem:[%s8053_s16 + $0x3c0] sm:$0xff] %v6859_v37  ;;  %v6710_v35 = vadd.f32 0.5, %v6560_v6  ;;  %v5381_v30 = vadd.f32 1.0, %v5380_v47  ;;  %v5417_v61 = vadd.f32 0.112945676, %v5416_v0  ;;  %v5369_v38 = vmul.f32 %v5368_v22, %v12438_v3 }
 0x543   : > { %v5345_v36 = vmul.f32 %v7587_v19, %v5344_v4  ;;  %v5442_v50 = vadd.f32 0.00028619796, %v5441_v18  ;;  %v5453_v52 = vadd.f32 0.001143296, %v5452_v5  ;;  %v5354_v29 = vor.u32 1.1754944e-38, %v5353_v13 }
 0x544   : > { %v6860_v46 = vmul.f32 %v6710_v35, %v12311_v7  ;;  %7588 = vrcp.f32 %v5381_v30  ;;  %v12545_v9 = vmin.f32 %v5479_v20, 16.0  ;;  %vm5352_vm11 = vcmp.eq.f32.partialorder %v5351_v14, 8.507059e+37 }
 0x545   : > { %v5346_v40 = vadd.f32 %v7587_v19, %v5345_v36  ;;  %v5407_v3 = vmul.f32 %v5406_v58, %v12483_v51  ;;  %v5418_v54 = vmul.f32 %v5417_v61, %v12483_v51  ;;  %v5443_v7 = vmul.f32 %v5442_v50, %v12520_v26 }
 0x546   : > { %7010 = vst [vmem:[%s8053_s16 + $0x3c8] sm:$0xff] %v6860_v46  ;;  %v5454_v59 = vmul.f32 %v5453_v52, %v12520_v26  ;;  %v5481_v25 = vmul.f32 2.1237322e-06, %v12545_v9  ;;  %v5370_v8 = vadd.f32 1.1283791, %v5369_v38  ;;  %vm5387_vm12 = vweird.f32 %v5381_v30  ;;  %v12586_v46 = vld [vmem:[%s7840_s24 + $0x400] sm:$0xff] }
 0x547   : > { %v5350_v21 = vsel %vm12541_vm10, %v7587_v19, %v5346_v40  ;;  %v5419_v53 = vadd.f32 0.4994258, %v5418_v54  ;;  %v5444_v63 = vadd.f32 0.0036580483, %v5443_v7  ;;  %v5408_v39 = vadd.f32 0.18741608, %v5407_v3 }
 0x548   : > { %v5355_v27 = vsel %vm5352_vm11, %v5354_v29, %v5350_v21  ;;  %v5455_v16 = vadd.f32 0.014752088, %v5454_v59  ;;  %v5482_v57 = vadd.f32 0.00028619796, %v5481_v25  ;;  %v5492_v10 = vmul.f32 3.8918573e-05, %v12545_v9 }
 0x549   : > { %v5356_v56 = vmul.f32 %v5355_v27, %v5331_v2  ;;  %v5420_v42 = vmul.f32 %v5419_v53, %v12483_v51  ;;  %v5445_v62 = vmul.f32 %v5444_v63, %v12520_v26  ;;  %v12564_v34 = vmul.f32 0.70710677, %v12556_v15 }
 0x54a   : > { %v7589_v14 = vpop.eup %7588  ;;  %v5456_v41 = vmul.f32 %v5455_v16, %v12520_v26  ;;  %v5483_v43 = vmul.f32 %v5482_v57, %v12545_v9  ;;  %v5391_v19 = vand.u32 2147483647, %v5381_v30  ;;  %v5393_v44 = vand.u32 2147483648, %v5381_v30 }
 0x54b   : > { %v7255_v48 = vclamps-f32 %v5356_v56, 1.0  ;;  %v5383_v13 = vmul.f32 %v7589_v14, %v5381_v30  ;;  %vm5388_vm13 = vweird.f32 %v7589_v14  ;;  %v5421_v17 = vadd.f32 1.0, %v5420_v42 }
 0x54c   : > { %v5446_v12 = vadd.f32 0.05243302, %v5445_v62  ;;  %v5457_v11 = vadd.f32 0.112945676, %v5456_v41  ;;  %v5484_v22 = vadd.f32 0.0036580483, %v5483_v43  ;;  %v5371_v47 = vmul.f32 %v5370_v8, %v12418_v24  ;;  %vm12574_vm14 = vmor %vm5387_vm12, %vm5388_vm13 }
 0x54d   : > { %v6561_v37 = vmul.f32 0.5, %v7255_v48  ;;  %v5384_v33 = vsub.f32 1.0, %v5383_v13  ;;  %v5493_v6 = vadd.f32 0.001143296, %v5492_v10  ;;  %v5409_v58 = vmul.f32 %v5408_v39, %v12483_v51 }
 0x54e   : > { %7590 = vrcp.f32 %v5421_v17  ;;  %v5519_v0 = vmul.f32 %v12564_v34, %v12564_v34  ;;  %v5447_v5 = vmul.f32 %v5446_v12, %v12520_v26  ;;  %v5458_v20 = vmul.f32 %v5457_v11, %v12520_v26 }
 0x54f   : > { %v6711_v4 = vadd.f32 0.5, %v6561_v37  ;;  %v5385_v18 = vmul.f32 %v7589_v14, %v5384_v33  ;;  %vm12578_vm15 = vcmp.eq.f32.partialorder %v5391_v19, 8.507059e+37  ;;  %v5394_v51 = vor.u32 1.1754944e-38, %v5393_v44 }
 0x550   : > { %v5485_v2 = vmul.f32 %v5484_v22, %v12545_v9  ;;  %v5494_v61 = vmul.f32 %v5493_v6, %v12545_v9  ;;  %v5448_v50 = vadd.f32 0.18741608, %v5447_v5  ;;  %v5459_v52 = vadd.f32 0.4994258, %v5458_v20 }
 0x551   : > { %v6861_v36 = vmul.f32 %v6711_v4, %v12361_v1  ;;  %v5386_v38 = vadd.f32 %v7589_v14, %v5385_v18  ;;  %v12588_v29 = vmin.f32 %v5519_v0, 16.0  ;;  %v5410_v3 = vadd.f32 1.1283791, %v5409_v58 }
 0x552   : > { %v5486_v30 = vadd.f32 0.05243302, %v5485_v2  ;;  %v5495_v55 = vadd.f32 0.014752088, %v5494_v61  ;;  %v5431_v54 = vand.u32 2147483647, %v5421_v17  ;;  %v5460_v7 = vmul.f32 %v5459_v52, %v12520_v26 }
 0x553   : > { %7011 = vst [vmem:[%s8053_s16 + $0x3d0] sm:$0xff] %v6861_v36  ;;  %v5390_v40 = vsel %vm12574_vm14, %v7589_v14, %v5386_v38  ;;  %v5521_v21 = vmul.f32 2.1237322e-06, %v12588_v29  ;;  %v12599_v8 = vmul.f32 0.70710677, %v12586_v46  ;;  %vm5427_vm0 = vweird.f32 %v5421_v17 }
 0x554   : > { %v7591_v59 = vpop.eup %7590  ;;  %v5395_v1 = vsel %vm12578_vm15, %v5394_v51, %v5390_v40  ;;  %v5496_v25 = vmul.f32 %v5495_v55, %v12545_v9  ;;  %v5487_v63 = vmul.f32 %v5486_v30, %v12545_v9  ;;  %v5433_v16 = vand.u32 2147483648, %v5421_v17 }
 0x555   : > { %v5396_v53 = vmul.f32 %v5395_v1, %v5371_v47  ;;  %v5423_v27 = vmul.f32 %v7591_v59, %v5421_v17  ;;  %v5449_v57 = vmul.f32 %v5448_v50, %v12520_v26  ;;  %v5461_v56 = vadd.f32 1.0, %v5460_v7 }
 0x556   : > { %v5497_v39 = vadd.f32 0.112945676, %v5496_v25  ;;  %vm5428_vm1 = vweird.f32 %v7591_v59  ;;  %v5522_v14 = vadd.f32 0.00028619796, %v5521_v21  ;;  %v5411_v62 = vmul.f32 %v5410_v3, %v12460_v60 }
 0x557   : > { %v7256_v42 = vclamps-f32 %v5396_v53, 1.0  ;;  %v5424_v10 = vsub.f32 1.0, %v5423_v27  ;;  %vm12604_vm2 = vcmp.eq.f32.partialorder %v5431_v54, 8.507059e+37  ;;  %7592 = vrcp.f32 %v5461_v56  ;;  %vm12612_vm3 = vmor %vm5427_vm0, %vm5428_vm1  ;;  %v12643_v27 = vld [vmem:[%s7840_s24 + $0x408] sm:$0xff] }
 0x558   : > { %v5559_v43 = vmul.f32 %v12599_v8, %v12599_v8  ;;  %v5488_v19 = vadd.f32 0.18741608, %v5487_v63  ;;  %v5498_v26 = vmul.f32 %v5497_v39, %v12545_v9  ;;  %v5434_v12 = vor.u32 1.1754944e-38, %v5433_v16  ;;  %v12646_v63 = vld [vmem:[%s7840_s24 + $0x410] sm:$0xff] }
 0x559   : > { %v6562_v48 = vmul.f32 0.5, %v7256_v42  ;;  %v5425_v13 = vmul.f32 %v7591_v59, %v5424_v10  ;;  %v5450_v60 = vadd.f32 1.1283791, %v5449_v57  ;;  %v5523_v11 = vmul.f32 %v5522_v14, %v12588_v29 }
 0x55a   : > { %v5532_v37 = vmul.f32 3.8918573e-05, %v12588_v29  ;;  %v5471_v6 = vand.u32 2147483647, %v5461_v56  ;;  %v5499_v47 = vadd.f32 0.4994258, %v5498_v26  ;;  %v5489_v20 = vmul.f32 %v5488_v19, %v12545_v9 }
 0x55b   : > { %v6712_v33 = vadd.f32 0.5, %v6562_v48  ;;  %v5426_v22 = vadd.f32 %v7591_v59, %v5425_v13  ;;  %v5473_v58 = vand.u32 2147483648, %v5461_v56  ;;  %v5524_v0 = vadd.f32 0.0036580483, %v5523_v11 }
 0x55c   : > { %v5533_v4 = vadd.f32 0.001143296, %v5532_v37  ;;  %v12618_v18 = vmin.f32 %v5559_v43, 16.0  ;;  %v5500_v35 = vmul.f32 %v5499_v47, %v12545_v9  ;;  %vm5467_vm4 = vweird.f32 %v5461_v56 }
 0x55d   : > { %v6862_v17 = vmul.f32 %v6712_v33, %v12403_v28  ;;  %v5430_v5 = vsel %vm12612_vm3, %v7591_v59, %v5426_v22  ;;  %v7593_v24 = vpop.eup %7592  ;;  %v5525_v2 = vmul.f32 %v5524_v0, %v12588_v29  ;;  %v5451_v28 = vmul.f32 %v5450_v60, %v12487_v31 }
 0x55e   : > { %v5435_v51 = vsel %vm12604_vm2, %v5434_v12, %v5430_v5  ;;  %v5534_v61 = vmul.f32 %v5533_v4, %v12588_v29  ;;  %v5561_v36 = vmul.f32 2.1237322e-06, %v12618_v18  ;;  %v5463_v50 = vmul.f32 %v7593_v24, %v5461_v56 }
 0x55f   : > { %7012 = vst [vmem:[%s8053_s16 + $0x3d8] sm:$0xff] %v6862_v17  ;;  %v5436_v38 = vmul.f32 %v5435_v51, %v5411_v62  ;;  %v12632_v52 = vadd.f32 1.0, %v5500_v35  ;;  %v5526_v9 = vadd.f32 0.05243302, %v5525_v2  ;;  %vm5468_vm5 = vweird.f32 %v7593_v24 }
 0x560   : > { %v5535_v30 = vadd.f32 0.014752088, %v5534_v61  ;;  %v5562_v55 = vadd.f32 0.00028619796, %v5561_v36  ;;  %v5464_v3 = vsub.f32 1.0, %v5463_v50  ;;  %vm12635_vm6 = vcmp.eq.f32.partialorder %v5471_v6, 8.507059e+37  ;;  %vm12649_vm7 = vmor %vm5467_vm4, %vm5468_vm5 }
 0x561   : > { %v7257_v40 = vclamps-f32 %v5436_v38, 1.0  ;;  %7594 = vrcp.f32 %v12632_v52  ;;  %v5474_v7 = vor.u32 1.1754944e-38, %v5473_v58  ;;  %v5490_v31 = vadd.f32 1.1283791, %v5489_v20 }
 0x562   : > { %v5536_v59 = vmul.f32 %v5535_v30, %v12588_v29  ;;  %v5465_v25 = vmul.f32 %v7593_v24, %v5464_v3  ;;  %v5563_v21 = vmul.f32 %v5562_v55, %v12618_v18  ;;  %v5572_v53 = vmul.f32 3.8918573e-05, %v12618_v18 }
 0x563   : > { %v6563_v1 = vmul.f32 0.5, %v7257_v40  ;;  %vm5507_vm8 = vweird.f32 %v12632_v52  ;;  %v5513_v57 = vand.u32 2147483648, %v12632_v52  ;;  %v5527_v39 = vmul.f32 %v5526_v9, %v12588_v29 }
 0x564   : > { %v5537_v42 = vadd.f32 0.112945676, %v5536_v59  ;;  %v5466_v14 = vadd.f32 %v7593_v24, %v5465_v25  ;;  %v5564_v62 = vadd.f32 0.0036580483, %v5563_v21  ;;  %v5573_v41 = vadd.f32 0.001143296, %v5572_v53 }
 0x565   : > { %v6713_v10 = vadd.f32 0.5, %v6563_v1  ;;  %v5511_v43 = vand.u32 2147483647, %v12632_v52  ;;  %v12659_v48 = vmul.f32 0.70710677, %v12643_v27  ;;  %v5514_v33 = vor.u32 1.1754944e-38, %v5513_v57 }
 0x566   : > { %v5538_v56 = vmul.f32 %v5537_v42, %v12588_v29  ;;  %v12662_v13 = vmul.f32 0.70710677, %v12646_v63  ;;  %v5470_v44 = vsel %vm12649_vm7, %v7593_v24, %v5466_v14  ;;  %v5565_v12 = vmul.f32 %v5564_v62, %v12618_v18 }
 0x567   : > { %v7595_v19 = vpop.eup %7594  ;;  %v6863_v26 = vmul.f32 %v6713_v10, %v12451_v49  ;;  %v5574_v60 = vmul.f32 %v5573_v41, %v12618_v18  ;;  %v5475_v11 = vsel %vm12635_vm6, %v5474_v7, %v5470_v44  ;;  %v5528_v22 = vadd.f32 0.18741608, %v5527_v39  ;;  %v12696_v7 = vld [vmem:[%s7840_s24 + $0x418] sm:$0xff] }
 0x568   : > { %v5503_v37 = vmul.f32 %v7595_v19, %v12632_v52  ;;  %v5476_v6 = vmul.f32 %v5475_v11, %v5451_v28  ;;  %v5539_v47 = vadd.f32 0.4994258, %v5538_v56  ;;  %v5566_v58 = vadd.f32 0.05243302, %v5565_v12 }
 0x569   : > { %7013 = vst [vmem:[%s8053_s16 + $0x3e0] sm:$0xff] %v6863_v26  ;;  %v5599_v49 = vmul.f32 %v12659_v48, %v12659_v48  ;;  %vm5508_vm9 = vweird.f32 %v7595_v19  ;;  %v5575_v4 = vadd.f32 0.014752088, %v5574_v60  ;;  %v5639_v17 = vmul.f32 %v12662_v13, %v12662_v13 }
 0x56a   : > { %v5504_v0 = vsub.f32 1.0, %v5503_v37  ;;  %v7258_v5 = vclamps-f32 %v5476_v6, 1.0  ;;  %v5540_v20 = vmul.f32 %v5539_v47, %v12588_v29  ;;  %v5567_v35 = vmul.f32 %v5566_v58, %v12618_v18  ;;  %vm12687_vm10 = vmor %vm5507_vm8, %vm5508_vm9 }
 0x56b   : > { %v12679_v24 = vmin.f32 %v5599_v49, 16.0  ;;  %v5529_v2 = vmul.f32 %v5528_v22, %v12588_v29  ;;  %v5576_v61 = vmul.f32 %v5575_v4, %v12618_v18  ;;  %v12683_v36 = vmin.f32 %v5639_v17, 16.0 }
 0x56c   : > { %v5505_v51 = vmul.f32 %v7595_v19, %v5504_v0  ;;  %v6564_v38 = vmul.f32 0.5, %v7258_v5  ;;  %v5541_v50 = vadd.f32 1.0, %v5540_v20  ;;  %v5568_v9 = vadd.f32 0.18741608, %v5567_v35 }
 0x56d   : > { %v5601_v30 = vmul.f32 2.1237322e-06, %v12679_v24  ;;  %v5491_v55 = vmul.f32 %v5490_v31, %v12523_v23  ;;  %vm5512_vm11 = vcmp.eq.f32.partialorder %v5511_v43, 8.507059e+37  ;;  %v5577_v29 = vadd.f32 0.112945676, %v5576_v61 }
 0x56e   : > { %v5506_v40 = vadd.f32 %v7595_v19, %v5505_v51  ;;  %v6714_v3 = vadd.f32 0.5, %v6564_v38  ;;  %7596 = vrcp.f32 %v5541_v50  ;;  %v5612_v54 = vmul.f32 3.8918573e-05, %v12679_v24 }
 0x56f   : > { %v5641_v52 = vmul.f32 2.1237322e-06, %v12683_v36  ;;  %v5530_v1 = vadd.f32 1.1283791, %v5529_v2  ;;  %v5578_v25 = vmul.f32 %v5577_v29, %v12618_v18  ;;  %v5569_v21 = vmul.f32 %v5568_v9, %v12618_v18 }
 0x570   : > { %v5510_v59 = vsel %vm12687_vm10, %v7595_v19, %v5506_v40  ;;  %v6864_v23 = vmul.f32 %v6714_v3, %v12469_v32  ;;  %v5602_v53 = vadd.f32 0.00028619796, %v5601_v30  ;;  %v5551_v57 = vand.u32 2147483647, %v5541_v50  ;;  %v12738_v3 = vld [vmem:[%s7840_s24 + $0x420] sm:$0xff] }
 0x571   : > { %v5515_v31 = vsel %vm5512_vm11, %v5514_v33, %v5510_v59  ;;  %v5579_v39 = vadd.f32 0.4994258, %v5578_v25  ;;  %v12704_v42 = vmul.f32 0.70710677, %v12696_v7  ;;  %vm5547_vm12 = vweird.f32 %v5541_v50 }
 0x572   : > { %v5516_v16 = vmul.f32 %v5515_v31, %v5491_v55  ;;  %7014 = vst [vmem:[%s8053_s16 + $0x3e8] sm:$0xff] %v6864_v23  ;;  %v5603_v10 = vmul.f32 %v5602_v53, %v12679_v24  ;;  %v5613_v14 = vadd.f32 0.001143296, %v5612_v54  ;;  %v5642_v62 = vadd.f32 0.00028619796, %v5641_v52 }
 0x573   : > { %v5553_v43 = vand.u32 2147483648, %v5541_v50  ;;  %v5580_v32 = vmul.f32 %v5579_v39, %v12618_v18  ;;  %v5652_v56 = vmul.f32 3.8918573e-05, %v12683_v36  ;;  %v5570_v26 = vadd.f32 1.1283791, %v5569_v21 }
 0x574   : > { %v7259_v41 = vclamps-f32 %v5516_v16, 1.0  ;;  %v7597_v19 = vpop.eup %7596  ;;  %v5604_v44 = vadd.f32 0.0036580483, %v5603_v10  ;;  %v5614_v12 = vmul.f32 %v5613_v14, %v12679_v24  ;;  %v5643_v60 = vmul.f32 %v5642_v62, %v12683_v36 }
 0x575   : > { %v5543_v37 = vmul.f32 %v7597_v19, %v5541_v50  ;;  %v12712_v33 = vadd.f32 1.0, %v5580_v32  ;;  %v5679_v22 = vmul.f32 %v12704_v42, %v12704_v42  ;;  %v5653_v58 = vadd.f32 0.001143296, %v5652_v56 }
 0x576   : > { %v6565_v11 = vmul.f32 0.5, %v7259_v41  ;;  %v5605_v6 = vmul.f32 %v5604_v44, %v12679_v24  ;;  %v5615_v47 = vadd.f32 0.014752088, %v5614_v12  ;;  %v5644_v18 = vadd.f32 0.0036580483, %v5643_v60 }
 0x577   : > { %v5544_v0 = vsub.f32 1.0, %v5543_v37  ;;  %vm5548_vm13 = vweird.f32 %v7597_v19  ;;  %7598 = vrcp.f32 %v12712_v33  ;;  %v5531_v4 = vmul.f32 %v5530_v1, %v12564_v34 }
 0x578   : > { %v6715_v49 = vadd.f32 0.5, %v6565_v11  ;;  %vm12719_vm14 = vcmp.eq.f32.partialorder %v5551_v57, 8.507059e+37  ;;  %v5606_v5 = vadd.f32 0.05243302, %v5605_v6  ;;  %v5616_v20 = vmul.f32 %v5615_v47, %v12679_v24  ;;  %vm12728_vm15 = vmor %vm5547_vm12, %vm5548_vm13 }
 0x579   : > { %v5545_v51 = vmul.f32 %v7597_v19, %v5544_v0  ;;  %v5645_v2 = vmul.f32 %v5644_v18, %v12683_v36  ;;  %v5654_v61 = vmul.f32 %v5653_v58, %v12683_v36  ;;  %v5554_v34 = vor.u32 1.1754944e-38, %v5553_v43 }
 0x57a   : > { %v6865_v35 = vmul.f32 %v6715_v49, %v12513_v45  ;;  %v5607_v28 = vmul.f32 %v5606_v5, %v12679_v24  ;;  %v5617_v9 = vadd.f32 0.112945676, %v5616_v20  ;;  %v12733_v30 = vmin.f32 %v5679_v22, 16.0 }
 0x57b   : > { %v5546_v55 = vadd.f32 %v7597_v19, %v5545_v51  ;;  %v5571_v45 = vmul.f32 %v5570_v26, %v12599_v8  ;;  %v5646_v40 = vadd.f32 0.05243302, %v5645_v2  ;;  %v5655_v29 = vadd.f32 0.014752088, %v5654_v61 }
 0x57c   : > { %7015 = vst [vmem:[%s8053_s16 + $0x3f0] sm:$0xff] %v6865_v35  ;;  %vm5587_vm0 = vweird.f32 %v12712_v33  ;;  %v5608_v50 = vadd.f32 0.18741608, %v5607_v28  ;;  %v5618_v54 = vmul.f32 %v5617_v9, %v12679_v24  ;;  %v5681_v52 = vmul.f32 2.1237322e-06, %v12733_v30 }
 0x57d   : > { %v7599_v59 = vpop.eup %7598  ;;  %v5550_v1 = vsel %vm12728_vm15, %v7597_v19, %v5546_v55  ;;  %v5591_v25 = vand.u32 2147483647, %v12712_v33  ;;  %v5647_v23 = vmul.f32 %v5646_v40, %v12683_v36  ;;  %v5656_v8 = vmul.f32 %v5655_v29, %v12683_v36 }
 0x57e   : > { %v5555_v31 = vsel %vm12719_vm14, %v5554_v34, %v5550_v1  ;;  %v5583_v21 = vmul.f32 %v7599_v59, %v12712_v33  ;;  %v5692_v53 = vmul.f32 3.8918573e-05, %v12733_v30  ;;  %v12753_v16 = vmul.f32 0.70710677, %v12738_v3 }
 0x57f   : > { %v5556_v57 = vmul.f32 %v5555_v31, %v5531_v4  ;;  %v5593_v39 = vand.u32 2147483648, %v12712_v33  ;;  %v5619_v10 = vadd.f32 0.4994258, %v5618_v54  ;;  %v5657_v14 = vadd.f32 0.112945676, %v5656_v8 }
 0x580   : > { %v5584_v62 = vsub.f32 1.0, %v5583_v21  ;;  %vm5588_vm1 = vweird.f32 %v7599_v59  ;;  %v5609_v41 = vmul.f32 %v5608_v50, %v12679_v24  ;;  %v5682_v43 = vadd.f32 0.00028619796, %v5681_v52 }
 0x581   : > { %v7260_v32 = vclamps-f32 %v5556_v57, 1.0  ;;  %v5620_v56 = vmul.f32 %v5619_v10, %v12679_v24  ;;  %v5648_v19 = vadd.f32 0.18741608, %v5647_v23  ;;  %v5658_v26 = vmul.f32 %v5657_v14, %v12683_v36  ;;  %vm12764_vm2 = vmor %vm5587_vm0, %vm5588_vm1 }
 0x582   : > { %v5585_v44 = vmul.f32 %v7599_v59, %v5584_v62  ;;  %v5683_v12 = vmul.f32 %v5682_v43, %v12733_v30  ;;  %v5693_v60 = vadd.f32 0.001143296, %v5692_v53  ;;  %v5719_v11 = vmul.f32 %v12753_v16, %v12753_v16 }
 0x583   : > { %v6566_v37 = vmul.f32 0.5, %v7260_v32  ;;  %v5594_v6 = vor.u32 1.1754944e-38, %v5593_v39  ;;  %v5621_v47 = vadd.f32 1.0, %v5620_v56  ;;  %v5659_v24 = vadd.f32 0.4994258, %v5658_v26 }
 0x584   : > { %v5586_v18 = vadd.f32 %v7599_v59, %v5585_v44  ;;  %vm5592_vm3 = vcmp.eq.f32.partialorder %v5591_v25, 8.507059e+37  ;;  %v5684_v58 = vadd.f32 0.0036580483, %v5683_v12  ;;  %v5694_v49 = vmul.f32 %v5693_v60, %v12733_v30  ;;  %v12804_v44 = vld [vmem:[%s7840_s24 + $0x430] sm:$0xff] }
 0x585   : > { %v6716_v0 = vadd.f32 0.5, %v6566_v37  ;;  %v5610_v4 = vadd.f32 1.1283791, %v5609_v41  ;;  %7600 = vrcp.f32 %v5621_v47  ;;  %v5649_v33 = vmul.f32 %v5648_v19, %v12683_v36 }
 0x586   : > { %v5590_v17 = vsel %vm12764_vm2, %v7599_v59, %v5586_v18  ;;  %v5660_v5 = vmul.f32 %v5659_v24, %v12683_v36  ;;  %v12773_v20 = vmin.f32 %v5719_v11, 16.0  ;;  %v5631_v2 = vand.u32 2147483647, %v5621_v47  ;;  %v12786_v59 = vld [vmem:[%s7840_s24 + $0x428] sm:$0xff] }
 0x587   : > { %v6866_v35 = vmul.f32 %v6716_v0, %v12556_v15  ;;  %v5595_v51 = vsel %vm5592_vm3, %v5594_v6, %v5590_v17  ;;  %v5685_v61 = vmul.f32 %v5684_v58, %v12733_v30  ;;  %v5633_v34 = vand.u32 2147483648, %v5621_v47 }
 0x588   : > { %v5596_v38 = vmul.f32 %v5595_v51, %v5571_v45  ;;  %v12777_v28 = vadd.f32 1.0, %v5660_v5  ;;  %v5695_v9 = vadd.f32 0.014752088, %v5694_v49  ;;  %v5721_v40 = vmul.f32 2.1237322e-06, %v12773_v20 }
 0x589   : > { %7016 = vst [vmem:[%s8053_s16 + $0x3f8] sm:$0xff] %v6866_v35  ;;  %v5686_v55 = vadd.f32 0.05243302, %v5685_v61  ;;  %v5611_v36 = vmul.f32 %v5610_v4, %v12659_v48  ;;  %v5650_v50 = vadd.f32 1.1283791, %v5649_v33  ;;  %vm5627_vm4 = vweird.f32 %v5621_v47 }
 0x58a   : > { %v7261_v29 = vclamps-f32 %v5596_v38, 1.0  ;;  %7602 = vrcp.f32 %v12777_v28  ;;  %v5696_v45 = vmul.f32 %v5695_v9, %v12733_v30  ;;  %v5722_v52 = vadd.f32 0.00028619796, %v5721_v40 }
 0x58b   : > { %v7601_v15 = vpop.eup %7600  ;;  %v5687_v54 = vmul.f32 %v5686_v55, %v12733_v30  ;;  %vm12788_vm5 = vcmp.eq.f32.partialorder %v5631_v2, 8.507059e+37  ;;  %v5634_v8 = vor.u32 1.1754944e-38, %v5633_v34  ;;  %v5732_v39 = vmul.f32 3.8918573e-05, %v12773_v20 }
 0x58c   : > { %v6567_v1 = vmul.f32 0.5, %v7261_v29  ;;  %v5623_v25 = vmul.f32 %v7601_v15, %v5621_v47  ;;  %vm5628_vm6 = vweird.f32 %v7601_v15  ;;  %v5697_v31 = vadd.f32 0.112945676, %v5696_v45 }
 0x58d   : > { %v5688_v48 = vadd.f32 0.18741608, %v5687_v54  ;;  %v5723_v21 = vmul.f32 %v5722_v52, %v12773_v20  ;;  %v12795_v10 = vmul.f32 0.70710677, %v12786_v59  ;;  %vm5667_vm7 = vweird.f32 %v12777_v28  ;;  %vm12808_vm8 = vmor %vm5627_vm4, %vm5628_vm6 }
 0x58e   : > { %v6717_v53 = vadd.f32 0.5, %v6567_v1  ;;  %v5624_v57 = vsub.f32 1.0, %v5623_v25  ;;  %v5671_v14 = vand.u32 2147483647, %v12777_v28  ;;  %v5698_v62 = vmul.f32 %v5697_v31, %v12733_v30  ;;  %v12848_v25 = vld [vmem:[%s7840_s24 + $0x438] sm:$0xff] }
 0x58f   : > { %v5724_v41 = vadd.f32 0.0036580483, %v5723_v21  ;;  %v5733_v19 = vadd.f32 0.001143296, %v5732_v39  ;;  %v5759_v26 = vmul.f32 %v12795_v10, %v12795_v10  ;;  %v5673_v11 = vand.u32 2147483648, %v12777_v28 }
 0x590   : > { %v7603_v43 = vpop.eup %7602  ;;  %v6867_v32 = vmul.f32 %v6717_v53, %v12586_v46  ;;  %v5625_v56 = vmul.f32 %v7601_v15, %v5624_v57  ;;  %v5689_v37 = vmul.f32 %v5688_v48, %v12733_v30  ;;  %v5699_v46 = vadd.f32 0.4994258, %v5698_v62 }
 0x591   : > { %v5663_v60 = vmul.f32 %v7603_v43, %v12777_v28  ;;  %v5725_v6 = vmul.f32 %v5724_v41, %v12773_v20  ;;  %v5734_v24 = vmul.f32 %v5733_v19, %v12773_v20  ;;  %v12818_v18 = vmin.f32 %v5759_v26, 16.0 }
 0x592   : > { %7017 = vst [vmem:[%s8053_s16 + $0x400] sm:$0xff] %v6867_v32  ;;  %v5626_v22 = vadd.f32 %v7601_v15, %v5625_v56  ;;  %vm5668_vm9 = vweird.f32 %v7603_v43  ;;  %v5700_v58 = vmul.f32 %v5699_v46, %v12733_v30  ;;  %v12822_v49 = vmul.f32 0.70710677, %v12804_v44 }
 0x593   : > { %v5664_v47 = vsub.f32 1.0, %v5663_v60  ;;  %v5726_v4 = vadd.f32 0.05243302, %v5725_v6  ;;  %v5735_v17 = vadd.f32 0.014752088, %v5734_v24  ;;  %vm12834_vm10 = vmor %vm5667_vm7, %vm5668_vm9  ;;  %v5674_v38 = vor.u32 1.1754944e-38, %v5673_v11 }
 0x594   : > { %v5630_v0 = vsel %vm12808_vm8, %v7601_v15, %v5626_v22  ;;  %v5761_v33 = vmul.f32 2.1237322e-06, %v12818_v18  ;;  %v12829_v51 = vadd.f32 1.0, %v5700_v58  ;;  %v5772_v2 = vmul.f32 3.8918573e-05, %v12818_v18 }
 0x595   : > { %v5635_v5 = vsel %vm12788_vm5, %v5634_v8, %v5630_v0  ;;  %v5665_v35 = vmul.f32 %v7603_v43, %v5664_v47  ;;  %v5736_v34 = vmul.f32 %v5735_v17, %v12773_v20  ;;  %v5651_v55 = vmul.f32 %v5650_v50, %v12662_v13 }
 0x596   : > { %v5636_v61 = vmul.f32 %v5635_v5, %v5611_v36  ;;  %v5762_v9 = vadd.f32 0.00028619796, %v5761_v33  ;;  %vm5672_vm11 = vcmp.eq.f32.partialorder %v5671_v14, 8.507059e+37  ;;  %7604 = vrcp.f32 %v12829_v51 }
 0x597   : > { %v5666_v40 = vadd.f32 %v7603_v43, %v5665_v35  ;;  %v5690_v15 = vadd.f32 1.1283791, %v5689_v37  ;;  %v5737_v36 = vadd.f32 0.112945676, %v5736_v34  ;;  %v5799_v28 = vmul.f32 %v12822_v49, %v12822_v49 }
 0x598   : > { %v7262_v29 = vclamps-f32 %v5636_v61, 1.0  ;;  %v5727_v45 = vmul.f32 %v5726_v4, %v12773_v20  ;;  %v5763_v52 = vmul.f32 %v5762_v9, %v12818_v18  ;;  %v5773_v1 = vadd.f32 0.001143296, %v5772_v2 }
 0x599   : > { %v5670_v54 = vsel %vm12834_vm10, %v7603_v43, %v5666_v40  ;;  %vm5707_vm12 = vweird.f32 %v12829_v51  ;;  %v5711_v23 = vand.u32 2147483647, %v12829_v51  ;;  %v5738_v48 = vmul.f32 %v5737_v36, %v12773_v20 }
 0x59a   : > { %v6568_v13 = vmul.f32 0.5, %v7262_v29  ;;  %v5675_v50 = vsel %vm5672_vm11, %v5674_v38, %v5670_v54  ;;  %v5764_v31 = vadd.f32 0.0036580483, %v5763_v52  ;;  %v5774_v21 = vmul.f32 %v5773_v1, %v12818_v18 }
 0x59b   : > { %v5676_v8 = vmul.f32 %v5675_v50, %v5651_v55  ;;  %v5713_v57 = vand.u32 2147483648, %v12829_v51  ;;  %v12855_v39 = vmin.f32 %v5799_v28, 16.0  ;;  %v12858_v14 = vmul.f32 0.70710677, %v12848_v25 }
 0x59c   : > { %v6718_v53 = vadd.f32 0.5, %v6568_v13  ;;  %v7605_v62 = vpop.eup %7604  ;;  %v5739_v43 = vadd.f32 0.4994258, %v5738_v48  ;;  %v5765_v32 = vmul.f32 %v5764_v31, %v12818_v18  ;;  %v5775_v56 = vadd.f32 0.014752088, %v5774_v21 }
 0x59d   : > { %v7263_v41 = vclamps-f32 %v5676_v8, 1.0  ;;  %v5703_v26 = vmul.f32 %v7605_v62, %v12829_v51  ;;  %vm5708_vm13 = vweird.f32 %v7605_v62  ;;  %v5728_v12 = vadd.f32 0.18741608, %v5727_v45 }
 0x59e   : > { %v6868_v19 = vmul.f32 %v6718_v53, %v12643_v27  ;;  %v5740_v11 = vmul.f32 %v5739_v43, %v12773_v20  ;;  %v5766_v37 = vadd.f32 0.05243302, %v5765_v32  ;;  %v5776_v46 = vmul.f32 %v5775_v56, %v12818_v18  ;;  %vm12876_vm14 = vmor %vm5707_vm12, %vm5708_vm13 }
 0x59f   : > { %v6569_v60 = vmul.f32 0.5, %v7263_v41  ;;  %v5704_v22 = vsub.f32 1.0, %v5703_v26  ;;  %v5801_v6 = vmul.f32 2.1237322e-06, %v12855_v39  ;;  %v5812_v24 = vmul.f32 3.8918573e-05, %v12855_v39 }
 0x5a0   : > { %7018 = vst [vmem:[%s8053_s16 + $0x408] sm:$0xff] %v6868_v19  ;;  %v5839_v47 = vmul.f32 %v12858_v14, %v12858_v14  ;;  %v5691_v58 = vmul.f32 %v5690_v15, %v12704_v42  ;;  %v5741_v0 = vadd.f32 1.0, %v5740_v11  ;;  %v5777_v4 = vadd.f32 0.112945676, %v5776_v46  ;;  %v12891_v15 = vld [vmem:[%s7840_s24 + $0x440] sm:$0xff] }
 0x5a1   : > { %v6719_v27 = vadd.f32 0.5, %v6569_v60  ;;  %v5705_v17 = vmul.f32 %v7605_v62, %v5704_v22  ;;  %v5729_v33 = vmul.f32 %v5728_v12, %v12773_v20  ;;  %v5802_v5 = vadd.f32 0.00028619796, %v5801_v6 }
 0x5a2   : > { %v5813_v35 = vadd.f32 0.001143296, %v5812_v24  ;;  %v5714_v30 = vor.u32 1.1754944e-38, %v5713_v57  ;;  %7606 = vrcp.f32 %v5741_v0  ;;  %v12880_v42 = vmin.f32 %v5839_v47, 16.0 }
 0x5a3   : > { %v6869_v2 = vmul.f32 %v6719_v27, %v12646_v63  ;;  %v5706_v38 = vadd.f32 %v7605_v62, %v5705_v17  ;;  %vm5712_vm15 = vcmp.eq.f32.partialorder %v5711_v23, 8.507059e+37  ;;  %v5767_v20 = vmul.f32 %v5766_v37, %v12818_v18 }
 0x5a4   : > { %v5778_v34 = vmul.f32 %v5777_v4, %v12818_v18  ;;  %v5803_v63 = vmul.f32 %v5802_v5, %v12855_v39  ;;  %v5814_v51 = vmul.f32 %v5813_v35, %v12855_v39  ;;  %v5841_v9 = vmul.f32 2.1237322e-06, %v12880_v42 }
 0x5a5   : > { %7019 = vst [vmem:[%s8053_s16 + $0x410] sm:$0xff] %v6869_v2  ;;  %v5710_v55 = vsel %vm12876_vm14, %v7605_v62, %v5706_v38  ;;  %v5730_v40 = vadd.f32 1.1283791, %v5729_v33  ;;  %vm5747_vm0 = vweird.f32 %v5741_v0  ;;  %v5768_v1 = vadd.f32 0.18741608, %v5767_v20  ;;  %v12921_v2 = vld [vmem:[%s7840_s24 + $0x448] sm:$0xff] }
 0x5a6   : > { %v5779_v29 = vadd.f32 0.4994258, %v5778_v34  ;;  %v5715_v36 = vsel %vm5712_vm15, %v5714_v30, %v5710_v55  ;;  %v5804_v28 = vadd.f32 0.0036580483, %v5803_v63  ;;  %v5815_v54 = vadd.f32 0.014752088, %v5814_v51 }
 0x5a7   : > { %v5842_v45 = vadd.f32 0.00028619796, %v5841_v9  ;;  %v5716_v52 = vmul.f32 %v5715_v36, %v5691_v58  ;;  %v5852_v50 = vmul.f32 3.8918573e-05, %v12880_v42  ;;  %v12899_v21 = vmul.f32 0.70710677, %v12891_v15 }
 0x5a8   : > { %v5780_v13 = vmul.f32 %v5779_v29, %v12818_v18  ;;  %v7607_v23 = vpop.eup %7606  ;;  %v5805_v8 = vmul.f32 %v5804_v28, %v12855_v39  ;;  %v5816_v48 = vmul.f32 %v5815_v54, %v12855_v39  ;;  %v5751_v62 = vand.u32 2147483647, %v5741_v0 }
 0x5a9   : > { %v5843_v31 = vmul.f32 %v5842_v45, %v12880_v42  ;;  %v7264_v53 = vclamps-f32 %v5716_v52, 1.0  ;;  %v5743_v57 = vmul.f32 %v7607_v23, %v5741_v0  ;;  %v5753_v41 = vand.u32 2147483648, %v5741_v0 }
 0x5aa   : > { %vm5748_vm1 = vweird.f32 %v7607_v23  ;;  %v5781_v43 = vadd.f32 1.0, %v5780_v13  ;;  %v5806_v32 = vadd.f32 0.05243302, %v5805_v8  ;;  %v5817_v56 = vadd.f32 0.112945676, %v5816_v48 }
 0x5ab   : > { %v6570_v19 = vmul.f32 0.5, %v7264_v53  ;;  %v5744_v26 = vsub.f32 1.0, %v5743_v57  ;;  %v5844_v12 = vadd.f32 0.0036580483, %v5843_v31  ;;  %v5853_v60 = vadd.f32 0.001143296, %v5852_v50  ;;  %vm12909_vm2 = vmor %vm5747_vm0, %vm5748_vm1 }
 0x5ac   : > { %v5731_v11 = vmul.f32 %v5730_v40, %v12753_v16  ;;  %v5769_v37 = vmul.f32 %v5768_v1, %v12818_v18  ;;  %7608 = vrcp.f32 %v5781_v43  ;;  %v5879_v46 = vmul.f32 %v12899_v21, %v12899_v21 }
 0x5ad   : > { %v6720_v22 = vadd.f32 0.5, %v6570_v19  ;;  %v5745_v6 = vmul.f32 %v7607_v23, %v5744_v26  ;;  %v5807_v24 = vmul.f32 %v5806_v32, %v12855_v39  ;;  %v5818_v47 = vmul.f32 %v5817_v56, %v12855_v39 }
 0x5ae   : > { %vm12913_vm3 = vcmp.eq.f32.partialorder %v5751_v62, 8.507059e+37  ;;  %v5754_v18 = vor.u32 1.1754944e-38, %v5753_v41  ;;  %v5845_v58 = vmul.f32 %v5844_v12, %v12880_v42  ;;  %v5854_v4 = vmul.f32 %v5853_v60, %v12880_v42 }
 0x5af   : > { %v6870_v17 = vmul.f32 %v6720_v22, %v12696_v7  ;;  %v5746_v33 = vadd.f32 %v7607_v23, %v5745_v6  ;;  %v5808_v5 = vadd.f32 0.18741608, %v5807_v24  ;;  %v5819_v35 = vadd.f32 0.4994258, %v5818_v47 }
 0x5b0   : > { %v5846_v0 = vadd.f32 0.05243302, %v5845_v58  ;;  %v5855_v61 = vadd.f32 0.014752088, %v5854_v4  ;;  %v12923_v30 = vmin.f32 %v5879_v46, 16.0  ;;  %vm5787_vm4 = vweird.f32 %v5781_v43 }
 0x5b1   : > { %7020 = vst [vmem:[%s8053_s16 + $0x418] sm:$0xff] %v6870_v17  ;;  %v5750_v38 = vsel %vm12909_vm2, %v7607_v23, %v5746_v33  ;;  %v5770_v20 = vadd.f32 1.1283791, %v5769_v37  ;;  %v5791_v34 = vand.u32 2147483647, %v5781_v43  ;;  %v5820_v63 = vmul.f32 %v5819_v35, %v12855_v39 }
 0x5b2   : > { %v7609_v51 = vpop.eup %7608  ;;  %v5755_v7 = vsel %vm12913_vm3, %v5754_v18, %v5750_v38  ;;  %v5856_v9 = vmul.f32 %v5855_v61, %v12880_v42  ;;  %v5881_v55 = vmul.f32 2.1237322e-06, %v12923_v30  ;;  %v12934_v40 = vmul.f32 0.70710677, %v12921_v2 }
 0x5b3   : > { %v5756_v29 = vmul.f32 %v5755_v7, %v5731_v11  ;;  %v5783_v36 = vmul.f32 %v7609_v51, %v5781_v43  ;;  %v5847_v28 = vmul.f32 %v5846_v0, %v12880_v42  ;;  %v5793_v54 = vand.u32 2147483648, %v5781_v43 }
 0x5b4   : > { %v5809_v45 = vmul.f32 %v5808_v5, %v12855_v39  ;;  %v5821_v52 = vadd.f32 1.0, %v5820_v63  ;;  %v5857_v1 = vadd.f32 0.112945676, %v5856_v9  ;;  %vm5788_vm5 = vweird.f32 %v7609_v51 }
 0x5b5   : > { %v7265_v13 = vclamps-f32 %v5756_v29, 1.0  ;;  %v5784_v50 = vsub.f32 1.0, %v5783_v36  ;;  %v5882_v23 = vadd.f32 0.00028619796, %v5881_v55  ;;  %v5771_v8 = vmul.f32 %v5770_v20, %v12795_v10  ;;  %vm12947_vm7 = vmor %vm5787_vm4, %vm5788_vm5  ;;  %v12978_v36 = vld [vmem:[%s7840_s24 + $0x450] sm:$0xff] }
 0x5b6   : > { %vm12939_vm6 = vcmp.eq.f32.partialorder %v5791_v34, 8.507059e+37  ;;  %7610 = vrcp.f32 %v5821_v52  ;;  %v5919_v31 = vmul.f32 %v12934_v40, %v12934_v40  ;;  %v5848_v62 = vadd.f32 0.18741608, %v5847_v28  ;;  %v12981_v28 = vld [vmem:[%s7840_s24 + $0x458] sm:$0xff] }
 0x5b7   : > { %v6571_v53 = vmul.f32 0.5, %v7265_v13  ;;  %v5785_v57 = vmul.f32 %v7609_v51, %v5784_v50  ;;  %v5858_v39 = vmul.f32 %v5857_v1, %v12880_v42  ;;  %v5794_v32 = vor.u32 1.1754944e-38, %v5793_v54 }
 0x5b8   : > { %v5810_v10 = vadd.f32 1.1283791, %v5809_v45  ;;  %v5883_v56 = vmul.f32 %v5882_v23, %v12923_v30  ;;  %v5892_v19 = vmul.f32 3.8918573e-05, %v12923_v30  ;;  %v5831_v60 = vand.u32 2147483647, %v5821_v52 }
 0x5b9   : > { %v6721_v26 = vadd.f32 0.5, %v6571_v53  ;;  %v5786_v12 = vadd.f32 %v7609_v51, %v5785_v57  ;;  %v5859_v11 = vadd.f32 0.4994258, %v5858_v39  ;;  %v5833_v37 = vand.u32 2147483648, %v5821_v52 }
 0x5ba   : > { %v5884_v46 = vadd.f32 0.0036580483, %v5883_v56  ;;  %v5893_v22 = vadd.f32 0.001143296, %v5892_v19  ;;  %v12953_v6 = vmin.f32 %v5919_v31, 16.0  ;;  %v5849_v47 = vmul.f32 %v5848_v62, %v12880_v42 }
 0x5bb   : > { %v6871_v43 = vmul.f32 %v6721_v26, %v12738_v3  ;;  %v5790_v24 = vsel %vm12947_vm7, %v7609_v51, %v5786_v12  ;;  %v5860_v27 = vmul.f32 %v5859_v11, %v12880_v42  ;;  %v5811_v3 = vmul.f32 %v5810_v10, %v12822_v49 }
 0x5bc   : > { %v7611_v16 = vpop.eup %7610  ;;  %v5795_v18 = vsel %vm12939_vm6, %v5794_v32, %v5790_v24  ;;  %v5885_v58 = vmul.f32 %v5884_v46, %v12923_v30  ;;  %v5894_v4 = vmul.f32 %v5893_v22, %v12923_v30  ;;  %v5921_v17 = vmul.f32 2.1237322e-06, %v12953_v6 }
 0x5bd   : > { %7021 = vst [vmem:[%s8053_s16 + $0x420] sm:$0xff] %v6871_v43  ;;  %v5796_v33 = vmul.f32 %v5795_v18, %v5771_v8  ;;  %v5823_v5 = vmul.f32 %v7611_v16, %v5821_v52  ;;  %v12967_v35 = vadd.f32 1.0, %v5860_v27  ;;  %vm5827_vm8 = vweird.f32 %v5821_v52 }
 0x5be   : > { %v5886_v42 = vadd.f32 0.05243302, %v5885_v58  ;;  %v5895_v0 = vadd.f32 0.014752088, %v5894_v4  ;;  %v5922_v61 = vadd.f32 0.00028619796, %v5921_v17  ;;  %vm5828_vm9 = vweird.f32 %v7611_v16 }
 0x5bf   : > { %v7266_v38 = vclamps-f32 %v5796_v33, 1.0  ;;  %v5824_v20 = vsub.f32 1.0, %v5823_v5  ;;  %7612 = vrcp.f32 %v12967_v35  ;;  %vm12970_vm10 = vcmp.eq.f32.partialorder %v5831_v60, 8.507059e+37  ;;  %vm12984_vm11 = vmor %vm5827_vm8, %vm5828_vm9 }
 0x5c0   : > { %v5834_v63 = vor.u32 1.1754944e-38, %v5833_v37  ;;  %v5850_v49 = vadd.f32 1.1283791, %v5849_v47  ;;  %v5896_v51 = vmul.f32 %v5895_v0, %v12923_v30  ;;  %v5923_v55 = vmul.f32 %v5922_v61, %v12953_v6 }
 0x5c1   : > { %v6572_v7 = vmul.f32 0.5, %v7266_v38  ;;  %v5825_v9 = vmul.f32 %v7611_v16, %v5824_v20  ;;  %v5932_v29 = vmul.f32 3.8918573e-05, %v12953_v6  ;;  %vm5867_vm12 = vweird.f32 %v12967_v35 }
 0x5c2   : > { %v5873_v45 = vand.u32 2147483648, %v12967_v35  ;;  %v5887_v1 = vmul.f32 %v5886_v42, %v12923_v30  ;;  %v5897_v13 = vadd.f32 0.112945676, %v5896_v51  ;;  %v5924_v8 = vadd.f32 0.0036580483, %v5923_v55 }
 0x5c3   : > { %v6722_v50 = vadd.f32 0.5, %v6572_v7  ;;  %v5826_v23 = vadd.f32 %v7611_v16, %v5825_v9  ;;  %v5933_v48 = vadd.f32 0.001143296, %v5932_v29  ;;  %v5871_v31 = vand.u32 2147483647, %v12967_v35 }
 0x5c4   : > { %v5898_v52 = vmul.f32 %v5897_v13, %v12923_v30  ;;  %v12994_v53 = vmul.f32 0.70710677, %v12978_v36  ;;  %v12997_v57 = vmul.f32 0.70710677, %v12981_v28  ;;  %v5925_v32 = vmul.f32 %v5924_v8, %v12953_v6 }
 0x5c5   : > { %v7613_v62 = vpop.eup %7612  ;;  %v6872_v39 = vmul.f32 %v6722_v50, %v12786_v59  ;;  %v5830_v41 = vsel %vm12984_vm11, %v7611_v16, %v5826_v23  ;;  %v5934_v10 = vmul.f32 %v5933_v48, %v12953_v6  ;;  %v5874_v26 = vor.u32 1.1754944e-38, %v5873_v45 }
 0x5c6   : > { %v5835_v56 = vsel %vm12970_vm10, %v5834_v63, %v5830_v41  ;;  %v5863_v19 = vmul.f32 %v7613_v62, %v12967_v35  ;;  %v5888_v12 = vadd.f32 0.18741608, %v5887_v1  ;;  %v5899_v11 = vadd.f32 0.4994258, %v5898_v52  ;;  %v13031_v63 = vld [vmem:[%s7840_s24 + $0x460] sm:$0xff] }
 0x5c7   : > { %7022 = vst [vmem:[%s8053_s16 + $0x428] sm:$0xff] %v6872_v39  ;;  %v5836_v60 = vmul.f32 %v5835_v56, %v5811_v3  ;;  %v5926_v37 = vadd.f32 0.05243302, %v5925_v32  ;;  %v5959_v59 = vmul.f32 %v12994_v53, %v12994_v53  ;;  %vm5868_vm13 = vweird.f32 %v7613_v62 }
 0x5c8   : > { %v5864_v46 = vsub.f32 1.0, %v5863_v19  ;;  %v5935_v22 = vadd.f32 0.014752088, %v5934_v10  ;;  %v5999_v43 = vmul.f32 %v12997_v57, %v12997_v57  ;;  %v5900_v47 = vmul.f32 %v5899_v11, %v12923_v30  ;;  %vm13022_vm14 = vmor %vm5867_vm12, %vm5868_vm13 }
 0x5c9   : > { %v7267_v24 = vclamps-f32 %v5836_v60, 1.0  ;;  %v5927_v27 = vmul.f32 %v5926_v37, %v12953_v6  ;;  %v13014_v16 = vmin.f32 %v5959_v59, 16.0  ;;  %v5889_v58 = vmul.f32 %v5888_v12, %v12923_v30 }
 0x5ca   : > { %v5865_v18 = vmul.f32 %v7613_v62, %v5864_v46  ;;  %v5936_v4 = vmul.f32 %v5935_v22, %v12953_v6  ;;  %v13018_v17 = vmin.f32 %v5999_v43, 16.0  ;;  %v5901_v5 = vadd.f32 1.0, %v5900_v47 }
 0x5cb   : > { %v6573_v33 = vmul.f32 0.5, %v7267_v24  ;;  %v5928_v42 = vadd.f32 0.18741608, %v5927_v27  ;;  %v5961_v0 = vmul.f32 2.1237322e-06, %v13014_v16  ;;  %v5851_v61 = vmul.f32 %v5850_v49, %v12858_v14 }
 0x5cc   : > { %v5866_v38 = vadd.f32 %v7613_v62, %v5865_v18  ;;  %vm5872_vm15 = vcmp.eq.f32.partialorder %v5871_v31, 8.507059e+37  ;;  %v5937_v30 = vadd.f32 0.112945676, %v5936_v4  ;;  %7614 = vrcp.f32 %v5901_v5 }
 0x5cd   : > { %v6723_v20 = vadd.f32 0.5, %v6573_v33  ;;  %v5972_v34 = vmul.f32 3.8918573e-05, %v13014_v16  ;;  %v6001_v35 = vmul.f32 2.1237322e-06, %v13018_v17  ;;  %v5929_v55 = vmul.f32 %v5928_v42, %v12953_v6 }
 0x5ce   : > { %v5870_v51 = vsel %vm13022_vm14, %v7613_v62, %v5866_v38  ;;  %v5890_v7 = vadd.f32 1.1283791, %v5889_v58  ;;  %v5938_v9 = vmul.f32 %v5937_v30, %v12953_v6  ;;  %v5962_v29 = vadd.f32 0.00028619796, %v5961_v0 }
 0x5cf   : > { %v6873_v14 = vmul.f32 %v6723_v20, %v12804_v44  ;;  %v5875_v49 = vsel %vm5872_vm15, %v5874_v26, %v5870_v51  ;;  %v5911_v45 = vand.u32 2147483647, %v5901_v5  ;;  %v13039_v13 = vmul.f32 0.70710677, %v13031_v63  ;;  %v13073_v20 = vld [vmem:[%s7840_s24 + $0x468] sm:$0xff] }
 0x5d0   : > { %v5876_v54 = vmul.f32 %v5875_v49, %v5851_v61  ;;  %v5939_v1 = vadd.f32 0.4994258, %v5938_v9  ;;  %vm5907_vm0 = vweird.f32 %v5901_v5  ;;  %v5963_v50 = vmul.f32 %v5962_v29, %v13014_v16 }
 0x5d1   : > { %7023 = vst [vmem:[%s8053_s16 + $0x430] sm:$0xff] %v6873_v14  ;;  %v5973_v23 = vadd.f32 0.001143296, %v5972_v34  ;;  %v6002_v8 = vadd.f32 0.00028619796, %v6001_v35  ;;  %v5913_v31 = vand.u32 2147483648, %v5901_v5  ;;  %v6039_v12 = vmul.f32 %v13039_v13, %v13039_v13 }
 0x5d2   : > { %v7268_v48 = vclamps-f32 %v5876_v54, 1.0  ;;  %v5940_v44 = vmul.f32 %v5939_v1, %v12953_v6  ;;  %v6012_v52 = vmul.f32 3.8918573e-05, %v13018_v17  ;;  %v7615_v62 = vpop.eup %7614  ;;  %v5930_v39 = vadd.f32 1.1283791, %v5929_v55 }
 0x5d3   : > { %v5964_v41 = vadd.f32 0.0036580483, %v5963_v50  ;;  %v5974_v32 = vmul.f32 %v5973_v23, %v13014_v16  ;;  %v6003_v10 = vmul.f32 %v6002_v8, %v13018_v17  ;;  %v5903_v19 = vmul.f32 %v7615_v62, %v5901_v5 }
 0x5d4   : > { %v6574_v56 = vmul.f32 0.5, %v7268_v48  ;;  %v13047_v26 = vadd.f32 1.0, %v5940_v44  ;;  %v6013_v37 = vadd.f32 0.001143296, %v6012_v52  ;;  %vm5908_vm1 = vweird.f32 %v7615_v62 }
 0x5d5   : > { %v5965_v60 = vmul.f32 %v5964_v41, %v13014_v16  ;;  %v5975_v11 = vadd.f32 0.014752088, %v5974_v32  ;;  %v6004_v6 = vadd.f32 0.0036580483, %v6003_v10  ;;  %v5904_v46 = vsub.f32 1.0, %v5903_v19  ;;  %vm13063_vm3 = vmor %vm5907_vm0, %vm5908_vm1 }
 0x5d6   : > { %v6724_v59 = vadd.f32 0.5, %v6574_v56  ;;  %7616 = vrcp.f32 %v13047_v26  ;;  %v5891_v22 = vmul.f32 %v5890_v7, %v12899_v21  ;;  %vm13054_vm2 = vcmp.eq.f32.partialorder %v5911_v45, 8.507059e+37 }
 0x5d7   : > { %v5966_v24 = vadd.f32 0.05243302, %v5965_v60  ;;  %v5976_v47 = vmul.f32 %v5975_v11, %v13014_v16  ;;  %v5905_v18 = vmul.f32 %v7615_v62, %v5904_v46  ;;  %v6005_v58 = vmul.f32 %v6004_v6, %v13018_v17 }
 0x5d8   : > { %v6874_v27 = vmul.f32 %v6724_v59, %v12848_v25  ;;  %v6014_v4 = vmul.f32 %v6013_v37, %v13018_v17  ;;  %v5914_v21 = vor.u32 1.1754944e-38, %v5913_v31  ;;  %v13068_v0 = vmin.f32 %v6039_v12, 16.0 }
 0x5d9   : > { %v5967_v3 = vmul.f32 %v5966_v24, %v13014_v16  ;;  %v5977_v42 = vadd.f32 0.112945676, %v5976_v47  ;;  %v5906_v61 = vadd.f32 %v7615_v62, %v5905_v18  ;;  %v5931_v25 = vmul.f32 %v5930_v39, %v12934_v40 }
 0x5da   : > { %7024 = vst [vmem:[%s8053_s16 + $0x438] sm:$0xff] %v6874_v27  ;;  %v6006_v38 = vadd.f32 0.05243302, %v6005_v58  ;;  %v6015_v30 = vadd.f32 0.014752088, %v6014_v4  ;;  %vm5947_vm4 = vweird.f32 %v13047_v26  ;;  %v5953_v1 = vand.u32 2147483648, %v13047_v26 }
 0x5db   : > { %v5968_v5 = vadd.f32 0.18741608, %v5967_v3  ;;  %v5978_v34 = vmul.f32 %v5977_v42, %v13014_v16  ;;  %v6041_v35 = vmul.f32 2.1237322e-06, %v13068_v0  ;;  %v5910_v7 = vsel %vm13063_vm3, %v7615_v62, %v5906_v61 }
 0x5dc   : > { %v7617_v51 = vpop.eup %7616  ;;  %v5951_v9 = vand.u32 2147483647, %v13047_v26  ;;  %v6007_v14 = vmul.f32 %v6006_v38, %v13018_v17  ;;  %v6016_v40 = vmul.f32 %v6015_v30, %v13018_v17  ;;  %v5915_v49 = vsel %vm13054_vm2, %v5914_v21, %v5910_v7 }
 0x5dd   : > { %v5943_v55 = vmul.f32 %v7617_v51, %v13047_v26  ;;  %v6052_v29 = vmul.f32 3.8918573e-05, %v13068_v0  ;;  %v13088_v54 = vmul.f32 0.70710677, %v13073_v20  ;;  %v5916_v45 = vmul.f32 %v5915_v49, %v5891_v22 }
 0x5de   : > { %v5979_v50 = vadd.f32 0.4994258, %v5978_v34  ;;  %v6017_v23 = vadd.f32 0.112945676, %v6016_v40  ;;  %vm5948_vm5 = vweird.f32 %v7617_v51  ;;  %v5969_v48 = vmul.f32 %v5968_v5, %v13014_v16 }
 0x5df   : > { %v5944_v8 = vsub.f32 1.0, %v5943_v55  ;;  %v6042_v31 = vadd.f32 0.00028619796, %v6041_v35  ;;  %v7269_v44 = vclamps-f32 %v5916_v45, 1.0  ;;  %v6008_v62 = vadd.f32 0.18741608, %v6007_v14  ;;  %vm13099_vm6 = vmor %vm5947_vm4, %vm5948_vm5 }
 0x5e0   : > { %v5980_v52 = vmul.f32 %v5979_v50, %v13014_v16  ;;  %v6018_v39 = vmul.f32 %v6017_v23, %v13018_v17  ;;  %v6053_v10 = vadd.f32 0.001143296, %v6052_v29  ;;  %v6079_v56 = vmul.f32 %v13088_v54, %v13088_v54 }
 0x5e1   : > { %v5945_v41 = vmul.f32 %v7617_v51, %v5944_v8  ;;  %v6043_v32 = vmul.f32 %v6042_v31, %v13068_v0  ;;  %v6575_v19 = vmul.f32 0.5, %v7269_v44  ;;  %v5954_v60 = vor.u32 1.1754944e-38, %v5953_v1 }
 0x5e2   : > { %v5981_v11 = vadd.f32 1.0, %v5980_v52  ;;  %v6019_v16 = vadd.f32 0.4994258, %v6018_v39  ;;  %vm5952_vm7 = vcmp.eq.f32.partialorder %v5951_v9, 8.507059e+37  ;;  %v6054_v59 = vmul.f32 %v6053_v10, %v13068_v0 }
 0x5e3   : > { %v5946_v6 = vadd.f32 %v7617_v51, %v5945_v41  ;;  %v6044_v37 = vadd.f32 0.0036580483, %v6043_v32  ;;  %v6725_v46 = vadd.f32 0.5, %v6575_v19  ;;  %v5970_v22 = vadd.f32 1.1283791, %v5969_v48  ;;  %v13139_v41 = vld [vmem:[%s7840_s24 + $0x478] sm:$0xff] }
 0x5e4   : > { %7618 = vrcp.f32 %v5981_v11  ;;  %v6009_v26 = vmul.f32 %v6008_v62, %v13018_v17  ;;  %v6020_v24 = vmul.f32 %v6019_v16, %v13018_v17  ;;  %v13108_v47 = vmin.f32 %v6079_v56, 16.0 }
 0x5e5   : > { %v5950_v43 = vsel %vm13099_vm6, %v7617_v51, %v5946_v6  ;;  %v6875_v27 = vmul.f32 %v6725_v46, %v12891_v15  ;;  %v5991_v58 = vand.u32 2147483647, %v5981_v11  ;;  %v6045_v4 = vmul.f32 %v6044_v37, %v13068_v0  ;;  %v13121_v51 = vld [vmem:[%s7840_s24 + $0x470] sm:$0xff] }
 0x5e6   : > { %v5955_v18 = vsel %vm5952_vm7, %v5954_v60, %v5950_v43  ;;  %v5993_v21 = vand.u32 2147483648, %v5981_v11  ;;  %v13112_v3 = vadd.f32 1.0, %v6020_v24  ;;  %v6055_v42 = vadd.f32 0.014752088, %v6054_v59 }
 0x5e7   : > { %v5956_v33 = vmul.f32 %v5955_v18, %v5931_v25  ;;  %7025 = vst [vmem:[%s8053_s16 + $0x440] sm:$0xff] %v6875_v27  ;;  %v6046_v61 = vadd.f32 0.05243302, %v6045_v4  ;;  %v6081_v38 = vmul.f32 2.1237322e-06, %v13108_v47  ;;  %v5971_v17 = vmul.f32 %v5970_v22, %v12994_v53 }
 0x5e8   : > { %v6010_v5 = vadd.f32 1.1283791, %v6009_v26  ;;  %7620 = vrcp.f32 %v13112_v3  ;;  %vm5987_vm8 = vweird.f32 %v5981_v11  ;;  %v6056_v25 = vmul.f32 %v6055_v42, %v13068_v0 }
 0x5e9   : > { %v7270_v30 = vclamps-f32 %v5956_v33, 1.0  ;;  %v6047_v34 = vmul.f32 %v6046_v61, %v13068_v0  ;;  %v6082_v35 = vadd.f32 0.00028619796, %v6081_v38  ;;  %vm13123_vm9 = vcmp.eq.f32.partialorder %v5991_v58, 8.507059e+37 }
 0x5ea   : > { %v7619_v15 = vpop.eup %7618  ;;  %v5994_v40 = vor.u32 1.1754944e-38, %v5993_v21  ;;  %v6057_v49 = vadd.f32 0.112945676, %v6056_v25  ;;  %v6092_v1 = vmul.f32 3.8918573e-05, %v13108_v47  ;;  %vm6027_vm11 = vweird.f32 %v13112_v3 }
 0x5eb   : > { %v6576_v7 = vmul.f32 0.5, %v7270_v30  ;;  %v5983_v9 = vmul.f32 %v7619_v15, %v5981_v11  ;;  %vm5988_vm10 = vweird.f32 %v7619_v15  ;;  %v6048_v53 = vadd.f32 0.18741608, %v6047_v34 }
 0x5ec   : > { %v6083_v55 = vmul.f32 %v6082_v35, %v13108_v47  ;;  %v13130_v50 = vmul.f32 0.70710677, %v13121_v51  ;;  %v6031_v23 = vand.u32 2147483647, %v13112_v3  ;;  %v6058_v8 = vmul.f32 %v6057_v49, %v13068_v0  ;;  %vm13143_vm12 = vmor %vm5987_vm8, %vm5988_vm10 }
 0x5ed   : > { %v6726_v29 = vadd.f32 0.5, %v6576_v7  ;;  %v5984_v45 = vsub.f32 1.0, %v5983_v9  ;;  %v6093_v62 = vadd.f32 0.001143296, %v6092_v1  ;;  %v6033_v56 = vand.u32 2147483648, %v13112_v3 }
 0x5ee   : > { %v6084_v48 = vadd.f32 0.0036580483, %v6083_v55  ;;  %v7621_v31 = vpop.eup %7620  ;;  %v6119_v39 = vmul.f32 %v13130_v50, %v13130_v50  ;;  %v6049_v19 = vmul.f32 %v6048_v53, %v13068_v0  ;;  %v13157_v59 = vmul.f32 0.70710677, %v13139_v41  ;;  %v13183_v9 = vld [vmem:[%s7840_s24 + $0x480] sm:$0xf] }
 0x5ef   : > { %v6876_v44 = vmul.f32 %v6726_v29, %v12921_v2  ;;  %v5985_v52 = vmul.f32 %v7619_v15, %v5984_v45  ;;  %v6023_v10 = vmul.f32 %v7621_v31, %v13112_v3  ;;  %v6059_v2 = vadd.f32 0.4994258, %v6058_v8 }
 0x5f0   : > { %v6085_v60 = vmul.f32 %v6084_v48, %v13108_v47  ;;  %v6094_v16 = vmul.f32 %v6093_v62, %v13108_v47  ;;  %v13153_v6 = vmin.f32 %v6119_v39, 16.0  ;;  %vm6028_vm13 = vweird.f32 %v7621_v31 }
 0x5f1   : > { %7026 = vst [vmem:[%s8053_s16 + $0x448] sm:$0xff] %v6876_v44  ;;  %v5986_v12 = vadd.f32 %v7619_v15, %v5985_v52  ;;  %v6024_v11 = vsub.f32 1.0, %v6023_v10  ;;  %v6060_v37 = vmul.f32 %v6059_v2, %v13068_v0  ;;  %vm13169_vm14 = vmor %vm6027_vm11, %vm6028_vm13  ;;  %v6034_v33 = vor.u32 1.1754944e-38, %v6033_v56 }
 0x5f2   : > { %v6086_v22 = vadd.f32 0.05243302, %v6085_v60  ;;  %v6095_v43 = vadd.f32 0.014752088, %v6094_v16  ;;  %v6121_v26 = vmul.f32 2.1237322e-06, %v13153_v6  ;;  %v6011_v61 = vmul.f32 %v6010_v5, %v12997_v57 }
 0x5f3   : > { %v5990_v46 = vsel %vm13143_vm12, %v7619_v15, %v5986_v12  ;;  %v6025_v27 = vmul.f32 %v7621_v31, %v6024_v11  ;;  %v13164_v18 = vadd.f32 1.0, %v6060_v37  ;;  %v6132_v58 = vmul.f32 3.8918573e-05, %v13153_v6 }
 0x5f4   : > { %v5995_v24 = vsel %vm13123_vm9, %v5994_v40, %v5990_v46  ;;  %v6096_v21 = vmul.f32 %v6095_v43, %v13108_v47  ;;  %v6122_v42 = vadd.f32 0.00028619796, %v6121_v26  ;;  %vm6032_vm15 = vcmp.eq.f32.partialorder %v6031_v23, 8.507059e+37 }
 0x5f5   : > { %v5996_v4 = vmul.f32 %v5995_v24, %v5971_v17  ;;  %v6026_v38 = vadd.f32 %v7621_v31, %v6025_v27  ;;  %7622 = vrcp.f32 %v13164_v18  ;;  %v6050_v15 = vadd.f32 1.1283791, %v6049_v19 }
 0x5f6   : > { %v6097_v17 = vadd.f32 0.112945676, %v6096_v21  ;;  %v6159_v3 = vmul.f32 %v13157_v59, %v13157_v59  ;;  %v6087_v25 = vmul.f32 %v6086_v22, %v13108_v47  ;;  %v6123_v35 = vmul.f32 %v6122_v42, %v13153_v6 }
 0x5f7   : > { %v7271_v30 = vclamps-f32 %v5996_v4, 1.0  ;;  %v6030_v34 = vsel %vm13169_vm14, %v7621_v31, %v6026_v38  ;;  %v6133_v7 = vadd.f32 0.001143296, %v6132_v58  ;;  %vm6067_vm0 = vweird.f32 %v13164_v18 }
 0x5f8   : > { %v6035_v5 = vsel %vm6032_vm15, %v6034_v33, %v6030_v34  ;;  %v6071_v14 = vand.u32 2147483647, %v13164_v18  ;;  %v6098_v53 = vmul.f32 %v6097_v17, %v13108_v47  ;;  %v6124_v49 = vadd.f32 0.0036580483, %v6123_v35 }
 0x5f9   : > { %v6577_v57 = vmul.f32 0.5, %v7271_v30  ;;  %v6036_v40 = vmul.f32 %v6035_v5, %v6011_v61  ;;  %v6134_v55 = vmul.f32 %v6133_v7, %v13153_v6  ;;  %v6073_v45 = vand.u32 2147483648, %v13164_v18 }
 0x5fa   : > { %v13190_v1 = vmin.f32 %v6159_v3, 16.0  ;;  %v13193_v23 = vmul.f32 0.70710677, %v13183_v9  ;;  %v6099_v31 = vadd.f32 0.4994258, %v6098_v53  ;;  %v6125_v44 = vmul.f32 %v6124_v49, %v13153_v6 }
 0x5fb   : > { %v6727_v29 = vadd.f32 0.5, %v6577_v57  ;;  %v7623_v8 = vpop.eup %7622  ;;  %v7272_v48 = vclamps-f32 %v6036_v40, 1.0  ;;  %v6135_v52 = vadd.f32 0.014752088, %v6134_v55  ;;  %v6088_v32 = vadd.f32 0.18741608, %v6087_v25 }
 0x5fc   : > { %v6063_v39 = vmul.f32 %v7623_v8, %v13164_v18  ;;  %vm6068_vm1 = vweird.f32 %v7623_v8  ;;  %v6100_v56 = vmul.f32 %v6099_v31, %v13108_v47  ;;  %v6126_v19 = vadd.f32 0.05243302, %v6125_v44 }
 0x5fd   : > { %v6877_v62 = vmul.f32 %v6727_v29, %v12978_v36  ;;  %v6578_v10 = vmul.f32 0.5, %v7272_v48  ;;  %v6136_v2 = vmul.f32 %v6135_v52, %v13153_v6  ;;  %v6161_v60 = vmul.f32 2.1237322e-06, %v13190_v1  ;;  %vm13211_vm2 = vmor %vm6067_vm0, %vm6068_vm1 }
 0x5fe   : > { %v6064_v12 = vsub.f32 1.0, %v6063_v39  ;;  %v6172_v16 = vmul.f32 3.8918573e-05, %v13190_v1  ;;  %v6199_v11 = vmul.f32 %v13193_v23, %v13193_v23  ;;  %v6051_v37 = vmul.f32 %v6050_v15, %v13039_v13  ;;  %v13226_v15 = vld [vmem:[%s7840_s24 + $0x488] sm:$0xf] }
 0x5ff   : > { %7027 = vst [vmem:[%s8053_s16 + $0x450] sm:$0xff] %v6877_v62  ;;  %v6728_v36 = vadd.f32 0.5, %v6578_v10  ;;  %v6101_v46 = vadd.f32 1.0, %v6100_v56  ;;  %v6137_v22 = vadd.f32 0.112945676, %v6136_v2  ;;  %v6089_v26 = vmul.f32 %v6088_v32, %v13108_v47 }
 0x600   : > { %v6065_v43 = vmul.f32 %v7623_v8, %v6064_v12  ;;  %v6162_v24 = vadd.f32 0.00028619796, %v6161_v60  ;;  %v6173_v27 = vadd.f32 0.001143296, %v6172_v16  ;;  %v6074_v0 = vor.u32 1.1754944e-38, %v6073_v45 }
 0x601   : > { %v6878_v58 = vmul.f32 %v6728_v36, %v12981_v28  ;;  %7624 = vrcp.f32 %v6101_v46  ;;  %v13215_v13 = vmin.f32 %v6199_v11, 16.0  ;;  %vm6072_vm3 = vcmp.eq.f32.partialorder %v6071_v14, 8.507059e+37 }
 0x602   : > { %v6066_v33 = vadd.f32 %v7623_v8, %v6065_v43  ;;  %v6127_v47 = vmul.f32 %v6126_v19, %v13153_v6  ;;  %v6138_v21 = vmul.f32 %v6137_v22, %v13153_v6  ;;  %v6163_v28 = vmul.f32 %v6162_v24, %v13190_v1 }
 0x603   : > { %7028 = vst [vmem:[%s8053_s16 + $0x458] sm:$0xff] %v6878_v58  ;;  %v6174_v18 = vmul.f32 %v6173_v27, %v13190_v1  ;;  %v6201_v42 = vmul.f32 2.1237322e-06, %v13215_v13  ;;  %v6090_v38 = vadd.f32 1.1283791, %v6089_v26  ;;  %vm6107_vm4 = vweird.f32 %v6101_v46 }
 0x604   : > { %v6070_v61 = vsel %vm13211_vm2, %v7623_v8, %v6066_v33  ;;  %v6139_v30 = vadd.f32 0.4994258, %v6138_v21  ;;  %v6164_v3 = vadd.f32 0.0036580483, %v6163_v28  ;;  %v6128_v7 = vadd.f32 0.18741608, %v6127_v47 }
 0x605   : > { %v6075_v17 = vsel %vm6072_vm3, %v6074_v0, %v6070_v61  ;;  %v6175_v34 = vadd.f32 0.014752088, %v6174_v18  ;;  %v6202_v25 = vadd.f32 0.00028619796, %v6201_v42  ;;  %v6212_v5 = vmul.f32 3.8918573e-05, %v13215_v13 }
 0x606   : > { %v6076_v35 = vmul.f32 %v6075_v17, %v6051_v37  ;;  %v6140_v57 = vmul.f32 %v6139_v30, %v13153_v6  ;;  %v6165_v40 = vmul.f32 %v6164_v3, %v13190_v1  ;;  %v13234_v55 = vmul.f32 0.70710677, %v13226_v15  ;;  %v13256_v58 = vld [vmem:[%s7840_s24 + $0x490] sm:$0xf] }
 0x607   : > { %v7625_v14 = vpop.eup %7624  ;;  %v6176_v53 = vmul.f32 %v6175_v34, %v13190_v1  ;;  %v6203_v49 = vmul.f32 %v6202_v25, %v13215_v13  ;;  %v6111_v8 = vand.u32 2147483647, %v6101_v46  ;;  %v6113_v48 = vand.u32 2147483648, %v6101_v46 }
 0x608   : > { %v7273_v29 = vclamps-f32 %v6076_v35, 1.0  ;;  %v6103_v45 = vmul.f32 %v7625_v14, %v6101_v46  ;;  %vm6108_vm5 = vweird.f32 %v7625_v14  ;;  %v6141_v31 = vadd.f32 1.0, %v6140_v57 }
 0x609   : > { %v6166_v44 = vadd.f32 0.05243302, %v6165_v40  ;;  %v6177_v52 = vadd.f32 0.112945676, %v6176_v53  ;;  %v6204_v32 = vadd.f32 0.0036580483, %v6203_v49  ;;  %v6091_v56 = vmul.f32 %v6090_v38, %v13088_v54  ;;  %vm13244_vm6 = vmor %vm6107_vm4, %vm6108_vm5 }
 0x60a   : > { %v6579_v62 = vmul.f32 0.5, %v7273_v29  ;;  %v6104_v39 = vsub.f32 1.0, %v6103_v45  ;;  %v6213_v10 = vadd.f32 0.001143296, %v6212_v5  ;;  %v6129_v19 = vmul.f32 %v6128_v7, %v13153_v6 }
 0x60b   : > { %7626 = vrcp.f32 %v6141_v31  ;;  %v6239_v2 = vmul.f32 %v13234_v55, %v13234_v55  ;;  %v6167_v16 = vmul.f32 %v6166_v44, %v13190_v1  ;;  %v6178_v11 = vmul.f32 %v6177_v52, %v13190_v1 }
 0x60c   : > { %v6729_v12 = vadd.f32 0.5, %v6579_v62  ;;  %v6105_v60 = vmul.f32 %v7625_v14, %v6104_v39  ;;  %vm13248_vm7 = vcmp.eq.f32.partialorder %v6111_v8, 8.507059e+37  ;;  %v6114_v6 = vor.u32 1.1754944e-38, %v6113_v48 }
 0x60d   : > { %v6205_v37 = vmul.f32 %v6204_v32, %v13215_v13  ;;  %v6214_v22 = vmul.f32 %v6213_v10, %v13215_v13  ;;  %v6168_v24 = vadd.f32 0.18741608, %v6167_v16  ;;  %v6179_v27 = vadd.f32 0.4994258, %v6178_v11 }
 0x60e   : > { %v6879_v43 = vmul.f32 %v6729_v12, %v13031_v63  ;;  %v6106_v26 = vadd.f32 %v7625_v14, %v6105_v60  ;;  %v13258_v0 = vmin.f32 %v6239_v2, 16.0  ;;  %v6130_v47 = vadd.f32 1.1283791, %v6129_v19 }
 0x60f   : > { %v6206_v46 = vadd.f32 0.05243302, %v6205_v37  ;;  %v6215_v4 = vadd.f32 0.014752088, %v6214_v22  ;;  %v6151_v21 = vand.u32 2147483647, %v6141_v31  ;;  %v6180_v28 = vmul.f32 %v6179_v27, %v13190_v1 }
 0x610   : > { %7029 = vst [vmem:[%s8053_s16 + $0x460] sm:$0xff] %v6879_v43  ;;  %v6110_v33 = vsel %vm13244_vm6, %v7625_v14, %v6106_v26  ;;  %v6241_v61 = vmul.f32 2.1237322e-06, %v13258_v0  ;;  %v13269_v38 = vmul.f32 0.70710677, %v13256_v58  ;;  %vm6147_vm8 = vweird.f32 %v6141_v31 }
 0x611   : > { %v7627_v18 = vpop.eup %7626  ;;  %v6115_v63 = vsel %vm13248_vm7, %v6114_v6, %v6110_v33  ;;  %v6216_v42 = vmul.f32 %v6215_v4, %v13215_v13  ;;  %v6153_v3 = vand.u32 2147483648, %v6141_v31  ;;  %v6169_v34 = vmul.f32 %v6168_v24, %v13190_v1 }
 0x612   : > { %v6116_v30 = vmul.f32 %v6115_v63, %v6091_v56  ;;  %v6143_v17 = vmul.f32 %v7627_v18, %v6141_v31  ;;  %v6181_v25 = vadd.f32 1.0, %v6180_v28  ;;  %v6207_v35 = vmul.f32 %v6206_v46, %v13215_v13 }
 0x613   : > { %v6217_v7 = vadd.f32 0.112945676, %v6216_v42  ;;  %vm6148_vm9 = vweird.f32 %v7627_v18  ;;  %v6242_v14 = vadd.f32 0.00028619796, %v6241_v61  ;;  %v6131_v40 = vmul.f32 %v6130_v47, %v13130_v50  ;;  %v13311_v42 = vld [vmem:[%s7840_s24 + $0x498] sm:$0xf] }
 0x614   : > { %v7274_v57 = vclamps-f32 %v6116_v30, 1.0  ;;  %v6144_v5 = vsub.f32 1.0, %v6143_v17  ;;  %vm13274_vm10 = vcmp.eq.f32.partialorder %v6151_v21, 8.507059e+37  ;;  %7628 = vrcp.f32 %v6181_v25  ;;  %vm13282_vm11 = vmor %vm6147_vm8, %vm6148_vm9 }
 0x615   : > { %v6279_v49 = vmul.f32 %v13269_v38, %v13269_v38  ;;  %v6154_v45 = vor.u32 1.1754944e-38, %v6153_v3  ;;  %v6218_v8 = vmul.f32 %v6217_v7, %v13215_v13  ;;  %v6170_v44 = vadd.f32 1.1283791, %v6169_v34  ;;  %v13316_v3 = vld [vmem:[%s7840_s24 + $0x4a0] sm:$0xf] }
 0x616   : > { %v6580_v29 = vmul.f32 0.5, %v7274_v57  ;;  %v6145_v1 = vmul.f32 %v7627_v18, %v6144_v5  ;;  %v6208_v50 = vadd.f32 0.18741608, %v6207_v35  ;;  %v6243_v52 = vmul.f32 %v6242_v14, %v13258_v0 }
 0x617   : > { %v6252_v62 = vmul.f32 3.8918573e-05, %v13258_v0  ;;  %v6191_v10 = vand.u32 2147483647, %v6181_v25  ;;  %v6219_v56 = vadd.f32 0.4994258, %v6218_v8  ;;  %vm6187_vm12 = vweird.f32 %v6181_v25 }
 0x618   : > { %v6730_v39 = vadd.f32 0.5, %v6580_v29  ;;  %v6146_v32 = vadd.f32 %v7627_v18, %v6145_v1  ;;  %v6244_v19 = vadd.f32 0.0036580483, %v6243_v52  ;;  %v13288_v12 = vmin.f32 %v6279_v49, 16.0 }
 0x619   : > { %v6253_v2 = vadd.f32 0.001143296, %v6252_v62  ;;  %v6193_v16 = vand.u32 2147483648, %v6181_v25  ;;  %v6220_v11 = vmul.f32 %v6219_v56, %v13215_v13  ;;  %v6209_v24 = vmul.f32 %v6208_v50, %v13215_v13 }
 0x61a   : > { %v6880_v31 = vmul.f32 %v6730_v39, %v13073_v20  ;;  %v6150_v60 = vsel %vm13282_vm11, %v7627_v18, %v6146_v32  ;;  %v7629_v36 = vpop.eup %7628  ;;  %v6245_v6 = vmul.f32 %v6244_v19, %v13258_v0  ;;  %v6281_v22 = vmul.f32 2.1237322e-06, %v13288_v12 }
 0x61b   : > { %v6155_v54 = vsel %vm13274_vm10, %v6154_v45, %v6150_v60  ;;  %v6254_v37 = vmul.f32 %v6253_v2, %v13258_v0  ;;  %v6183_v20 = vmul.f32 %v7629_v36, %v6181_v25  ;;  %v13300_v26 = vadd.f32 1.0, %v6220_v11 }
 0x61c   : > { %7030 = vst [vmem:[%s8053_s16 + $0x468] sm:$0xff] %v6880_v31  ;;  %v6156_v43 = vmul.f32 %v6155_v54, %v6131_v40  ;;  %v6246_v27 = vadd.f32 0.05243302, %v6245_v6  ;;  %v6282_v4 = vadd.f32 0.00028619796, %v6281_v22  ;;  %vm6188_vm13 = vweird.f32 %v7629_v36 }
 0x61d   : > { %v6255_v46 = vadd.f32 0.014752088, %v6254_v37  ;;  %v6184_v47 = vsub.f32 1.0, %v6183_v20  ;;  %7630 = vrcp.f32 %v13300_v26  ;;  %v6171_v21 = vmul.f32 %v6170_v44, %v13157_v59  ;;  %vm13319_vm15 = vmor %vm6187_vm12, %vm6188_vm13 }
 0x61e   : > { %v7275_v33 = vclamps-f32 %v6156_v43, 1.0  ;;  %vm13305_vm14 = vcmp.eq.f32.partialorder %v6191_v10, 8.507059e+37  ;;  %v6194_v18 = vor.u32 1.1754944e-38, %v6193_v16  ;;  %v6283_v30 = vmul.f32 %v6282_v4, %v13288_v12 }
 0x61f   : > { %v6256_v63 = vmul.f32 %v6255_v46, %v13258_v0  ;;  %v6185_v61 = vmul.f32 %v7629_v36, %v6184_v47  ;;  %v6292_v17 = vmul.f32 3.8918573e-05, %v13288_v12  ;;  %v6210_v34 = vadd.f32 1.1283791, %v6209_v24 }
 0x620   : > { %v6581_v13 = vmul.f32 0.5, %v7275_v33  ;;  %vm6227_vm0 = vweird.f32 %v13300_v26  ;;  %v6247_v35 = vmul.f32 %v6246_v27, %v13258_v0  ;;  %v6284_v14 = vadd.f32 0.0036580483, %v6283_v30  ;;  %v13365_v33 = vld [vmem:[%s7840_s24 + $0x4a8] sm:$0xf] }
 0x621   : > { %v6257_v7 = vadd.f32 0.112945676, %v6256_v63  ;;  %v6186_v5 = vadd.f32 %v7629_v36, %v6185_v61  ;;  %v6293_v40 = vadd.f32 0.001143296, %v6292_v17  ;;  %v6231_v53 = vand.u32 2147483647, %v13300_v26 }
 0x622   : > { %v6731_v57 = vadd.f32 0.5, %v6581_v13  ;;  %v13328_v25 = vmul.f32 0.70710677, %v13311_v42  ;;  %v13331_v29 = vmul.f32 0.70710677, %v13316_v3  ;;  %v6285_v48 = vmul.f32 %v6284_v14, %v13288_v12 }
 0x623   : > { %v6258_v49 = vmul.f32 %v6257_v7, %v13258_v0  ;;  %v7631_v1 = vpop.eup %7630  ;;  %v6190_v8 = vsel %vm13319_vm15, %v7629_v36, %v6186_v5  ;;  %v6294_v44 = vmul.f32 %v6293_v40, %v13288_v12  ;;  %v6233_v62 = vand.u32 2147483648, %v13300_v26 }
 0x624   : > { %v6881_v45 = vmul.f32 %v6731_v57, %v13121_v51  ;;  %v6195_v50 = vsel %vm13305_vm14, %v6194_v18, %v6190_v8  ;;  %v6223_v52 = vmul.f32 %v7631_v1, %v13300_v26  ;;  %v6248_v39 = vadd.f32 0.18741608, %v6247_v35 }
 0x625   : > { %v6196_v32 = vmul.f32 %v6195_v50, %v6171_v21  ;;  %vm6228_vm1 = vweird.f32 %v7631_v1  ;;  %v6259_v10 = vadd.f32 0.4994258, %v6258_v49  ;;  %v6319_v51 = vmul.f32 %v13328_v25, %v13328_v25 }
 0x626   : > { %7031 = vst [vmem:[%s8053_s16 + $0x470] sm:$0xff] %v6881_v45  ;;  %v6224_v56 = vsub.f32 1.0, %v6223_v52  ;;  %v6286_v19 = vadd.f32 0.05243302, %v6285_v48  ;;  %v6295_v2 = vadd.f32 0.014752088, %v6294_v44  ;;  %v6359_v31 = vmul.f32 %v13331_v29, %v13331_v29  ;;  %vm13356_vm2 = vmor %vm6227_vm0, %vm6228_vm1 }
 0x627   : > { %v7276_v60 = vclamps-f32 %v6196_v32, 1.0  ;;  %v6211_v16 = vmul.f32 %v6210_v34, %v13193_v23  ;;  %v6260_v11 = vmul.f32 %v6259_v10, %v13258_v0  ;;  %v13349_v36 = vmin.f32 %v6319_v51, 16.0 }
 0x628   : > { %v6225_v54 = vmul.f32 %v7631_v1, %v6224_v56  ;;  %v6234_v6 = vor.u32 1.1754944e-38, %v6233_v62  ;;  %v6249_v37 = vmul.f32 %v6248_v39, %v13258_v0  ;;  %v6296_v22 = vmul.f32 %v6295_v2, %v13288_v12 }
 0x629   : > { %v6582_v43 = vmul.f32 0.5, %v7276_v60  ;;  %v6261_v23 = vadd.f32 1.0, %v6260_v11  ;;  %v6321_v24 = vmul.f32 2.1237322e-06, %v13349_v36  ;;  %v13361_v27 = vmin.f32 %v6359_v31, 16.0 }
 0x62a   : > { %v6226_v46 = vadd.f32 %v7631_v1, %v6225_v54  ;;  %vm6232_vm3 = vcmp.eq.f32.partialorder %v6231_v53, 8.507059e+37  ;;  %v6287_v4 = vmul.f32 %v6286_v19, %v13288_v12  ;;  %v6297_v0 = vadd.f32 0.112945676, %v6296_v22 }
 0x62b   : > { %v6732_v47 = vadd.f32 0.5, %v6582_v43  ;;  %7632 = vrcp.f32 %v6261_v23  ;;  %v6332_v26 = vmul.f32 3.8918573e-05, %v13349_v36  ;;  %v6361_v21 = vmul.f32 2.1237322e-06, %v13361_v27 }
 0x62c   : > { %v6230_v28 = vsel %vm13356_vm2, %v7631_v1, %v6226_v46  ;;  %v6298_v18 = vmul.f32 %v6297_v0, %v13288_v12  ;;  %v6250_v61 = vadd.f32 1.1283791, %v6249_v37  ;;  %v6322_v30 = vadd.f32 0.00028619796, %v6321_v24 }
 0x62d   : > { %v6882_v63 = vmul.f32 %v6732_v47, %v13139_v41  ;;  %v6235_v13 = vsel %vm6232_vm3, %v6234_v6, %v6230_v28  ;;  %v6288_v59 = vadd.f32 0.18741608, %v6287_v4  ;;  %v13374_v35 = vmul.f32 0.70710677, %v13365_v33 }
 0x62e   : > { %v6236_v17 = vmul.f32 %v6235_v13, %v6211_v16  ;;  %v6299_v34 = vadd.f32 0.4994258, %v6298_v18  ;;  %v6323_v7 = vmul.f32 %v6322_v30, %v13349_v36  ;;  %v6333_v57 = vadd.f32 0.001143296, %v6332_v26 }
 0x62f   : > { %7032 = vst [vmem:[%s8053_s16 + $0x478] sm:$0xff] %v6882_v63  ;;  %v6362_v5 = vadd.f32 0.00028619796, %v6361_v21  ;;  %vm6267_vm4 = vweird.f32 %v6261_v23  ;;  %v6372_v41 = vmul.f32 3.8918573e-05, %v13361_v27  ;;  %v6273_v50 = vand.u32 2147483648, %v6261_v23 }
 0x630   : > { %v7277_v14 = vclamps-f32 %v6236_v17, 1.0  ;;  %v6300_v40 = vmul.f32 %v6299_v34, %v13288_v12  ;;  %v6271_v49 = vand.u32 2147483647, %v6261_v23  ;;  %v6324_v1 = vadd.f32 0.0036580483, %v6323_v7 }
 0x631   : > { %v7633_v53 = vpop.eup %7632  ;;  %v6334_v45 = vmul.f32 %v6333_v57, %v13349_v36  ;;  %v6363_v8 = vmul.f32 %v6362_v5, %v13361_v27  ;;  %v6373_v32 = vadd.f32 0.001143296, %v6372_v41  ;;  %v6399_v10 = vmul.f32 %v13374_v35, %v13374_v35 }
 0x632   : > { %v6583_v48 = vmul.f32 0.5, %v7277_v14  ;;  %v6263_v44 = vmul.f32 %v7633_v53, %v6261_v23  ;;  %v6301_v52 = vadd.f32 1.0, %v6300_v40  ;;  %v6325_v62 = vmul.f32 %v6324_v1, %v13349_v36 }
 0x633   : > { %v6335_v39 = vadd.f32 0.014752088, %v6334_v45  ;;  %vm6268_vm5 = vweird.f32 %v7633_v53  ;;  %v6289_v19 = vmul.f32 %v6288_v59, %v13288_v12  ;;  %v6364_v31 = vadd.f32 0.0036580483, %v6363_v8 }
 0x634   : > { %v6733_v51 = vadd.f32 0.5, %v6583_v48  ;;  %v6264_v56 = vsub.f32 1.0, %v6263_v44  ;;  %7634 = vrcp.f32 %v6301_v52  ;;  %v6374_v11 = vmul.f32 %v6373_v32, %v13361_v27  ;;  %vm13390_vm6 = vmor %vm6267_vm4, %vm6268_vm5 }
 0x635   : > { %v6336_v2 = vmul.f32 %v6335_v39, %v13349_v36  ;;  %v6274_v6 = vor.u32 1.1754944e-38, %v6273_v50  ;;  %v6326_v37 = vadd.f32 0.05243302, %v6325_v62  ;;  %v13394_v43 = vmin.f32 %v6399_v10, 16.0 }
 0x636   : > { %v6883_v60 = vmul.f32 %v6733_v51, %v13183_v9  ;;  %v6265_v16 = vmul.f32 %v7633_v53, %v6264_v56  ;;  %v6251_v12 = vmul.f32 %v6250_v61, %v13234_v55  ;;  %vm6272_vm7 = vcmp.eq.f32.partialorder %v6271_v49, 8.507059e+37 }
 0x637   : > { %v6337_v22 = vadd.f32 0.112945676, %v6336_v2  ;;  %v6375_v24 = vadd.f32 0.014752088, %v6374_v11  ;;  %v6290_v9 = vadd.f32 1.1283791, %v6289_v19  ;;  %v6365_v23 = vmul.f32 %v6364_v31, %v13361_v27 }
 0x638   : > { %7033 = vst [vmem:[%s8053_s16 + $0x480] sm:$0xf] %v6883_v60  ;;  %v6266_v20 = vadd.f32 %v7633_v53, %v6265_v16  ;;  %v6401_v4 = vmul.f32 2.1237322e-06, %v13394_v43  ;;  %vm6307_vm8 = vweird.f32 %v6301_v52  ;;  %v6313_v26 = vand.u32 2147483648, %v6301_v52 }
 0x639   : > { %v6338_v46 = vmul.f32 %v6337_v22, %v13349_v36  ;;  %v6376_v21 = vmul.f32 %v6375_v24, %v13361_v27  ;;  %v6327_v18 = vmul.f32 %v6326_v37, %v13349_v36  ;;  %v6412_v63 = vmul.f32 3.8918573e-05, %v13394_v43 }
 0x63a   : > { %v7635_v0 = vpop.eup %7634  ;;  %v6270_v47 = vsel %vm13390_vm6, %v7633_v53, %v6266_v20  ;;  %v6311_v61 = vand.u32 2147483647, %v6301_v52  ;;  %v6366_v34 = vadd.f32 0.05243302, %v6365_v23  ;;  %v6402_v7 = vadd.f32 0.00028619796, %v6401_v4 }
 0x63b   : > { %v6275_v28 = vsel %vm6272_vm7, %v6274_v6, %v6270_v47  ;;  %v6303_v55 = vmul.f32 %v7635_v0, %v6301_v52  ;;  %v6339_v30 = vadd.f32 0.4994258, %v6338_v46  ;;  %v6377_v17 = vadd.f32 0.112945676, %v6376_v21 }
 0x63c   : > { %v6276_v13 = vmul.f32 %v6275_v28, %v6251_v12  ;;  %vm6308_vm9 = vweird.f32 %v7635_v0  ;;  %v6291_v5 = vmul.f32 %v6290_v9, %v13269_v38  ;;  %v6314_v53 = vor.u32 1.1754944e-38, %v6313_v26 }
 0x63d   : > { %v6304_v59 = vsub.f32 1.0, %v6303_v55  ;;  %v6340_v14 = vmul.f32 %v6339_v30, %v13349_v36  ;;  %v6378_v40 = vmul.f32 %v6377_v17, %v13361_v27  ;;  %v6328_v49 = vadd.f32 0.18741608, %v6327_v18  ;;  %vm6309_vm10 = vmor %vm6307_vm8, %vm6308_vm9 }
 0x63e   : > { %v7278_v57 = vclamps-f32 %v6276_v13, 1.0  ;;  %v6413_v1 = vadd.f32 0.001143296, %v6412_v63  ;;  %v6403_v44 = vmul.f32 %v6402_v7, %v13394_v43  ;;  %vm6312_vm11 = vcmp.eq.f32.partialorder %v6311_v61, 8.507059e+37 }
 0x63f   : > { %v6305_v41 = vmul.f32 %v7635_v0, %v6304_v59  ;;  %v6341_v8 = vadd.f32 1.0, %v6340_v14  ;;  %v6379_v48 = vadd.f32 0.4994258, %v6378_v40  ;;  %v6367_v38 = vmul.f32 %v6366_v34, %v13361_v27 }
 0x640   : > { %v6584_v45 = vmul.f32 0.5, %v7278_v57  ;;  %v6414_v62 = vmul.f32 %v6413_v1, %v13394_v43  ;;  %v6329_v56 = vmul.f32 %v6328_v49, %v13349_v36  ;;  %v6404_v19 = vadd.f32 0.0036580483, %v6403_v44 }
 0x641   : > { %v6306_v50 = vadd.f32 %v7635_v0, %v6305_v41  ;;  %7636 = vrcp.f32 %v6341_v8  ;;  %v6380_v10 = vmul.f32 %v6379_v48, %v13361_v27  ;;  %v6368_v31 = vadd.f32 0.18741608, %v6367_v38 }
 0x642   : > { %v6734_v39 = vadd.f32 0.5, %v6584_v45  ;;  %v6415_v16 = vadd.f32 0.014752088, %v6414_v62  ;;  %v6405_v6 = vmul.f32 %v6404_v19, %v13394_v43  ;;  %v6330_v12 = vadd.f32 1.1283791, %v6329_v56 }
 0x643   : > { %v6310_v32 = vsel %vm6309_vm10, %v7635_v0, %v6306_v50  ;;  %v6381_v60 = vadd.f32 1.0, %v6380_v10  ;;  %v6351_v24 = vand.u32 2147483647, %v6341_v8  ;;  %v6353_v36 = vand.u32 2147483648, %v6341_v8 }
 0x644   : > { %v6884_v51 = vmul.f32 %v6734_v39, %v13226_v15  ;;  %v6315_v52 = vsel %vm6312_vm11, %v6314_v53, %v6310_v32  ;;  %v6416_v37 = vmul.f32 %v6415_v16, %v13394_v43  ;;  %v6369_v15 = vmul.f32 %v6368_v31, %v13361_v27 }
 0x645   : > { %v6316_v2 = vmul.f32 %v6315_v52, %v6291_v5  ;;  %7638 = vrcp.f32 %v6381_v60  ;;  %vm6347_vm12 = vweird.f32 %v6341_v8  ;;  %v6406_v4 = vadd.f32 0.05243302, %v6405_v6 }
 0x646   : > { %7034 = vst [vmem:[%s8053_s16 + $0x488] sm:$0xf] %v6884_v51  ;;  %v6417_v9 = vadd.f32 0.112945676, %v6416_v37  ;;  %v6331_v21 = vmul.f32 %v6330_v12, %v13328_v25  ;;  %v6370_v55 = vadd.f32 1.1283791, %v6369_v15  ;;  %vm6387_vm0 = vweird.f32 %v6381_v60 }
 0x647   : > { %v7279_v11 = vclamps-f32 %v6316_v2, 1.0  ;;  %v7637_v54 = vpop.eup %7636  ;;  %vm6352_vm15 = vcmp.eq.f32.partialorder %v6351_v24, 8.507059e+37  ;;  %v6354_v18 = vor.u32 1.1754944e-38, %v6353_v36  ;;  %v6391_v30 = vand.u32 2147483647, %v6381_v60 }
 0x648   : > { %v6343_v20 = vmul.f32 %v7637_v54, %v6341_v8  ;;  %vm6348_vm13 = vweird.f32 %v7637_v54  ;;  %v6418_v0 = vmul.f32 %v6417_v9, %v13394_v43  ;;  %v6393_v17 = vand.u32 2147483648, %v6381_v60 }
 0x649   : > { %v6585_v22 = vmul.f32 0.5, %v7279_v11  ;;  %vm13423_vm14 = vmor %vm6347_vm12, %vm6348_vm13  ;;  %v6371_v40 = vmul.f32 %v6370_v55, %v13331_v29  ;;  %vm6392_vm3 = vcmp.eq.f32.partialorder %v6391_v30, 8.507059e+37 }
 0x64a   : > { %v6344_v23 = vsub.f32 1.0, %v6343_v20  ;;  %v6419_v13 = vadd.f32 0.4994258, %v6418_v0  ;;  %v6394_v41 = vor.u32 1.1754944e-38, %v6393_v17 }
 0x64b   : > { %v6735_v46 = vadd.f32 0.5, %v6585_v22  ;;  %v7639_v47 = vpop.eup %7638 }
 0x64c   : > { %v6345_v28 = vmul.f32 %v7637_v54, %v6344_v23  ;;  %v6383_v63 = vmul.f32 %v7639_v47, %v6381_v60  ;;  %vm6388_vm1 = vweird.f32 %v7639_v47  ;;  %v6420_v25 = vmul.f32 %v6419_v13, %v13394_v43 }
 0x64d   : > { %v6885_v26 = vmul.f32 %v6735_v46, %v13256_v58  ;;  %v6407_v58 = vmul.f32 %v6406_v4, %v13394_v43  ;;  %vm6389_vm2 = vmor %vm6387_vm0, %vm6388_vm1 }
 0x64e   : > { %v6346_v61 = vadd.f32 %v7637_v54, %v6345_v28  ;;  %v6384_v59 = vsub.f32 1.0, %v6383_v63  ;;  %v6421_v5 = vadd.f32 1.0, %v6420_v25 }
 0x64f   : > { %7035 = vst [vmem:[%s8053_s16 + $0x490] sm:$0xf] %v6885_v26  ;;  %v6408_v49 = vadd.f32 0.18741608, %v6407_v58 }
 0x650   : > { %v6350_v34 = vsel %vm13423_vm14, %v7637_v54, %v6346_v61  ;;  %v6385_v57 = vmul.f32 %v7639_v47, %v6384_v59  ;;  %7640 = vrcp.f32 %v6421_v5  ;;  %v6433_v52 = vand.u32 2147483648, %v6421_v5 }
 0x651   : > { %v6355_v7 = vsel %vm6352_vm15, %v6354_v18, %v6350_v34  ;;  %v6409_v50 = vmul.f32 %v6408_v49, %v13394_v43  ;;  %vm6427_vm4 = vweird.f32 %v6421_v5  ;;  %v6431_v19 = vand.u32 2147483647, %v6421_v5 }
 0x652   : > { %v6356_v14 = vmul.f32 %v6355_v7, %v6331_v21  ;;  %v6386_v53 = vadd.f32 %v7639_v47, %v6385_v57  ;;  %v6434_v60 = vor.u32 1.1754944e-38, %v6433_v52 }
 0x653   : > { %v6410_v51 = vadd.f32 1.1283791, %v6409_v50  ;;  %vm6432_vm7 = vcmp.eq.f32.partialorder %v6431_v19, 8.507059e+37 }
 0x654   : > { %v7280_v1 = vclamps-f32 %v6356_v14, 1.0  ;;  %v6390_v45 = vsel %vm6389_vm2, %v7639_v47, %v6386_v53 }
 0x655   : > { %v6395_v48 = vsel %vm6392_vm3, %v6394_v41, %v6390_v45 }
 0x656   : > { %v6586_v8 = vmul.f32 0.5, %v7280_v1  ;;  %v6396_v44 = vmul.f32 %v6395_v48, %v6371_v40  ;;  %v7641_v62 = vpop.eup %7640 }
 0x657   : > { %v6423_v29 = vmul.f32 %v7641_v62, %v6421_v5  ;;  %vm6428_vm5 = vweird.f32 %v7641_v62 }
 0x658   : > { %v6736_v38 = vadd.f32 0.5, %v6586_v8  ;;  %v7281_v39 = vclamps-f32 %v6396_v44, 1.0  ;;  %vm6429_vm6 = vmor %vm6427_vm4, %vm6428_vm5 }
 0x659   : > { %v6424_v56 = vsub.f32 1.0, %v6423_v29 }
 0x65a   : > { %v6886_v32 = vmul.f32 %v6736_v38, %v13311_v42  ;;  %v6587_v10 = vmul.f32 0.5, %v7281_v39  ;;  %v6411_v42 = vmul.f32 %v6410_v51, %v13374_v35 }
 0x65b   : > { %v6425_v31 = vmul.f32 %v7641_v62, %v6424_v56 }
 0x65c   : > { %7036 = vst [vmem:[%s8053_s16 + $0x498] sm:$0xf] %v6886_v32  ;;  %v6737_v2 = vadd.f32 0.5, %v6587_v10 }
 0x65d   : > { %v6426_v16 = vadd.f32 %v7641_v62, %v6425_v31 }
 0x65e   : > { %v6887_v43 = vmul.f32 %v6737_v2, %v13316_v3 }
 0x65f   : > { %v6430_v11 = vsel %vm6429_vm6, %v7641_v62, %v6426_v16 }
 0x660   : > { %7037 = vst [vmem:[%s8053_s16 + $0x4a0] sm:$0xf] %v6887_v43  ;;  %v6435_v54 = vsel %vm6432_vm7, %v6434_v60, %v6430_v11 }
 0x661   : > { %v6436_v6 = vmul.f32 %v6435_v54, %v6411_v42 }
 0x663   : > { %v7282_v37 = vclamps-f32 %v6436_v6, 1.0 }
 0x665   : > { %v6588_v3 = vmul.f32 0.5, %v7282_v37 }
 0x667   : > { %v6738_v22 = vadd.f32 0.5, %v6588_v3 }
 0x669   : > { %v6888_v35 = vmul.f32 %v6738_v22, %v13365_v33 }
 0x66b   : > { %7038 = vst [vmem:[%s8053_s16 + $0x4a8] sm:$0xf] %v6888_v35 }
 0x66c   : > { %7699 = shalt.err (!%p7696_p7)
}
 0x66d   : > { %s7743_s19 = smov 768   ;;  %s7744_s20 = smov 1536  }
 0x66e   : > { %s7745_s21 = smov 48  }
 0x66f   : > { %7292 = dma.vmem_to_hbm [thread:$0]  (%p7802_p11), %s7053_s29, 19200, %s7055_s30, %s7040_s2, %s7743_s19, %s7744_s20, %s7745_s21  }
 0x670 PF: > { %s7069_s22 = sand.u32 1, %s7726_s6   ;;  %p7299_p8 = pnand %p7130_p9, %p7806_p12 }
 0x671   : > { %s7070_s23 = scalar_lea.sflag [#allocation4], %s7069_s22 }
 0x672   : > { %p7300_p10 = pneg %p7299_p8 }
 0x674   : > { %7721 = dma.done.wait (%p7300_p10), %s7070_s23, 19200  }
 0x675   : > { %7723 = vsyncadd (%p7300_p10), %s7070_s23, 4294948096  ;;  %p14_p1 = scmp.ge.s32.totalorder %s7781_s12, 4   ;;  %s13961_s6 = smov %s7730_s7 }
 0x676   : > { %s13962_s7 = smov %s7734_s8  ;;  %s13963_s8 = smov %s7793_s15 }
 0x677   : > { %s13964_s9 = smov %s7781_s12  ;;  %16 = sbr.rel (!%p14_p1) target bundleno = 5 (0x5), region = 69 }
 0x67c   :  { %7076 = vsyncpa [#allocation3], 1 }
 0x67d   :  { %7078 = vsyncpa [#allocation3 + $0x1], 1 }
 0x67e   :  { %7079 = vsyncpa [#allocation4], 1 }
 0x67f   :  { %7081 = vsyncpa [#allocation4 + $0x1], 1 }

</bundles_post_ra>
